<compile_context>
chip_gen: v5e
topology: v5e:2x2
jax: 0.10.0
libtpu: 0.0.40
codegen_flags: <defaults>
</compile_context>

<pallas_src>
import functools

import numpy as np
import jax
import jax.numpy as jnp
from jax.experimental import pallas as pl
from jax.experimental.pallas import tpu as pltpu

# ------------------------- synthetic small config -------------------------
PATCH = 8                       # encoder patch size
D_MODEL = 128                   # encoder / decoder width (lane-dense)
D_FF = 256                      # MLP hidden width
N_HEADS = D_MODEL // 64         # decoder rule n_heads = d_model // 64 -> 2 heads of 64
DH = D_MODEL // N_HEADS
ENC_LAYERS = 2
DEC_LAYERS = 2                  # MaskTransformer(n_layers=2)
N_CLS = 4

EPS_LN = 1e-5                   # torch.nn.LayerNorm default eps
SCALE = float(DH) ** -0.5

WA_W = 3 * D_MODEL + D_MODEL + D_FF   # 768 : packed [Wqkv | Wo | W1]
PROW_W = 3 * D_MODEL                  # 384 : packed bias/LN row width


# ------------------------------ small helpers ------------------------------
def _ln(x, g, b):
    mu = jnp.mean(x, axis=-1, keepdims=True)
    xc = x - mu
    var = jnp.mean(xc * xc, axis=-1, keepdims=True)
    return xc * jax.lax.rsqrt(var + EPS_LN) * g + b


def _gelu_tanh(x):
    # TODO(synk): torch nn.GELU default is exact-erf; tanh approximation used for clean EUP lowering.
    c = 0.7978845608028654  # sqrt(2/pi)
    return 0.5 * x * (1.0 + jnp.tanh(c * (x + 0.044715 * x * x * x)))


def _rep_spec(a):
    """Full-array block replicated across the 1-D grid (never re-fetched)."""
    nd = a.ndim
    return pl.BlockSpec(a.shape, lambda i, _nd=nd: (0,) * _nd)


def _prow(p_ref, l, r):
    """Load one packed f32 parameter row (1, 3*D_MODEL) of layer l."""
    return p_ref[l, pl.ds(r, 1), :]


# ------------------------- fused transformer block -------------------------
def _block(x, wa_ref, w2_ref, p_ref, l):
    """Pre-norm transformer block on an in-VMEM activation x: (T, D) f32."""
    f32, bf16 = jnp.float32, jnp.bfloat16
    D = D_MODEL

    wa = wa_ref[l]                                   # (D, 768) bf16 = [Wqkv | Wo | W1]
    w2 = w2_ref[l]                                   # (D_FF, D) bf16
    ln1_g = _prow(p_ref, l, 0)[:, :D]
    ln1_b = _prow(p_ref, l, 1)[:, :D]
    ln2_g = _prow(p_ref, l, 2)[:, :D]
    ln2_b = _prow(p_ref, l, 3)[:, :D]
    proj_b = _prow(p_ref, l, 4)[:, :D]
    fc2_b = _prow(p_ref, l, 5)[:, :D]
    qkv_b = _prow(p_ref, l, 6)                       # (1, 3D)
    fc1_b = _prow(p_ref, l, 7)[:, :D_FF]

    # ----- attention: one fused QKV GEMM + single folded bias add -----
    xl = _ln(x, ln1_g, ln1_b).astype(bf16)
    qkv = jnp.dot(xl, wa[:, 0:3 * D], preferred_element_type=f32) + qkv_b   # (T, 3D)

    head_outs = []
    for h in range(N_HEADS):                         # static unroll (2 heads)
        q = qkv[:, h * DH:(h + 1) * DH].astype(bf16)
        k = qkv[:, D + h * DH:D + (h + 1) * DH].astype(bf16)
        v = qkv[:, 2 * D + h * DH:2 * D + (h + 1) * DH].astype(bf16)
        s = jax.lax.dot_general(q, k, (((1,), (1,)), ((), ())),
                                preferred_element_type=f32) * SCALE          # (T, T)
        s = s - jnp.max(s, axis=-1, keepdims=True)
        e = jnp.exp(s)
        p = e * pl.reciprocal(jnp.sum(e, axis=-1, keepdims=True), approx=True)
        head_outs.append(jnp.dot(p.astype(bf16), v, preferred_element_type=f32))  # (T, DH)
    o_cat = jnp.concatenate(head_outs, axis=-1).astype(bf16)                 # (T, D)

    # single fused output projection on the concatenated heads
    x = x + jnp.dot(o_cat, wa[:, 3 * D:4 * D], preferred_element_type=f32) + proj_b

    # ----- MLP -----
    xl2 = _ln(x, ln2_g, ln2_b).astype(bf16)
    h1 = jnp.dot(xl2, wa[:, 4 * D:4 * D + D_FF], preferred_element_type=f32) + fc1_b
    h1 = _gelu_tanh(h1)
    return x + jnp.dot(h1.astype(bf16), w2, preferred_element_type=f32) + fc2_b


# ------------------------------ the fused kernel ------------------------------
def _segmenter_kernel(n_patch,
                      xp_ref, emb_w_ref, emb_add_ref,
                      enc_wa_ref, enc_w2_ref, enc_p_ref,
                      misc_w_ref, misc_p_ref,
                      dec_wa_ref, dec_w2_ref, dec_p_ref,
                      mask_gb_ref, up_ref,
                      masks_ref, patches_ref, cls_seg_ref, cls_tok_ref,
                      xe_scr, xd_scr):
    """Whole Segmenter forward for one batch element; everything VMEM-resident."""
    f32, bf16 = jnp.float32, jnp.bfloat16
    D = D_MODEL
    N = n_patch

    # ---------- patch embedding + positional / cls token ----------
    # token layout: [patch tokens (N) ; cls token (1)]  (attention is permutation-equivariant)
    pe = jnp.dot(xp_ref[0], emb_w_ref[...], preferred_element_type=f32)      # (N, D)
    xe_scr[pl.ds(0, N), :] = pe
    xe_scr[pl.ds(N, 1), :] = jnp.zeros((1, D), f32)
    x = xe_scr[...] + emb_add_ref[...]     # rows 0..N-1: +patch_b+pos ; row N: cls_token+pos0

    # ---------- ViT encoder ----------
    for l in range(ENC_LAYERS):
        x = _block(x, enc_wa_ref, enc_w2_ref, enc_p_ref, l)

    # ---------- bridge: final encoder LN -> cls out / proj_dec -> append cls_emb ----------
    enc_g = misc_p_ref[pl.ds(0, 1), :]
    enc_b = misc_p_ref[pl.ds(1, 1), :]
    pd_b = misc_p_ref[pl.ds(2, 1), :]
    xe_scr[...] = _ln(x, enc_g, enc_b)
    cls_tok_ref[0] = xe_scr[pl.ds(N, 1), :].astype(cls_tok_ref.dtype)
    x_pat = xe_scr[pl.ds(0, N), :].astype(bf16)

    mw = misc_w_ref[...]                   # (D, 3D) bf16 = [proj_dec | proj_patch | proj_classes]
    xd_scr[pl.ds(0, N), :] = jnp.dot(x_pat, mw[:, 0:D], preferred_element_type=f32) + pd_b
    xd_scr[pl.ds(N, N_CLS), :] = misc_p_ref[pl.ds(8, N_CLS), :]              # cls_emb
    xd = xd_scr[...]                       # (N + N_CLS, D)

    # ---------- MaskTransformer decoder ----------
    for l in range(DEC_LAYERS):
        xd = _block(xd, dec_wa_ref, dec_w2_ref, dec_p_ref, l)

    # ---------- decoder tail ----------
    dec_g = misc_p_ref[pl.ds(3, 1), :]
    dec_b = misc_p_ref[pl.ds(4, 1), :]
    xd_scr[...] = _ln(xd, dec_g, dec_b)
    xp_n = xd_scr[pl.ds(0, N), :].astype(bf16)
    xc_n = xd_scr[pl.ds(N, N_CLS), :].astype(bf16)
    pp = jnp.dot(xp_n, mw[:, D:2 * D], preferred_element_type=f32)           # (N, D)
    cc = jnp.dot(xc_n, mw[:, 2 * D:3 * D], preferred_element_type=f32)       # (C, D)
    pn = pp * jax.lax.rsqrt(jnp.sum(pp * pp, axis=-1, keepdims=True) + 1e-12)
    cn = cc * jax.lax.rsqrt(jnp.sum(cc * cc, axis=-1, keepdims=True) + 1e-12)
    patches_ref[0] = pn.astype(patches_ref.dtype)
    cls_seg_ref[0] = cn.astype(cls_seg_ref.dtype)

    # masks^T : (n_cls, N)  so the upsampled output is lane-dense over H*W
    mt = jax.lax.dot_general(cn, pn, (((1,), (1,)), ((), ())),
                             preferred_element_type=f32)                     # (C, N)
    # mask_norm: LayerNorm over the class axis (axis 0 in this transposed layout)
    mu = jnp.mean(mt, axis=0, keepdims=True)
    mc = mt - mu
    var = jnp.mean(mc * mc, axis=0, keepdims=True)
    mg = mask_gb_ref[:, pl.ds(0, 1)]
    mb = mask_gb_ref[:, pl.ds(1, 1)]
    mtn = mc * jax.lax.rsqrt(var + EPS_LN) * mg + mb
    # TODO(synk): kron(Rh,Rw) upsample is fine at 16x1024 but should become a separable
    # two-step matmul (Rw then Rh) before scaling N*H*W toward real resolutions (v7x 64 MiB VMEM).
    masks_ref[0] = jnp.dot(mtn, up_ref[...], preferred_element_type=f32).astype(masks_ref.dtype)


# --------------------------------- glue ops ---------------------------------
def bilinear_matrix(out_size, in_size):
    """Row-interpolation matrix matching F.interpolate(mode='bilinear', align_corners=False)."""
    i = np.arange(out_size, dtype=np.float64)
    src = (i + 0.5) * (float(in_size) / float(out_size)) - 0.5
    src = np.maximum(src, 0.0)
    x0 = np.minimum(np.floor(src).astype(np.int64), in_size - 1)
    x1 = np.minimum(x0 + 1, in_size - 1)
    w = src - x0
    R = np.zeros((out_size, in_size), np.float64)
    rows = np.arange(out_size)
    R[rows, x0] += 1.0 - w
    R[rows, x1] += w
    return R.astype(np.float32)


def _pack_block_params(blocks):
    """Stack per-layer weights into: bf16 (L,D,768)=[Wqkv|Wo|W1], bf16 (L,D_FF,D)=W2, f32 (L,8,384)."""
    bf16 = jnp.bfloat16
    was, w2s, ps = [], [], []

    def row(v):
        v = v.reshape(1, -1).astype(jnp.float32)
        return jnp.pad(v, ((0, 0), (0, PROW_W - v.shape[1])))

    for blk in blocks:
        was.append(jnp.concatenate(
            [blk["qkv_w"], blk["proj_w"], blk["fc1_w"]], axis=1).astype(bf16))   # (D, 768)
        w2s.append(blk["fc2_w"].astype(bf16))                                    # (D_FF, D)
        ps.append(jnp.concatenate(
            [row(blk["ln1_g"]), row(blk["ln1_b"]), row(blk["ln2_g"]), row(blk["ln2_b"]),
             row(blk["proj_b"]), row(blk["fc2_b"]), row(blk["qkv_b"]), row(blk["fc1_b"])],
            axis=0))                                                             # (8, 384)
    return jnp.stack(was), jnp.stack(w2s), jnp.stack(ps)


def segmenter_forward(im, params):
    B, C, H_ori, W_ori = im.shape

    # padding(im, patch_size)
    pad_h = (-H_ori) % PATCH
    pad_w = (-W_ori) % PATCH
    im_p = jnp.pad(im, ((0, 0), (0, 0), (0, pad_h), (0, pad_w)))
    H, W = im_p.shape[2], im_p.shape[3]
    GS_h, GS_w = H // PATCH, W // PATCH
    N = GS_h * GS_w
    CPP = C * PATCH * PATCH
    CPP_pad = pl.cdiv(CPP, 128) * 128                 # 192 -> 256 : two clean 128-lane tiles

    # patchify (Conv2d k=s=P == unfold + matmul), zero-pad the contraction dim, bf16 feed
    xp = im_p.reshape(B, C, GS_h, PATCH, GS_w, PATCH)
    xp = xp.transpose(0, 2, 4, 1, 3, 5).reshape(B, N, CPP)
    xp = jnp.pad(xp, ((0, 0), (0, 0), (0, CPP_pad - CPP))).astype(jnp.bfloat16)

    emb_w = jnp.pad(params["patch_w"], ((0, CPP_pad - CPP), (0, 0))).astype(jnp.bfloat16)
    pos = params["pos_embed"][0]                      # (1+N, D), cls first
    # token layout inside the kernel: [patches (N) ; cls (1)]
    emb_add = jnp.concatenate(
        [params["patch_b"].reshape(1, D_MODEL) + pos[1:],
         params["cls_token"][0] + pos[0:1]], axis=0)  # (N+1, D)

    enc_wa, enc_w2, enc_p = _pack_block_params(params["enc_blocks"])
    dec_wa, dec_w2, dec_p = _pack_block_params(params["dec_blocks"])

    misc_w = jnp.concatenate(
        [params["proj_dec_w"], params["proj_patch"], params["proj_classes"]],
        axis=1).astype(jnp.bfloat16)                  # (D, 3D)
    misc_p = jnp.concatenate(
        [params["enc_norm_g"].reshape(1, -1), params["enc_norm_b"].reshape(1, -1),
         params["proj_dec_b"].reshape(1, -1),
         params["dec_norm_g"].reshape(1, -1), params["dec_norm_b"].reshape(1, -1),
         jnp.zeros((3, D_MODEL), jnp.float32),
         params["cls_emb"][0]], axis=0)               # (8 + N_CLS, D)
    mask_gb = jnp.stack([params["mask_norm_g"], params["mask_norm_b"]], axis=1)  # (N_CLS, 2)

    # bilinear upsample as one matmul against kron(Rh, Rw)^T : (N, H*W), built at trace time
    up = jnp.asarray(np.kron(bilinear_matrix(H, GS_h), bilinear_matrix(W, GS_w)).T)

    w_ins = [emb_w, emb_add, enc_wa, enc_w2, enc_p, misc_w, misc_p,
             dec_wa, dec_w2, dec_p, mask_gb, up]

    # rough cost hint for XLA scheduling around the custom call
    T_e, T_d = N + 1, N + N_CLS
    flops = 2 * B * N * CPP_pad * D_MODEL
    for T in [T_e] * ENC_LAYERS + [T_d] * DEC_LAYERS:
        flops += B * (2 * T * D_MODEL * 4 * D_MODEL + 4 * T * D_MODEL * D_FF
                      + N_HEADS * 4 * T * T * DH)
    flops += B * (2 * (N + N_CLS) * D_MODEL * D_MODEL + 2 * N_CLS * N * D_MODEL
                  + 2 * N_CLS * N * H * W)
    trans = B * (ENC_LAYERS * (N_HEADS * T_e * T_e + T_e * D_FF)
                 + DEC_LAYERS * (N_HEADS * T_d * T_d + T_d * D_FF))
    bytes_acc = int(np.prod(xp.shape)) * 2
    bytes_acc += sum(int(np.prod(a.shape)) * a.dtype.itemsize for a in w_ins)
    bytes_acc += B * (N_CLS * H * W + N * D_MODEL + N_CLS * D_MODEL + D_MODEL) * 4

    grid_spec = pltpu.PrefetchScalarGridSpec(
        num_scalar_prefetch=0,
        grid=(B,),
        in_specs=[pl.BlockSpec((1, N, CPP_pad), lambda i: (i, 0, 0))] +
                 [_rep_spec(a) for a in w_ins],
        out_specs=(pl.BlockSpec((1, N_CLS, H * W), lambda i: (i, 0, 0)),
                   pl.BlockSpec((1, N, D_MODEL), lambda i: (i, 0, 0)),
                   pl.BlockSpec((1, N_CLS, D_MODEL), lambda i: (i, 0, 0)),
                   pl.BlockSpec((1, 1, D_MODEL), lambda i: (i, 0, 0))),
        scratch_shapes=[pltpu.VMEM((N + 1, D_MODEL), jnp.float32),
                        pltpu.VMEM((N + N_CLS, D_MODEL), jnp.float32)],
    )

    masks_t, patches_n, cls_seg_n, cls_tok = pl.pallas_call(
        functools.partial(_segmenter_kernel, N),
        out_shape=(jax.ShapeDtypeStruct((B, N_CLS, H * W), jnp.float32),
                   jax.ShapeDtypeStruct((B, N, D_MODEL), jnp.float32),
                   jax.ShapeDtypeStruct((B, N_CLS, D_MODEL), jnp.float32),
                   jax.ShapeDtypeStruct((B, 1, D_MODEL), jnp.float32)),
        grid_spec=grid_spec,
        compiler_params=pltpu.CompilerParams(dimension_semantics=("parallel",)),
        cost_estimate=pl.CostEstimate(flops=int(flops), transcendentals=int(trans),
                                      bytes_accessed=int(bytes_acc)),
    )(xp, *w_ins)

    masks = masks_t.reshape(B, N_CLS, H, W)[:, :, :H_ori, :W_ori]   # unpadding
    # TODO(synk): decoder.return_feats() cls_token approximated by the encoder CLS token.
    return masks, patches_n, cls_seg_n, cls_tok[:, 0, :]


# ------------------------------- param init -------------------------------
def init_segmenter_params(key, n_patches, in_chans=3):
    ks = iter(jax.random.split(key, 64))

    def normal(shape, std=0.02):
        return (std * jax.random.normal(next(ks), shape)).astype(jnp.float32)

    def zeros(shape):
        return jnp.zeros(shape, jnp.float32)

    def ones(shape):
        return jnp.ones(shape, jnp.float32)

    def block_params():
        return dict(
            ln1_g=ones((D_MODEL,)), ln1_b=zeros((D_MODEL,)),
            qkv_w=normal((D_MODEL, 3 * D_MODEL)), qkv_b=zeros((3 * D_MODEL,)),
            proj_w=normal((D_MODEL, D_MODEL)), proj_b=zeros((D_MODEL,)),
            ln2_g=ones((D_MODEL,)), ln2_b=zeros((D_MODEL,)),
            fc1_w=normal((D_MODEL, D_FF)), fc1_b=zeros((D_FF,)),
            fc2_w=normal((D_FF, D_MODEL)), fc2_b=zeros((D_MODEL,)),
        )

    return dict(
        patch_w=normal((in_chans * PATCH * PATCH, D_MODEL)),
        patch_b=zeros((D_MODEL,)),
        cls_token=normal((1, 1, D_MODEL)),
        pos_embed=normal((1, 1 + n_patches, D_MODEL)),
        enc_blocks=[block_params() for _ in range(ENC_LAYERS)],
        enc_norm_g=ones((D_MODEL,)), enc_norm_b=zeros((D_MODEL,)),
        proj_dec_w=normal((D_MODEL, D_MODEL)), proj_dec_b=zeros((D_MODEL,)),
        cls_emb=normal((1, N_CLS, D_MODEL)),
        dec_blocks=[block_params() for _ in range(DEC_LAYERS)],
        dec_norm_g=ones((D_MODEL,)), dec_norm_b=zeros((D_MODEL,)),
        proj_patch=normal((D_MODEL, D_MODEL), std=D_MODEL ** -0.5),
        proj_classes=normal((D_MODEL, D_MODEL), std=D_MODEL ** -0.5),
        mask_norm_g=ones((N_CLS,)), mask_norm_b=zeros((N_CLS,)),
    )


# ----------------------------------- main -----------------------------------
if __name__ == "__main__":
    key = jax.random.PRNGKey(0)
    k_im, k_par = jax.random.split(key)

    B, C, H_ori, W_ori = 2, 3, 30, 30            # non-multiple of patch -> exercises padding/unpadding
    im = jax.random.normal(k_im, (B, C, H_ori, W_ori), dtype=jnp.float32)

    H_pad = ((H_ori + PATCH - 1) // PATCH) * PATCH
    W_pad = ((W_ori + PATCH - 1) // PATCH) * PATCH
    n_patches = (H_pad // PATCH) * (W_pad // PATCH)

    params = init_segmenter_params(k_par, n_patches, in_chans=C)

    fwd = jax.jit(segmenter_forward)
    masks, patches, cls_seg_feat, cls_token = fwd(im, params)
    jax.block_until_ready((masks, patches, cls_seg_feat, cls_token))

    assert masks.shape == (B, N_CLS, H_ori, W_ori), masks.shape
    assert patches.shape == (B, n_patches, D_MODEL), patches.shape
    assert cls_seg_feat.shape == (B, N_CLS, D_MODEL), cls_seg_feat.shape
    assert cls_token.shape == (B, D_MODEL), cls_token.shape
    assert bool(jnp.all(jnp.isfinite(masks)))
    assert bool(jnp.all(jnp.isfinite(patches)))
    assert bool(jnp.all(jnp.isfinite(cls_seg_feat)))

    print("KERNEL_OK")
</pallas_src>

<mosaic_0001>
module attributes {stable_mosaic.version = 11 : i64} {
  func.func @_segmenter_kernel(%arg0: i32, %arg1: memref<1x16x256xbf16, #tpu.memory_space<vmem>>, %arg2: memref<256x128xbf16, #tpu.memory_space<vmem>>, %arg3: memref<17x128xf32, #tpu.memory_space<vmem>>, %arg4: memref<2x128x768xbf16, #tpu.memory_space<vmem>>, %arg5: memref<2x256x128xbf16, #tpu.memory_space<vmem>>, %arg6: memref<2x8x384xf32, #tpu.memory_space<vmem>>, %arg7: memref<128x384xbf16, #tpu.memory_space<vmem>>, %arg8: memref<12x128xf32, #tpu.memory_space<vmem>>, %arg9: memref<2x128x768xbf16, #tpu.memory_space<vmem>>, %arg10: memref<2x256x128xbf16, #tpu.memory_space<vmem>>, %arg11: memref<2x8x384xf32, #tpu.memory_space<vmem>>, %arg12: memref<4x2xf32, #tpu.memory_space<vmem>>, %arg13: memref<16x1024xf32, #tpu.memory_space<vmem>>, %arg14: memref<1x4x1024xf32, #tpu.memory_space<vmem>>, %arg15: memref<1x16x128xf32, #tpu.memory_space<vmem>>, %arg16: memref<1x4x128xf32, #tpu.memory_space<vmem>>, %arg17: memref<1x1x128xf32, #tpu.memory_space<vmem>>, %arg18: memref<17x128xf32, #tpu.memory_space<vmem>>, %arg19: memref<20x128xf32, #tpu.memory_space<vmem>>) attributes {dimension_semantics = [#tpu.dimension_semantics<parallel>], iteration_bounds = array<i64: 2>, scalar_prefetch = 0 : i64, scratch_operands = 2 : i64, tpu.core_type = #tpu.core_type<tc>, window_params = [{transform_indices = @transform_0, window_bounds = array<i64: 1, 16, 256>}, {pipeline_mode = #tpu.pipeline_mode<synchronous>, transform_indices = @transform_1, window_bounds = array<i64: 256, 128>}, {pipeline_mode = #tpu.pipeline_mode<synchronous>, transform_indices = @transform_2, window_bounds = array<i64: 17, 128>}, {pipeline_mode = #tpu.pipeline_mode<synchronous>, transform_indices = @transform_3, window_bounds = array<i64: 2, 128, 768>}, {pipeline_mode = #tpu.pipeline_mode<synchronous>, transform_indices = @transform_4, window_bounds = array<i64: 2, 256, 128>}, {pipeline_mode = #tpu.pipeline_mode<synchronous>, transform_indices = @transform_5, window_bounds = array<i64: 2, 8, 384>}, {pipeline_mode = #tpu.pipeline_mode<synchronous>, transform_indices = @transform_6, window_bounds = array<i64: 128, 384>}, {pipeline_mode = #tpu.pipeline_mode<synchronous>, transform_indices = @transform_7, window_bounds = array<i64: 12, 128>}, {pipeline_mode = #tpu.pipeline_mode<synchronous>, transform_indices = @transform_8, window_bounds = array<i64: 2, 128, 768>}, {pipeline_mode = #tpu.pipeline_mode<synchronous>, transform_indices = @transform_9, window_bounds = array<i64: 2, 256, 128>}, {pipeline_mode = #tpu.pipeline_mode<synchronous>, transform_indices = @transform_10, window_bounds = array<i64: 2, 8, 384>}, {pipeline_mode = #tpu.pipeline_mode<synchronous>, transform_indices = @transform_11, window_bounds = array<i64: 4, 2>}, {pipeline_mode = #tpu.pipeline_mode<synchronous>, transform_indices = @transform_12, window_bounds = array<i64: 16, 1024>}, {transform_indices = @transform_13, window_bounds = array<i64: 1, 4, 1024>}, {transform_indices = @transform_14, window_bounds = array<i64: 1, 16, 128>}, {transform_indices = @transform_15, window_bounds = array<i64: 1, 4, 128>}, {transform_indices = @transform_16, window_bounds = array<i64: 1, 1, 128>}]} {
    %c0 = arith.constant 0 : index
    %c0_0 = arith.constant 0 : index
    %c0_1 = arith.constant 0 : index
    %0 = vector.load %arg1[%c0, %c0_0, %c0_1] : memref<1x16x256xbf16, #tpu.memory_space<vmem>>, vector<1x16x256xbf16>
    %1 = vector.shape_cast %0 : vector<1x16x256xbf16> to vector<16x256xbf16>
    %c0_2 = arith.constant 0 : index
    %c0_3 = arith.constant 0 : index
    %2 = vector.load %arg2[%c0_2, %c0_3] : memref<256x128xbf16, #tpu.memory_space<vmem>>, vector<256x128xbf16>
    %cst = arith.constant dense<0.000000e+00> : vector<16x128xf32>
    %3 = tpu.matmul %1, %2, %cst {dimension_numbers = #tpu.dot_dimension_numbers<[1], [0], [0], [1], [0, 0, 1, 1], [], []>} : vector<16x256xbf16>, vector<256x128xbf16>, vector<16x128xf32> -> vector<16x128xf32>
    %c0_4 = arith.constant 0 : index
    %c0_5 = arith.constant 0 : index
    %4 = vector.load %arg18[%c0_4, %c0_5] : memref<17x128xf32, #tpu.memory_space<vmem>>, vector<16x128xf32>
    tpu.vector_store %arg18[%c0_4, %c0_5], %3 {strides = array<i32>} : memref<17x128xf32, #tpu.memory_space<vmem>>, vector<16x128xf32>,
    %cst_6 = arith.constant 0.000000e+00 : f32
    %5 = vector.broadcast %cst_6 : f32 to vector<1x128xf32>
    %c16 = arith.constant 16 : index
    %c0_7 = arith.constant 0 : index
    %6 = vector.load %arg18[%c16, %c0_7] : memref<17x128xf32, #tpu.memory_space<vmem>>, vector<1x128xf32>
    tpu.vector_store %arg18[%c16, %c0_7], %5 {strides = array<i32>} : memref<17x128xf32, #tpu.memory_space<vmem>>, vector<1x128xf32>,
    %c0_8 = arith.constant 0 : index
    %c0_9 = arith.constant 0 : index
    %7 = vector.load %arg18[%c0_8, %c0_9] : memref<17x128xf32, #tpu.memory_space<vmem>>, vector<17x128xf32>
    %c0_10 = arith.constant 0 : index
    %c0_11 = arith.constant 0 : index
    %8 = vector.load %arg3[%c0_10, %c0_11] : memref<17x128xf32, #tpu.memory_space<vmem>>, vector<17x128xf32>
    %9 = arith.addf %7, %8 : vector<17x128xf32>
    %c0_12 = arith.constant 0 : index
    %c0_13 = arith.constant 0 : index
    %c0_14 = arith.constant 0 : index
    %10 = vector.load %arg4[%c0_12, %c0_13, %c0_14] : memref<2x128x768xbf16, #tpu.memory_space<vmem>>, vector<1x128x768xbf16>
    %11 = vector.shape_cast %10 : vector<1x128x768xbf16> to vector<128x768xbf16>
    %c0_15 = arith.constant 0 : index
    %c0_16 = arith.constant 0 : index
    %c0_17 = arith.constant 0 : index
    %12 = vector.load %arg5[%c0_15, %c0_16, %c0_17] : memref<2x256x128xbf16, #tpu.memory_space<vmem>>, vector<1x256x128xbf16>
    %13 = vector.shape_cast %12 : vector<1x256x128xbf16> to vector<256x128xbf16>
    %c0_18 = arith.constant 0 : index
    %c0_19 = arith.constant 0 : index
    %c0_20 = arith.constant 0 : index
    %14 = vector.load %arg6[%c0_18, %c0_19, %c0_20] : memref<2x8x384xf32, #tpu.memory_space<vmem>>, vector<1x1x384xf32>
    %15 = vector.shape_cast %14 : vector<1x1x384xf32> to vector<1x384xf32>
    %16 = vector.extract_strided_slice %15 {offsets = [0, 0], sizes = [1, 128], strides = [1, 1]} : vector<1x384xf32> to vector<1x128xf32>
    %c0_21 = arith.constant 0 : index
    %c1 = arith.constant 1 : index
    %c0_22 = arith.constant 0 : index
    %17 = vector.load %arg6[%c0_21, %c1, %c0_22] : memref<2x8x384xf32, #tpu.memory_space<vmem>>, vector<1x1x384xf32>
    %18 = vector.shape_cast %17 : vector<1x1x384xf32> to vector<1x384xf32>
    %19 = vector.extract_strided_slice %18 {offsets = [0, 0], sizes = [1, 128], strides = [1, 1]} : vector<1x384xf32> to vector<1x128xf32>
    %c0_23 = arith.constant 0 : index
    %c2 = arith.constant 2 : index
    %c0_24 = arith.constant 0 : index
    %20 = vector.load %arg6[%c0_23, %c2, %c0_24] : memref<2x8x384xf32, #tpu.memory_space<vmem>>, vector<1x1x384xf32>
    %21 = vector.shape_cast %20 : vector<1x1x384xf32> to vector<1x384xf32>
    %22 = vector.extract_strided_slice %21 {offsets = [0, 0], sizes = [1, 128], strides = [1, 1]} : vector<1x384xf32> to vector<1x128xf32>
    %c0_25 = arith.constant 0 : index
    %c3 = arith.constant 3 : index
    %c0_26 = arith.constant 0 : index
    %23 = vector.load %arg6[%c0_25, %c3, %c0_26] : memref<2x8x384xf32, #tpu.memory_space<vmem>>, vector<1x1x384xf32>
    %24 = vector.shape_cast %23 : vector<1x1x384xf32> to vector<1x384xf32>
    %25 = vector.extract_strided_slice %24 {offsets = [0, 0], sizes = [1, 128], strides = [1, 1]} : vector<1x384xf32> to vector<1x128xf32>
    %c0_27 = arith.constant 0 : index
    %c4 = arith.constant 4 : index
    %c0_28 = arith.constant 0 : index
    %26 = vector.load %arg6[%c0_27, %c4, %c0_28] : memref<2x8x384xf32, #tpu.memory_space<vmem>>, vector<1x1x384xf32>
    %27 = vector.shape_cast %26 : vector<1x1x384xf32> to vector<1x384xf32>
    %28 = vector.extract_strided_slice %27 {offsets = [0, 0], sizes = [1, 128], strides = [1, 1]} : vector<1x384xf32> to vector<1x128xf32>
    %c0_29 = arith.constant 0 : index
    %c5 = arith.constant 5 : index
    %c0_30 = arith.constant 0 : index
    %29 = vector.load %arg6[%c0_29, %c5, %c0_30] : memref<2x8x384xf32, #tpu.memory_space<vmem>>, vector<1x1x384xf32>
    %30 = vector.shape_cast %29 : vector<1x1x384xf32> to vector<1x384xf32>
    %31 = vector.extract_strided_slice %30 {offsets = [0, 0], sizes = [1, 128], strides = [1, 1]} : vector<1x384xf32> to vector<1x128xf32>
    %c0_31 = arith.constant 0 : index
    %c6 = arith.constant 6 : index
    %c0_32 = arith.constant 0 : index
    %32 = vector.load %arg6[%c0_31, %c6, %c0_32] : memref<2x8x384xf32, #tpu.memory_space<vmem>>, vector<1x1x384xf32>
    %33 = vector.shape_cast %32 : vector<1x1x384xf32> to vector<1x384xf32>
    %c0_33 = arith.constant 0 : index
    %c7 = arith.constant 7 : index
    %c0_34 = arith.constant 0 : index
    %34 = vector.load %arg6[%c0_33, %c7, %c0_34] : memref<2x8x384xf32, #tpu.memory_space<vmem>>, vector<1x1x384xf32>
    %35 = vector.shape_cast %34 : vector<1x1x384xf32> to vector<1x384xf32>
    %36 = vector.extract_strided_slice %35 {offsets = [0, 0], sizes = [1, 256], strides = [1, 1]} : vector<1x384xf32> to vector<1x256xf32>
    %cst_35 = arith.constant dense<0.000000e+00> : vector<17xf32>
    %37 = vector.multi_reduction <add>, %9, %cst_35 [1] : vector<17x128xf32> to vector<17xf32>
    %38 = vector.shape_cast %37 : vector<17xf32> to vector<17x1xf32>
    %cst_36 = arith.constant 1.280000e+02 : f32
    %39 = vector.broadcast %cst_36 : f32 to vector<17x1xf32>
    %40 = arith.divf %38, %39 : vector<17x1xf32>
    %41 = vector.broadcast %40 : vector<17x1xf32> to vector<17x128xf32>
    %42 = arith.subf %9, %41 : vector<17x128xf32>
    %43 = arith.mulf %42, %42 : vector<17x128xf32>
    %cst_37 = arith.constant dense<0.000000e+00> : vector<17xf32>
    %44 = vector.multi_reduction <add>, %43, %cst_37 [1] : vector<17x128xf32> to vector<17xf32>
    %45 = vector.shape_cast %44 : vector<17xf32> to vector<17x1xf32>
    %cst_38 = arith.constant 1.280000e+02 : f32
    %46 = vector.broadcast %cst_38 : f32 to vector<17x1xf32>
    %47 = arith.divf %45, %46 : vector<17x1xf32>
    %cst_39 = arith.constant 9.99999974E-6 : f32
    %48 = vector.broadcast %cst_39 : f32 to vector<17x1xf32>
    %49 = arith.addf %47, %48 : vector<17x1xf32>
    %50 = math.rsqrt %49 : vector<17x1xf32>
    %51 = vector.broadcast %50 : vector<17x1xf32> to vector<17x128xf32>
    %52 = arith.mulf %42, %51 : vector<17x128xf32>
    %53 = vector.broadcast %16 : vector<1x128xf32> to vector<17x128xf32>
    %54 = arith.mulf %52, %53 : vector<17x128xf32>
    %55 = vector.broadcast %19 : vector<1x128xf32> to vector<17x128xf32>
    %56 = arith.addf %54, %55 : vector<17x128xf32>
    %57 = arith.truncf %56 : vector<17x128xf32> to vector<17x128xbf16>
    %58 = vector.extract_strided_slice %11 {offsets = [0, 0], sizes = [128, 384], strides = [1, 1]} : vector<128x768xbf16> to vector<128x384xbf16>
    %cst_40 = arith.constant dense<0.000000e+00> : vector<17x384xf32>
    %59 = tpu.matmul %57, %58, %cst_40 {dimension_numbers = #tpu.dot_dimension_numbers<[1], [0], [0], [1], [0, 0, 1, 1], [], []>} : vector<17x128xbf16>, vector<128x384xbf16>, vector<17x384xf32> -> vector<17x384xf32>
    %60 = vector.broadcast %33 : vector<1x384xf32> to vector<17x384xf32>
    %61 = arith.addf %59, %60 : vector<17x384xf32>
    %62 = vector.extract_strided_slice %61 {offsets = [0, 0], sizes = [17, 64], strides = [1, 1]} : vector<17x384xf32> to vector<17x64xf32>
    %63 = arith.truncf %62 : vector<17x64xf32> to vector<17x64xbf16>
    %64 = vector.extract_strided_slice %61 {offsets = [0, 128], sizes = [17, 64], strides = [1, 1]} : vector<17x384xf32> to vector<17x64xf32>
    %65 = arith.truncf %64 : vector<17x64xf32> to vector<17x64xbf16>
    %66 = vector.extract_strided_slice %61 {offsets = [0, 256], sizes = [17, 64], strides = [1, 1]} : vector<17x384xf32> to vector<17x64xf32>
    %67 = arith.truncf %66 : vector<17x64xf32> to vector<17x64xbf16>
    %cst_41 = arith.constant dense<0.000000e+00> : vector<17x17xf32>
    %68 = tpu.matmul %63, %65, %cst_41 {dimension_numbers = #tpu.dot_dimension_numbers<[1], [1], [0], [0], [0, 0, 1, 0], [], []>} : vector<17x64xbf16>, vector<17x64xbf16>, vector<17x17xf32> -> vector<17x17xf32>
    %cst_42 = arith.constant 1.250000e-01 : f32
    %69 = vector.broadcast %cst_42 : f32 to vector<17x17xf32>
    %70 = arith.mulf %68, %69 : vector<17x17xf32>
    %cst_43 = arith.constant dense<0xFF800000> : vector<17xf32>
    %71 = vector.multi_reduction <maximumf>, %70, %cst_43 [1] : vector<17x17xf32> to vector<17xf32>
    %72 = vector.shape_cast %71 : vector<17xf32> to vector<17x1xf32>
    %73 = vector.broadcast %72 : vector<17x1xf32> to vector<17x17xf32>
    %74 = arith.subf %70, %73 : vector<17x17xf32>
    %75 = math.exp %74 : vector<17x17xf32>
    %cst_44 = arith.constant dense<0.000000e+00> : vector<17xf32>
    %76 = vector.multi_reduction <add>, %75, %cst_44 [1] : vector<17x17xf32> to vector<17xf32>
    %77 = vector.shape_cast %76 : vector<17xf32> to vector<17x1xf32>
    %78 = tpu.reciprocal %77 {approx = true} : vector<17x1xf32> -> vector<17x1xf32>
    %79 = vector.broadcast %78 : vector<17x1xf32> to vector<17x17xf32>
    %80 = arith.mulf %75, %79 : vector<17x17xf32>
    %81 = arith.truncf %80 : vector<17x17xf32> to vector<17x17xbf16>
    %cst_45 = arith.constant dense<0.000000e+00> : vector<17x64xf32>
    %82 = tpu.matmul %81, %67, %cst_45 {dimension_numbers = #tpu.dot_dimension_numbers<[1], [0], [0], [1], [0, 0, 1, 1], [], []>} : vector<17x17xbf16>, vector<17x64xbf16>, vector<17x64xf32> -> vector<17x64xf32>
    %83 = vector.extract_strided_slice %61 {offsets = [0, 64], sizes = [17, 64], strides = [1, 1]} : vector<17x384xf32> to vector<17x64xf32>
    %84 = arith.truncf %83 : vector<17x64xf32> to vector<17x64xbf16>
    %85 = vector.extract_strided_slice %61 {offsets = [0, 192], sizes = [17, 64], strides = [1, 1]} : vector<17x384xf32> to vector<17x64xf32>
    %86 = arith.truncf %85 : vector<17x64xf32> to vector<17x64xbf16>
    %87 = vector.extract_strided_slice %61 {offsets = [0, 320], sizes = [17, 64], strides = [1, 1]} : vector<17x384xf32> to vector<17x64xf32>
    %88 = arith.truncf %87 : vector<17x64xf32> to vector<17x64xbf16>
    %cst_46 = arith.constant dense<0.000000e+00> : vector<17x17xf32>
    %89 = tpu.matmul %84, %86, %cst_46 {dimension_numbers = #tpu.dot_dimension_numbers<[1], [1], [0], [0], [0, 0, 1, 0], [], []>} : vector<17x64xbf16>, vector<17x64xbf16>, vector<17x17xf32> -> vector<17x17xf32>
    %cst_47 = arith.constant 1.250000e-01 : f32
    %90 = vector.broadcast %cst_47 : f32 to vector<17x17xf32>
    %91 = arith.mulf %89, %90 : vector<17x17xf32>
    %cst_48 = arith.constant dense<0xFF800000> : vector<17xf32>
    %92 = vector.multi_reduction <maximumf>, %91, %cst_48 [1] : vector<17x17xf32> to vector<17xf32>
    %93 = vector.shape_cast %92 : vector<17xf32> to vector<17x1xf32>
    %94 = vector.broadcast %93 : vector<17x1xf32> to vector<17x17xf32>
    %95 = arith.subf %91, %94 : vector<17x17xf32>
    %96 = math.exp %95 : vector<17x17xf32>
    %cst_49 = arith.constant dense<0.000000e+00> : vector<17xf32>
    %97 = vector.multi_reduction <add>, %96, %cst_49 [1] : vector<17x17xf32> to vector<17xf32>
    %98 = vector.shape_cast %97 : vector<17xf32> to vector<17x1xf32>
    %99 = tpu.reciprocal %98 {approx = true} : vector<17x1xf32> -> vector<17x1xf32>
    %100 = vector.broadcast %99 : vector<17x1xf32> to vector<17x17xf32>
    %101 = arith.mulf %96, %100 : vector<17x17xf32>
    %102 = arith.truncf %101 : vector<17x17xf32> to vector<17x17xbf16>
    %cst_50 = arith.constant dense<0.000000e+00> : vector<17x64xf32>
    %103 = tpu.matmul %102, %88, %cst_50 {dimension_numbers = #tpu.dot_dimension_numbers<[1], [0], [0], [1], [0, 0, 1, 1], [], []>} : vector<17x17xbf16>, vector<17x64xbf16>, vector<17x64xf32> -> vector<17x64xf32>
    %104 = tpu.concatenate %82, %103 in 1 : vector<17x64xf32>, vector<17x64xf32> -> vector<17x128xf32>
    %105 = arith.truncf %104 : vector<17x128xf32> to vector<17x128xbf16>
    %106 = vector.extract_strided_slice %11 {offsets = [0, 384], sizes = [128, 128], strides = [1, 1]} : vector<128x768xbf16> to vector<128x128xbf16>
    %cst_51 = arith.constant dense<0.000000e+00> : vector<17x128xf32>
    %107 = tpu.matmul %105, %106, %cst_51 {dimension_numbers = #tpu.dot_dimension_numbers<[1], [0], [0], [1], [0, 0, 1, 1], [], []>} : vector<17x128xbf16>, vector<128x128xbf16>, vector<17x128xf32> -> vector<17x128xf32>
    %108 = arith.addf %9, %107 : vector<17x128xf32>
    %109 = vector.broadcast %28 : vector<1x128xf32> to vector<17x128xf32>
    %110 = arith.addf %108, %109 : vector<17x128xf32>
    %cst_52 = arith.constant dense<0.000000e+00> : vector<17xf32>
    %111 = vector.multi_reduction <add>, %110, %cst_52 [1] : vector<17x128xf32> to vector<17xf32>
    %112 = vector.shape_cast %111 : vector<17xf32> to vector<17x1xf32>
    %cst_53 = arith.constant 1.280000e+02 : f32
    %113 = vector.broadcast %cst_53 : f32 to vector<17x1xf32>
    %114 = arith.divf %112, %113 : vector<17x1xf32>
    %115 = vector.broadcast %114 : vector<17x1xf32> to vector<17x128xf32>
    %116 = arith.subf %110, %115 : vector<17x128xf32>
    %117 = arith.mulf %116, %116 : vector<17x128xf32>
    %cst_54 = arith.constant dense<0.000000e+00> : vector<17xf32>
    %118 = vector.multi_reduction <add>, %117, %cst_54 [1] : vector<17x128xf32> to vector<17xf32>
    %119 = vector.shape_cast %118 : vector<17xf32> to vector<17x1xf32>
    %cst_55 = arith.constant 1.280000e+02 : f32
    %120 = vector.broadcast %cst_55 : f32 to vector<17x1xf32>
    %121 = arith.divf %119, %120 : vector<17x1xf32>
    %cst_56 = arith.constant 9.99999974E-6 : f32
    %122 = vector.broadcast %cst_56 : f32 to vector<17x1xf32>
    %123 = arith.addf %121, %122 : vector<17x1xf32>
    %124 = math.rsqrt %123 : vector<17x1xf32>
    %125 = vector.broadcast %124 : vector<17x1xf32> to vector<17x128xf32>
    %126 = arith.mulf %116, %125 : vector<17x128xf32>
    %127 = vector.broadcast %22 : vector<1x128xf32> to vector<17x128xf32>
    %128 = arith.mulf %126, %127 : vector<17x128xf32>
    %129 = vector.broadcast %25 : vector<1x128xf32> to vector<17x128xf32>
    %130 = arith.addf %128, %129 : vector<17x128xf32>
    %131 = arith.truncf %130 : vector<17x128xf32> to vector<17x128xbf16>
    %132 = vector.extract_strided_slice %11 {offsets = [0, 512], sizes = [128, 256], strides = [1, 1]} : vector<128x768xbf16> to vector<128x256xbf16>
    %cst_57 = arith.constant dense<0.000000e+00> : vector<17x256xf32>
    %133 = tpu.matmul %131, %132, %cst_57 {dimension_numbers = #tpu.dot_dimension_numbers<[1], [0], [0], [1], [0, 0, 1, 1], [], []>} : vector<17x128xbf16>, vector<128x256xbf16>, vector<17x256xf32> -> vector<17x256xf32>
    %134 = vector.broadcast %36 : vector<1x256xf32> to vector<17x256xf32>
    %135 = arith.addf %133, %134 : vector<17x256xf32>
    %cst_58 = arith.constant 5.000000e-01 : f32
    %136 = vector.broadcast %cst_58 : f32 to vector<17x256xf32>
    %137 = arith.mulf %136, %135 : vector<17x256xf32>
    %cst_59 = arith.constant 4.471500e-02 : f32
    %138 = vector.broadcast %cst_59 : f32 to vector<17x256xf32>
    %139 = arith.mulf %138, %135 : vector<17x256xf32>
    %140 = arith.mulf %139, %135 : vector<17x256xf32>
    %141 = arith.mulf %140, %135 : vector<17x256xf32>
    %142 = arith.addf %135, %141 : vector<17x256xf32>
    %cst_60 = arith.constant 0.797884583 : f32
    %143 = vector.broadcast %cst_60 : f32 to vector<17x256xf32>
    %144 = arith.mulf %143, %142 : vector<17x256xf32>
    %145 = math.tanh %144 : vector<17x256xf32>
    %cst_61 = arith.constant 1.000000e+00 : f32
    %146 = vector.broadcast %cst_61 : f32 to vector<17x256xf32>
    %147 = arith.addf %146, %145 : vector<17x256xf32>
    %148 = arith.mulf %137, %147 : vector<17x256xf32>
    %149 = arith.truncf %148 : vector<17x256xf32> to vector<17x256xbf16>
    %cst_62 = arith.constant dense<0.000000e+00> : vector<17x128xf32>
    %150 = tpu.matmul %149, %13, %cst_62 {dimension_numbers = #tpu.dot_dimension_numbers<[1], [0], [0], [1], [0, 0, 1, 1], [], []>} : vector<17x256xbf16>, vector<256x128xbf16>, vector<17x128xf32> -> vector<17x128xf32>
    %151 = arith.addf %110, %150 : vector<17x128xf32>
    %152 = vector.broadcast %31 : vector<1x128xf32> to vector<17x128xf32>
    %153 = arith.addf %151, %152 : vector<17x128xf32>
    %c1_63 = arith.constant 1 : index
    %c0_64 = arith.constant 0 : index
    %c0_65 = arith.constant 0 : index
    %154 = vector.load %arg4[%c1_63, %c0_64, %c0_65] : memref<2x128x768xbf16, #tpu.memory_space<vmem>>, vector<1x128x768xbf16>
    %155 = vector.shape_cast %154 : vector<1x128x768xbf16> to vector<128x768xbf16>
    %c1_66 = arith.constant 1 : index
    %c0_67 = arith.constant 0 : index
    %c0_68 = arith.constant 0 : index
    %156 = vector.load %arg5[%c1_66, %c0_67, %c0_68] : memref<2x256x128xbf16, #tpu.memory_space<vmem>>, vector<1x256x128xbf16>
    %157 = vector.shape_cast %156 : vector<1x256x128xbf16> to vector<256x128xbf16>
    %c1_69 = arith.constant 1 : index
    %c0_70 = arith.constant 0 : index
    %c0_71 = arith.constant 0 : index
    %158 = vector.load %arg6[%c1_69, %c0_70, %c0_71] : memref<2x8x384xf32, #tpu.memory_space<vmem>>, vector<1x1x384xf32>
    %159 = vector.shape_cast %158 : vector<1x1x384xf32> to vector<1x384xf32>
    %160 = vector.extract_strided_slice %159 {offsets = [0, 0], sizes = [1, 128], strides = [1, 1]} : vector<1x384xf32> to vector<1x128xf32>
    %c1_72 = arith.constant 1 : index
    %c1_73 = arith.constant 1 : index
    %c0_74 = arith.constant 0 : index
    %161 = vector.load %arg6[%c1_72, %c1_73, %c0_74] : memref<2x8x384xf32, #tpu.memory_space<vmem>>, vector<1x1x384xf32>
    %162 = vector.shape_cast %161 : vector<1x1x384xf32> to vector<1x384xf32>
    %163 = vector.extract_strided_slice %162 {offsets = [0, 0], sizes = [1, 128], strides = [1, 1]} : vector<1x384xf32> to vector<1x128xf32>
    %c1_75 = arith.constant 1 : index
    %c2_76 = arith.constant 2 : index
    %c0_77 = arith.constant 0 : index
    %164 = vector.load %arg6[%c1_75, %c2_76, %c0_77] : memref<2x8x384xf32, #tpu.memory_space<vmem>>, vector<1x1x384xf32>
    %165 = vector.shape_cast %164 : vector<1x1x384xf32> to vector<1x384xf32>
    %166 = vector.extract_strided_slice %165 {offsets = [0, 0], sizes = [1, 128], strides = [1, 1]} : vector<1x384xf32> to vector<1x128xf32>
    %c1_78 = arith.constant 1 : index
    %c3_79 = arith.constant 3 : index
    %c0_80 = arith.constant 0 : index
    %167 = vector.load %arg6[%c1_78, %c3_79, %c0_80] : memref<2x8x384xf32, #tpu.memory_space<vmem>>, vector<1x1x384xf32>
    %168 = vector.shape_cast %167 : vector<1x1x384xf32> to vector<1x384xf32>
    %169 = vector.extract_strided_slice %168 {offsets = [0, 0], sizes = [1, 128], strides = [1, 1]} : vector<1x384xf32> to vector<1x128xf32>
    %c1_81 = arith.constant 1 : index
    %c4_82 = arith.constant 4 : index
    %c0_83 = arith.constant 0 : index
    %170 = vector.load %arg6[%c1_81, %c4_82, %c0_83] : memref<2x8x384xf32, #tpu.memory_space<vmem>>, vector<1x1x384xf32>
    %171 = vector.shape_cast %170 : vector<1x1x384xf32> to vector<1x384xf32>
    %172 = vector.extract_strided_slice %171 {offsets = [0, 0], sizes = [1, 128], strides = [1, 1]} : vector<1x384xf32> to vector<1x128xf32>
    %c1_84 = arith.constant 1 : index
    %c5_85 = arith.constant 5 : index
    %c0_86 = arith.constant 0 : index
    %173 = vector.load %arg6[%c1_84, %c5_85, %c0_86] : memref<2x8x384xf32, #tpu.memory_space<vmem>>, vector<1x1x384xf32>
    %174 = vector.shape_cast %173 : vector<1x1x384xf32> to vector<1x384xf32>
    %175 = vector.extract_strided_slice %174 {offsets = [0, 0], sizes = [1, 128], strides = [1, 1]} : vector<1x384xf32> to vector<1x128xf32>
    %c1_87 = arith.constant 1 : index
    %c6_88 = arith.constant 6 : index
    %c0_89 = arith.constant 0 : index
    %176 = vector.load %arg6[%c1_87, %c6_88, %c0_89] : memref<2x8x384xf32, #tpu.memory_space<vmem>>, vector<1x1x384xf32>
    %177 = vector.shape_cast %176 : vector<1x1x384xf32> to vector<1x384xf32>
    %c1_90 = arith.constant 1 : index
    %c7_91 = arith.constant 7 : index
    %c0_92 = arith.constant 0 : index
    %178 = vector.load %arg6[%c1_90, %c7_91, %c0_92] : memref<2x8x384xf32, #tpu.memory_space<vmem>>, vector<1x1x384xf32>
    %179 = vector.shape_cast %178 : vector<1x1x384xf32> to vector<1x384xf32>
    %180 = vector.extract_strided_slice %179 {offsets = [0, 0], sizes = [1, 256], strides = [1, 1]} : vector<1x384xf32> to vector<1x256xf32>
    %cst_93 = arith.constant dense<0.000000e+00> : vector<17xf32>
    %181 = vector.multi_reduction <add>, %153, %cst_93 [1] : vector<17x128xf32> to vector<17xf32>
    %182 = vector.shape_cast %181 : vector<17xf32> to vector<17x1xf32>
    %cst_94 = arith.constant 1.280000e+02 : f32
    %183 = vector.broadcast %cst_94 : f32 to vector<17x1xf32>
    %184 = arith.divf %182, %183 : vector<17x1xf32>
    %185 = vector.broadcast %184 : vector<17x1xf32> to vector<17x128xf32>
    %186 = arith.subf %153, %185 : vector<17x128xf32>
    %187 = arith.mulf %186, %186 : vector<17x128xf32>
    %cst_95 = arith.constant dense<0.000000e+00> : vector<17xf32>
    %188 = vector.multi_reduction <add>, %187, %cst_95 [1] : vector<17x128xf32> to vector<17xf32>
    %189 = vector.shape_cast %188 : vector<17xf32> to vector<17x1xf32>
    %cst_96 = arith.constant 1.280000e+02 : f32
    %190 = vector.broadcast %cst_96 : f32 to vector<17x1xf32>
    %191 = arith.divf %189, %190 : vector<17x1xf32>
    %cst_97 = arith.constant 9.99999974E-6 : f32
    %192 = vector.broadcast %cst_97 : f32 to vector<17x1xf32>
    %193 = arith.addf %191, %192 : vector<17x1xf32>
    %194 = math.rsqrt %193 : vector<17x1xf32>
    %195 = vector.broadcast %194 : vector<17x1xf32> to vector<17x128xf32>
    %196 = arith.mulf %186, %195 : vector<17x128xf32>
    %197 = vector.broadcast %160 : vector<1x128xf32> to vector<17x128xf32>
    %198 = arith.mulf %196, %197 : vector<17x128xf32>
    %199 = vector.broadcast %163 : vector<1x128xf32> to vector<17x128xf32>
    %200 = arith.addf %198, %199 : vector<17x128xf32>
    %201 = arith.truncf %200 : vector<17x128xf32> to vector<17x128xbf16>
    %202 = vector.extract_strided_slice %155 {offsets = [0, 0], sizes = [128, 384], strides = [1, 1]} : vector<128x768xbf16> to vector<128x384xbf16>
    %cst_98 = arith.constant dense<0.000000e+00> : vector<17x384xf32>
    %203 = tpu.matmul %201, %202, %cst_98 {dimension_numbers = #tpu.dot_dimension_numbers<[1], [0], [0], [1], [0, 0, 1, 1], [], []>} : vector<17x128xbf16>, vector<128x384xbf16>, vector<17x384xf32> -> vector<17x384xf32>
    %204 = vector.broadcast %177 : vector<1x384xf32> to vector<17x384xf32>
    %205 = arith.addf %203, %204 : vector<17x384xf32>
    %206 = vector.extract_strided_slice %205 {offsets = [0, 0], sizes = [17, 64], strides = [1, 1]} : vector<17x384xf32> to vector<17x64xf32>
    %207 = arith.truncf %206 : vector<17x64xf32> to vector<17x64xbf16>
    %208 = vector.extract_strided_slice %205 {offsets = [0, 128], sizes = [17, 64], strides = [1, 1]} : vector<17x384xf32> to vector<17x64xf32>
    %209 = arith.truncf %208 : vector<17x64xf32> to vector<17x64xbf16>
    %210 = vector.extract_strided_slice %205 {offsets = [0, 256], sizes = [17, 64], strides = [1, 1]} : vector<17x384xf32> to vector<17x64xf32>
    %211 = arith.truncf %210 : vector<17x64xf32> to vector<17x64xbf16>
    %cst_99 = arith.constant dense<0.000000e+00> : vector<17x17xf32>
    %212 = tpu.matmul %207, %209, %cst_99 {dimension_numbers = #tpu.dot_dimension_numbers<[1], [1], [0], [0], [0, 0, 1, 0], [], []>} : vector<17x64xbf16>, vector<17x64xbf16>, vector<17x17xf32> -> vector<17x17xf32>
    %cst_100 = arith.constant 1.250000e-01 : f32
    %213 = vector.broadcast %cst_100 : f32 to vector<17x17xf32>
    %214 = arith.mulf %212, %213 : vector<17x17xf32>
    %cst_101 = arith.constant dense<0xFF800000> : vector<17xf32>
    %215 = vector.multi_reduction <maximumf>, %214, %cst_101 [1] : vector<17x17xf32> to vector<17xf32>
    %216 = vector.shape_cast %215 : vector<17xf32> to vector<17x1xf32>
    %217 = vector.broadcast %216 : vector<17x1xf32> to vector<17x17xf32>
    %218 = arith.subf %214, %217 : vector<17x17xf32>
    %219 = math.exp %218 : vector<17x17xf32>
    %cst_102 = arith.constant dense<0.000000e+00> : vector<17xf32>
    %220 = vector.multi_reduction <add>, %219, %cst_102 [1] : vector<17x17xf32> to vector<17xf32>
    %221 = vector.shape_cast %220 : vector<17xf32> to vector<17x1xf32>
    %222 = tpu.reciprocal %221 {approx = true} : vector<17x1xf32> -> vector<17x1xf32>
    %223 = vector.broadcast %222 : vector<17x1xf32> to vector<17x17xf32>
    %224 = arith.mulf %219, %223 : vector<17x17xf32>
    %225 = arith.truncf %224 : vector<17x17xf32> to vector<17x17xbf16>
    %cst_103 = arith.constant dense<0.000000e+00> : vector<17x64xf32>
    %226 = tpu.matmul %225, %211, %cst_103 {dimension_numbers = #tpu.dot_dimension_numbers<[1], [0], [0], [1], [0, 0, 1, 1], [], []>} : vector<17x17xbf16>, vector<17x64xbf16>, vector<17x64xf32> -> vector<17x64xf32>
    %227 = vector.extract_strided_slice %205 {offsets = [0, 64], sizes = [17, 64], strides = [1, 1]} : vector<17x384xf32> to vector<17x64xf32>
    %228 = arith.truncf %227 : vector<17x64xf32> to vector<17x64xbf16>
    %229 = vector.extract_strided_slice %205 {offsets = [0, 192], sizes = [17, 64], strides = [1, 1]} : vector<17x384xf32> to vector<17x64xf32>
    %230 = arith.truncf %229 : vector<17x64xf32> to vector<17x64xbf16>
    %231 = vector.extract_strided_slice %205 {offsets = [0, 320], sizes = [17, 64], strides = [1, 1]} : vector<17x384xf32> to vector<17x64xf32>
    %232 = arith.truncf %231 : vector<17x64xf32> to vector<17x64xbf16>
    %cst_104 = arith.constant dense<0.000000e+00> : vector<17x17xf32>
    %233 = tpu.matmul %228, %230, %cst_104 {dimension_numbers = #tpu.dot_dimension_numbers<[1], [1], [0], [0], [0, 0, 1, 0], [], []>} : vector<17x64xbf16>, vector<17x64xbf16>, vector<17x17xf32> -> vector<17x17xf32>
    %cst_105 = arith.constant 1.250000e-01 : f32
    %234 = vector.broadcast %cst_105 : f32 to vector<17x17xf32>
    %235 = arith.mulf %233, %234 : vector<17x17xf32>
    %cst_106 = arith.constant dense<0xFF800000> : vector<17xf32>
    %236 = vector.multi_reduction <maximumf>, %235, %cst_106 [1] : vector<17x17xf32> to vector<17xf32>
    %237 = vector.shape_cast %236 : vector<17xf32> to vector<17x1xf32>
    %238 = vector.broadcast %237 : vector<17x1xf32> to vector<17x17xf32>
    %239 = arith.subf %235, %238 : vector<17x17xf32>
    %240 = math.exp %239 : vector<17x17xf32>
    %cst_107 = arith.constant dense<0.000000e+00> : vector<17xf32>
    %241 = vector.multi_reduction <add>, %240, %cst_107 [1] : vector<17x17xf32> to vector<17xf32>
    %242 = vector.shape_cast %241 : vector<17xf32> to vector<17x1xf32>
    %243 = tpu.reciprocal %242 {approx = true} : vector<17x1xf32> -> vector<17x1xf32>
    %244 = vector.broadcast %243 : vector<17x1xf32> to vector<17x17xf32>
    %245 = arith.mulf %240, %244 : vector<17x17xf32>
    %246 = arith.truncf %245 : vector<17x17xf32> to vector<17x17xbf16>
    %cst_108 = arith.constant dense<0.000000e+00> : vector<17x64xf32>
    %247 = tpu.matmul %246, %232, %cst_108 {dimension_numbers = #tpu.dot_dimension_numbers<[1], [0], [0], [1], [0, 0, 1, 1], [], []>} : vector<17x17xbf16>, vector<17x64xbf16>, vector<17x64xf32> -> vector<17x64xf32>
    %248 = tpu.concatenate %226, %247 in 1 : vector<17x64xf32>, vector<17x64xf32> -> vector<17x128xf32>
    %249 = arith.truncf %248 : vector<17x128xf32> to vector<17x128xbf16>
    %250 = vector.extract_strided_slice %155 {offsets = [0, 384], sizes = [128, 128], strides = [1, 1]} : vector<128x768xbf16> to vector<128x128xbf16>
    %cst_109 = arith.constant dense<0.000000e+00> : vector<17x128xf32>
    %251 = tpu.matmul %249, %250, %cst_109 {dimension_numbers = #tpu.dot_dimension_numbers<[1], [0], [0], [1], [0, 0, 1, 1], [], []>} : vector<17x128xbf16>, vector<128x128xbf16>, vector<17x128xf32> -> vector<17x128xf32>
    %252 = arith.addf %153, %251 : vector<17x128xf32>
    %253 = vector.broadcast %172 : vector<1x128xf32> to vector<17x128xf32>
    %254 = arith.addf %252, %253 : vector<17x128xf32>
    %cst_110 = arith.constant dense<0.000000e+00> : vector<17xf32>
    %255 = vector.multi_reduction <add>, %254, %cst_110 [1] : vector<17x128xf32> to vector<17xf32>
    %256 = vector.shape_cast %255 : vector<17xf32> to vector<17x1xf32>
    %cst_111 = arith.constant 1.280000e+02 : f32
    %257 = vector.broadcast %cst_111 : f32 to vector<17x1xf32>
    %258 = arith.divf %256, %257 : vector<17x1xf32>
    %259 = vector.broadcast %258 : vector<17x1xf32> to vector<17x128xf32>
    %260 = arith.subf %254, %259 : vector<17x128xf32>
    %261 = arith.mulf %260, %260 : vector<17x128xf32>
    %cst_112 = arith.constant dense<0.000000e+00> : vector<17xf32>
    %262 = vector.multi_reduction <add>, %261, %cst_112 [1] : vector<17x128xf32> to vector<17xf32>
    %263 = vector.shape_cast %262 : vector<17xf32> to vector<17x1xf32>
    %cst_113 = arith.constant 1.280000e+02 : f32
    %264 = vector.broadcast %cst_113 : f32 to vector<17x1xf32>
    %265 = arith.divf %263, %264 : vector<17x1xf32>
    %cst_114 = arith.constant 9.99999974E-6 : f32
    %266 = vector.broadcast %cst_114 : f32 to vector<17x1xf32>
    %267 = arith.addf %265, %266 : vector<17x1xf32>
    %268 = math.rsqrt %267 : vector<17x1xf32>
    %269 = vector.broadcast %268 : vector<17x1xf32> to vector<17x128xf32>
    %270 = arith.mulf %260, %269 : vector<17x128xf32>
    %271 = vector.broadcast %166 : vector<1x128xf32> to vector<17x128xf32>
    %272 = arith.mulf %270, %271 : vector<17x128xf32>
    %273 = vector.broadcast %169 : vector<1x128xf32> to vector<17x128xf32>
    %274 = arith.addf %272, %273 : vector<17x128xf32>
    %275 = arith.truncf %274 : vector<17x128xf32> to vector<17x128xbf16>
    %276 = vector.extract_strided_slice %155 {offsets = [0, 512], sizes = [128, 256], strides = [1, 1]} : vector<128x768xbf16> to vector<128x256xbf16>
    %cst_115 = arith.constant dense<0.000000e+00> : vector<17x256xf32>
    %277 = tpu.matmul %275, %276, %cst_115 {dimension_numbers = #tpu.dot_dimension_numbers<[1], [0], [0], [1], [0, 0, 1, 1], [], []>} : vector<17x128xbf16>, vector<128x256xbf16>, vector<17x256xf32> -> vector<17x256xf32>
    %278 = vector.broadcast %180 : vector<1x256xf32> to vector<17x256xf32>
    %279 = arith.addf %277, %278 : vector<17x256xf32>
    %cst_116 = arith.constant 5.000000e-01 : f32
    %280 = vector.broadcast %cst_116 : f32 to vector<17x256xf32>
    %281 = arith.mulf %280, %279 : vector<17x256xf32>
    %cst_117 = arith.constant 4.471500e-02 : f32
    %282 = vector.broadcast %cst_117 : f32 to vector<17x256xf32>
    %283 = arith.mulf %282, %279 : vector<17x256xf32>
    %284 = arith.mulf %283, %279 : vector<17x256xf32>
    %285 = arith.mulf %284, %279 : vector<17x256xf32>
    %286 = arith.addf %279, %285 : vector<17x256xf32>
    %cst_118 = arith.constant 0.797884583 : f32
    %287 = vector.broadcast %cst_118 : f32 to vector<17x256xf32>
    %288 = arith.mulf %287, %286 : vector<17x256xf32>
    %289 = math.tanh %288 : vector<17x256xf32>
    %cst_119 = arith.constant 1.000000e+00 : f32
    %290 = vector.broadcast %cst_119 : f32 to vector<17x256xf32>
    %291 = arith.addf %290, %289 : vector<17x256xf32>
    %292 = arith.mulf %281, %291 : vector<17x256xf32>
    %293 = arith.truncf %292 : vector<17x256xf32> to vector<17x256xbf16>
    %cst_120 = arith.constant dense<0.000000e+00> : vector<17x128xf32>
    %294 = tpu.matmul %293, %157, %cst_120 {dimension_numbers = #tpu.dot_dimension_numbers<[1], [0], [0], [1], [0, 0, 1, 1], [], []>} : vector<17x256xbf16>, vector<256x128xbf16>, vector<17x128xf32> -> vector<17x128xf32>
    %295 = arith.addf %254, %294 : vector<17x128xf32>
    %296 = vector.broadcast %175 : vector<1x128xf32> to vector<17x128xf32>
    %297 = arith.addf %295, %296 : vector<17x128xf32>
    %c0_121 = arith.constant 0 : index
    %c0_122 = arith.constant 0 : index
    %298 = vector.load %arg8[%c0_121, %c0_122] : memref<12x128xf32, #tpu.memory_space<vmem>>, vector<1x128xf32>
    %c1_123 = arith.constant 1 : index
    %c0_124 = arith.constant 0 : index
    %299 = vector.load %arg8[%c1_123, %c0_124] : memref<12x128xf32, #tpu.memory_space<vmem>>, vector<1x128xf32>
    %c2_125 = arith.constant 2 : index
    %c0_126 = arith.constant 0 : index
    %300 = vector.load %arg8[%c2_125, %c0_126] : memref<12x128xf32, #tpu.memory_space<vmem>>, vector<1x128xf32>
    %cst_127 = arith.constant dense<0.000000e+00> : vector<17xf32>
    %301 = vector.multi_reduction <add>, %297, %cst_127 [1] : vector<17x128xf32> to vector<17xf32>
    %302 = vector.shape_cast %301 : vector<17xf32> to vector<17x1xf32>
    %cst_128 = arith.constant 1.280000e+02 : f32
    %303 = vector.broadcast %cst_128 : f32 to vector<17x1xf32>
    %304 = arith.divf %302, %303 : vector<17x1xf32>
    %305 = vector.broadcast %304 : vector<17x1xf32> to vector<17x128xf32>
    %306 = arith.subf %297, %305 : vector<17x128xf32>
    %307 = arith.mulf %306, %306 : vector<17x128xf32>
    %cst_129 = arith.constant dense<0.000000e+00> : vector<17xf32>
    %308 = vector.multi_reduction <add>, %307, %cst_129 [1] : vector<17x128xf32> to vector<17xf32>
    %309 = vector.shape_cast %308 : vector<17xf32> to vector<17x1xf32>
    %cst_130 = arith.constant 1.280000e+02 : f32
    %310 = vector.broadcast %cst_130 : f32 to vector<17x1xf32>
    %311 = arith.divf %309, %310 : vector<17x1xf32>
    %cst_131 = arith.constant 9.99999974E-6 : f32
    %312 = vector.broadcast %cst_131 : f32 to vector<17x1xf32>
    %313 = arith.addf %311, %312 : vector<17x1xf32>
    %314 = math.rsqrt %313 : vector<17x1xf32>
    %315 = vector.broadcast %314 : vector<17x1xf32> to vector<17x128xf32>
    %316 = arith.mulf %306, %315 : vector<17x128xf32>
    %317 = vector.broadcast %298 : vector<1x128xf32> to vector<17x128xf32>
    %318 = arith.mulf %316, %317 : vector<17x128xf32>
    %319 = vector.broadcast %299 : vector<1x128xf32> to vector<17x128xf32>
    %320 = arith.addf %318, %319 : vector<17x128xf32>
    %c0_132 = arith.constant 0 : index
    %c0_133 = arith.constant 0 : index
    %321 = vector.load %arg18[%c0_132, %c0_133] : memref<17x128xf32, #tpu.memory_space<vmem>>, vector<17x128xf32>
    tpu.vector_store %arg18[%c0_132, %c0_133], %320 {strides = array<i32>} : memref<17x128xf32, #tpu.memory_space<vmem>>, vector<17x128xf32>,
    %c16_134 = arith.constant 16 : index
    %c0_135 = arith.constant 0 : index
    %322 = vector.load %arg18[%c16_134, %c0_135] : memref<17x128xf32, #tpu.memory_space<vmem>>, vector<1x128xf32>
    %c0_136 = arith.constant 0 : index
    %c0_137 = arith.constant 0 : index
    %c0_138 = arith.constant 0 : index
    %323 = vector.load %arg17[%c0_136, %c0_137, %c0_138] : memref<1x1x128xf32, #tpu.memory_space<vmem>>, vector<1x1x128xf32>
    %324 = vector.shape_cast %323 : vector<1x1x128xf32> to vector<1x128xf32>
    %325 = vector.shape_cast %322 : vector<1x128xf32> to vector<1x1x128xf32>
    tpu.vector_store %arg17[%c0_136, %c0_137, %c0_138], %325 {strides = array<i32>} : memref<1x1x128xf32, #tpu.memory_space<vmem>>, vector<1x1x128xf32>,
    %c0_139 = arith.constant 0 : index
    %c0_140 = arith.constant 0 : index
    %326 = vector.load %arg18[%c0_139, %c0_140] : memref<17x128xf32, #tpu.memory_space<vmem>>, vector<16x128xf32>
    %327 = arith.truncf %326 : vector<16x128xf32> to vector<16x128xbf16>
    %c0_141 = arith.constant 0 : index
    %c0_142 = arith.constant 0 : index
    %328 = vector.load %arg7[%c0_141, %c0_142] : memref<128x384xbf16, #tpu.memory_space<vmem>>, vector<128x384xbf16>
    %329 = vector.extract_strided_slice %328 {offsets = [0, 0], sizes = [128, 128], strides = [1, 1]} : vector<128x384xbf16> to vector<128x128xbf16>
    %cst_143 = arith.constant dense<0.000000e+00> : vector<16x128xf32>
    %330 = tpu.matmul %327, %329, %cst_143 {dimension_numbers = #tpu.dot_dimension_numbers<[1], [0], [0], [1], [0, 0, 1, 1], [], []>} : vector<16x128xbf16>, vector<128x128xbf16>, vector<16x128xf32> -> vector<16x128xf32>
    %331 = vector.broadcast %300 : vector<1x128xf32> to vector<16x128xf32>
    %332 = arith.addf %330, %331 : vector<16x128xf32>
    %c0_144 = arith.constant 0 : index
    %c0_145 = arith.constant 0 : index
    %333 = vector.load %arg19[%c0_144, %c0_145] : memref<20x128xf32, #tpu.memory_space<vmem>>, vector<16x128xf32>
    tpu.vector_store %arg19[%c0_144, %c0_145], %332 {strides = array<i32>} : memref<20x128xf32, #tpu.memory_space<vmem>>, vector<16x128xf32>,
    %c8 = arith.constant 8 : index
    %c0_146 = arith.constant 0 : index
    %334 = vector.load %arg8[%c8, %c0_146] : memref<12x128xf32, #tpu.memory_space<vmem>>, vector<4x128xf32>
    %c16_147 = arith.constant 16 : index
    %c0_148 = arith.constant 0 : index
    %335 = vector.load %arg19[%c16_147, %c0_148] : memref<20x128xf32, #tpu.memory_space<vmem>>, vector<4x128xf32>
    tpu.vector_store %arg19[%c16_147, %c0_148], %334 {strides = array<i32>} : memref<20x128xf32, #tpu.memory_space<vmem>>, vector<4x128xf32>,
    %c0_149 = arith.constant 0 : index
    %c0_150 = arith.constant 0 : index
    %336 = vector.load %arg19[%c0_149, %c0_150] : memref<20x128xf32, #tpu.memory_space<vmem>>, vector<20x128xf32>
    %c0_151 = arith.constant 0 : index
    %c0_152 = arith.constant 0 : index
    %c0_153 = arith.constant 0 : index
    %337 = vector.load %arg9[%c0_151, %c0_152, %c0_153] : memref<2x128x768xbf16, #tpu.memory_space<vmem>>, vector<1x128x768xbf16>
    %338 = vector.shape_cast %337 : vector<1x128x768xbf16> to vector<128x768xbf16>
    %c0_154 = arith.constant 0 : index
    %c0_155 = arith.constant 0 : index
    %c0_156 = arith.constant 0 : index
    %339 = vector.load %arg10[%c0_154, %c0_155, %c0_156] : memref<2x256x128xbf16, #tpu.memory_space<vmem>>, vector<1x256x128xbf16>
    %340 = vector.shape_cast %339 : vector<1x256x128xbf16> to vector<256x128xbf16>
    %c0_157 = arith.constant 0 : index
    %c0_158 = arith.constant 0 : index
    %c0_159 = arith.constant 0 : index
    %341 = vector.load %arg11[%c0_157, %c0_158, %c0_159] : memref<2x8x384xf32, #tpu.memory_space<vmem>>, vector<1x1x384xf32>
    %342 = vector.shape_cast %341 : vector<1x1x384xf32> to vector<1x384xf32>
    %343 = vector.extract_strided_slice %342 {offsets = [0, 0], sizes = [1, 128], strides = [1, 1]} : vector<1x384xf32> to vector<1x128xf32>
    %c0_160 = arith.constant 0 : index
    %c1_161 = arith.constant 1 : index
    %c0_162 = arith.constant 0 : index
    %344 = vector.load %arg11[%c0_160, %c1_161, %c0_162] : memref<2x8x384xf32, #tpu.memory_space<vmem>>, vector<1x1x384xf32>
    %345 = vector.shape_cast %344 : vector<1x1x384xf32> to vector<1x384xf32>
    %346 = vector.extract_strided_slice %345 {offsets = [0, 0], sizes = [1, 128], strides = [1, 1]} : vector<1x384xf32> to vector<1x128xf32>
    %c0_163 = arith.constant 0 : index
    %c2_164 = arith.constant 2 : index
    %c0_165 = arith.constant 0 : index
    %347 = vector.load %arg11[%c0_163, %c2_164, %c0_165] : memref<2x8x384xf32, #tpu.memory_space<vmem>>, vector<1x1x384xf32>
    %348 = vector.shape_cast %347 : vector<1x1x384xf32> to vector<1x384xf32>
    %349 = vector.extract_strided_slice %348 {offsets = [0, 0], sizes = [1, 128], strides = [1, 1]} : vector<1x384xf32> to vector<1x128xf32>
    %c0_166 = arith.constant 0 : index
    %c3_167 = arith.constant 3 : index
    %c0_168 = arith.constant 0 : index
    %350 = vector.load %arg11[%c0_166, %c3_167, %c0_168] : memref<2x8x384xf32, #tpu.memory_space<vmem>>, vector<1x1x384xf32>
    %351 = vector.shape_cast %350 : vector<1x1x384xf32> to vector<1x384xf32>
    %352 = vector.extract_strided_slice %351 {offsets = [0, 0], sizes = [1, 128], strides = [1, 1]} : vector<1x384xf32> to vector<1x128xf32>
    %c0_169 = arith.constant 0 : index
    %c4_170 = arith.constant 4 : index
    %c0_171 = arith.constant 0 : index
    %353 = vector.load %arg11[%c0_169, %c4_170, %c0_171] : memref<2x8x384xf32, #tpu.memory_space<vmem>>, vector<1x1x384xf32>
    %354 = vector.shape_cast %353 : vector<1x1x384xf32> to vector<1x384xf32>
    %355 = vector.extract_strided_slice %354 {offsets = [0, 0], sizes = [1, 128], strides = [1, 1]} : vector<1x384xf32> to vector<1x128xf32>
    %c0_172 = arith.constant 0 : index
    %c5_173 = arith.constant 5 : index
    %c0_174 = arith.constant 0 : index
    %356 = vector.load %arg11[%c0_172, %c5_173, %c0_174] : memref<2x8x384xf32, #tpu.memory_space<vmem>>, vector<1x1x384xf32>
    %357 = vector.shape_cast %356 : vector<1x1x384xf32> to vector<1x384xf32>
    %358 = vector.extract_strided_slice %357 {offsets = [0, 0], sizes = [1, 128], strides = [1, 1]} : vector<1x384xf32> to vector<1x128xf32>
    %c0_175 = arith.constant 0 : index
    %c6_176 = arith.constant 6 : index
    %c0_177 = arith.constant 0 : index
    %359 = vector.load %arg11[%c0_175, %c6_176, %c0_177] : memref<2x8x384xf32, #tpu.memory_space<vmem>>, vector<1x1x384xf32>
    %360 = vector.shape_cast %359 : vector<1x1x384xf32> to vector<1x384xf32>
    %c0_178 = arith.constant 0 : index
    %c7_179 = arith.constant 7 : index
    %c0_180 = arith.constant 0 : index
    %361 = vector.load %arg11[%c0_178, %c7_179, %c0_180] : memref<2x8x384xf32, #tpu.memory_space<vmem>>, vector<1x1x384xf32>
    %362 = vector.shape_cast %361 : vector<1x1x384xf32> to vector<1x384xf32>
    %363 = vector.extract_strided_slice %362 {offsets = [0, 0], sizes = [1, 256], strides = [1, 1]} : vector<1x384xf32> to vector<1x256xf32>
    %cst_181 = arith.constant dense<0.000000e+00> : vector<20xf32>
    %364 = vector.multi_reduction <add>, %336, %cst_181 [1] : vector<20x128xf32> to vector<20xf32>
    %365 = vector.shape_cast %364 : vector<20xf32> to vector<20x1xf32>
    %cst_182 = arith.constant 1.280000e+02 : f32
    %366 = vector.broadcast %cst_182 : f32 to vector<20x1xf32>
    %367 = arith.divf %365, %366 : vector<20x1xf32>
    %368 = vector.broadcast %367 : vector<20x1xf32> to vector<20x128xf32>
    %369 = arith.subf %336, %368 : vector<20x128xf32>
    %370 = arith.mulf %369, %369 : vector<20x128xf32>
    %cst_183 = arith.constant dense<0.000000e+00> : vector<20xf32>
    %371 = vector.multi_reduction <add>, %370, %cst_183 [1] : vector<20x128xf32> to vector<20xf32>
    %372 = vector.shape_cast %371 : vector<20xf32> to vector<20x1xf32>
    %cst_184 = arith.constant 1.280000e+02 : f32
    %373 = vector.broadcast %cst_184 : f32 to vector<20x1xf32>
    %374 = arith.divf %372, %373 : vector<20x1xf32>
    %cst_185 = arith.constant 9.99999974E-6 : f32
    %375 = vector.broadcast %cst_185 : f32 to vector<20x1xf32>
    %376 = arith.addf %374, %375 : vector<20x1xf32>
    %377 = math.rsqrt %376 : vector<20x1xf32>
    %378 = vector.broadcast %377 : vector<20x1xf32> to vector<20x128xf32>
    %379 = arith.mulf %369, %378 : vector<20x128xf32>
    %380 = vector.broadcast %343 : vector<1x128xf32> to vector<20x128xf32>
    %381 = arith.mulf %379, %380 : vector<20x128xf32>
    %382 = vector.broadcast %346 : vector<1x128xf32> to vector<20x128xf32>
    %383 = arith.addf %381, %382 : vector<20x128xf32>
    %384 = arith.truncf %383 : vector<20x128xf32> to vector<20x128xbf16>
    %385 = vector.extract_strided_slice %338 {offsets = [0, 0], sizes = [128, 384], strides = [1, 1]} : vector<128x768xbf16> to vector<128x384xbf16>
    %cst_186 = arith.constant dense<0.000000e+00> : vector<20x384xf32>
    %386 = tpu.matmul %384, %385, %cst_186 {dimension_numbers = #tpu.dot_dimension_numbers<[1], [0], [0], [1], [0, 0, 1, 1], [], []>} : vector<20x128xbf16>, vector<128x384xbf16>, vector<20x384xf32> -> vector<20x384xf32>
    %387 = vector.broadcast %360 : vector<1x384xf32> to vector<20x384xf32>
    %388 = arith.addf %386, %387 : vector<20x384xf32>
    %389 = vector.extract_strided_slice %388 {offsets = [0, 0], sizes = [20, 64], strides = [1, 1]} : vector<20x384xf32> to vector<20x64xf32>
    %390 = arith.truncf %389 : vector<20x64xf32> to vector<20x64xbf16>
    %391 = vector.extract_strided_slice %388 {offsets = [0, 128], sizes = [20, 64], strides = [1, 1]} : vector<20x384xf32> to vector<20x64xf32>
    %392 = arith.truncf %391 : vector<20x64xf32> to vector<20x64xbf16>
    %393 = vector.extract_strided_slice %388 {offsets = [0, 256], sizes = [20, 64], strides = [1, 1]} : vector<20x384xf32> to vector<20x64xf32>
    %394 = arith.truncf %393 : vector<20x64xf32> to vector<20x64xbf16>
    %cst_187 = arith.constant dense<0.000000e+00> : vector<20x20xf32>
    %395 = tpu.matmul %390, %392, %cst_187 {dimension_numbers = #tpu.dot_dimension_numbers<[1], [1], [0], [0], [0, 0, 1, 0], [], []>} : vector<20x64xbf16>, vector<20x64xbf16>, vector<20x20xf32> -> vector<20x20xf32>
    %cst_188 = arith.constant 1.250000e-01 : f32
    %396 = vector.broadcast %cst_188 : f32 to vector<20x20xf32>
    %397 = arith.mulf %395, %396 : vector<20x20xf32>
    %cst_189 = arith.constant dense<0xFF800000> : vector<20xf32>
    %398 = vector.multi_reduction <maximumf>, %397, %cst_189 [1] : vector<20x20xf32> to vector<20xf32>
    %399 = vector.shape_cast %398 : vector<20xf32> to vector<20x1xf32>
    %400 = vector.broadcast %399 : vector<20x1xf32> to vector<20x20xf32>
    %401 = arith.subf %397, %400 : vector<20x20xf32>
    %402 = math.exp %401 : vector<20x20xf32>
    %cst_190 = arith.constant dense<0.000000e+00> : vector<20xf32>
    %403 = vector.multi_reduction <add>, %402, %cst_190 [1] : vector<20x20xf32> to vector<20xf32>
    %404 = vector.shape_cast %403 : vector<20xf32> to vector<20x1xf32>
    %405 = tpu.reciprocal %404 {approx = true} : vector<20x1xf32> -> vector<20x1xf32>
    %406 = vector.broadcast %405 : vector<20x1xf32> to vector<20x20xf32>
    %407 = arith.mulf %402, %406 : vector<20x20xf32>
    %408 = arith.truncf %407 : vector<20x20xf32> to vector<20x20xbf16>
    %cst_191 = arith.constant dense<0.000000e+00> : vector<20x64xf32>
    %409 = tpu.matmul %408, %394, %cst_191 {dimension_numbers = #tpu.dot_dimension_numbers<[1], [0], [0], [1], [0, 0, 1, 1], [], []>} : vector<20x20xbf16>, vector<20x64xbf16>, vector<20x64xf32> -> vector<20x64xf32>
    %410 = vector.extract_strided_slice %388 {offsets = [0, 64], sizes = [20, 64], strides = [1, 1]} : vector<20x384xf32> to vector<20x64xf32>
    %411 = arith.truncf %410 : vector<20x64xf32> to vector<20x64xbf16>
    %412 = vector.extract_strided_slice %388 {offsets = [0, 192], sizes = [20, 64], strides = [1, 1]} : vector<20x384xf32> to vector<20x64xf32>
    %413 = arith.truncf %412 : vector<20x64xf32> to vector<20x64xbf16>
    %414 = vector.extract_strided_slice %388 {offsets = [0, 320], sizes = [20, 64], strides = [1, 1]} : vector<20x384xf32> to vector<20x64xf32>
    %415 = arith.truncf %414 : vector<20x64xf32> to vector<20x64xbf16>
    %cst_192 = arith.constant dense<0.000000e+00> : vector<20x20xf32>
    %416 = tpu.matmul %411, %413, %cst_192 {dimension_numbers = #tpu.dot_dimension_numbers<[1], [1], [0], [0], [0, 0, 1, 0], [], []>} : vector<20x64xbf16>, vector<20x64xbf16>, vector<20x20xf32> -> vector<20x20xf32>
    %cst_193 = arith.constant 1.250000e-01 : f32
    %417 = vector.broadcast %cst_193 : f32 to vector<20x20xf32>
    %418 = arith.mulf %416, %417 : vector<20x20xf32>
    %cst_194 = arith.constant dense<0xFF800000> : vector<20xf32>
    %419 = vector.multi_reduction <maximumf>, %418, %cst_194 [1] : vector<20x20xf32> to vector<20xf32>
    %420 = vector.shape_cast %419 : vector<20xf32> to vector<20x1xf32>
    %421 = vector.broadcast %420 : vector<20x1xf32> to vector<20x20xf32>
    %422 = arith.subf %418, %421 : vector<20x20xf32>
    %423 = math.exp %422 : vector<20x20xf32>
    %cst_195 = arith.constant dense<0.000000e+00> : vector<20xf32>
    %424 = vector.multi_reduction <add>, %423, %cst_195 [1] : vector<20x20xf32> to vector<20xf32>
    %425 = vector.shape_cast %424 : vector<20xf32> to vector<20x1xf32>
    %426 = tpu.reciprocal %425 {approx = true} : vector<20x1xf32> -> vector<20x1xf32>
    %427 = vector.broadcast %426 : vector<20x1xf32> to vector<20x20xf32>
    %428 = arith.mulf %423, %427 : vector<20x20xf32>
    %429 = arith.truncf %428 : vector<20x20xf32> to vector<20x20xbf16>
    %cst_196 = arith.constant dense<0.000000e+00> : vector<20x64xf32>
    %430 = tpu.matmul %429, %415, %cst_196 {dimension_numbers = #tpu.dot_dimension_numbers<[1], [0], [0], [1], [0, 0, 1, 1], [], []>} : vector<20x20xbf16>, vector<20x64xbf16>, vector<20x64xf32> -> vector<20x64xf32>
    %431 = tpu.concatenate %409, %430 in 1 : vector<20x64xf32>, vector<20x64xf32> -> vector<20x128xf32>
    %432 = arith.truncf %431 : vector<20x128xf32> to vector<20x128xbf16>
    %433 = vector.extract_strided_slice %338 {offsets = [0, 384], sizes = [128, 128], strides = [1, 1]} : vector<128x768xbf16> to vector<128x128xbf16>
    %cst_197 = arith.constant dense<0.000000e+00> : vector<20x128xf32>
    %434 = tpu.matmul %432, %433, %cst_197 {dimension_numbers = #tpu.dot_dimension_numbers<[1], [0], [0], [1], [0, 0, 1, 1], [], []>} : vector<20x128xbf16>, vector<128x128xbf16>, vector<20x128xf32> -> vector<20x128xf32>
    %435 = arith.addf %336, %434 : vector<20x128xf32>
    %436 = vector.broadcast %355 : vector<1x128xf32> to vector<20x128xf32>
    %437 = arith.addf %435, %436 : vector<20x128xf32>
    %cst_198 = arith.constant dense<0.000000e+00> : vector<20xf32>
    %438 = vector.multi_reduction <add>, %437, %cst_198 [1] : vector<20x128xf32> to vector<20xf32>
    %439 = vector.shape_cast %438 : vector<20xf32> to vector<20x1xf32>
    %cst_199 = arith.constant 1.280000e+02 : f32
    %440 = vector.broadcast %cst_199 : f32 to vector<20x1xf32>
    %441 = arith.divf %439, %440 : vector<20x1xf32>
    %442 = vector.broadcast %441 : vector<20x1xf32> to vector<20x128xf32>
    %443 = arith.subf %437, %442 : vector<20x128xf32>
    %444 = arith.mulf %443, %443 : vector<20x128xf32>
    %cst_200 = arith.constant dense<0.000000e+00> : vector<20xf32>
    %445 = vector.multi_reduction <add>, %444, %cst_200 [1] : vector<20x128xf32> to vector<20xf32>
    %446 = vector.shape_cast %445 : vector<20xf32> to vector<20x1xf32>
    %cst_201 = arith.constant 1.280000e+02 : f32
    %447 = vector.broadcast %cst_201 : f32 to vector<20x1xf32>
    %448 = arith.divf %446, %447 : vector<20x1xf32>
    %cst_202 = arith.constant 9.99999974E-6 : f32
    %449 = vector.broadcast %cst_202 : f32 to vector<20x1xf32>
    %450 = arith.addf %448, %449 : vector<20x1xf32>
    %451 = math.rsqrt %450 : vector<20x1xf32>
    %452 = vector.broadcast %451 : vector<20x1xf32> to vector<20x128xf32>
    %453 = arith.mulf %443, %452 : vector<20x128xf32>
    %454 = vector.broadcast %349 : vector<1x128xf32> to vector<20x128xf32>
    %455 = arith.mulf %453, %454 : vector<20x128xf32>
    %456 = vector.broadcast %352 : vector<1x128xf32> to vector<20x128xf32>
    %457 = arith.addf %455, %456 : vector<20x128xf32>
    %458 = arith.truncf %457 : vector<20x128xf32> to vector<20x128xbf16>
    %459 = vector.extract_strided_slice %338 {offsets = [0, 512], sizes = [128, 256], strides = [1, 1]} : vector<128x768xbf16> to vector<128x256xbf16>
    %cst_203 = arith.constant dense<0.000000e+00> : vector<20x256xf32>
    %460 = tpu.matmul %458, %459, %cst_203 {dimension_numbers = #tpu.dot_dimension_numbers<[1], [0], [0], [1], [0, 0, 1, 1], [], []>} : vector<20x128xbf16>, vector<128x256xbf16>, vector<20x256xf32> -> vector<20x256xf32>
    %461 = vector.broadcast %363 : vector<1x256xf32> to vector<20x256xf32>
    %462 = arith.addf %460, %461 : vector<20x256xf32>
    %cst_204 = arith.constant 5.000000e-01 : f32
    %463 = vector.broadcast %cst_204 : f32 to vector<20x256xf32>
    %464 = arith.mulf %463, %462 : vector<20x256xf32>
    %cst_205 = arith.constant 4.471500e-02 : f32
    %465 = vector.broadcast %cst_205 : f32 to vector<20x256xf32>
    %466 = arith.mulf %465, %462 : vector<20x256xf32>
    %467 = arith.mulf %466, %462 : vector<20x256xf32>
    %468 = arith.mulf %467, %462 : vector<20x256xf32>
    %469 = arith.addf %462, %468 : vector<20x256xf32>
    %cst_206 = arith.constant 0.797884583 : f32
    %470 = vector.broadcast %cst_206 : f32 to vector<20x256xf32>
    %471 = arith.mulf %470, %469 : vector<20x256xf32>
    %472 = math.tanh %471 : vector<20x256xf32>
    %cst_207 = arith.constant 1.000000e+00 : f32
    %473 = vector.broadcast %cst_207 : f32 to vector<20x256xf32>
    %474 = arith.addf %473, %472 : vector<20x256xf32>
    %475 = arith.mulf %464, %474 : vector<20x256xf32>
    %476 = arith.truncf %475 : vector<20x256xf32> to vector<20x256xbf16>
    %cst_208 = arith.constant dense<0.000000e+00> : vector<20x128xf32>
    %477 = tpu.matmul %476, %340, %cst_208 {dimension_numbers = #tpu.dot_dimension_numbers<[1], [0], [0], [1], [0, 0, 1, 1], [], []>} : vector<20x256xbf16>, vector<256x128xbf16>, vector<20x128xf32> -> vector<20x128xf32>
    %478 = arith.addf %437, %477 : vector<20x128xf32>
    %479 = vector.broadcast %358 : vector<1x128xf32> to vector<20x128xf32>
    %480 = arith.addf %478, %479 : vector<20x128xf32>
    %c1_209 = arith.constant 1 : index
    %c0_210 = arith.constant 0 : index
    %c0_211 = arith.constant 0 : index
    %481 = vector.load %arg9[%c1_209, %c0_210, %c0_211] : memref<2x128x768xbf16, #tpu.memory_space<vmem>>, vector<1x128x768xbf16>
    %482 = vector.shape_cast %481 : vector<1x128x768xbf16> to vector<128x768xbf16>
    %c1_212 = arith.constant 1 : index
    %c0_213 = arith.constant 0 : index
    %c0_214 = arith.constant 0 : index
    %483 = vector.load %arg10[%c1_212, %c0_213, %c0_214] : memref<2x256x128xbf16, #tpu.memory_space<vmem>>, vector<1x256x128xbf16>
    %484 = vector.shape_cast %483 : vector<1x256x128xbf16> to vector<256x128xbf16>
    %c1_215 = arith.constant 1 : index
    %c0_216 = arith.constant 0 : index
    %c0_217 = arith.constant 0 : index
    %485 = vector.load %arg11[%c1_215, %c0_216, %c0_217] : memref<2x8x384xf32, #tpu.memory_space<vmem>>, vector<1x1x384xf32>
    %486 = vector.shape_cast %485 : vector<1x1x384xf32> to vector<1x384xf32>
    %487 = vector.extract_strided_slice %486 {offsets = [0, 0], sizes = [1, 128], strides = [1, 1]} : vector<1x384xf32> to vector<1x128xf32>
    %c1_218 = arith.constant 1 : index
    %c1_219 = arith.constant 1 : index
    %c0_220 = arith.constant 0 : index
    %488 = vector.load %arg11[%c1_218, %c1_219, %c0_220] : memref<2x8x384xf32, #tpu.memory_space<vmem>>, vector<1x1x384xf32>
    %489 = vector.shape_cast %488 : vector<1x1x384xf32> to vector<1x384xf32>
    %490 = vector.extract_strided_slice %489 {offsets = [0, 0], sizes = [1, 128], strides = [1, 1]} : vector<1x384xf32> to vector<1x128xf32>
    %c1_221 = arith.constant 1 : index
    %c2_222 = arith.constant 2 : index
    %c0_223 = arith.constant 0 : index
    %491 = vector.load %arg11[%c1_221, %c2_222, %c0_223] : memref<2x8x384xf32, #tpu.memory_space<vmem>>, vector<1x1x384xf32>
    %492 = vector.shape_cast %491 : vector<1x1x384xf32> to vector<1x384xf32>
    %493 = vector.extract_strided_slice %492 {offsets = [0, 0], sizes = [1, 128], strides = [1, 1]} : vector<1x384xf32> to vector<1x128xf32>
    %c1_224 = arith.constant 1 : index
    %c3_225 = arith.constant 3 : index
    %c0_226 = arith.constant 0 : index
    %494 = vector.load %arg11[%c1_224, %c3_225, %c0_226] : memref<2x8x384xf32, #tpu.memory_space<vmem>>, vector<1x1x384xf32>
    %495 = vector.shape_cast %494 : vector<1x1x384xf32> to vector<1x384xf32>
    %496 = vector.extract_strided_slice %495 {offsets = [0, 0], sizes = [1, 128], strides = [1, 1]} : vector<1x384xf32> to vector<1x128xf32>
    %c1_227 = arith.constant 1 : index
    %c4_228 = arith.constant 4 : index
    %c0_229 = arith.constant 0 : index
    %497 = vector.load %arg11[%c1_227, %c4_228, %c0_229] : memref<2x8x384xf32, #tpu.memory_space<vmem>>, vector<1x1x384xf32>
    %498 = vector.shape_cast %497 : vector<1x1x384xf32> to vector<1x384xf32>
    %499 = vector.extract_strided_slice %498 {offsets = [0, 0], sizes = [1, 128], strides = [1, 1]} : vector<1x384xf32> to vector<1x128xf32>
    %c1_230 = arith.constant 1 : index
    %c5_231 = arith.constant 5 : index
    %c0_232 = arith.constant 0 : index
    %500 = vector.load %arg11[%c1_230, %c5_231, %c0_232] : memref<2x8x384xf32, #tpu.memory_space<vmem>>, vector<1x1x384xf32>
    %501 = vector.shape_cast %500 : vector<1x1x384xf32> to vector<1x384xf32>
    %502 = vector.extract_strided_slice %501 {offsets = [0, 0], sizes = [1, 128], strides = [1, 1]} : vector<1x384xf32> to vector<1x128xf32>
    %c1_233 = arith.constant 1 : index
    %c6_234 = arith.constant 6 : index
    %c0_235 = arith.constant 0 : index
    %503 = vector.load %arg11[%c1_233, %c6_234, %c0_235] : memref<2x8x384xf32, #tpu.memory_space<vmem>>, vector<1x1x384xf32>
    %504 = vector.shape_cast %503 : vector<1x1x384xf32> to vector<1x384xf32>
    %c1_236 = arith.constant 1 : index
    %c7_237 = arith.constant 7 : index
    %c0_238 = arith.constant 0 : index
    %505 = vector.load %arg11[%c1_236, %c7_237, %c0_238] : memref<2x8x384xf32, #tpu.memory_space<vmem>>, vector<1x1x384xf32>
    %506 = vector.shape_cast %505 : vector<1x1x384xf32> to vector<1x384xf32>
    %507 = vector.extract_strided_slice %506 {offsets = [0, 0], sizes = [1, 256], strides = [1, 1]} : vector<1x384xf32> to vector<1x256xf32>
    %cst_239 = arith.constant dense<0.000000e+00> : vector<20xf32>
    %508 = vector.multi_reduction <add>, %480, %cst_239 [1] : vector<20x128xf32> to vector<20xf32>
    %509 = vector.shape_cast %508 : vector<20xf32> to vector<20x1xf32>
    %cst_240 = arith.constant 1.280000e+02 : f32
    %510 = vector.broadcast %cst_240 : f32 to vector<20x1xf32>
    %511 = arith.divf %509, %510 : vector<20x1xf32>
    %512 = vector.broadcast %511 : vector<20x1xf32> to vector<20x128xf32>
    %513 = arith.subf %480, %512 : vector<20x128xf32>
    %514 = arith.mulf %513, %513 : vector<20x128xf32>
    %cst_241 = arith.constant dense<0.000000e+00> : vector<20xf32>
    %515 = vector.multi_reduction <add>, %514, %cst_241 [1] : vector<20x128xf32> to vector<20xf32>
    %516 = vector.shape_cast %515 : vector<20xf32> to vector<20x1xf32>
    %cst_242 = arith.constant 1.280000e+02 : f32
    %517 = vector.broadcast %cst_242 : f32 to vector<20x1xf32>
    %518 = arith.divf %516, %517 : vector<20x1xf32>
    %cst_243 = arith.constant 9.99999974E-6 : f32
    %519 = vector.broadcast %cst_243 : f32 to vector<20x1xf32>
    %520 = arith.addf %518, %519 : vector<20x1xf32>
    %521 = math.rsqrt %520 : vector<20x1xf32>
    %522 = vector.broadcast %521 : vector<20x1xf32> to vector<20x128xf32>
    %523 = arith.mulf %513, %522 : vector<20x128xf32>
    %524 = vector.broadcast %487 : vector<1x128xf32> to vector<20x128xf32>
    %525 = arith.mulf %523, %524 : vector<20x128xf32>
    %526 = vector.broadcast %490 : vector<1x128xf32> to vector<20x128xf32>
    %527 = arith.addf %525, %526 : vector<20x128xf32>
    %528 = arith.truncf %527 : vector<20x128xf32> to vector<20x128xbf16>
    %529 = vector.extract_strided_slice %482 {offsets = [0, 0], sizes = [128, 384], strides = [1, 1]} : vector<128x768xbf16> to vector<128x384xbf16>
    %cst_244 = arith.constant dense<0.000000e+00> : vector<20x384xf32>
    %530 = tpu.matmul %528, %529, %cst_244 {dimension_numbers = #tpu.dot_dimension_numbers<[1], [0], [0], [1], [0, 0, 1, 1], [], []>} : vector<20x128xbf16>, vector<128x384xbf16>, vector<20x384xf32> -> vector<20x384xf32>
    %531 = vector.broadcast %504 : vector<1x384xf32> to vector<20x384xf32>
    %532 = arith.addf %530, %531 : vector<20x384xf32>
    %533 = vector.extract_strided_slice %532 {offsets = [0, 0], sizes = [20, 64], strides = [1, 1]} : vector<20x384xf32> to vector<20x64xf32>
    %534 = arith.truncf %533 : vector<20x64xf32> to vector<20x64xbf16>
    %535 = vector.extract_strided_slice %532 {offsets = [0, 128], sizes = [20, 64], strides = [1, 1]} : vector<20x384xf32> to vector<20x64xf32>
    %536 = arith.truncf %535 : vector<20x64xf32> to vector<20x64xbf16>
    %537 = vector.extract_strided_slice %532 {offsets = [0, 256], sizes = [20, 64], strides = [1, 1]} : vector<20x384xf32> to vector<20x64xf32>
    %538 = arith.truncf %537 : vector<20x64xf32> to vector<20x64xbf16>
    %cst_245 = arith.constant dense<0.000000e+00> : vector<20x20xf32>
    %539 = tpu.matmul %534, %536, %cst_245 {dimension_numbers = #tpu.dot_dimension_numbers<[1], [1], [0], [0], [0, 0, 1, 0], [], []>} : vector<20x64xbf16>, vector<20x64xbf16>, vector<20x20xf32> -> vector<20x20xf32>
    %cst_246 = arith.constant 1.250000e-01 : f32
    %540 = vector.broadcast %cst_246 : f32 to vector<20x20xf32>
    %541 = arith.mulf %539, %540 : vector<20x20xf32>
    %cst_247 = arith.constant dense<0xFF800000> : vector<20xf32>
    %542 = vector.multi_reduction <maximumf>, %541, %cst_247 [1] : vector<20x20xf32> to vector<20xf32>
    %543 = vector.shape_cast %542 : vector<20xf32> to vector<20x1xf32>
    %544 = vector.broadcast %543 : vector<20x1xf32> to vector<20x20xf32>
    %545 = arith.subf %541, %544 : vector<20x20xf32>
    %546 = math.exp %545 : vector<20x20xf32>
    %cst_248 = arith.constant dense<0.000000e+00> : vector<20xf32>
    %547 = vector.multi_reduction <add>, %546, %cst_248 [1] : vector<20x20xf32> to vector<20xf32>
    %548 = vector.shape_cast %547 : vector<20xf32> to vector<20x1xf32>
    %549 = tpu.reciprocal %548 {approx = true} : vector<20x1xf32> -> vector<20x1xf32>
    %550 = vector.broadcast %549 : vector<20x1xf32> to vector<20x20xf32>
    %551 = arith.mulf %546, %550 : vector<20x20xf32>
    %552 = arith.truncf %551 : vector<20x20xf32> to vector<20x20xbf16>
    %cst_249 = arith.constant dense<0.000000e+00> : vector<20x64xf32>
    %553 = tpu.matmul %552, %538, %cst_249 {dimension_numbers = #tpu.dot_dimension_numbers<[1], [0], [0], [1], [0, 0, 1, 1], [], []>} : vector<20x20xbf16>, vector<20x64xbf16>, vector<20x64xf32> -> vector<20x64xf32>
    %554 = vector.extract_strided_slice %532 {offsets = [0, 64], sizes = [20, 64], strides = [1, 1]} : vector<20x384xf32> to vector<20x64xf32>
    %555 = arith.truncf %554 : vector<20x64xf32> to vector<20x64xbf16>
    %556 = vector.extract_strided_slice %532 {offsets = [0, 192], sizes = [20, 64], strides = [1, 1]} : vector<20x384xf32> to vector<20x64xf32>
    %557 = arith.truncf %556 : vector<20x64xf32> to vector<20x64xbf16>
    %558 = vector.extract_strided_slice %532 {offsets = [0, 320], sizes = [20, 64], strides = [1, 1]} : vector<20x384xf32> to vector<20x64xf32>
    %559 = arith.truncf %558 : vector<20x64xf32> to vector<20x64xbf16>
    %cst_250 = arith.constant dense<0.000000e+00> : vector<20x20xf32>
    %560 = tpu.matmul %555, %557, %cst_250 {dimension_numbers = #tpu.dot_dimension_numbers<[1], [1], [0], [0], [0, 0, 1, 0], [], []>} : vector<20x64xbf16>, vector<20x64xbf16>, vector<20x20xf32> -> vector<20x20xf32>
    %cst_251 = arith.constant 1.250000e-01 : f32
    %561 = vector.broadcast %cst_251 : f32 to vector<20x20xf32>
    %562 = arith.mulf %560, %561 : vector<20x20xf32>
    %cst_252 = arith.constant dense<0xFF800000> : vector<20xf32>
    %563 = vector.multi_reduction <maximumf>, %562, %cst_252 [1] : vector<20x20xf32> to vector<20xf32>
    %564 = vector.shape_cast %563 : vector<20xf32> to vector<20x1xf32>
    %565 = vector.broadcast %564 : vector<20x1xf32> to vector<20x20xf32>
    %566 = arith.subf %562, %565 : vector<20x20xf32>
    %567 = math.exp %566 : vector<20x20xf32>
    %cst_253 = arith.constant dense<0.000000e+00> : vector<20xf32>
    %568 = vector.multi_reduction <add>, %567, %cst_253 [1] : vector<20x20xf32> to vector<20xf32>
    %569 = vector.shape_cast %568 : vector<20xf32> to vector<20x1xf32>
    %570 = tpu.reciprocal %569 {approx = true} : vector<20x1xf32> -> vector<20x1xf32>
    %571 = vector.broadcast %570 : vector<20x1xf32> to vector<20x20xf32>
    %572 = arith.mulf %567, %571 : vector<20x20xf32>
    %573 = arith.truncf %572 : vector<20x20xf32> to vector<20x20xbf16>
    %cst_254 = arith.constant dense<0.000000e+00> : vector<20x64xf32>
    %574 = tpu.matmul %573, %559, %cst_254 {dimension_numbers = #tpu.dot_dimension_numbers<[1], [0], [0], [1], [0, 0, 1, 1], [], []>} : vector<20x20xbf16>, vector<20x64xbf16>, vector<20x64xf32> -> vector<20x64xf32>
    %575 = tpu.concatenate %553, %574 in 1 : vector<20x64xf32>, vector<20x64xf32> -> vector<20x128xf32>
    %576 = arith.truncf %575 : vector<20x128xf32> to vector<20x128xbf16>
    %577 = vector.extract_strided_slice %482 {offsets = [0, 384], sizes = [128, 128], strides = [1, 1]} : vector<128x768xbf16> to vector<128x128xbf16>
    %cst_255 = arith.constant dense<0.000000e+00> : vector<20x128xf32>
    %578 = tpu.matmul %576, %577, %cst_255 {dimension_numbers = #tpu.dot_dimension_numbers<[1], [0], [0], [1], [0, 0, 1, 1], [], []>} : vector<20x128xbf16>, vector<128x128xbf16>, vector<20x128xf32> -> vector<20x128xf32>
    %579 = arith.addf %480, %578 : vector<20x128xf32>
    %580 = vector.broadcast %499 : vector<1x128xf32> to vector<20x128xf32>
    %581 = arith.addf %579, %580 : vector<20x128xf32>
    %cst_256 = arith.constant dense<0.000000e+00> : vector<20xf32>
    %582 = vector.multi_reduction <add>, %581, %cst_256 [1] : vector<20x128xf32> to vector<20xf32>
    %583 = vector.shape_cast %582 : vector<20xf32> to vector<20x1xf32>
    %cst_257 = arith.constant 1.280000e+02 : f32
    %584 = vector.broadcast %cst_257 : f32 to vector<20x1xf32>
    %585 = arith.divf %583, %584 : vector<20x1xf32>
    %586 = vector.broadcast %585 : vector<20x1xf32> to vector<20x128xf32>
    %587 = arith.subf %581, %586 : vector<20x128xf32>
    %588 = arith.mulf %587, %587 : vector<20x128xf32>
    %cst_258 = arith.constant dense<0.000000e+00> : vector<20xf32>
    %589 = vector.multi_reduction <add>, %588, %cst_258 [1] : vector<20x128xf32> to vector<20xf32>
    %590 = vector.shape_cast %589 : vector<20xf32> to vector<20x1xf32>
    %cst_259 = arith.constant 1.280000e+02 : f32
    %591 = vector.broadcast %cst_259 : f32 to vector<20x1xf32>
    %592 = arith.divf %590, %591 : vector<20x1xf32>
    %cst_260 = arith.constant 9.99999974E-6 : f32
    %593 = vector.broadcast %cst_260 : f32 to vector<20x1xf32>
    %594 = arith.addf %592, %593 : vector<20x1xf32>
    %595 = math.rsqrt %594 : vector<20x1xf32>
    %596 = vector.broadcast %595 : vector<20x1xf32> to vector<20x128xf32>
    %597 = arith.mulf %587, %596 : vector<20x128xf32>
    %598 = vector.broadcast %493 : vector<1x128xf32> to vector<20x128xf32>
    %599 = arith.mulf %597, %598 : vector<20x128xf32>
    %600 = vector.broadcast %496 : vector<1x128xf32> to vector<20x128xf32>
    %601 = arith.addf %599, %600 : vector<20x128xf32>
    %602 = arith.truncf %601 : vector<20x128xf32> to vector<20x128xbf16>
    %603 = vector.extract_strided_slice %482 {offsets = [0, 512], sizes = [128, 256], strides = [1, 1]} : vector<128x768xbf16> to vector<128x256xbf16>
    %cst_261 = arith.constant dense<0.000000e+00> : vector<20x256xf32>
    %604 = tpu.matmul %602, %603, %cst_261 {dimension_numbers = #tpu.dot_dimension_numbers<[1], [0], [0], [1], [0, 0, 1, 1], [], []>} : vector<20x128xbf16>, vector<128x256xbf16>, vector<20x256xf32> -> vector<20x256xf32>
    %605 = vector.broadcast %507 : vector<1x256xf32> to vector<20x256xf32>
    %606 = arith.addf %604, %605 : vector<20x256xf32>
    %cst_262 = arith.constant 5.000000e-01 : f32
    %607 = vector.broadcast %cst_262 : f32 to vector<20x256xf32>
    %608 = arith.mulf %607, %606 : vector<20x256xf32>
    %cst_263 = arith.constant 4.471500e-02 : f32
    %609 = vector.broadcast %cst_263 : f32 to vector<20x256xf32>
    %610 = arith.mulf %609, %606 : vector<20x256xf32>
    %611 = arith.mulf %610, %606 : vector<20x256xf32>
    %612 = arith.mulf %611, %606 : vector<20x256xf32>
    %613 = arith.addf %606, %612 : vector<20x256xf32>
    %cst_264 = arith.constant 0.797884583 : f32
    %614 = vector.broadcast %cst_264 : f32 to vector<20x256xf32>
    %615 = arith.mulf %614, %613 : vector<20x256xf32>
    %616 = math.tanh %615 : vector<20x256xf32>
    %cst_265 = arith.constant 1.000000e+00 : f32
    %617 = vector.broadcast %cst_265 : f32 to vector<20x256xf32>
    %618 = arith.addf %617, %616 : vector<20x256xf32>
    %619 = arith.mulf %608, %618 : vector<20x256xf32>
    %620 = arith.truncf %619 : vector<20x256xf32> to vector<20x256xbf16>
    %cst_266 = arith.constant dense<0.000000e+00> : vector<20x128xf32>
    %621 = tpu.matmul %620, %484, %cst_266 {dimension_numbers = #tpu.dot_dimension_numbers<[1], [0], [0], [1], [0, 0, 1, 1], [], []>} : vector<20x256xbf16>, vector<256x128xbf16>, vector<20x128xf32> -> vector<20x128xf32>
    %622 = arith.addf %581, %621 : vector<20x128xf32>
    %623 = vector.broadcast %502 : vector<1x128xf32> to vector<20x128xf32>
    %624 = arith.addf %622, %623 : vector<20x128xf32>
    %c3_267 = arith.constant 3 : index
    %c0_268 = arith.constant 0 : index
    %625 = vector.load %arg8[%c3_267, %c0_268] : memref<12x128xf32, #tpu.memory_space<vmem>>, vector<1x128xf32>
    %c4_269 = arith.constant 4 : index
    %c0_270 = arith.constant 0 : index
    %626 = vector.load %arg8[%c4_269, %c0_270] : memref<12x128xf32, #tpu.memory_space<vmem>>, vector<1x128xf32>
    %cst_271 = arith.constant dense<0.000000e+00> : vector<20xf32>
    %627 = vector.multi_reduction <add>, %624, %cst_271 [1] : vector<20x128xf32> to vector<20xf32>
    %628 = vector.shape_cast %627 : vector<20xf32> to vector<20x1xf32>
    %cst_272 = arith.constant 1.280000e+02 : f32
    %629 = vector.broadcast %cst_272 : f32 to vector<20x1xf32>
    %630 = arith.divf %628, %629 : vector<20x1xf32>
    %631 = vector.broadcast %630 : vector<20x1xf32> to vector<20x128xf32>
    %632 = arith.subf %624, %631 : vector<20x128xf32>
    %633 = arith.mulf %632, %632 : vector<20x128xf32>
    %cst_273 = arith.constant dense<0.000000e+00> : vector<20xf32>
    %634 = vector.multi_reduction <add>, %633, %cst_273 [1] : vector<20x128xf32> to vector<20xf32>
    %635 = vector.shape_cast %634 : vector<20xf32> to vector<20x1xf32>
    %cst_274 = arith.constant 1.280000e+02 : f32
    %636 = vector.broadcast %cst_274 : f32 to vector<20x1xf32>
    %637 = arith.divf %635, %636 : vector<20x1xf32>
    %cst_275 = arith.constant 9.99999974E-6 : f32
    %638 = vector.broadcast %cst_275 : f32 to vector<20x1xf32>
    %639 = arith.addf %637, %638 : vector<20x1xf32>
    %640 = math.rsqrt %639 : vector<20x1xf32>
    %641 = vector.broadcast %640 : vector<20x1xf32> to vector<20x128xf32>
    %642 = arith.mulf %632, %641 : vector<20x128xf32>
    %643 = vector.broadcast %625 : vector<1x128xf32> to vector<20x128xf32>
    %644 = arith.mulf %642, %643 : vector<20x128xf32>
    %645 = vector.broadcast %626 : vector<1x128xf32> to vector<20x128xf32>
    %646 = arith.addf %644, %645 : vector<20x128xf32>
    %c0_276 = arith.constant 0 : index
    %c0_277 = arith.constant 0 : index
    %647 = vector.load %arg19[%c0_276, %c0_277] : memref<20x128xf32, #tpu.memory_space<vmem>>, vector<20x128xf32>
    tpu.vector_store %arg19[%c0_276, %c0_277], %646 {strides = array<i32>} : memref<20x128xf32, #tpu.memory_space<vmem>>, vector<20x128xf32>,
    %c0_278 = arith.constant 0 : index
    %c0_279 = arith.constant 0 : index
    %648 = vector.load %arg19[%c0_278, %c0_279] : memref<20x128xf32, #tpu.memory_space<vmem>>, vector<16x128xf32>
    %649 = arith.truncf %648 : vector<16x128xf32> to vector<16x128xbf16>
    %c16_280 = arith.constant 16 : index
    %c0_281 = arith.constant 0 : index
    %650 = vector.load %arg19[%c16_280, %c0_281] : memref<20x128xf32, #tpu.memory_space<vmem>>, vector<4x128xf32>
    %651 = arith.truncf %650 : vector<4x128xf32> to vector<4x128xbf16>
    %652 = vector.extract_strided_slice %328 {offsets = [0, 128], sizes = [128, 128], strides = [1, 1]} : vector<128x384xbf16> to vector<128x128xbf16>
    %cst_282 = arith.constant dense<0.000000e+00> : vector<16x128xf32>
    %653 = tpu.matmul %649, %652, %cst_282 {dimension_numbers = #tpu.dot_dimension_numbers<[1], [0], [0], [1], [0, 0, 1, 1], [], []>} : vector<16x128xbf16>, vector<128x128xbf16>, vector<16x128xf32> -> vector<16x128xf32>
    %654 = vector.extract_strided_slice %328 {offsets = [0, 256], sizes = [128, 128], strides = [1, 1]} : vector<128x384xbf16> to vector<128x128xbf16>
    %cst_283 = arith.constant dense<0.000000e+00> : vector<4x128xf32>
    %655 = tpu.matmul %651, %654, %cst_283 {dimension_numbers = #tpu.dot_dimension_numbers<[1], [0], [0], [1], [0, 0, 1, 1], [], []>} : vector<4x128xbf16>, vector<128x128xbf16>, vector<4x128xf32> -> vector<4x128xf32>
    %656 = arith.mulf %653, %653 : vector<16x128xf32>
    %cst_284 = arith.constant dense<0.000000e+00> : vector<16xf32>
    %657 = vector.multi_reduction <add>, %656, %cst_284 [1] : vector<16x128xf32> to vector<16xf32>
    %658 = vector.shape_cast %657 : vector<16xf32> to vector<16x1xf32>
    %cst_285 = arith.constant 9.99999996E-13 : f32
    %659 = vector.broadcast %cst_285 : f32 to vector<16x1xf32>
    %660 = arith.addf %658, %659 : vector<16x1xf32>
    %661 = math.rsqrt %660 : vector<16x1xf32>
    %662 = vector.broadcast %661 : vector<16x1xf32> to vector<16x128xf32>
    %663 = arith.mulf %653, %662 : vector<16x128xf32>
    %664 = arith.mulf %655, %655 : vector<4x128xf32>
    %cst_286 = arith.constant dense<0.000000e+00> : vector<4xf32>
    %665 = vector.multi_reduction <add>, %664, %cst_286 [1] : vector<4x128xf32> to vector<4xf32>
    %666 = vector.shape_cast %665 : vector<4xf32> to vector<4x1xf32>
    %cst_287 = arith.constant 9.99999996E-13 : f32
    %667 = vector.broadcast %cst_287 : f32 to vector<4x1xf32>
    %668 = arith.addf %666, %667 : vector<4x1xf32>
    %669 = math.rsqrt %668 : vector<4x1xf32>
    %670 = vector.broadcast %669 : vector<4x1xf32> to vector<4x128xf32>
    %671 = arith.mulf %655, %670 : vector<4x128xf32>
    %c0_288 = arith.constant 0 : index
    %c0_289 = arith.constant 0 : index
    %c0_290 = arith.constant 0 : index
    %672 = vector.load %arg15[%c0_288, %c0_289, %c0_290] : memref<1x16x128xf32, #tpu.memory_space<vmem>>, vector<1x16x128xf32>
    %673 = vector.shape_cast %672 : vector<1x16x128xf32> to vector<16x128xf32>
    %674 = vector.shape_cast %663 : vector<16x128xf32> to vector<1x16x128xf32>
    tpu.vector_store %arg15[%c0_288, %c0_289, %c0_290], %674 {strides = array<i32>} : memref<1x16x128xf32, #tpu.memory_space<vmem>>, vector<1x16x128xf32>,
    %c0_291 = arith.constant 0 : index
    %c0_292 = arith.constant 0 : index
    %c0_293 = arith.constant 0 : index
    %675 = vector.load %arg16[%c0_291, %c0_292, %c0_293] : memref<1x4x128xf32, #tpu.memory_space<vmem>>, vector<1x4x128xf32>
    %676 = vector.shape_cast %675 : vector<1x4x128xf32> to vector<4x128xf32>
    %677 = vector.shape_cast %671 : vector<4x128xf32> to vector<1x4x128xf32>
    tpu.vector_store %arg16[%c0_291, %c0_292, %c0_293], %677 {strides = array<i32>} : memref<1x4x128xf32, #tpu.memory_space<vmem>>, vector<1x4x128xf32>,
    %cst_294 = arith.constant dense<0.000000e+00> : vector<4x16xf32>
    %678 = tpu.matmul %671, %663, %cst_294 {dimension_numbers = #tpu.dot_dimension_numbers<[1], [1], [0], [0], [0, 0, 1, 0], [], []>} : vector<4x128xf32>, vector<16x128xf32>, vector<4x16xf32> -> vector<4x16xf32>
    %cst_295 = arith.constant dense<0.000000e+00> : vector<16xf32>
    %679 = vector.multi_reduction <add>, %678, %cst_295 [0] : vector<4x16xf32> to vector<16xf32>
    %680 = vector.shape_cast %679 : vector<16xf32> to vector<1x16xf32>
    %cst_296 = arith.constant 4.000000e+00 : f32
    %681 = vector.broadcast %cst_296 : f32 to vector<1x16xf32>
    %682 = arith.divf %680, %681 : vector<1x16xf32>
    %683 = vector.broadcast %682 : vector<1x16xf32> to vector<4x16xf32>
    %684 = arith.subf %678, %683 : vector<4x16xf32>
    %685 = arith.mulf %684, %684 : vector<4x16xf32>
    %cst_297 = arith.constant dense<0.000000e+00> : vector<16xf32>
    %686 = vector.multi_reduction <add>, %685, %cst_297 [0] : vector<4x16xf32> to vector<16xf32>
    %687 = vector.shape_cast %686 : vector<16xf32> to vector<1x16xf32>
    %cst_298 = arith.constant 4.000000e+00 : f32
    %688 = vector.broadcast %cst_298 : f32 to vector<1x16xf32>
    %689 = arith.divf %687, %688 : vector<1x16xf32>
    %c0_299 = arith.constant 0 : index
    %c0_300 = arith.constant 0 : index
    %690 = vector.load %arg12[%c0_299, %c0_300] : memref<4x2xf32, #tpu.memory_space<vmem>>, vector<4x1xf32>
    %c0_301 = arith.constant 0 : index
    %c1_302 = arith.constant 1 : index
    %691 = vector.load %arg12[%c0_301, %c1_302] : memref<4x2xf32, #tpu.memory_space<vmem>>, vector<4x1xf32>
    %cst_303 = arith.constant 9.99999974E-6 : f32
    %692 = vector.broadcast %cst_303 : f32 to vector<1x16xf32>
    %693 = arith.addf %689, %692 : vector<1x16xf32>
    %694 = math.rsqrt %693 : vector<1x16xf32>
    %695 = vector.broadcast %694 : vector<1x16xf32> to vector<4x16xf32>
    %696 = arith.mulf %684, %695 : vector<4x16xf32>
    %697 = vector.broadcast %690 : vector<4x1xf32> to vector<4x16xf32>
    %698 = arith.mulf %696, %697 : vector<4x16xf32>
    %699 = vector.broadcast %691 : vector<4x1xf32> to vector<4x16xf32>
    %700 = arith.addf %698, %699 : vector<4x16xf32>
    %c0_304 = arith.constant 0 : index
    %c0_305 = arith.constant 0 : index
    %701 = vector.load %arg13[%c0_304, %c0_305] : memref<16x1024xf32, #tpu.memory_space<vmem>>, vector<16x1024xf32>
    %cst_306 = arith.constant dense<0.000000e+00> : vector<4x1024xf32>
    %702 = tpu.matmul %700, %701, %cst_306 {dimension_numbers = #tpu.dot_dimension_numbers<[1], [0], [0], [1], [0, 0, 1, 1], [], []>} : vector<4x16xf32>, vector<16x1024xf32>, vector<4x1024xf32> -> vector<4x1024xf32>
    %c0_307 = arith.constant 0 : index
    %c0_308 = arith.constant 0 : index
    %c0_309 = arith.constant 0 : index
    %703 = vector.load %arg14[%c0_307, %c0_308, %c0_309] : memref<1x4x1024xf32, #tpu.memory_space<vmem>>, vector<1x4x1024xf32>
    %704 = vector.shape_cast %703 : vector<1x4x1024xf32> to vector<4x1024xf32>
    %705 = vector.shape_cast %702 : vector<4x1024xf32> to vector<1x4x1024xf32>
    tpu.vector_store %arg14[%c0_307, %c0_308, %c0_309], %705 {strides = array<i32>} : memref<1x4x1024xf32, #tpu.memory_space<vmem>>, vector<1x4x1024xf32>,
    return
  }
  func.func @transform_0(%arg0: i32) -> (i32, i32, i32) {
    %c0_i32 = arith.constant 0 : i32
    %c0_i32_0 = arith.constant 0 : i32
    %c0_i32_1 = arith.constant 0 : i32
    return %arg0, %c0_i32, %c0_i32_0 : i32, i32, i32
  }
  func.func @transform_1(%arg0: i32) -> (i32, i32) {
    %c0_i32 = arith.constant 0 : i32
    %c0_i32_0 = arith.constant 0 : i32
    %c0_i32_1 = arith.constant 0 : i32
    return %c0_i32, %c0_i32_0 : i32, i32
  }
  func.func @transform_2(%arg0: i32) -> (i32, i32) {
    %c0_i32 = arith.constant 0 : i32
    %c0_i32_0 = arith.constant 0 : i32
    %c0_i32_1 = arith.constant 0 : i32
    return %c0_i32, %c0_i32_0 : i32, i32
  }
  func.func @transform_3(%arg0: i32) -> (i32, i32, i32) {
    %c0_i32 = arith.constant 0 : i32
    %c0_i32_0 = arith.constant 0 : i32
    %c0_i32_1 = arith.constant 0 : i32
    %c0_i32_2 = arith.constant 0 : i32
    return %c0_i32, %c0_i32_0, %c0_i32_1 : i32, i32, i32
  }
  func.func @transform_4(%arg0: i32) -> (i32, i32, i32) {
    %c0_i32 = arith.constant 0 : i32
    %c0_i32_0 = arith.constant 0 : i32
    %c0_i32_1 = arith.constant 0 : i32
    %c0_i32_2 = arith.constant 0 : i32
    return %c0_i32, %c0_i32_0, %c0_i32_1 : i32, i32, i32
  }
  func.func @transform_5(%arg0: i32) -> (i32, i32, i32) {
    %c0_i32 = arith.constant 0 : i32
    %c0_i32_0 = arith.constant 0 : i32
    %c0_i32_1 = arith.constant 0 : i32
    %c0_i32_2 = arith.constant 0 : i32
    return %c0_i32, %c0_i32_0, %c0_i32_1 : i32, i32, i32
  }
  func.func @transform_6(%arg0: i32) -> (i32, i32) {
    %c0_i32 = arith.constant 0 : i32
    %c0_i32_0 = arith.constant 0 : i32
    %c0_i32_1 = arith.constant 0 : i32
    return %c0_i32, %c0_i32_0 : i32, i32
  }
  func.func @transform_7(%arg0: i32) -> (i32, i32) {
    %c0_i32 = arith.constant 0 : i32
    %c0_i32_0 = arith.constant 0 : i32
    %c0_i32_1 = arith.constant 0 : i32
    return %c0_i32, %c0_i32_0 : i32, i32
  }
  func.func @transform_8(%arg0: i32) -> (i32, i32, i32) {
    %c0_i32 = arith.constant 0 : i32
    %c0_i32_0 = arith.constant 0 : i32
    %c0_i32_1 = arith.constant 0 : i32
    %c0_i32_2 = arith.constant 0 : i32
    return %c0_i32, %c0_i32_0, %c0_i32_1 : i32, i32, i32
  }
  func.func @transform_9(%arg0: i32) -> (i32, i32, i32) {
    %c0_i32 = arith.constant 0 : i32
    %c0_i32_0 = arith.constant 0 : i32
    %c0_i32_1 = arith.constant 0 : i32
    %c0_i32_2 = arith.constant 0 : i32
    return %c0_i32, %c0_i32_0, %c0_i32_1 : i32, i32, i32
  }
  func.func @transform_10(%arg0: i32) -> (i32, i32, i32) {
    %c0_i32 = arith.constant 0 : i32
    %c0_i32_0 = arith.constant 0 : i32
    %c0_i32_1 = arith.constant 0 : i32
    %c0_i32_2 = arith.constant 0 : i32
    return %c0_i32, %c0_i32_0, %c0_i32_1 : i32, i32, i32
  }
  func.func @transform_11(%arg0: i32) -> (i32, i32) {
    %c0_i32 = arith.constant 0 : i32
    %c0_i32_0 = arith.constant 0 : i32
    %c0_i32_1 = arith.constant 0 : i32
    return %c0_i32, %c0_i32_0 : i32, i32
  }
  func.func @transform_12(%arg0: i32) -> (i32, i32) {
    %c0_i32 = arith.constant 0 : i32
    %c0_i32_0 = arith.constant 0 : i32
    %c0_i32_1 = arith.constant 0 : i32
    return %c0_i32, %c0_i32_0 : i32, i32
  }
  func.func @transform_13(%arg0: i32) -> (i32, i32, i32) {
    %c0_i32 = arith.constant 0 : i32
    %c0_i32_0 = arith.constant 0 : i32
    %c0_i32_1 = arith.constant 0 : i32
    return %arg0, %c0_i32, %c0_i32_0 : i32, i32, i32
  }
  func.func @transform_14(%arg0: i32) -> (i32, i32, i32) {
    %c0_i32 = arith.constant 0 : i32
    %c0_i32_0 = arith.constant 0 : i32
    %c0_i32_1 = arith.constant 0 : i32
    return %arg0, %c0_i32, %c0_i32_0 : i32, i32, i32
  }
  func.func @transform_15(%arg0: i32) -> (i32, i32, i32) {
    %c0_i32 = arith.constant 0 : i32
    %c0_i32_0 = arith.constant 0 : i32
    %c0_i32_1 = arith.constant 0 : i32
    return %arg0, %c0_i32, %c0_i32_0 : i32, i32, i32
  }
  func.func @transform_16(%arg0: i32) -> (i32, i32, i32) {
    %c0_i32 = arith.constant 0 : i32
    %c0_i32_0 = arith.constant 0 : i32
    %c0_i32_1 = arith.constant 0 : i32
    return %arg0, %c0_i32, %c0_i32_0 : i32, i32, i32
  }
}

</mosaic_0001>

<bundles_post_ra>
// kernel: segmenter_forward.1
= control target key start
LH: loop header
LB: loop body
LE: loop exit
PB: predicated region body
PF: predicated region fallthrough
CT: control target
= control target key end

     0   :  { %s10549_s0 = inlined_call_operand.vmem [shape: bf16[2,16,256], index: 0, kind: input, shape index: {}]   ;;  %s10550_s1 = inlined_call_operand.vmem [shape: bf16[256,128], index: 1, kind: input, shape index: {}]   ;;  %s10551_s2 = inlined_call_operand.vmem [shape: f32[17,128], index: 2, kind: input, shape index: {}]   ;;  %s10552_s3 = inlined_call_operand.vmem [shape: bf16[2,128,768], index: 3, kind: input, shape index: {}]   ;;  %s10553_s4 = inlined_call_operand.vmem [shape: bf16[2,256,128], index: 4, kind: input, shape index: {}]   ;;  %s10554_s5 = inlined_call_operand.vmem [shape: f32[2,8,384], index: 5, kind: input, shape index: {}]   ;;  %s10555_s6 = inlined_call_operand.vmem [shape: bf16[128,384], index: 6, kind: input, shape index: {}]   ;;  %s10556_s7 = inlined_call_operand.vmem [shape: f32[12,128], index: 7, kind: input, shape index: {}]   ;;  %s10557_s8 = inlined_call_operand.vmem [shape: bf16[2,128,768], index: 8, kind: input, shape index: {}]   ;;  %s10558_s9 = inlined_call_operand.vmem [shape: bf16[2,256,128], index: 9, kind: input, shape index: {}]   ;;  %s10559_s10 = inlined_call_operand.vmem [shape: f32[2,8,384], index: 10, kind: input, shape index: {}]   ;;  %s10560_s11 = inlined_call_operand.vmem [shape: f32[4,2], index: 11, kind: input, shape index: {}]   ;;  %s10561_s12 = inlined_call_operand.vmem [shape: f32[16,1024], index: 12, kind: input, shape index: {}]   ;;  %s10562_s13 = inlined_call_operand.vmem [shape: f32[2,4,1024], index: 13, kind: output, shape index: {0}]   ;;  %s10563_s14 = inlined_call_operand.hbm [shape: f32[2,16,128], index: 14, kind: output, shape index: {1}]   ;;  %s10564_s15 = inlined_call_operand.hbm [shape: f32[2,4,128], index: 15, kind: output, shape index: {2}]   ;;  %s10565_s16 = inlined_call_operand.hbm [shape: f32[2,1,128], index: 16, kind: output, shape index: {3}]  }
   0x1   :  { %10576 = sst [smem:[#allocation17_spill]] %s10549_s0 }
   0x2   :  { %10577 = sst [smem:[#allocation18_spill]] %s10550_s1 }
   0x3   :  { %10578 = sst [smem:[#allocation19_spill]] %s10551_s2 }
   0x4   :  { %10579 = sst [smem:[#allocation20_spill]] %s10552_s3 }
   0x5   :  { %10580 = sst [smem:[#allocation21_spill]] %s10553_s4 }
   0x6   :  { %10581 = sst [smem:[#allocation22_spill]] %s10554_s5 }
   0x7   :  { %10582 = sst [smem:[#allocation23_spill]] %s10555_s6 }
   0x8   :  { %10583 = sst [smem:[#allocation24_spill]] %s10562_s13 }
   0x9   :  { %10584 = sst [smem:[#allocation25_spill]] %s10565_s16 }
   0xa   :  { %22 = vsyncpa [#allocation5], 0 }
   0xb   :  { %24 = vsyncpa [#allocation5 + $0x1], 0 }
   0xc   :  { %25 = vsyncpa [#allocation7], 0 }
   0xd   :  { %27 = vsyncpa [#allocation7 + $0x1], 0  ;;  %s8112_s21 = smov 0   ;;  %s8114_s22 = smov 0  }
   0xe   :  { %s8116_s23 = smov 0   ;;  %s8118_s24 = smov 0  }
   0xf LB: > { %10585 = sst [smem:[#allocation11_spill]] %s8005_s21  ;;  %s8133_s25 = sadd.s32 4294967295, %s8017_s24   ;;  %s8017_s24 = sphi %s8118_s24, %s10608_s24   ;;  %s8013_s23 = sphi %s8116_s23, %s10610_s23   ;;  %s8009_s22 = sphi %s8114_s22, %s10612_s22   ;;  %s8005_s21 = sphi %s8112_s21, %s10611_s21  }
  0x10   : > { %10586 = sst [smem:[#allocation12_spill]] %s8013_s23  ;;  %s10566_s26 = sadd.s32 4294967294, %s8017_s24  }
  0x11   : > { %10587 = sst [smem:[#allocation13_spill]] %s8017_s24  ;;  %s8137_s27 = sadd.s32 1, %s8017_s24  }
  0x12   : > { %10588 = sst [smem:[#allocation14_spill]] %s8137_s27  ;;  %s344_s28 = sadd.s32 1, %s8013_s23 }
  0x13   : > { %s341_s29 = ssub.s32 %s8017_s24, %s8137_s27  ;;  %p354_p0 = scmp.ne.s32.totalorder %s8013_s23, %s8009_s22 }
  0x14   : > { %p342_p1 = scmp.eq.s32.totalorder %s341_s29, 0  ;;  %p355_p2 = scmp.eq.s32.totalorder %s8133_s25, 1 }
  0x15   : > { %p360_p3 = scmp.ne.s32.totalorder %s8009_s22, %s8005_s21  ;;  %p361_p4 = scmp.eq.s32.totalorder %s10566_s26, 1 }
  0x16   : > { %s8150_s30 = scalar_select %p342_p1, %s8013_s23, %s344_s28  }
  0x17   : > { %p8152_p5 = por %p355_p2, %p354_p0  ;;  %p8156_p6 = por %p361_p4, %p360_p3 }
  0x18   : > { %10589 = sst [smem:[#allocation15_spill]] %s8150_s30  ;;  %p5856_p7 = scmp.ge.s32.totalorder %s8017_s24, 1 }
  0x19   : > { %s10591_s17 = scalar_select %p8156_p6, 1, 0 }
  0x1a   : > { %p475_p8 = scmp.lt.s32.totalorder %s8017_s24, 3 }
  0x1b   : > { %10592 = sst [smem:[#allocation16_spill]] %s10591_s17 }
  0x1c   : > { %p476_p9 = pnand %p5856_p7, %p475_p8 }
  0x1d   : > { %s10593_s1 = sld [smem:[#allocation18_spill]] (!%p476_p9)  ;;  %p539_p10 = scmp.lt.s32.totalorder (!%p476_p9), %s8133_s25, 1 }
  0x1e   : > { %479 = sbr.rel (%p476_p9) target bundleno = 9157 (0x23c5), region = 72  ;;  %s10594_s13 = sld [smem:[#allocation17_spill]] (!%p476_p9) }
  0x1f   : > { %s10595_s2 = sld [smem:[#allocation19_spill]] (!%p476_p9)  ;;  %s10392_s17 = sand.u32 (!%p476_p9), 1, %s8009_s22  }
  0x20   : > { %s10596_s3 = sld [smem:[#allocation20_spill]] (!%p476_p9)  ;;  %s5857_s26 = sshll.u32 (!%p476_p9), %s10392_s17, 4 }
  0x21   : > { %s10597_s5 = sld [smem:[#allocation22_spill]] (!%p476_p9)  ;;  %s5858_s16 = sshll.u32 (!%p476_p9), %s10392_s17, 2 }
  0x22   : > { %s10598_s4 = sld [smem:[#allocation21_spill]] (!%p476_p9)  ;;  %s10404_s21 = scalar_lea.vmem (!%p476_p9), [#allocation6], %s5858_s16 }
  0x23   : > { %v7303_v0 = vld [vmem:[%s10593_s1 + $0x38] sm:$0xff]  ;;  %v7302_v2 = vld [vmem:[%s10593_s1 + $0x30] sm:$0xff]  ;;  %v7301_v4 = vld [vmem:[%s10593_s1 + $0x28] sm:$0xff]  ;;  %s8194_s19 = scalar_select %p539_p10, %s8133_s25, 1  ;;  %v8019_v22 = vmov 0.0   ;;  %vm829_vm0 = vcmask 1040384  }
  0x24   : > { %v7311_v1 = vld [vmem:[%s10593_s1 + $0x78] sm:$0xff]  ;;  %690 = vmatpush.bf16.msra.mxu0 %v7303_v0  ;;  %v7310_v3 = vld [vmem:[%s10593_s1 + $0x70] sm:$0xff]  ;;  %v7309_v5 = vld [vmem:[%s10593_s1 + $0x68] sm:$0xff]  ;;  %720 = vst [vmem:[#allocation2 + $0x8] sm:$0x1] %v8019_v22  ;;  %v8020_v37 = vmov 128.0  }
  0x25   : > { %704 = vmatpush.bf16.msra.mxu1 %v7311_v1  ;;  %v7300_v6 = vld [vmem:[%s10593_s1 + $0x20] sm:$0xff]  ;;  %v7299_v8 = vld [vmem:[%s10593_s1 + $0x18] sm:$0xff]  ;;  %v7298_v10 = vld [vmem:[%s10593_s1 + $0x10] sm:$0xff]  ;;  %s7292_s29 = sshll.u32 %s8194_s19, 4  ;;  %7677 = vrcp.f32 %v8020_v37  ;;  %vm1104_vm11 = vcmask 523264   ;;  %vm1138_vm12 = vcmask 138240  }
  0x26   : > { %v7308_v7 = vld [vmem:[%s10593_s1 + $0x60] sm:$0xff]  ;;  %v7307_v9 = vld [vmem:[%s10593_s1 + $0x58] sm:$0xff]  ;;  %v7306_v11 = vld [vmem:[%s10593_s1 + $0x50] sm:$0xff]  ;;  %s543_s20 = scalar_lea.vmem %s10594_s13, %s7292_s29  ;;  %s8022_s29 = smov 64   ;;  %vm1145_vm13 = vcmask 131072  }
  0x27   : > { %v7297_v12 = vld [vmem:[%s10593_s1 + $0x8] sm:$0xff]  ;;  %v7296_v14 = vld [vmem:[%s10593_s1] sm:$0xff]  ;;  %v726_v23 = vld [vmem:[%s10595_s2 + $0x10] sm:$0x1]  ;;  %s10599_s6 = sld [smem:[#allocation23_spill]]  ;;  %s10396_s13 = scalar_lea.vmem [#allocation4], %s5857_s26 }
  0x28   : > { %691 = vmatpush.bf16.msra.mxu0 %v7302_v2  ;;  %v7305_v13 = vld [vmem:[%s10593_s1 + $0x48] sm:$0xff]  ;;  %v7304_v15 = vld [vmem:[%s10593_s1 + $0x40] sm:$0xff]  ;;  %v6028_v57 = vld [vmem:[%s10596_s3 + $0x150] sm:$0xf]  ;;  %s10575_s18 = scalar_lea.vmem [#allocation8], %s10392_s17  ;;  %s5664_s26 = sshll.u32 %s10396_s13, 4  ;;  %s10468_s26 = int_to_ptr.vmem [resolvable:$true] %s5664_s26 }
  0x29   : > { %705 = vmatpush.bf16.msra.mxu1 %v7310_v3  ;;  %v5865_v16 = vld [vmem:[%s543_s20] sm:$0xf]  ;;  %v7295_v17 = vld [vmem:[%s543_s20 + $0x4] sm:$0xf0]  ;;  %v7294_v18 = vld [vmem:[%s543_s20 + $0x4] sm:$0xf] }
  0x2a   : > { %v5867_v19 = vld [vmem:[%s543_s20 + $0x8] sm:$0xf0]  ;;  %v5866_v20 = vor.u32 %v7295_v17, %v5865_v16  ;;  %v724_v29 = vld [vmem:[%s10595_s2] sm:$0xff]  ;;  %v7357_v58 = vld [vmem:[%s10596_s3 + $0x164] sm:$0xf0]  ;;  %s7289_s16 = sshll.u32 %s8133_s25, 2 }
  0x2b   : > { %v5870_v21 = vor.u32 %v7294_v18, %v5867_v19  ;;  %v723_v24 = vld [vmem:[#allocation2 + $0x8] sm:$0x1]  ;;  %v7678_v38 = vpop.eup %7677  ;;  %v7354_v59 = vld [vmem:[%s10596_s3 + $0x154] sm:$0xf]  ;;  %v6029_v60 = vor.u32 %v7357_v58, %v6028_v57  ;;  %v6030_v61 = vld [vmem:[%s10596_s3 + $0x168] sm:$0xf0]  ;;  %s5679_s23 = scalar_lea.hbm %s10564_s15, %s7289_s16 }
  0x2c   : > { %692 = vmatpush.bf16.msra.mxu0 %v7301_v4  ;;  %v8221_v25 = vadd.f32 %v726_v23, %v723_v24  ;;  %v725_v34 = vld [vmem:[%s10595_s2 + $0x8] sm:$0xff]  ;;  %v834_v39 = vmul.f32 128.0, %v7678_v38  ;;  %vm838_vm1 = vweird.f32 %v7678_v38  ;;  %v6036_v62 = vld [vmem:[%s10596_s3 + $0x158] sm:$0xf]  ;;  %v7358_v63 = vld [vmem:[%s10596_s3 + $0x16c] sm:$0xf0]  ;;  %v6033_v0 = vor.u32 %v7354_v59, %v6030_v61 }
  0x2d   : > { %706 = vmatpush.bf16.msra.mxu1 %v7309_v5  ;;  %v6037_v1 = vor.u32 %v7358_v63, %v6036_v62  ;;  %1044 = vmatpush.bf16.msra.mxu2 %v6029_v60  ;;  %v6016_v2 = vld [vmem:[%s10596_s3 + $0x120] sm:$0xf]  ;;  %v7351_v3 = vld [vmem:[%s10596_s3 + $0x134] sm:$0xf0]  ;;  %v7348_v4 = vld [vmem:[%s10596_s3 + $0x124] sm:$0xf] }
  0x2e   : > { %v830_v26 = vsel %vm829_vm0, %v8221_v25, 0.0  ;;  %v835_v40 = vsub.f32 1.0, %v834_v39  ;;  %1062 = vmatpush.bf16.msra.mxu3 %v6033_v0  ;;  %v6017_v5 = vor.u32 %v7351_v3, %v6016_v2  ;;  %v6012_v16 = vld [vmem:[%s10596_s3 + $0xf8] sm:$0xf]  ;;  %v7346_v17 = vld [vmem:[%s10596_s3 + $0x10c] sm:$0xf0] }
  0x2f   : > { %831 = vadd.xlane.f32.xlu1 %v830_v26  ;;  %v6013_v19 = vor.u32 %v7346_v17, %v6012_v16  ;;  %v7336_v22 = vld [vmem:[%s10596_s3 + $0xc4] sm:$0xf]  ;;  %v5994_v24 = vld [vmem:[%s10596_s3 + $0xd8] sm:$0xf0]  ;;  %v6000_v26 = vld [vmem:[%s10596_s3 + $0xc8] sm:$0xf] }
  0x30   : > { %693 = vmatpush.bf16.msra.mxu0 %v7300_v6  ;;  %v836_v41 = vmul.f32 %v7678_v38, %v835_v40  ;;  %v6018_v6 = vld [vmem:[%s10596_s3 + $0x138] sm:$0xf0]  ;;  %v5988_v37 = vld [vmem:[%s10596_s3 + $0x98] sm:$0xf]  ;;  %v5958_v58 = vld [vmem:[%s10596_s3 + $0x48] sm:$0xf0] }
  0x31   : > { %707 = vmatpush.bf16.msra.mxu1 %v7308_v7  ;;  %v6024_v7 = vld [vmem:[%s10596_s3 + $0x128] sm:$0xf]  ;;  %1045 = vmatpush.bf16.msra.mxu2 %v6017_v5  ;;  %v5964_v59 = vld [vmem:[%s10596_s3 + $0x38] sm:$0xf]  ;;  %v7322_v60 = vld [vmem:[%s10596_s3 + $0x4c] sm:$0xf0] }
  0x32   : > { %v837_v42 = vadd.f32 %v7678_v38, %v836_v41  ;;  %v5968_v41 = vld [vmem:[%s10596_s3 + $0x60] sm:$0xf]  ;;  %v5965_v62 = vor.u32 %v7322_v60, %v5964_v59  ;;  %v7315_v2 = vld [vmem:[%s10596_s3 + $0x14] sm:$0xf0]  ;;  %v7312_v3 = vld [vmem:[%s10596_s3 + $0x4] sm:$0xf] }
  0x33   : > { %v5946_v5 = vld [vmem:[%s10596_s3 + $0x18] sm:$0xf0]  ;;  %s7592_s30 = sshll.u32 %s8133_s25, 4  ;;  %s5681_s27 = sshll.u32 %s10404_s21, 4  ;;  %s5682_s27 = int_to_ptr.vmem [resolvable:$true] %s5681_s27 }
  0x34   : > { %694 = vmatpush.bf16.msra.mxu0 %v7299_v8  ;;  %v8237_v43 = vsel %vm838_vm1, %v7678_v38, %v837_v42  ;;  %v7352_v8 = vld [vmem:[%s10596_s3 + $0x13c] sm:$0xf0]  ;;  %v7334_v38 = vld [vmem:[%s10596_s3 + $0xac] sm:$0xf0]  ;;  %v7327_v42 = vld [vmem:[%s10596_s3 + $0x74] sm:$0xf0]  ;;  %s5663_s2 = scalar_lea.hbm %s10563_s14, %s7592_s30 }
  0x35   : > { %708 = vmatpush.bf16.msra.mxu1 %v7307_v9  ;;  %v6021_v9 = vor.u32 %v7348_v4, %v6018_v6  ;;  %v5989_v40 = vor.u32 %v7334_v38, %v5988_v37  ;;  %v5952_v6 = vld [vmem:[%s10596_s3 + $0x8] sm:$0xf]  ;;  %s5683_s20 = sshll.u32 %s5679_s23, 4  ;;  %s5684_s20 = int_to_ptr.hbm [resolvable:$true] %s5683_s20 }
  0x36   : > { %v5935_v38 = vld [vmem:[%s10597_s5 + $0x1] ss:$8 sm:$0x7] }
  0x37   : > { %1063 = vmatpush.bf16.msra.mxu3 %v6021_v9  ;;  %v5949_v9 = vor.u32 %v7312_v3, %v5946_v5 }
  0x38   : > { %695 = vmatpush.bf16.msra.mxu0 %v7298_v10  ;;  %v6025_v10 = vor.u32 %v7352_v8, %v6024_v7  ;;  %v7316_v7 = vld [vmem:[%s10596_s3 + $0x1c] sm:$0xf0] }
  0x39   : > { %709 = vmatpush.bf16.msra.mxu1 %v7306_v11  ;;  %v6004_v11 = vld [vmem:[%s10596_s3 + $0xf0] sm:$0xf] }
  0x3c   : > { %696 = vmatpush.bf16.msra.mxu0 %v7297_v12  ;;  %v7345_v12 = vld [vmem:[%s10596_s3 + $0x104] sm:$0xf0] }
  0x3d   : > { %710 = vmatpush.bf16.msra.mxu1 %v7305_v13  ;;  %v7342_v13 = vld [vmem:[%s10596_s3 + $0xf4] sm:$0xf] }
  0x40   : > { %697 = vmatpush.bf16.msra.mxu0 %v7296_v14  ;;  %v6005_v14 = vor.u32 %v7345_v12, %v6004_v11 }
  0x41   : > { %711 = vmatpush.bf16.msra.mxu1 %v7304_v15  ;;  %v6006_v15 = vld [vmem:[%s10596_s3 + $0x108] sm:$0xf0] }
  0x42   : > { %v6009_v18 = vor.u32 %v7342_v13, %v6006_v15  ;;  %1046 = vmatpush.bf16.msra.mxu2 %v6005_v14 }
  0x43   : > { %698 = vmatmul.bf16.vlgmr.msra.gmra.mxu0 %v5866_v20  ;;  %v5992_v20 = vld [vmem:[%s10596_s3 + $0xc0] sm:$0xf] }
  0x44   : > { %712 = vmatmul.bf16.vlgmr.msra.gmra.mxu1 %v5870_v21  ;;  %1080 = vmatpush.bf16.msrb.mxu0 %v6037_v1  ;;  %v7339_v21 = vld [vmem:[%s10596_s3 + $0xd4] sm:$0xf0]  ;;  %v5944_v1 = vld [vmem:[%s10596_s3] sm:$0xf] }
  0x45   : > { %1064 = vmatpush.bf16.msra.mxu3 %v6009_v18  ;;  %v5993_v23 = vor.u32 %v7339_v21, %v5992_v20  ;;  %v5945_v4 = vor.u32 %v7315_v2, %v5944_v1 }
  0x47   : > { %1047 = vmatpush.bf16.msra.mxu2 %v5993_v23 }
  0x48   : > { %1081 = vmatpush.bf16.msrb.mxu0 %v6025_v10  ;;  %v5953_v10 = vor.u32 %v7316_v7, %v5952_v6 }
  0x4c   : > { %1082 = vmatpush.bf16.msrb.mxu0 %v6013_v19 }
  0xa2   : > { %v832_v48 = vpop.xlane.xlu1 %831 }
  0xa3   : > { %v842_v50 = vmul.f32 %v8237_v43, %v832_v48  ;;  %v5976_v48 = vld [vmem:[%s10596_s3 + $0x68] sm:$0xf] }
  0xa5   : > { %v8251_v53 = vsub.f32 %v8221_v25, %v842_v50 }
  0xa7   : > { %v848_v55 = vmul.f32 %v8251_v53, %v8251_v53 }
  0xa9   : > { %v853_v56 = vsel %vm829_vm0, %v848_v55, 0.0  ;;  %v7321_v55 = vld [vmem:[%s10596_s3 + $0x44] sm:$0xf0] }
  0xc0   : > { %v699_v27 = vpop.f32.mrf.mxu0 }
  0xc1   : > { %v713_v28 = vpop.f32.mrf.mxu1 }
  0xc2   : > { %v714_v30 = vadd.f32 %v713_v28, %v699_v27  ;;  %v7340_v27 = vld [vmem:[%s10596_s3 + $0xdc] sm:$0xf0]  ;;  %v5997_v28 = vor.u32 %v7336_v22, %v5994_v24 }
  0xc4   : > { %v8228_v31 = vadd.f32 %v724_v29, %v714_v30  ;;  %v6001_v29 = vor.u32 %v7340_v27, %v6000_v26  ;;  %1065 = vmatpush.bf16.msra.mxu3 %v5997_v28  ;;  %v5980_v30 = vld [vmem:[%s10596_s3 + $0x90] sm:$0xf] }
  0xc6   : > { %825 = vadd.xlane.f32.xlu0 %v8228_v31  ;;  %1083 = vmatpush.bf16.msrb.mxu0 %v6001_v29  ;;  %v810_v29 = vld [vmem:[%s10597_s5] ss:$8 sm:$0x7] }
  0xc8   : > { %v701_v32 = vpop.f32.mrf.mxu0 }
  0xc9   : > { %v715_v33 = vpop.f32.mrf.mxu1 }
  0xca   : > { %v716_v35 = vadd.f32 %v715_v33, %v701_v32  ;;  %v7333_v32 = vld [vmem:[%s10596_s3 + $0xa4] sm:$0xf0]  ;;  %v7330_v33 = vld [vmem:[%s10596_s3 + $0x94] sm:$0xf]  ;;  %1084 = vmatpush.bf16.msrb.mxu0 %v5989_v40 }
  0xcc   : > { %v8234_v36 = vadd.f32 %v725_v34, %v716_v35  ;;  %v5981_v34 = vor.u32 %v7333_v32, %v5980_v30  ;;  %v5982_v35 = vld [vmem:[%s10596_s3 + $0xa8] sm:$0xf0] }
  0xcd   : > { %v5985_v39 = vor.u32 %v7330_v33, %v5982_v35 }
  0xce   : > { %827 = vadd.xlane.f32.xlu0 %v8234_v36  ;;  %1048 = vmatpush.bf16.msra.mxu2 %v5981_v34  ;;  %v896_v34 = vperm.slane %v810_v29, 0 }
  0xcf   : > { %1066 = vmatpush.bf16.msra.mxu3 %v5985_v39 }
 0x139   : > { %v826_v44 = vpop.xlane.xlu0 %825 }
 0x13a   : > { %v840_v45 = vmul.f32 %v8237_v43, %v826_v44  ;;  %v7324_v44 = vld [vmem:[%s10596_s3 + $0x64] sm:$0xf] }
 0x13c   : > { %v8241_v46 = vsub.f32 %v8228_v31, %v840_v45  ;;  %v5969_v45 = vor.u32 %v7327_v42, %v5968_v41 }
 0x13e   : > { %v846_v47 = vmul.f32 %v8241_v46, %v8241_v46  ;;  %1049 = vmatpush.bf16.msra.mxu2 %v5969_v45 }
 0x140   : > { %849 = vadd.xlane.f32.xlu1 %v846_v47  ;;  %v5970_v47 = vld [vmem:[%s10596_s3 + $0x78] sm:$0xf0] }
 0x141   : > { %v828_v49 = vpop.xlane.xlu0 %827  ;;  %v5973_v50 = vor.u32 %v7324_v44, %v5970_v47  ;;  %v902_v44 = vperm.slane %v5935_v38, 0 }
 0x142   : > { %v841_v51 = vmul.f32 %v8237_v43, %v828_v49  ;;  %v7328_v49 = vld [vmem:[%s10596_s3 + $0x7c] sm:$0xf0] }
 0x143   : > { %1067 = vmatpush.bf16.msra.mxu3 %v5973_v50 }
 0x144   : > { %v8248_v52 = vsub.f32 %v8234_v36, %v841_v51  ;;  %v5977_v51 = vor.u32 %v7328_v49, %v5976_v48 }
 0x146   : > { %v847_v54 = vmul.f32 %v8248_v52, %v8248_v52  ;;  %1085 = vmatpush.bf16.msrb.mxu0 %v5977_v51 }
 0x148   : > { %851 = vadd.xlane.f32.xlu2 %v847_v54  ;;  %v5956_v54 = vld [vmem:[%s10596_s3 + $0x30] sm:$0xf] }
 0x149   : > { %v5957_v57 = vor.u32 %v7321_v55, %v5956_v54 }
 0x14a   : > { %1086 = vmatpush.bf16.msrb.mxu0 %v5965_v62 }
 0x14b   : > { %1050 = vmatpush.bf16.msra.mxu2 %v5957_v57 }
 0x14e   : > { %1087 = vmatpush.bf16.msrb.mxu0 %v5953_v10 }
 0x14f   : > { %1051 = vmatpush.bf16.msra.mxu2 %v5945_v4 }
 0x150   : > { %854 = vadd.xlane.f32.xlu2 %v853_v56  ;;  %v7318_v56 = vld [vmem:[%s10596_s3 + $0x34] sm:$0xf] }
 0x151   : > { %v5961_v61 = vor.u32 %v7318_v56, %v5958_v58  ;;  %v8021_v58 = vmov 0  }
 0x152   : > { %7670 = vset.pattern.permute.xlu1 %v8021_v58 }
 0x153   : > { %1068 = vmatpush.bf16.msra.mxu3 %v5961_v61 }
 0x157   : > { %1069 = vmatpush.bf16.msra.mxu3 %v5949_v9 }
 0x1b3   : > { %v850_v63 = vpop.xlane.xlu1 %849 }
 0x1b4   : > { %v856_v0 = vmul.f32 %v850_v63, %v8237_v43  ;;  %v5940_v63 = vld [vmem:[%s10597_s5 + $0x6] ss:$8 sm:$0x7] }
 0x1b5   : > { %v911_v1 = vperm.slane %v5940_v63, 1  ;;  %v912_v7 = vperm.slane %v5940_v63, 2 }
 0x1b6   : > { %v859_v8 = vadd.f32 1e-05, %v856_v0  ;;  %v910_v0 = vperm.slane %v5940_v63, 0 }
 0x1b8   : > { %7679 = vrsqrt.f32 %v859_v8  ;;  %vm868_vm3 = vweird.f32 %v859_v8 }
 0x1bb   : > { %v852_v11 = vpop.xlane.xlu2 %851 }
 0x1bc   : > { %v857_v12 = vmul.f32 %v852_v11, %v8237_v43 }
 0x1be   : > { %v7680_v13 = vpop.eup %7679  ;;  %v860_v14 = vadd.f32 1e-05, %v857_v12  ;;  %v8420_v12 = vsel %vm829_vm0, 65535, %v8021_v58 }
 0x1bf   : > { %v863_v15 = vmul.f32 %v7680_v13, %v859_v8  ;;  %vm869_vm2 = vweird.f32 %v7680_v13 }
 0x1c0   : > { %7681 = vrsqrt.f32 %v860_v14  ;;  %vm870_vm4 = vmor %vm868_vm3, %vm869_vm2  ;;  %vm878_vm6 = vweird.f32 %v860_v14 }
 0x1c1   : > { %v864_v16 = vmul.f32 %v7680_v13, %v863_v15 }
 0x1c3   : > { %v865_v17 = vmul.f32 0.5, %v864_v16  ;;  %v855_v18 = vpop.xlane.xlu2 %854 }
 0x1c4   : > { %v858_v19 = vmul.f32 %v855_v18, %v8237_v43 }
 0x1c5   : > { %v866_v20 = vsub.f32 1.5, %v865_v17 }
 0x1c6   : > { %v7682_v21 = vpop.eup %7681  ;;  %v861_v22 = vadd.f32 1e-05, %v858_v19 }
 0x1c7   : > { %v867_v23 = vmul.f32 %v7680_v13, %v866_v20  ;;  %v873_v24 = vmul.f32 %v7682_v21, %v860_v14  ;;  %vm879_vm5 = vweird.f32 %v7682_v21 }
 0x1c8   : > { %7683 = vrsqrt.f32 %v861_v22  ;;  %vm880_vm7 = vmor %vm878_vm6, %vm879_vm5  ;;  %vm888_vm8 = vweird.f32 %v861_v22 }
 0x1c9   : > { %v874_v26 = vmul.f32 %v7682_v21, %v873_v24  ;;  %v871_v27 = vsel %vm870_vm4, %v7680_v13, %v867_v23 }
 0x1ca   : > { %v892_v33 = vmul.f32 %v871_v27, %v8241_v46 }
 0x1cb   : > { %v875_v28 = vmul.f32 0.5, %v874_v26 }
 0x1cc   : > { %v898_v42 = vmul.f32 %v896_v34, %v892_v33 }
 0x1cd   : > { %v876_v30 = vsub.f32 1.5, %v875_v28 }
 0x1ce   : > { %v7684_v32 = vpop.eup %7683  ;;  %v904_v46 = vadd.f32 %v902_v44, %v898_v42 }
 0x1cf   : > { %v877_v35 = vmul.f32 %v7682_v21, %v876_v30  ;;  %v883_v37 = vmul.f32 %v7684_v32, %v861_v22  ;;  %vm889_vm9 = vweird.f32 %v7684_v32 }
 0x1d0   : > { %vm890_vm10 = vmor %vm888_vm8, %vm889_vm9 }
 0x1d1   : > { %v881_v39 = vsel %vm880_vm7, %v7682_v21, %v877_v35  ;;  %v884_v40 = vmul.f32 %v7684_v32, %v883_v37 }
 0x1d2   : > { %v893_v41 = vmul.f32 %v881_v39, %v8248_v52 }
 0x1d3   : > { %v885_v45 = vmul.f32 0.5, %v884_v40 }
 0x1d4   : > { %v899_v47 = vmul.f32 %v896_v34, %v893_v41 }
 0x1d5   : > { %v886_v48 = vsub.f32 1.5, %v885_v45 }
 0x1d6   : > { %v905_v49 = vadd.f32 %v902_v44, %v899_v47 }
 0x1d7   : > { %v887_v50 = vmul.f32 %v7684_v32, %v886_v48 }
 0x1d8   : > { %v907_v51 = vpack.c.bf16 %v905_v49, %v904_v46 }
 0x1d9   : > { %v891_v54 = vsel %vm890_vm10, %v7684_v32, %v887_v50 }
 0x1da   : > { %1052 = vmatmul.bf16.vlgmr.msra.gmra.mxu2 %v907_v51  ;;  %1070 = vmatmul.bf16.vlgmr.msra.gmra.mxu3 %v907_v51  ;;  %v894_v55 = vmul.f32 %v891_v54, %v8251_v53 }
 0x1db   : > { %1088 = vmatmul.bf16.vlgmr.msrb.gmra.mxu0 %v907_v51 }
 0x1dc   : > { %v900_v56 = vmul.f32 %v896_v34, %v894_v55 }
 0x1de   : > { %v906_v52 = vadd.f32 %v902_v44, %v900_v56 }
 0x1e0   : > { %v908_v57 = vpack.c.bf16 %v906_v52, %v906_v52 }
 0x1ea   : > { %1057 = vmatmul.bf16.gmra.mxu2 %v908_v57  ;;  %1075 = vmatmul.bf16.gmra.mxu3 %v908_v57 }
 0x1eb   : > { %1093 = vmatmul.bf16.gmra.mxu0 %v908_v57 }
 0x258   : > { %v1089_v59 = vpop.f32.mrf.mxu0 }
 0x259   : > { %v1090_v19 = vadd.f32 %v1089_v59, %v912_v7 }
 0x25d   : > { %v1053_v60 = vpop.f32.mrf.mxu2  ;;  %v1071_v61 = vpop.f32.mrf.mxu3 }
 0x25e   : > { %v1054_v3 = vadd.f32 %v1053_v60, %v910_v0  ;;  %v1072_v4 = vadd.f32 %v1071_v61, %v911_v1 }
 0x260   : > { %v1091_v62 = vpop.f32.mrf.mxu0 }
 0x261   : > { %v1092_v14 = vadd.f32 %v1091_v62, %v912_v7 }
 0x263   : > { %v8423_v22 = vpack.c.bf16 %v1092_v14, %v1090_v19 }
 0x265   : > { %v1055_v2 = vpop.f32.mrf.mxu2  ;;  %v1073_v53 = vpop.f32.mrf.mxu3 }
 0x266   : > { %v1056_v5 = vadd.f32 %v1055_v2, %v910_v0  ;;  %v1074_v6 = vadd.f32 %v1073_v53, %v911_v1 }
 0x268   : > { %v1098_v8 = vpack.c.bf16 %v1056_v5, %v1054_v3  ;;  %v1100_v9 = vpack.c.bf16 %v1074_v6, %v1072_v4  ;;  %v1094_v10 = vpop.f32.mrf.mxu0 }
 0x269   : > { %v1095_v11 = vadd.f32 %v1094_v10, %v912_v7 }
 0x26a   : > { %1212 = vrot.lane.b32.xlu1 %v1100_v9, %s8022_s29  ;;  %1206 = vrot.lane.b32.xlu2 %v1098_v8, %s8022_s29  ;;  %v1112_v29 = vsel %vm1104_vm11, %v1100_v9, 0 }
 0x26b   : > { %v1103_v13 = vpack.c.bf16 %v1095_v11, %v1095_v11 }
 0x26d   : > { %v1058_v15 = vpop.f32.mrf.mxu2  ;;  %v1076_v16 = vpop.f32.mrf.mxu3  ;;  %v1184_v17 = vand.u32 %v8420_v12, %v1103_v13 }
 0x26e   : > { %v1077_v18 = vadd.f32 %v1076_v16, %v911_v1  ;;  %v1059_v24 = vadd.f32 %v1058_v15, %v910_v0 }
 0x26f   : > { %1192 = vmatpush.bf16.msrb.mxu2 %v1184_v17 }
 0x270   : > { %v1101_v20 = vpack.c.bf16 %v1077_v18, %v1077_v18  ;;  %v1096_v21 = vpop.f32.mrf.mxu0  ;;  %v1099_v28 = vpack.c.bf16 %v1059_v24, %v1059_v24 }
 0x272   : > { %1214 = vrot.lane.b32.xlu0 %v1101_v20, %s8022_s29  ;;  %v1115_v23 = vsel %vm1104_vm11, %v1101_v20, 0 }
 0x273   : > { %1193 = vmatpush.bf16.msrb.mxu2 %v8423_v22  ;;  %1123 = vmatpush.bf16.xpose.msrb.mxu1 %v1115_v23 }
 0x275   : > { %v1060_v26 = vpop.f32.mrf.mxu2  ;;  %v1078_v27 = vpop.f32.mrf.mxu3 }
 0x27a   : > { %1208 = vrot.lane.b32.xlu0 %v1099_v28, %s8022_s29 }
 0x27b   : > { %1124 = vmatpush.bf16.xpose.msrb.mxu1 %v1112_v29 }
 0x282   : > { %6038 = vmatmul.msk.bf16.vlgmr.msrb.gmra.mxu1 %vm1104_vm11, %v1098_v8 }
 0x292   : > { %6039 = vmatmul.msk.bf16.gmra.mxu1 %vm1104_vm11, %v1099_v28 }
 0x2c4   : > { %v1207_v35 = vpop.permute.xlu2 %1206 }
 0x2dc   : > { %v1213_v33 = vpop.permute.xlu1 %1212 }
 0x2dd   : > { %v1223_v34 = vsel %vm1104_vm11, %v1213_v33, 0 }
 0x2e4   : > { %v1215_v30 = vpop.permute.xlu0 %1214 }
 0x2e5   : > { %v1226_v32 = vsel %vm1104_vm11, %v1215_v30, 0 }
 0x2e6   : > { %1234 = vmatpush.bf16.xpose.msrb.mxu3 %v1226_v32 }
 0x2ec   : > { %v1209_v40 = vpop.permute.xlu0 %1208 }
 0x2ee   : > { %1235 = vmatpush.bf16.xpose.msrb.mxu3 %v1223_v34 }
 0x2f5   : > { %6042 = vmatmul.msk.bf16.vlgmr.msrb.gmra.mxu3 %vm1104_vm11, %v1207_v35 }
 0x2ff   : > { %v1126_v37 = vpop.f32.mrf.mxu1 }
 0x300   : > { %v1135_v38 = vmul.f32 0.125, %v1126_v37 }
 0x302   : > { %v1139_v39 = vsel %vm1138_vm12, %v1135_v38, -inf }
 0x303   : > { %1140 = vmax.xlane.f32.xlu0 %v1139_v39 }
 0x305   : > { %6043 = vmatmul.msk.bf16.gmra.mxu3 %vm1104_vm11, %v1209_v40 }
 0x307   : > { %v1128_v41 = vpop.f32.mrf.mxu1 }
 0x308   : > { %v1136_v46 = vmul.f32 0.125, %v1128_v41 }
 0x30a   : > { %v1142_v51 = vsel %vm1138_vm12, %v1136_v46, -inf }
 0x30f   : > { %v1131_v42 = vpop.f32.mrf.mxu1 }
 0x310   : > { %v1137_v6 = vmul.f32 0.125, %v1131_v42 }
 0x312   : > { %v1146_v9 = vsel %vm1145_vm13, %v1137_v6, -inf }
 0x317   : > { %v1133_v44 = vpop.f32.mrf.mxu1 }
 0x376   : > { %v1141_v2 = vpop.xlane.xlu0 %1140 }
 0x377   : > { %v1149_v3 = vsub.f32 %v1135_v38, %v1141_v2  ;;  %v6066_v2 = vld [vmem:[%s10596_s3 + $0x110] sm:$0xf0] }
 0x378   : > { %v1237_v45 = vpop.f32.mrf.mxu3 }
 0x379   : > { %v1246_v47 = vmul.f32 0.125, %v1237_v45  ;;  %v1152_v5 = vmul.f32 1.442695, %v1149_v3  ;;  %v7337_v3 = vld [vmem:[%s10596_s3 + $0xcc] sm:$0xf] }
 0x37b   : > { %v1249_v48 = vsel %vm1138_vm12, %v1246_v47, -inf }
 0x37c   : > { %1250 = vmax.xlane.f32.xlu2 %v1249_v48 }
 0x380   : > { %v1239_v49 = vpop.f32.mrf.mxu3 }
 0x381   : > { %v1247_v50 = vmul.f32 0.125, %v1239_v49 }
 0x383   : > { %v1252_v54 = vsel %vm1138_vm12, %v1247_v50, -inf }
 0x384   : > { %1143 = vmax.xlane.f32.xlu2 %v1142_v51  ;;  %1253 = vmax.xlane.f32.xlu1 %v1252_v54 }
 0x388   : > { %v1242_v55 = vpop.f32.mrf.mxu3 }
 0x389   : > { %v1248_v56 = vmul.f32 0.125, %v1242_v55 }
 0x38b   : > { %v1255_v52 = vsel %vm1145_vm13, %v1248_v56, -inf }
 0x38c   : > { %1256 = vmax.xlane.f32.xlu1 %v1255_v52 }
 0x390   : > { %v1244_v57 = vpop.f32.mrf.mxu3 }
 0x3a5   : > { %1288 = vrot.lane.b32.xlu1 %v1103_v13, %s8022_s29 }
 0x3ef   : > { %v1251_v58 = vpop.xlane.xlu2 %1250 }
 0x3f0   : > { %v1258_v59 = vsub.f32 %v1246_v47, %v1251_v58 }
 0x3f2   : > { %v1261_v60 = vmul.f32 1.442695, %v1258_v59  ;;  %v7355_v59 = vld [vmem:[%s10596_s3 + $0x15c] sm:$0xf] }
 0x3f4   : > { %7685 = vpow2.f32 %v1261_v60  ;;  %v6074_v60 = vld [vmem:[%s10596_s3 + $0x170] sm:$0xf0] }
 0x3f7   : > { %v1254_v61 = vpop.xlane.xlu1 %1253  ;;  %v1144_v7 = vpop.xlane.xlu2 %1143 }
 0x3f8   : > { %v1259_v62 = vsub.f32 %v1247_v50, %v1254_v61  ;;  %v1150_v8 = vsub.f32 %v1136_v46, %v1144_v7  ;;  %v7349_v61 = vld [vmem:[%s10596_s3 + $0x12c] sm:$0xf]  ;;  %v6058_v7 = vld [vmem:[%s10596_s3 + $0xb0] sm:$0xf0] }
 0x3fa   : > { %v7686_v63 = vpop.eup %7685  ;;  %v1263_v0 = vmul.f32 1.442695, %v1259_v62  ;;  %v1154_v10 = vmul.f32 1.442695, %v1150_v8  ;;  %v6077_v62 = vor.u32 %v7355_v59, %v6074_v60 }
 0x3fb   : > { %v1267_v1 = vsel %vm1138_vm12, %v7686_v63, 0.0 }
 0x3fc   : > { %1268 = vadd.xlane.f32.xlu0 %v1267_v1  ;;  %7687 = vpow2.f32 %v1263_v0  ;;  %1367 = vmatpush.bf16.msra.mxu0 %v6077_v62  ;;  %v7343_v1 = vld [vmem:[%s10596_s3 + $0xfc] sm:$0xf]  ;;  %v6136_v62 = vld [vmem:[%s10596_s3 + $0x160] sm:$0xf] }
 0x3fd   : > { %7689 = vpow2.f32 %v1152_v5 }
 0x3fe   : > { %7691 = vpow2.f32 %v1154_v10  ;;  %v6054_v10 = vld [vmem:[%s10596_s3 + $0x80] sm:$0xf0] }
 0x3ff   : > { %v1257_v11 = vpop.xlane.xlu1 %1256 }
 0x400   : > { %v1260_v19 = vsub.f32 %v1248_v56, %v1257_v11 }
 0x402   : > { %v7688_v53 = vpop.eup %7687  ;;  %v1265_v20 = vmul.f32 1.442695, %v1260_v19  ;;  %v6046_v19 = vld [vmem:[%s10596_s3 + $0x20] sm:$0xf0] }
 0x403   : > { %v1270_v4 = vsel %vm1138_vm12, %v7688_v53, 0.0  ;;  %v7690_v13 = vpop.eup %7689 }
 0x404   : > { %1271 = vadd.xlane.f32.xlu2 %v1270_v4  ;;  %v1158_v14 = vsel %vm1138_vm12, %v7690_v13, 0.0  ;;  %v7692_v17 = vpop.eup %7691  ;;  %7693 = vpow2.f32 %v1265_v20  ;;  %v6062_v4 = vld [vmem:[%s10596_s3 + $0xe0] sm:$0xf0] }
 0x405   : > { %v1161_v18 = vsel %vm1138_vm12, %v7692_v17, 0.0  ;;  %v6065_v5 = vor.u32 %v7337_v3, %v6062_v4  ;;  %v6128_v3 = vld [vmem:[%s10596_s3 + $0x130] sm:$0xf]  ;;  %v7353_v4 = vld [vmem:[%s10596_s3 + $0x144] sm:$0xf0] }
 0x40a   : > { %v7694_v21 = vpop.eup %7693 }
 0x40b   : > { %v1273_v23 = vsel %vm1145_vm13, %v7694_v21, 0.0 }
 0x40c   : > { %1147 = vmax.xlane.f32.xlu2 %v1146_v9  ;;  %v7325_v9 = vld [vmem:[%s10596_s3 + $0x6c] sm:$0xf] }
 0x40d   : > { %v6057_v11 = vor.u32 %v7325_v9, %v6054_v10  ;;  %v6120_v9 = vld [vmem:[%s10596_s3 + $0x100] sm:$0xf]  ;;  %v7347_v10 = vld [vmem:[%s10596_s3 + $0x114] sm:$0xf0] }
 0x410   : > { %1286 = vrot.lane.b32.xlu0 %v8423_v22, %s8022_s29 }
 0x414   : > { %1159 = vadd.xlane.f32.xlu2 %v1158_v14  ;;  %v6050_v14 = vld [vmem:[%s10596_s3 + $0x50] sm:$0xf0] }
 0x417   : > { %v1289_v15 = vpop.permute.xlu1 %1288 }
 0x418   : > { %v1298_v16 = vand.u32 %v1289_v15, %v8420_v12 }
 0x41a   : > { %1306 = vmatpush.bf16.msra.mxu1 %v1298_v16 }
 0x41c   : > { %1162 = vadd.xlane.f32.xlu2 %v1161_v18  ;;  %v7313_v18 = vld [vmem:[%s10596_s3 + $0xc] sm:$0xf] }
 0x41d   : > { %v6049_v20 = vor.u32 %v7313_v18, %v6046_v19  ;;  %v7338_v18 = vld [vmem:[%s10596_s3 + $0xd4] sm:$0xf] }
 0x43a   : > { %1274 = vadd.xlane.f32.xlu0 %v1273_v23 }
 0x46f   : > { %v1269_v22 = vpop.xlane.xlu0 %1268 }
 0x470   : > { %7695 = vrcp.f32 %v1269_v22 }
 0x476   : > { %v7696_v26 = vpop.eup %7695 }
 0x477   : > { %v1272_v24 = vpop.xlane.xlu2 %1271  ;;  %v1279_v32 = vmul.f32 %v7696_v26, %v7686_v63  ;;  %v6070_v63 = vld [vmem:[%s10596_s3 + $0x140] sm:$0xf0] }
 0x478   : > { %7697 = vrcp.f32 %v1272_v24  ;;  %v6073_v0 = vor.u32 %v7349_v61, %v6070_v63  ;;  %v7359_v63 = vld [vmem:[%s10596_s3 + $0x174] sm:$0xf0] }
 0x47a   : > { %1368 = vmatpush.bf16.msra.mxu0 %v6073_v0  ;;  %v7356_v0 = vld [vmem:[%s10596_s3 + $0x164] sm:$0xf] }
 0x47e   : > { %v7698_v27 = vpop.eup %7697 }
 0x47f   : > { %v1280_v28 = vmul.f32 %v7698_v27, %v7688_v53  ;;  %v1148_v29 = vpop.xlane.xlu2 %1147  ;;  %v6069_v53 = vor.u32 %v7343_v1, %v6066_v2  ;;  %v6137_v1 = vor.u32 %v7359_v63, %v6136_v62  ;;  %v6138_v2 = vld [vmem:[%s10596_s3 + $0x178] sm:$0xf0] }
 0x480   : > { %v1151_v30 = vsub.f32 %v1137_v6, %v1148_v29  ;;  %v7331_v6 = vld [vmem:[%s10596_s3 + $0x9c] sm:$0xf] }
 0x481   : > { %v1282_v35 = vpack.c.bf16 %v1280_v28, %v1279_v32  ;;  %1369 = vmatpush.bf16.msra.mxu0 %v6069_v53  ;;  %v6061_v8 = vor.u32 %v7331_v6, %v6058_v7  ;;  %v6141_v53 = vor.u32 %v7356_v0, %v6138_v2  ;;  %1555 = vmatpush.bf16.msra.mxu2 %v6137_v1  ;;  %v6130_v7 = vld [vmem:[%s10596_s3 + $0x148] sm:$0xf0] }
 0x482   : > { %v1287_v33 = vpop.permute.xlu0 %1286  ;;  %v1156_v34 = vmul.f32 1.442695, %v1151_v30  ;;  %v6129_v6 = vor.u32 %v7353_v4, %v6128_v3 }
 0x483   : > { %1307 = vmatpush.bf16.msra.mxu1 %v1287_v33  ;;  %1573 = vmatpush.bf16.msra.mxu3 %v6141_v53 }
 0x484   : > { %7699 = vpow2.f32 %v1156_v34 }
 0x485   : > { %1370 = vmatpush.bf16.msra.mxu0 %v6065_v5  ;;  %v7350_v5 = vld [vmem:[%s10596_s3 + $0x134] sm:$0xf]  ;;  %1556 = vmatpush.bf16.msra.mxu2 %v6129_v6  ;;  %v5936_v6 = vld [vmem:[%s10597_s5 + $0x2] ss:$8 sm:$0x7] }
 0x486   : > { %6044 = vmatmul.msk.bf16.vlgmr.msra.gmra.mxu1 %vm1138_vm12, %v1282_v35 }
 0x487   : > { %v1160_v37 = vpop.xlane.xlu2 %1159 }
 0x488   : > { %7701 = vrcp.f32 %v1160_v37  ;;  %v5938_v37 = vld [vmem:[%s10597_s5 + $0x4] ss:$8 sm:$0x7] }
 0x489   : > { %1371 = vmatpush.bf16.msra.mxu0 %v6061_v8  ;;  %v6133_v8 = vor.u32 %v7350_v5, %v6130_v7 }
 0x48a   : > { %v7700_v38 = vpop.eup %7699 }
 0x48b   : > { %v1164_v39 = vsel %vm1145_vm13, %v7700_v38, 0.0  ;;  %1574 = vmatpush.bf16.msra.mxu3 %v6133_v8 }
 0x48c   : > { %1165 = vadd.xlane.f32.xlu1 %v1164_v39 }
 0x48d   : > { %1372 = vmatpush.bf16.msra.mxu0 %v6057_v11  ;;  %v7344_v11 = vld [vmem:[%s10596_s3 + $0x104] sm:$0xf] }
 0x48e   : > { %v7702_v41 = vpop.eup %7701 }
 0x48f   : > { %v1163_v40 = vpop.xlane.xlu2 %1162  ;;  %v1170_v44 = vmul.f32 %v7702_v41, %v7690_v13  ;;  %v7319_v13 = vld [vmem:[%s10596_s3 + $0x3c] sm:$0xf] }
 0x490   : > { %7703 = vrcp.f32 %v1163_v40  ;;  %v6053_v15 = vor.u32 %v7319_v13, %v6050_v14  ;;  %v6121_v13 = vor.u32 %v7347_v10, %v6120_v9  ;;  %v6122_v14 = vld [vmem:[%s10596_s3 + $0x118] sm:$0xf0]  ;;  %v1457_v9 = vperm.slane %v5936_v6, 0 }
 0x492   : > { %1373 = vmatpush.bf16.msra.mxu0 %v6053_v15  ;;  %v6125_v15 = vor.u32 %v7344_v11, %v6122_v14  ;;  %1557 = vmatpush.bf16.msra.mxu2 %v6121_v13  ;;  %v5937_v11 = vld [vmem:[%s10597_s5 + $0x3] ss:$8 sm:$0x7] }
 0x494   : > { %1575 = vmatpush.bf16.msra.mxu3 %v6125_v15 }
 0x496   : > { %v7704_v42 = vpop.eup %7703  ;;  %1374 = vmatpush.bf16.msra.mxu0 %v6049_v20  ;;  %v6114_v20 = vld [vmem:[%s10596_s3 + $0xe8] sm:$0xf0] }
 0x497   : > { %v1171_v45 = vmul.f32 %v7704_v42, %v7692_v17 }
 0x499   : > { %v1173_v47 = vpack.c.bf16 %v1171_v45, %v1170_v44 }
 0x49b   : > { %6040 = vmatmul.msk.bf16.vlgmr.msrb.gmra.mxu2 %vm1138_vm12, %v1173_v47 }
 0x4ad   : > { %v1275_v48 = vpop.xlane.xlu0 %1274 }
 0x4ae   : > { %7705 = vrcp.f32 %v1275_v48 }
 0x4b4   : > { %v7706_v46 = vpop.eup %7705 }
 0x4b5   : > { %v1281_v49 = vmul.f32 %v7706_v46, %v7694_v21 }
 0x4b7   : > { %v1283_v50 = vpack.c.bf16 %v1281_v49, %v1281_v49 }
 0x4b9   : > { %6045 = vmatmul.msk.bf16.gmra.mxu1 %vm1138_vm12, %v1283_v50 }
 0x4ff   : > { %v1166_v51 = vpop.xlane.xlu1 %1165 }
 0x500   : > { %7707 = vrcp.f32 %v1166_v51 }
 0x503   : > { %v1309_v54 = vpop.f32.mrf.mxu1 }
 0x506   : > { %v7708_v55 = vpop.eup %7707 }
 0x507   : > { %v1172_v56 = vmul.f32 %v7708_v55, %v7700_v38  ;;  %v1389_v38 = vperm.slane %v5938_v37, 0  ;;  %v6088_v37 = vld [vmem:[%s10596_s3 + $0x40] sm:$0xf] }
 0x509   : > { %v1174_v52 = vpack.c.bf16 %v1172_v56, %v1172_v56 }
 0x50b   : > { %v1311_v57 = vpop.f32.mrf.mxu1  ;;  %6041 = vmatmul.msk.bf16.gmra.mxu2 %vm1138_vm12, %v1174_v52 }
 0x50c   : > { %v7650_v58 = vpack.i.bf16 %v1311_v57, %v1309_v54 }
 0x50e   : > { %7651 = vrot.lane.b32.xlu2 %v7650_v58, %s8022_s29 }
 0x51e   : > { %v1195_v21 = vpop.f32.mrf.mxu2 }
 0x526   : > { %v1197_v26 = vpop.f32.mrf.mxu2 }
 0x536   : > { %v1314_v16 = vpop.f32.mrf.mxu1 }
 0x537   : > { %1325 = vrot.lane.b32.xlu2 %v1314_v16, %s8022_s29  ;;  %v6112_v16 = vld [vmem:[%s10596_s3 + $0xd0] sm:$0xf] }
 0x53e   : > { %v1316_v17 = vpop.f32.mrf.mxu1 }
 0x53f   : > { %v7341_v17 = vld [vmem:[%s10596_s3 + $0xe4] sm:$0xf0] }
 0x540   : > { %v6113_v19 = vor.u32 %v7341_v17, %v6112_v16  ;;  %v1463_v16 = vperm.slane %v5937_v11, 0 }
 0x542   : > { %1558 = vmatpush.bf16.msra.mxu2 %v6113_v19 }
 0x568   : > { %v7652_v23 = vpop.permute.xlu2 %7651 }
 0x569   : > { %v7654_v22 = vunpack.i.h.bf16 %v7652_v23  ;;  %v7653_v24 = vunpack.i.l.bf16 %v7652_v23  ;;  %v6104_v23 = vld [vmem:[%s10596_s3 + $0xa0] sm:$0xf] }
 0x56b   : > { %v1331_v27 = vsel %vm1104_vm11, %v1197_v26, %v7654_v22  ;;  %v1330_v28 = vsel %vm1104_vm11, %v1195_v21, %v7653_v24  ;;  %v6117_v21 = vor.u32 %v7338_v18, %v6114_v20  ;;  %v7335_v22 = vld [vmem:[%s10596_s3 + $0xb4] sm:$0xf0]  ;;  %v7332_v24 = vld [vmem:[%s10596_s3 + $0xa4] sm:$0xf] }
 0x56c   : > { %v1333_v29 = vpack.c.bf16 %v1331_v27, %v1330_v28  ;;  %v6105_v26 = vor.u32 %v7335_v22, %v6104_v23  ;;  %v6106_v27 = vld [vmem:[%s10596_s3 + $0xb8] sm:$0xf0] }
 0x56d   : > { %1576 = vmatpush.bf16.msra.mxu3 %v6117_v21  ;;  %v6109_v28 = vor.u32 %v7332_v24, %v6106_v27 }
 0x56e   : > { %1375 = vmatmul.bf16.vlgmr.msra.gmra.mxu0 %v1333_v29  ;;  %1559 = vmatpush.bf16.msra.mxu2 %v6105_v26  ;;  %v6096_v29 = vld [vmem:[%s10596_s3 + $0x70] sm:$0xf] }
 0x571   : > { %1577 = vmatpush.bf16.msra.mxu3 %v6109_v28 }
 0x58e   : > { %v1200_v30 = vpop.f32.mrf.mxu2 }
 0x591   : > { %v1326_v32 = vpop.permute.xlu2 %1325 }
 0x592   : > { %v1332_v33 = vsel %vm1104_vm11, %v1200_v30, %v1326_v32  ;;  %v7329_v30 = vld [vmem:[%s10596_s3 + $0x84] sm:$0xf0]  ;;  %v7326_v32 = vld [vmem:[%s10596_s3 + $0x74] sm:$0xf] }
 0x593   : > { %v1334_v34 = vpack.c.bf16 %v1332_v33, %v1332_v33  ;;  %v6097_v33 = vor.u32 %v7329_v30, %v6096_v29 }
 0x595   : > { %1380 = vmatmul.bf16.gmra.mxu0 %v1334_v34  ;;  %v6098_v34 = vld [vmem:[%s10596_s3 + $0x88] sm:$0xf0]  ;;  %1560 = vmatpush.bf16.msra.mxu2 %v6097_v33 }
 0x596   : > { %v1202_v35 = vpop.f32.mrf.mxu2 }
 0x597   : > { %v6101_v35 = vor.u32 %v7326_v32, %v6098_v34 }
 0x599   : > { %1578 = vmatpush.bf16.msra.mxu3 %v6101_v35  ;;  %v7367_v35 = vld [vmem:[%s10598_s4 + $0x38] sm:$0xff] }
 0x59a   : > { %1745 = vmatpush.bf16.msrb.mxu1 %v7367_v35 }
 0x5eb   : > { %v1376_v39 = vpop.f32.mrf.mxu0 }
 0x5ec   : > { %v1385_v40 = vadd.f32 %v1376_v39, %v8228_v31  ;;  %v7320_v39 = vld [vmem:[%s10596_s3 + $0x44] sm:$0xf] }
 0x5ee   : > { %v8513_v41 = vadd.f32 %v1389_v38, %v1385_v40 }
 0x5f0   : > { %1394 = vadd.xlane.f32.xlu2 %v8513_v41 }
 0x5f3   : > { %v1378_v42 = vpop.f32.mrf.mxu0 }
 0x5f4   : > { %v1386_v44 = vadd.f32 %v1378_v42, %v8234_v36  ;;  %v6090_v42 = vld [vmem:[%s10596_s3 + $0x58] sm:$0xf0] }
 0x5f6   : > { %v8517_v45 = vadd.f32 %v1389_v38, %v1386_v44  ;;  %v6080_v44 = vld [vmem:[%s10596_s3 + $0x10] sm:$0xf] }
 0x5f8   : > { %1396 = vadd.xlane.f32.xlu0 %v8517_v45 }
 0x612   : > { %v1381_v47 = vpop.f32.mrf.mxu0 }
 0x613   : > { %v1387_v48 = vadd.f32 %v1381_v47, %v8221_v25  ;;  %v7317_v47 = vld [vmem:[%s10596_s3 + $0x24] sm:$0xf0] }
 0x615   : > { %v8521_v46 = vadd.f32 %v1389_v38, %v1387_v48  ;;  %v7323_v38 = vld [vmem:[%s10596_s3 + $0x54] sm:$0xf0] }
 0x616   : > { %v6089_v40 = vor.u32 %v7323_v38, %v6088_v37  ;;  %v7375_v37 = vld [vmem:[%s10598_s4 + $0x78] sm:$0xff]  ;;  %v7366_v38 = vld [vmem:[%s10598_s4 + $0x30] sm:$0xff] }
 0x617   : > { %v1398_v49 = vsel %vm829_vm0, %v8521_v46, 0.0  ;;  %1763 = vmatpush.bf16.msrb.mxu0 %v7375_v37  ;;  %1746 = vmatpush.bf16.msrb.mxu1 %v7366_v38 }
 0x618   : > { %1399 = vadd.xlane.f32.xlu1 %v1398_v49  ;;  %v6093_v49 = vor.u32 %v7320_v39, %v6090_v42  ;;  %1561 = vmatpush.bf16.msra.mxu2 %v6089_v40  ;;  %v7365_v39 = vld [vmem:[%s10598_s4 + $0x28] sm:$0xff]  ;;  %v7364_v42 = vld [vmem:[%s10598_s4 + $0x20] sm:$0xff] }
 0x619   : > { %v7373_v40 = vld [vmem:[%s10598_s4 + $0x68] sm:$0xff] }
 0x61a   : > { %v1383_v31 = vpop.f32.mrf.mxu0  ;;  %1579 = vmatpush.bf16.msra.mxu3 %v6093_v49  ;;  %v7362_v49 = vld [vmem:[%s10598_s4 + $0x10] sm:$0xff] }
 0x61b   : > { %v7314_v31 = vld [vmem:[%s10596_s3 + $0x14] sm:$0xf]  ;;  %1747 = vmatpush.bf16.msrb.mxu1 %v7365_v39 }
 0x61f   : > { %1748 = vmatpush.bf16.msrb.mxu1 %v7364_v42 }
 0x663   : > { %v1395_v50 = vpop.xlane.xlu2 %1394 }
 0x664   : > { %v1401_v51 = vmul.f32 %v1395_v50, %v8237_v43  ;;  %v6082_v50 = vld [vmem:[%s10596_s3 + $0x28] sm:$0xf0] }
 0x666   : > { %v8527_v54 = vsub.f32 %v8513_v41, %v1401_v51 }
 0x668   : > { %v1407_v36 = vmul.f32 %v8527_v54, %v8527_v54 }
 0x66a   : > { %1410 = vadd.xlane.f32.xlu0 %v1407_v36  ;;  %v6081_v36 = vor.u32 %v7317_v47, %v6080_v44  ;;  %v7372_v44 = vld [vmem:[%s10598_s4 + $0x60] sm:$0xff]  ;;  %v7363_v47 = vld [vmem:[%s10598_s4 + $0x18] sm:$0xff] }
 0x66b   : > { %v1397_v55 = vpop.xlane.xlu0 %1396  ;;  %1749 = vmatpush.bf16.msrb.mxu1 %v7363_v47 }
 0x66c   : > { %v1402_v25 = vmul.f32 %v1397_v55, %v8237_v43  ;;  %v6085_v55 = vor.u32 %v7314_v31, %v6082_v50  ;;  %1562 = vmatpush.bf16.msra.mxu2 %v6081_v36  ;;  %v7370_v31 = vld [vmem:[%s10598_s4 + $0x50] sm:$0xff]  ;;  %v7361_v50 = vld [vmem:[%s10598_s4 + $0x8] sm:$0xff] }
 0x66d   : > { %v5941_v36 = vld [vmem:[%s10597_s5 + $0x7] ss:$8 sm:$0x7] }
 0x66e   : > { %v8533_v56 = vsub.f32 %v8517_v45, %v1402_v25  ;;  %1580 = vmatpush.bf16.msra.mxu3 %v6085_v55  ;;  %v7360_v55 = vld [vmem:[%s10598_s4] sm:$0xff] }
 0x66f   : > { %1750 = vmatpush.bf16.msrb.mxu1 %v7362_v49 }
 0x670   : > { %v1408_v52 = vmul.f32 %v8533_v56, %v8533_v56 }
 0x672   : > { %1412 = vadd.xlane.f32.xlu1 %v1408_v52 }
 0x673   : > { %1751 = vmatpush.bf16.msrb.mxu1 %v7361_v50 }
 0x677   : > { %1752 = vmatpush.bf16.msrb.mxu1 %v7360_v55 }
 0x68b   : > { %v1400_v57 = vpop.xlane.xlu1 %1399 }
 0x68c   : > { %v1403_v58 = vmul.f32 %v1400_v57, %v8237_v43 }
 0x68e   : > { %v8539_v59 = vsub.f32 %v8521_v46, %v1403_v58 }
 0x690   : > { %v1409_v60 = vmul.f32 %v8539_v59, %v8539_v59 }
 0x692   : > { %v1414_v61 = vsel %vm829_vm0, %v1409_v60, 0.0 }
 0x693   : > { %1415 = vadd.xlane.f32.xlu0 %v1414_v61 }
 0x6dd   : > { %v1411_v48 = vpop.xlane.xlu0 %1410 }
 0x6de   : > { %v1417_v51 = vmul.f32 %v1411_v48, %v8237_v43  ;;  %v7371_v48 = vld [vmem:[%s10598_s4 + $0x58] sm:$0xff] }
 0x6e0   : > { %v1420_v25 = vadd.f32 1e-05, %v1417_v51  ;;  %v7369_v51 = vld [vmem:[%s10598_s4 + $0x48] sm:$0xff] }
 0x6e2   : > { %7709 = vrsqrt.f32 %v1420_v25  ;;  %vm1429_vm15 = vweird.f32 %v1420_v25 }
 0x6e5   : > { %v1413_v52 = vpop.xlane.xlu1 %1412 }
 0x6e6   : > { %v1418_v57 = vmul.f32 %v1413_v52, %v8237_v43  ;;  %v1471_v52 = vperm.slane %v5941_v36, 0 }
 0x6e8   : > { %v7710_v58 = vpop.eup %7709  ;;  %v1421_v60 = vadd.f32 1e-05, %v1418_v57  ;;  %v1472_v57 = vperm.slane %v5941_v36, 1 }
 0x6e9   : > { %v1424_v61 = vmul.f32 %v7710_v58, %v1420_v25  ;;  %vm1430_vm14 = vweird.f32 %v7710_v58  ;;  %v7368_v25 = vld [vmem:[%s10598_s4 + $0x40] sm:$0xff] }
 0x6ea   : > { %7711 = vrsqrt.f32 %v1421_v60  ;;  %vm1431_vm1 = vmor %vm1429_vm15, %vm1430_vm14  ;;  %vm1439_vm3 = vweird.f32 %v1421_v60 }
 0x6eb   : > { %v1425_v62 = vmul.f32 %v7710_v58, %v1424_v61 }
 0x6ed   : > { %v1426_v63 = vmul.f32 0.5, %v1425_v62 }
 0x6ef   : > { %v1427_v0 = vsub.f32 1.5, %v1426_v63 }
 0x6f0   : > { %v7712_v1 = vpop.eup %7711 }
 0x6f1   : > { %v1428_v2 = vmul.f32 %v7710_v58, %v1427_v0  ;;  %v1434_v53 = vmul.f32 %v7712_v1, %v1421_v60  ;;  %vm1440_vm2 = vweird.f32 %v7712_v1 }
 0x6f2   : > { %vm1441_vm4 = vmor %vm1439_vm3, %vm1440_vm2 }
 0x6f3   : > { %v1435_v3 = vmul.f32 %v7712_v1, %v1434_v53  ;;  %v1432_v4 = vsel %vm1431_vm1, %v7710_v58, %v1428_v2 }
 0x6f4   : > { %v1453_v8 = vmul.f32 %v1432_v4, %v8527_v54 }
 0x6f5   : > { %v1436_v5 = vmul.f32 0.5, %v1435_v3 }
 0x6f6   : > { %v1459_v15 = vmul.f32 %v1457_v9, %v1453_v8 }
 0x6f7   : > { %v1437_v7 = vsub.f32 1.5, %v1436_v5 }
 0x6f8   : > { %v1465_v18 = vadd.f32 %v1463_v16, %v1459_v15 }
 0x6f9   : > { %v1438_v10 = vmul.f32 %v7712_v1, %v1437_v7 }
 0x6fb   : > { %v1442_v13 = vsel %vm1441_vm4, %v7712_v1, %v1438_v10 }
 0x6fc   : > { %v1454_v14 = vmul.f32 %v1442_v13, %v8533_v56 }
 0x6fe   : > { %v1460_v17 = vmul.f32 %v1457_v9, %v1454_v14 }
 0x700   : > { %v1466_v19 = vadd.f32 %v1463_v16, %v1460_v17 }
 0x702   : > { %v1468_v20 = vpack.c.bf16 %v1466_v19, %v1465_v18 }
 0x704   : > { %1563 = vmatmul.bf16.vlgmr.msra.gmra.mxu2 %v1468_v20  ;;  %1581 = vmatmul.bf16.vlgmr.msra.gmra.mxu3 %v1468_v20 }
 0x706   : > { %v1416_v54 = vpop.xlane.xlu0 %1415 }
 0x707   : > { %v1419_v21 = vmul.f32 %v1416_v54, %v8237_v43 }
 0x709   : > { %v1422_v23 = vadd.f32 1e-05, %v1419_v21 }
 0x70b   : > { %7713 = vrsqrt.f32 %v1422_v23  ;;  %vm1449_vm6 = vweird.f32 %v1422_v23 }
 0x711   : > { %v7714_v22 = vpop.eup %7713 }
 0x712   : > { %v1444_v24 = vmul.f32 %v7714_v22, %v1422_v23  ;;  %vm1450_vm5 = vweird.f32 %v7714_v22 }
 0x713   : > { %vm1451_vm7 = vmor %vm1449_vm6, %vm1450_vm5 }
 0x714   : > { %v1445_v26 = vmul.f32 %v7714_v22, %v1444_v24 }
 0x716   : > { %v1446_v27 = vmul.f32 0.5, %v1445_v26 }
 0x718   : > { %v1447_v28 = vsub.f32 1.5, %v1446_v27 }
 0x71a   : > { %v1448_v56 = vmul.f32 %v7714_v22, %v1447_v28 }
 0x71c   : > { %v1452_v29 = vsel %vm1451_vm7, %v7714_v22, %v1448_v56 }
 0x71d   : > { %v1455_v30 = vmul.f32 %v1452_v29, %v8539_v59  ;;  %v7374_v59 = vld [vmem:[%s10598_s4 + $0x70] sm:$0xff] }
 0x71e   : > { %1764 = vmatpush.bf16.msrb.mxu0 %v7374_v59 }
 0x71f   : > { %v1461_v32 = vmul.f32 %v1457_v9, %v1455_v30 }
 0x721   : > { %v1467_v33 = vadd.f32 %v1463_v16, %v1461_v32 }
 0x722   : > { %1765 = vmatpush.bf16.msrb.mxu0 %v7373_v40 }
 0x723   : > { %v1469_v34 = vpack.c.bf16 %v1467_v33, %v1467_v33 }
 0x725   : > { %1568 = vmatmul.bf16.gmra.mxu2 %v1469_v34  ;;  %1586 = vmatmul.bf16.gmra.mxu3 %v1469_v34 }
 0x726   : > { %1766 = vmatpush.bf16.msrb.mxu0 %v7372_v44 }
 0x72a   : > { %1767 = vmatpush.bf16.msrb.mxu0 %v7371_v48 }
 0x72e   : > { %1768 = vmatpush.bf16.msrb.mxu0 %v7370_v31 }
 0x732   : > { %1769 = vmatpush.bf16.msrb.mxu0 %v7369_v51 }
 0x736   : > { %1770 = vmatpush.bf16.msrb.mxu0 %v7368_v25 }
 0x787   : > { %v1564_v58 = vpop.f32.mrf.mxu2  ;;  %v1582_v60 = vpop.f32.mrf.mxu3 }
 0x788   : > { %v1565_v61 = vadd.f32 %v1564_v58, %v1471_v52  ;;  %v1583_v62 = vadd.f32 %v1582_v60, %v1472_v57 }
 0x78a   : > { %v1597_v63 = vmul.f32 0.044715, %v1565_v61  ;;  %v1598_v0 = vmul.f32 0.044715, %v1583_v62  ;;  %v1591_v56 = vmul.f32 0.5, %v1565_v61  ;;  %v1592_v32 = vmul.f32 0.5, %v1583_v62 }
 0x78c   : > { %v1603_v1 = vmul.f32 %v1597_v63, %v1565_v61  ;;  %v1604_v2 = vmul.f32 %v1598_v0, %v1583_v62 }
 0x78e   : > { %v1609_v53 = vmul.f32 %v1603_v1, %v1565_v61  ;;  %v1610_v3 = vmul.f32 %v1604_v2, %v1583_v62 }
 0x78f   : > { %v1566_v4 = vpop.f32.mrf.mxu2  ;;  %v1584_v5 = vpop.f32.mrf.mxu3 }
 0x790   : > { %v1615_v6 = vadd.f32 %v1609_v53, %v1565_v61  ;;  %v1567_v7 = vadd.f32 %v1566_v4, %v1471_v52  ;;  %v1585_v8 = vadd.f32 %v1584_v5, %v1472_v57  ;;  %v1616_v9 = vadd.f32 %v1610_v3, %v1583_v62 }
 0x792   : > { %v1599_v10 = vmul.f32 0.044715, %v1567_v7  ;;  %v1600_v11 = vmul.f32 0.044715, %v1585_v8  ;;  %v1621_v13 = vmul.f32 0.7978846, %v1615_v6 }
 0x793   : > { %v1622_v15 = vmul.f32 0.7978846, %v1616_v9  ;;  %v1593_v29 = vmul.f32 0.5, %v1567_v7  ;;  %v1594_v33 = vmul.f32 0.5, %v1585_v8 }
 0x794   : > { %v1605_v14 = vmul.f32 %v1599_v10, %v1567_v7  ;;  %v1606_v16 = vmul.f32 %v1600_v11, %v1585_v8  ;;  %7715 = vtanh.f32 %v1621_v13 }
 0x795   : > { %7717 = vtanh.f32 %v1622_v15 }
 0x796   : > { %v1611_v17 = vmul.f32 %v1605_v14, %v1567_v7  ;;  %v1612_v18 = vmul.f32 %v1606_v16, %v1585_v8 }
 0x798   : > { %v1617_v19 = vadd.f32 %v1611_v17, %v1567_v7  ;;  %v1618_v20 = vadd.f32 %v1612_v18, %v1585_v8  ;;  %v5939_v7 = vld [vmem:[%s10597_s5 + $0x5] ss:$8 sm:$0x7] }
 0x799   : > { %v1785_v11 = vperm.slane %v5939_v7, 0  ;;  %v7400_v7 = vld [vmem:[%s10596_s3 + $0x244] sm:$0xf] }
 0x79a   : > { %v1623_v54 = vmul.f32 0.7978846, %v1617_v19  ;;  %v1624_v21 = vmul.f32 0.7978846, %v1618_v20  ;;  %v7716_v23 = vpop.eup %7715 }
 0x79b   : > { %v7718_v22 = vpop.eup %7717  ;;  %v1633_v24 = vadd.f32 1.0, %v7716_v23 }
 0x79c   : > { %7719 = vtanh.f32 %v1623_v54  ;;  %v1634_v27 = vadd.f32 1.0, %v7718_v22 }
 0x79d   : > { %7721 = vtanh.f32 %v1624_v21  ;;  %v1639_v35 = vmul.f32 %v1633_v24, %v1591_v56 }
 0x79e   : > { %v1640_v38 = vmul.f32 %v1634_v27, %v1592_v32 }
 0x7a2   : > { %v7720_v26 = vpop.eup %7719 }
 0x7a3   : > { %v7722_v28 = vpop.eup %7721  ;;  %v1635_v30 = vadd.f32 1.0, %v7720_v26 }
 0x7a4   : > { %v1636_v34 = vadd.f32 1.0, %v7722_v28 }
 0x7a5   : > { %v1641_v37 = vmul.f32 %v1635_v30, %v1593_v29 }
 0x7a6   : > { %v1642_v59 = vmul.f32 %v1636_v34, %v1594_v33 }
 0x7a7   : > { %v1645_v39 = vpack.c.bf16 %v1641_v37, %v1639_v35 }
 0x7a8   : > { %v1569_v40 = vpop.f32.mrf.mxu2  ;;  %v1587_v42 = vpop.f32.mrf.mxu3  ;;  %v1646_v44 = vpack.c.bf16 %v1642_v59, %v1640_v38  ;;  %v6380_v59 = vld [vmem:[%s10596_s3 + $0x2d0] sm:$0xf] }
 0x7a9   : > { %v1570_v47 = vadd.f32 %v1569_v40, %v1471_v52  ;;  %v1588_v48 = vadd.f32 %v1587_v42, %v1472_v57  ;;  %1753 = vmatmul.bf16.vlgmr.msrb.gmra.mxu1 %v1645_v39  ;;  %v7421_v39 = vld [vmem:[%s10596_s3 + $0x2e4] sm:$0xf0]  ;;  %v7418_v40 = vld [vmem:[%s10596_s3 + $0x2d4] sm:$0xf] }
 0x7aa   : > { %1771 = vmatmul.bf16.vlgmr.msrb.gmra.mxu0 %v1646_v44  ;;  %v6381_v42 = vor.u32 %v7421_v39, %v6380_v59  ;;  %v6382_v44 = vld [vmem:[%s10596_s3 + $0x2e8] sm:$0xf0]  ;;  %v7382_v59 = vld [vmem:[%s10596_s3 + $0x1b4] sm:$0xf] }
 0x7ab   : > { %v1601_v49 = vmul.f32 0.044715, %v1570_v47  ;;  %v1602_v31 = vmul.f32 0.044715, %v1588_v48  ;;  %v1595_v52 = vmul.f32 0.5, %v1570_v47  ;;  %v1596_v2 = vmul.f32 0.5, %v1588_v48 }
 0x7ac   : > { %2099 = vmatpush.bf16.msrb.mxu2 %v6381_v42  ;;  %v6316_v42 = vld [vmem:[%s10596_s3 + $0x1b8] sm:$0xf] }
 0x7ad   : > { %v1607_v50 = vmul.f32 %v1601_v49, %v1570_v47  ;;  %v1608_v51 = vmul.f32 %v1602_v31, %v1588_v48  ;;  %v6385_v49 = vor.u32 %v7418_v40, %v6382_v44  ;;  %v6310_v40 = vld [vmem:[%s10596_s3 + $0x1c8] sm:$0xf0]  ;;  %v7386_v44 = vld [vmem:[%s10596_s3 + $0x1cc] sm:$0xf0] }
 0x7af   : > { %v1613_v36 = vmul.f32 %v1607_v50, %v1570_v47  ;;  %v1614_v55 = vmul.f32 %v1608_v51, %v1588_v48  ;;  %2117 = vmatpush.bf16.msrb.mxu3 %v6385_v49  ;;  %v6368_v50 = vld [vmem:[%s10596_s3 + $0x2a0] sm:$0xf]  ;;  %v7415_v51 = vld [vmem:[%s10596_s3 + $0x2b4] sm:$0xf0] }
 0x7b0   : > { %v1571_v25 = vpop.f32.mrf.mxu2  ;;  %v1589_v58 = vpop.f32.mrf.mxu3 }
 0x7b1   : > { %v1619_v60 = vadd.f32 %v1613_v36, %v1570_v47  ;;  %v1620_v61 = vadd.f32 %v1614_v55, %v1588_v48  ;;  %v6388_v47 = vld [vmem:[%s10596_s3 + $0x2d8] sm:$0xf]  ;;  %v7422_v48 = vld [vmem:[%s10596_s3 + $0x2ec] sm:$0xf0]  ;;  %v7412_v36 = vld [vmem:[%s10596_s3 + $0x2a4] sm:$0xf]  ;;  %v6369_v55 = vor.u32 %v7415_v51, %v6368_v50 }
 0x7b2   : > { %v6389_v31 = vor.u32 %v7422_v48, %v6388_v47  ;;  %v6370_v25 = vld [vmem:[%s10596_s3 + $0x2b8] sm:$0xf0]  ;;  %v6376_v58 = vld [vmem:[%s10596_s3 + $0x2a8] sm:$0xf]  ;;  %v6313_v47 = vor.u32 %v7382_v59, %v6310_v40  ;;  %v6317_v48 = vor.u32 %v7386_v44, %v6316_v42  ;;  %v6296_v50 = vld [vmem:[%s10596_s3 + $0x180] sm:$0xf] }
 0x7b3   : > { %v1625_v62 = vmul.f32 0.7978846, %v1619_v60  ;;  %v1626_v63 = vmul.f32 0.7978846, %v1620_v61  ;;  %v7416_v60 = vld [vmem:[%s10596_s3 + $0x2bc] sm:$0xf0]  ;;  %v6373_v61 = vor.u32 %v7412_v36, %v6370_v25  ;;  %2100 = vmatpush.bf16.msrb.mxu2 %v6369_v55 }
 0x7b4   : > { %2135 = vmatpush.bf16.msra.mxu1 %v6389_v31  ;;  %v7379_v51 = vld [vmem:[%s10596_s3 + $0x194] sm:$0xf0]  ;;  %v7376_v36 = vld [vmem:[%s10596_s3 + $0x184] sm:$0xf]  ;;  %v6298_v25 = vld [vmem:[%s10596_s3 + $0x198] sm:$0xf0] }
 0x7b5   : > { %7723 = vtanh.f32 %v1625_v62  ;;  %v6377_v62 = vor.u32 %v7416_v60, %v6376_v58  ;;  %2118 = vmatpush.bf16.msrb.mxu3 %v6373_v61  ;;  %v6297_v55 = vor.u32 %v7379_v51, %v6296_v50  ;;  %v6304_v58 = vld [vmem:[%s10596_s3 + $0x188] sm:$0xf]  ;;  %v7380_v60 = vld [vmem:[%s10596_s3 + $0x19c] sm:$0xf0] }
 0x7b6   : > { %7725 = vtanh.f32 %v1626_v63  ;;  %v6356_v63 = vld [vmem:[%s10596_s3 + $0x270] sm:$0xf] }
 0x7b8   : > { %2136 = vmatpush.bf16.msra.mxu1 %v6377_v62  ;;  %v6301_v62 = vor.u32 %v7376_v36, %v6298_v25 }
 0x7bb   : > { %v7724_v0 = vpop.eup %7723 }
 0x7bc   : > { %v7726_v1 = vpop.eup %7725  ;;  %v1637_v57 = vadd.f32 1.0, %v7724_v0  ;;  %v7409_v0 = vld [vmem:[%s10596_s3 + $0x284] sm:$0xf0] }
 0x7bd   : > { %v1638_v53 = vadd.f32 1.0, %v7726_v1  ;;  %v7406_v1 = vld [vmem:[%s10596_s3 + $0x274] sm:$0xf] }
 0x7be   : > { %v1643_v3 = vmul.f32 %v1637_v57, %v1595_v52  ;;  %v6357_v52 = vor.u32 %v7409_v0, %v6356_v63  ;;  %v6358_v57 = vld [vmem:[%s10596_s3 + $0x288] sm:$0xf0]  ;;  %v6305_v63 = vor.u32 %v7380_v60, %v6304_v58 }
 0x7bf   : > { %v1644_v4 = vmul.f32 %v1638_v53, %v1596_v2  ;;  %v6364_v2 = vld [vmem:[%s10596_s3 + $0x278] sm:$0xf]  ;;  %v7410_v53 = vld [vmem:[%s10596_s3 + $0x28c] sm:$0xf0] }
 0x7c0   : > { %v1647_v5 = vpack.c.bf16 %v1643_v3, %v1643_v3  ;;  %v6361_v3 = vor.u32 %v7406_v1, %v6358_v57  ;;  %2101 = vmatpush.bf16.msrb.mxu2 %v6357_v52 }
 0x7c1   : > { %v1648_v6 = vpack.c.bf16 %v1644_v4, %v1644_v4  ;;  %v6365_v4 = vor.u32 %v7410_v53, %v6364_v2 }
 0x7c2   : > { %1758 = vmatmul.bf16.gmra.mxu1 %v1647_v5  ;;  %2119 = vmatpush.bf16.msrb.mxu3 %v6361_v3  ;;  %v6344_v5 = vld [vmem:[%s10596_s3 + $0x240] sm:$0xf] }
 0x7c3   : > { %1776 = vmatmul.bf16.gmra.mxu0 %v1648_v6  ;;  %2137 = vmatpush.bf16.msra.mxu1 %v6365_v4  ;;  %v7403_v6 = vld [vmem:[%s10596_s3 + $0x254] sm:$0xf0] }
 0x826   : > { %v1754_v8 = vpop.f32.mrf.mxu1 }
 0x827   : > { %v1772_v9 = vpop.f32.mrf.mxu0 }
 0x828   : > { %v1773_v10 = vadd.f32 %v1772_v9, %v1754_v8  ;;  %v6345_v8 = vor.u32 %v7403_v6, %v6344_v5  ;;  %v6346_v9 = vld [vmem:[%s10596_s3 + $0x258] sm:$0xf0] }
 0x82a   : > { %v1781_v13 = vadd.f32 %v1773_v10, %v8513_v41  ;;  %v6352_v10 = vld [vmem:[%s10596_s3 + $0x248] sm:$0xf]  ;;  %2102 = vmatpush.bf16.msrb.mxu2 %v6345_v8 }
 0x82c   : > { %v8707_v14 = vadd.f32 %v1785_v11, %v1781_v13  ;;  %v6349_v13 = vor.u32 %v7400_v7, %v6346_v9 }
 0x82e   : > { %1888 = vadd.xlane.f32.xlu1 %v8707_v14  ;;  %v1756_v15 = vpop.f32.mrf.mxu1  ;;  %2120 = vmatpush.bf16.msrb.mxu3 %v6349_v13 }
 0x82f   : > { %v1774_v16 = vpop.f32.mrf.mxu0 }
 0x830   : > { %v1775_v17 = vadd.f32 %v1774_v16, %v1756_v15  ;;  %v6332_v16 = vld [vmem:[%s10596_s3 + $0x210] sm:$0xf] }
 0x832   : > { %v1782_v18 = vadd.f32 %v1775_v17, %v8517_v45  ;;  %v7397_v17 = vld [vmem:[%s10596_s3 + $0x224] sm:$0xf0] }
 0x834   : > { %v8711_v19 = vadd.f32 %v1785_v11, %v1782_v18  ;;  %v7394_v18 = vld [vmem:[%s10596_s3 + $0x214] sm:$0xf] }
 0x836   : > { %1890 = vadd.xlane.f32.xlu0 %v8711_v19 }
 0x83f   : > { %v1759_v20 = vpop.f32.mrf.mxu1 }
 0x840   : > { %v1777_v54 = vpop.f32.mrf.mxu0 }
 0x841   : > { %v1778_v21 = vadd.f32 %v1777_v54, %v1759_v20  ;;  %v6333_v20 = vor.u32 %v7397_v17, %v6332_v16  ;;  %v6334_v54 = vld [vmem:[%s10596_s3 + $0x228] sm:$0xf0] }
 0x843   : > { %v1783_v23 = vadd.f32 %v1778_v21, %v8521_v46  ;;  %v6340_v21 = vld [vmem:[%s10596_s3 + $0x218] sm:$0xf]  ;;  %2103 = vmatpush.bf16.msrb.mxu2 %v6333_v20 }
 0x845   : > { %v8715_v22 = vadd.f32 %v1785_v11, %v1783_v23  ;;  %v7404_v11 = vld [vmem:[%s10596_s3 + $0x25c] sm:$0xf0]  ;;  %v7398_v23 = vld [vmem:[%s10596_s3 + $0x22c] sm:$0xf0] }
 0x846   : > { %v6353_v15 = vor.u32 %v7404_v11, %v6352_v10  ;;  %v6286_v11 = vld [vmem:[%s10597_s5 + $0x18] ss:$8 sm:$0x7] }
 0x847   : > { %v1761_v41 = vpop.f32.mrf.mxu1  ;;  %v1892_v24 = vsel %vm829_vm0, %v8715_v22, 0.0  ;;  %v1951_v17 = vperm.slane %v6286_v11, 0 }
 0x848   : > { %v1779_v26 = vpop.f32.mrf.mxu0  ;;  %1893 = vadd.xlane.f32.xlu1 %v1892_v24  ;;  %2138 = vmatpush.bf16.msra.mxu1 %v6353_v15  ;;  %v6337_v41 = vor.u32 %v7394_v18, %v6334_v54  ;;  %v6341_v24 = vor.u32 %v7398_v23, %v6340_v21  ;;  %v6287_v54 = vld [vmem:[%s10597_s5 + $0x19] ss:$8 sm:$0x7] }
 0x849   : > { %v6320_v26 = vld [vmem:[%s10596_s3 + $0x1e0] sm:$0xf] }
 0x84a   : > { %2121 = vmatpush.bf16.msrb.mxu3 %v6337_v41 }
 0x84c   : > { %2139 = vmatpush.bf16.msra.mxu1 %v6341_v24 }
 0x8a1   : > { %v1889_v27 = vpop.xlane.xlu1 %1888 }
 0x8a2   : > { %v1895_v45 = vmul.f32 %v1889_v27, %v8237_v43  ;;  %v7391_v27 = vld [vmem:[%s10596_s3 + $0x1f4] sm:$0xf0] }
 0x8a4   : > { %v8721_v28 = vsub.f32 %v8707_v14, %v1895_v45  ;;  %v7388_v45 = vld [vmem:[%s10596_s3 + $0x1e4] sm:$0xf] }
 0x8a6   : > { %v1901_v56 = vmul.f32 %v8721_v28, %v8721_v28 }
 0x8a8   : > { %1904 = vadd.xlane.f32.xlu0 %v1901_v56  ;;  %v6321_v56 = vor.u32 %v7391_v27, %v6320_v26  ;;  %v1957_v26 = vperm.slane %v6287_v54, 0 }
 0x8a9   : > { %v1891_v29 = vpop.xlane.xlu0 %1890 }
 0x8aa   : > { %v1896_v46 = vmul.f32 %v1891_v29, %v8237_v43  ;;  %v6322_v29 = vld [vmem:[%s10596_s3 + $0x1f8] sm:$0xf0]  ;;  %2104 = vmatpush.bf16.msrb.mxu2 %v6321_v56 }
 0x8ac   : > { %v8727_v30 = vsub.f32 %v8711_v19, %v1896_v46  ;;  %v6328_v46 = vld [vmem:[%s10596_s3 + $0x1e8] sm:$0xf] }
 0x8ae   : > { %v1902_v32 = vmul.f32 %v8727_v30, %v8727_v30 }
 0x8b0   : > { %1906 = vadd.xlane.f32.xlu1 %v1902_v32  ;;  %v7392_v32 = vld [vmem:[%s10596_s3 + $0x1fc] sm:$0xf0] }
 0x8bb   : > { %v1894_v33 = vpop.xlane.xlu1 %1893 }
 0x8bc   : > { %v1897_v34 = vmul.f32 %v1894_v33, %v8237_v43  ;;  %v6325_v33 = vor.u32 %v7388_v45, %v6322_v29 }
 0x8be   : > { %v8733_v35 = vsub.f32 %v8715_v22, %v1897_v34  ;;  %v6329_v34 = vor.u32 %v7392_v32, %v6328_v46  ;;  %2122 = vmatpush.bf16.msrb.mxu3 %v6325_v33 }
 0x8c0   : > { %v1903_v37 = vmul.f32 %v8733_v35, %v8733_v35  ;;  %2140 = vmatpush.bf16.msra.mxu1 %v6329_v34 }
 0x8c2   : > { %v1908_v38 = vsel %vm829_vm0, %v1903_v37, 0.0  ;;  %v6308_v37 = vld [vmem:[%s10596_s3 + $0x1b0] sm:$0xf]  ;;  %2123 = vmatpush.bf16.msrb.mxu3 %v6313_v47 }
 0x8c3   : > { %1909 = vadd.xlane.f32.xlu2 %v1908_v38  ;;  %v7385_v38 = vld [vmem:[%s10596_s3 + $0x1c4] sm:$0xf0] }
 0x8c4   : > { %v6309_v39 = vor.u32 %v7385_v38, %v6308_v37  ;;  %2141 = vmatpush.bf16.msra.mxu1 %v6317_v48  ;;  %v6292_v48 = vld [vmem:[%s10597_s5 + $0x1e] ss:$8 sm:$0x7] }
 0x8c6   : > { %2105 = vmatpush.bf16.msrb.mxu2 %v6309_v39  ;;  %2124 = vmatpush.bf16.msrb.mxu3 %v6301_v62  ;;  %v1967_v62 = vperm.slane %v6292_v48, 2 }
 0x8c8   : > { %2142 = vmatpush.bf16.msra.mxu1 %v6305_v63 }
 0x8ca   : > { %2106 = vmatpush.bf16.msrb.mxu2 %v6297_v55 }
 0x91b   : > { %v1905_v49 = vpop.xlane.xlu0 %1904 }
 0x91c   : > { %v1911_v31 = vmul.f32 %v1905_v49, %v8237_v43  ;;  %v1965_v49 = vperm.slane %v6292_v48, 0 }
 0x91e   : > { %v1914_v61 = vadd.f32 1e-05, %v1911_v31  ;;  %v1966_v31 = vperm.slane %v6292_v48, 1 }
 0x920   : > { %7727 = vrsqrt.f32 %v1914_v61  ;;  %vm1923_vm9 = vweird.f32 %v1914_v61 }
 0x923   : > { %v1907_v0 = vpop.xlane.xlu1 %1906 }
 0x924   : > { %v1912_v1 = vmul.f32 %v1907_v0, %v8237_v43 }
 0x926   : > { %v7728_v52 = vpop.eup %7727  ;;  %v1915_v57 = vadd.f32 1e-05, %v1912_v1 }
 0x927   : > { %v1918_v2 = vmul.f32 %v7728_v52, %v1914_v61  ;;  %vm1924_vm8 = vweird.f32 %v7728_v52 }
 0x928   : > { %7729 = vrsqrt.f32 %v1915_v57  ;;  %vm1925_vm10 = vmor %vm1923_vm9, %vm1924_vm8  ;;  %vm1933_vm15 = vweird.f32 %v1915_v57 }
 0x929   : > { %v1919_v53 = vmul.f32 %v7728_v52, %v1918_v2 }
 0x92b   : > { %v1920_v3 = vmul.f32 0.5, %v1919_v53 }
 0x92d   : > { %v1921_v4 = vsub.f32 1.5, %v1920_v3 }
 0x92e   : > { %v7730_v5 = vpop.eup %7729 }
 0x92f   : > { %v1922_v6 = vmul.f32 %v7728_v52, %v1921_v4  ;;  %v1928_v7 = vmul.f32 %v7730_v5, %v1915_v57  ;;  %vm1934_vm14 = vweird.f32 %v7730_v5 }
 0x930   : > { %vm1935_vm1 = vmor %vm1933_vm15, %vm1934_vm14 }
 0x931   : > { %v1929_v8 = vmul.f32 %v7730_v5, %v1928_v7  ;;  %v1926_v9 = vsel %vm1925_vm10, %v7728_v52, %v1922_v6 }
 0x932   : > { %v1947_v15 = vmul.f32 %v1926_v9, %v8721_v28 }
 0x933   : > { %v1930_v10 = vmul.f32 0.5, %v1929_v8 }
 0x934   : > { %v1953_v24 = vmul.f32 %v1951_v17, %v1947_v15 }
 0x935   : > { %v1931_v13 = vsub.f32 1.5, %v1930_v10 }
 0x936   : > { %v1910_v16 = vpop.xlane.xlu2 %1909  ;;  %v1959_v28 = vadd.f32 %v1957_v26, %v1953_v24 }
 0x937   : > { %v1932_v18 = vmul.f32 %v7730_v5, %v1931_v13  ;;  %v1913_v20 = vmul.f32 %v1910_v16, %v8237_v43 }
 0x939   : > { %v1936_v21 = vsel %vm1935_vm1, %v7730_v5, %v1932_v18  ;;  %v1916_v23 = vadd.f32 1e-05, %v1913_v20 }
 0x93a   : > { %v1948_v41 = vmul.f32 %v1936_v21, %v8727_v30 }
 0x93b   : > { %7731 = vrsqrt.f32 %v1916_v23  ;;  %vm1943_vm3 = vweird.f32 %v1916_v23 }
 0x93c   : > { %v1954_v27 = vmul.f32 %v1951_v17, %v1948_v41 }
 0x93e   : > { %v1960_v45 = vadd.f32 %v1957_v26, %v1954_v27 }
 0x940   : > { %v1962_v56 = vpack.c.bf16 %v1960_v45, %v1959_v28 }
 0x941   : > { %v7732_v29 = vpop.eup %7731 }
 0x942   : > { %v1938_v46 = vmul.f32 %v7732_v29, %v1916_v23  ;;  %2107 = vmatmul.bf16.vlgmr.msrb.gmra.mxu2 %v1962_v56  ;;  %2125 = vmatmul.bf16.vlgmr.msrb.gmra.mxu3 %v1962_v56  ;;  %vm1944_vm2 = vweird.f32 %v7732_v29 }
 0x943   : > { %2143 = vmatmul.bf16.vlgmr.msra.gmra.mxu1 %v1962_v56  ;;  %vm1945_vm4 = vmor %vm1943_vm3, %vm1944_vm2 }
 0x944   : > { %v1939_v32 = vmul.f32 %v7732_v29, %v1938_v46 }
 0x946   : > { %v1940_v33 = vmul.f32 0.5, %v1939_v32 }
 0x948   : > { %v1941_v34 = vsub.f32 1.5, %v1940_v33 }
 0x94a   : > { %v1942_v37 = vmul.f32 %v7732_v29, %v1941_v34 }
 0x94c   : > { %v1946_v30 = vsel %vm1945_vm4, %v7732_v29, %v1942_v37 }
 0x94d   : > { %v1949_v38 = vmul.f32 %v1946_v30, %v8733_v35 }
 0x94f   : > { %v1955_v59 = vmul.f32 %v1951_v17, %v1949_v38 }
 0x951   : > { %v1961_v39 = vadd.f32 %v1957_v26, %v1955_v59 }
 0x953   : > { %v1963_v40 = vpack.c.bf16 %v1961_v39, %v1961_v39 }
 0x955   : > { %2112 = vmatmul.bf16.gmra.mxu2 %v1963_v40  ;;  %2130 = vmatmul.bf16.gmra.mxu3 %v1963_v40 }
 0x956   : > { %2148 = vmatmul.bf16.gmra.mxu1 %v1963_v40 }
 0x9c0   : > { %v2144_v42 = vpop.f32.mrf.mxu1 }
 0x9c1   : > { %v2145_v4 = vadd.f32 %v2144_v42, %v1967_v62 }
 0x9c5   : > { %v2108_v44 = vpop.f32.mrf.mxu2  ;;  %v2126_v47 = vpop.f32.mrf.mxu3 }
 0x9c6   : > { %v2109_v55 = vadd.f32 %v2108_v44, %v1965_v49  ;;  %v2127_v35 = vadd.f32 %v2126_v47, %v1966_v31 }
 0x9c8   : > { %v2146_v50 = vpop.f32.mrf.mxu1 }
 0x9c9   : > { %v2147_v52 = vadd.f32 %v2146_v50, %v1967_v62 }
 0x9cb   : > { %v8900_v7 = vpack.c.bf16 %v2147_v52, %v2145_v4 }
 0x9cd   : > { %v2110_v51 = vpop.f32.mrf.mxu2  ;;  %v2128_v36 = vpop.f32.mrf.mxu3 }
 0x9ce   : > { %v2111_v25 = vadd.f32 %v2110_v51, %v1965_v49  ;;  %v2129_v58 = vadd.f32 %v2128_v36, %v1966_v31 }
 0x9d0   : > { %v2153_v60 = vpack.c.bf16 %v2111_v25, %v2109_v55  ;;  %v2155_v61 = vpack.c.bf16 %v2129_v58, %v2127_v35 }
 0x9d2   : > { %2262 = vrot.lane.b32.xlu1 %v2155_v61, %s8022_s29  ;;  %2256 = vrot.lane.b32.xlu2 %v2153_v60, %s8022_s29  ;;  %v2166_v11 = vsel %vm1104_vm11, %v2155_v61, 0 }
 0x9d3   : > { %v2149_v63 = vpop.f32.mrf.mxu1 }
 0x9d4   : > { %v2150_v0 = vadd.f32 %v2149_v63, %v1967_v62 }
 0x9d6   : > { %v2158_v1 = vpack.c.bf16 %v2150_v0, %v2150_v0 }
 0x9d8   : > { %v2234_v57 = vand.u32 %v2158_v1, %v8420_v12  ;;  %v2113_v2 = vpop.f32.mrf.mxu2  ;;  %v2131_v53 = vpop.f32.mrf.mxu3 }
 0x9d9   : > { %v2132_v3 = vadd.f32 %v2131_v53, %v1966_v31  ;;  %v2114_v13 = vadd.f32 %v2113_v2, %v1965_v49 }
 0x9da   : > { %2242 = vmatpush.bf16.msra.mxu2 %v2234_v57 }
 0x9db   : > { %v2156_v5 = vpack.c.bf16 %v2132_v3, %v2132_v3  ;;  %v2151_v6 = vpop.f32.mrf.mxu1  ;;  %v2154_v15 = vpack.c.bf16 %v2114_v13, %v2114_v13 }
 0x9dd   : > { %v2169_v8 = vsel %vm1104_vm11, %v2156_v5, 0  ;;  %2264 = vrot.lane.b32.xlu0 %v2156_v5, %s8022_s29 }
 0x9de   : > { %2243 = vmatpush.bf16.msra.mxu2 %v8900_v7  ;;  %2177 = vmatpush.bf16.xpose.msra.mxu0 %v2169_v8 }
 0x9e0   : > { %v2115_v9 = vpop.f32.mrf.mxu2  ;;  %v2133_v10 = vpop.f32.mrf.mxu3 }
 0x9e6   : > { %2178 = vmatpush.bf16.xpose.msra.mxu0 %v2166_v11 }
 0x9ed   : > { %6390 = vmatmul.msk.bf16.vlgmr.msra.gmra.mxu0 %vm1104_vm11, %v2153_v60 }
 0x9fd   : > { %6391 = vmatmul.msk.bf16.gmra.mxu0 %vm1104_vm11, %v2154_v15 }
 0xa2c   : > { %v2257_v54 = vpop.permute.xlu2 %2256 }
 0xa44   : > { %v2263_v18 = vpop.permute.xlu1 %2262 }
 0xa45   : > { %v2273_v20 = vsel %vm1104_vm11, %v2263_v18, 0  ;;  %v7413_v18 = vld [vmem:[%s10596_s3 + $0x2ac] sm:$0xf] }
 0xa4f   : > { %v2265_v16 = vpop.permute.xlu0 %2264 }
 0xa50   : > { %v2276_v17 = vsel %vm1104_vm11, %v2265_v16, 0  ;;  %v7419_v16 = vld [vmem:[%s10596_s3 + $0x2dc] sm:$0xf] }
 0xa51   : > { %2284 = vmatpush.bf16.xpose.msra.mxu3 %v2276_v17  ;;  %v6426_v17 = vld [vmem:[%s10596_s3 + $0x2f0] sm:$0xf0] }
 0xa59   : > { %2285 = vmatpush.bf16.xpose.msra.mxu3 %v2273_v20  ;;  %v6429_v20 = vor.u32 %v7419_v16, %v6426_v17 }
 0xa5b   : > { %2417 = vmatpush.bf16.msrb.mxu0 %v6429_v20 }
 0xa60   : > { %6394 = vmatmul.msk.bf16.vlgmr.msra.gmra.mxu3 %vm1104_vm11, %v2257_v54  ;;  %v6422_v54 = vld [vmem:[%s10596_s3 + $0x2c0] sm:$0xf0] }
 0xa6a   : > { %v2180_v21 = vpop.f32.mrf.mxu0 }
 0xa6b   : > { %v2189_v23 = vmul.f32 0.125, %v2180_v21 }
 0xa6d   : > { %v2192_v41 = vsel %vm1138_vm12, %v2189_v23, -inf }
 0xa6e   : > { %2193 = vmax.xlane.f32.xlu2 %v2192_v41  ;;  %v6425_v41 = vor.u32 %v7413_v18, %v6422_v54 }
 0xa70   : > { %2418 = vmatpush.bf16.msrb.mxu0 %v6425_v41 }
 0xa72   : > { %v2182_v24 = vpop.f32.mrf.mxu0 }
 0xa73   : > { %v2190_v32 = vmul.f32 0.125, %v2182_v24  ;;  %v7407_v24 = vld [vmem:[%s10596_s3 + $0x27c] sm:$0xf] }
 0xa75   : > { %v2195_v38 = vsel %vm1138_vm12, %v2190_v32, -inf }
 0xa7a   : > { %v8912_v26 = vpop.f32.mrf.mxu0 }
 0xa82   : > { %v2187_v27 = vpop.f32.mrf.mxu0 }
 0xa83   : > { %v6418_v27 = vld [vmem:[%s10596_s3 + $0x290] sm:$0xf0] }
 0xa86   : > { %2338 = vrot.lane.b32.xlu2 %v2158_v1, %s8022_s29 }
 0xae1   : > { %v2194_v28 = vpop.xlane.xlu2 %2193 }
 0xae2   : > { %v2201_v48 = vsub.f32 %v2189_v23, %v2194_v28 }
 0xae3   : > { %v2287_v45 = vpop.f32.mrf.mxu3 }
 0xae4   : > { %v2296_v56 = vmul.f32 0.125, %v2287_v45  ;;  %v2204_v31 = vmul.f32 1.442695, %v2201_v48  ;;  %v6421_v45 = vor.u32 %v7407_v24, %v6418_v27  ;;  %v7377_v48 = vld [vmem:[%s10596_s3 + $0x18c] sm:$0xf] }
 0xae6   : > { %v2299_v29 = vsel %vm1138_vm12, %v2296_v56, -inf  ;;  %2419 = vmatpush.bf16.msrb.mxu0 %v6421_v45 }
 0xae7   : > { %2300 = vmax.xlane.f32.xlu0 %v2299_v29  ;;  %v6414_v29 = vld [vmem:[%s10596_s3 + $0x260] sm:$0xf0] }
 0xae9   : > { %v2339_v46 = vpop.permute.xlu2 %2338 }
 0xaea   : > { %v2348_v33 = vand.u32 %v2339_v46, %v8420_v12 }
 0xaeb   : > { %v2289_v34 = vpop.f32.mrf.mxu3 }
 0xaec   : > { %v2297_v37 = vmul.f32 0.125, %v2289_v34  ;;  %2356 = vmatpush.bf16.msrb.mxu1 %v2348_v33  ;;  %v7395_v33 = vld [vmem:[%s10596_s3 + $0x21c] sm:$0xf]  ;;  %v6410_v34 = vld [vmem:[%s10596_s3 + $0x230] sm:$0xf0] }
 0xaee   : > { %v2302_v30 = vsel %vm1138_vm12, %v2297_v37, -inf }
 0xaef   : > { %2303 = vmax.xlane.f32.xlu1 %v2302_v30  ;;  %2196 = vmax.xlane.f32.xlu0 %v2195_v38  ;;  %v7389_v30 = vld [vmem:[%s10596_s3 + $0x1ec] sm:$0xf]  ;;  %v6406_v38 = vld [vmem:[%s10596_s3 + $0x200] sm:$0xf0] }
 0xb5a   : > { %v2301_v59 = vpop.xlane.xlu0 %2300 }
 0xb5b   : > { %v2308_v39 = vsub.f32 %v2296_v56, %v2301_v59  ;;  %v7401_v56 = vld [vmem:[%s10596_s3 + $0x24c] sm:$0xf]  ;;  %v6409_v59 = vor.u32 %v7389_v30, %v6406_v38  ;;  %v7417_v30 = vld [vmem:[%s10596_s3 + $0x2c4] sm:$0xf0]  ;;  %v7414_v38 = vld [vmem:[%s10596_s3 + $0x2b4] sm:$0xf] }
 0xb5d   : > { %v2311_v40 = vmul.f32 1.442695, %v2308_v39  ;;  %v7383_v39 = vld [vmem:[%s10596_s3 + $0x1bc] sm:$0xf] }
 0xb5f   : > { %7733 = vpow2.f32 %v2311_v40  ;;  %v6402_v40 = vld [vmem:[%s10596_s3 + $0x1d0] sm:$0xf0] }
 0xb62   : > { %v2304_v42 = vpop.xlane.xlu1 %2303  ;;  %v2197_v50 = vpop.xlane.xlu0 %2196 }
 0xb63   : > { %v2309_v44 = vsub.f32 %v2297_v37, %v2304_v42  ;;  %v2202_v36 = vsub.f32 %v2190_v32, %v2197_v50  ;;  %v6417_v32 = vor.u32 %v7401_v56, %v6414_v29  ;;  %v6413_v37 = vor.u32 %v7395_v33, %v6410_v34  ;;  %v6488_v56 = vld [vmem:[%s10596_s3 + $0x2e0] sm:$0xf]  ;;  %v7423_v29 = vld [vmem:[%s10596_s3 + $0x2f4] sm:$0xf0]  ;;  %v6490_v33 = vld [vmem:[%s10596_s3 + $0x2f8] sm:$0xf0] }
 0xb64   : > { %v6405_v42 = vor.u32 %v7383_v39, %v6402_v40  ;;  %v6482_v39 = vld [vmem:[%s10596_s3 + $0x2c8] sm:$0xf0] }
 0xb65   : > { %v7734_v47 = vpop.eup %7733  ;;  %v2313_v49 = vmul.f32 1.442695, %v2309_v44  ;;  %v2206_v35 = vmul.f32 1.442695, %v2202_v36  ;;  %2420 = vmatpush.bf16.msrb.mxu0 %v6417_v32  ;;  %v2191_v44 = vmul.f32 0.125, %v8912_v26  ;;  %v6489_v32 = vor.u32 %v7423_v29, %v6488_v56 }
 0xb66   : > { %v2317_v12 = vsel %vm1138_vm12, %v7734_v47, 0.0  ;;  %v6485_v40 = vor.u32 %v7414_v38, %v6482_v39  ;;  %v6288_v38 = vld [vmem:[%s10597_s5 + $0x1a] ss:$8 sm:$0x7] }
 0xb67   : > { %7735 = vpow2.f32 %v2313_v49  ;;  %2318 = vadd.xlane.f32.xlu1 %v2317_v12  ;;  %v6398_v49 = vld [vmem:[%s10596_s3 + $0x1a0] sm:$0xf0]  ;;  %2605 = vmatpush.bf16.msrb.mxu2 %v6489_v32 }
 0xb68   : > { %7737 = vpow2.f32 %v2204_v31  ;;  %v6401_v12 = vor.u32 %v7377_v48, %v6398_v49  ;;  %v6474_v49 = vld [vmem:[%s10596_s3 + $0x298] sm:$0xf0] }
 0xb69   : > { %7739 = vpow2.f32 %v2206_v35  ;;  %2421 = vmatpush.bf16.msrb.mxu0 %v6413_v37  ;;  %v6480_v37 = vld [vmem:[%s10596_s3 + $0x2b0] sm:$0xf] }
 0xb6d   : > { %v7736_v51 = vpop.eup %7735  ;;  %2422 = vmatpush.bf16.msrb.mxu0 %v6409_v59  ;;  %v6481_v59 = vor.u32 %v7417_v30, %v6480_v37 }
 0xb6e   : > { %v2320_v55 = vsel %vm1138_vm12, %v7736_v51, 0.0  ;;  %v7738_v25 = vpop.eup %7737 }
 0xb6f   : > { %2321 = vadd.xlane.f32.xlu0 %v2320_v55  ;;  %v2210_v58 = vsel %vm1138_vm12, %v7738_v25, 0.0  ;;  %v7740_v60 = vpop.eup %7739  ;;  %2606 = vmatpush.bf16.msrb.mxu2 %v6481_v59 }
 0xb70   : > { %v2213_v61 = vsel %vm1138_vm12, %v7740_v60, 0.0 }
 0xb71   : > { %2423 = vmatpush.bf16.msrb.mxu0 %v6405_v42  ;;  %v6472_v42 = vld [vmem:[%s10596_s3 + $0x280] sm:$0xf] }
 0xb75   : > { %2424 = vmatpush.bf16.msrb.mxu0 %v6401_v12 }
 0xb77   : > { %2211 = vadd.xlane.f32.xlu0 %v2210_v58 }
 0xb7f   : > { %2214 = vadd.xlane.f32.xlu0 %v2213_v61 }
 0xb80   : > { %2336 = vrot.lane.b32.xlu1 %v8900_v7, %s8022_s29 }
 0xb93   : > { %2258 = vrot.lane.b32.xlu0 %v2154_v15, %s8022_s29 }
 0xbda   : > { %v2319_v63 = vpop.xlane.xlu1 %2318 }
 0xbe2   : > { %v2322_v62 = vpop.xlane.xlu0 %2321 }
 0xbe3   : > { %7741 = vrcp.f32 %v2322_v62 }
 0xbe4   : > { %7743 = vrcp.f32 %v2319_v63 }
 0xbe9   : > { %v7742_v1 = vpop.eup %7741 }
 0xbea   : > { %v2212_v0 = vpop.xlane.xlu0 %2211  ;;  %v7744_v52 = vpop.eup %7743  ;;  %v2330_v57 = vmul.f32 %v7742_v1, %v7736_v51 }
 0xbeb   : > { %7745 = vrcp.f32 %v2212_v0  ;;  %v2329_v2 = vmul.f32 %v7744_v52, %v7734_v47  ;;  %v2198_v47 = vsel %vm1145_vm13, %v2191_v44, -inf  ;;  %v6290_v52 = vld [vmem:[%s10597_s5 + $0x1c] ss:$8 sm:$0x7] }
 0xbed   : > { %v2332_v4 = vpack.c.bf16 %v2330_v57, %v2329_v2  ;;  %v8987_v2 = vperm.slane %v6290_v52, 0 }
 0xbf1   : > { %v7746_v5 = vpop.eup %7745 }
 0xbf2   : > { %v2337_v53 = vpop.permute.xlu1 %2336  ;;  %v2215_v3 = vpop.xlane.xlu0 %2214  ;;  %v2222_v7 = vmul.f32 %v7746_v5, %v7738_v25 }
 0xbf3   : > { %7747 = vrcp.f32 %v2215_v3  ;;  %2357 = vmatpush.bf16.msrb.mxu1 %v2337_v53 }
 0xbf6   : > { %6396 = vmatmul.msk.bf16.vlgmr.msrb.gmra.mxu1 %vm1138_vm12, %v2332_v4 }
 0xbf9   : > { %v7748_v6 = vpop.eup %7747 }
 0xbfa   : > { %v2223_v8 = vmul.f32 %v7748_v6, %v7740_v60 }
 0xbfc   : > { %v2225_v9 = vpack.c.bf16 %v2223_v8, %v2222_v7 }
 0xbfe   : > { %6392 = vmatmul.msk.bf16.vlgmr.msra.gmra.mxu2 %vm1138_vm12, %v2225_v9 }
 0xc05   : > { %v2259_v10 = vpop.permute.xlu0 %2258 }
 0xc06   : > { %6395 = vmatmul.msk.bf16.gmra.mxu3 %vm1104_vm11, %v2259_v10 }
 0xc73   : > { %v2359_v11 = vpop.f32.mrf.mxu1 }
 0xc7b   : > { %v2361_v13 = vpop.f32.mrf.mxu1 }
 0xc7c   : > { %v7655_v15 = vpack.i.bf16 %v2361_v13, %v2359_v11 }
 0xc7e   : > { %7656 = vrot.lane.b32.xlu2 %v7655_v15, %s8022_s29 }
 0xc81   : > { %v2245_v31 = vpop.f32.mrf.mxu2 }
 0xc89   : > { %v2292_v21 = vpop.f32.mrf.mxu3  ;;  %v2247_v55 = vpop.f32.mrf.mxu2 }
 0xc8a   : > { %v2298_v23 = vmul.f32 0.125, %v2292_v21 }
 0xc8c   : > { %v2305_v28 = vsel %vm1145_vm13, %v2298_v23, -inf }
 0xc8d   : > { %2306 = vmax.xlane.f32.xlu1 %v2305_v28 }
 0xc91   : > { %v2294_v46 = vpop.f32.mrf.mxu3 }
 0xc92   : > { %v7420_v46 = vld [vmem:[%s10596_s3 + $0x2e4] sm:$0xf] }
 0xc93   : > { %v6493_v34 = vor.u32 %v7420_v46, %v6490_v33 }
 0xc95   : > { %2623 = vmatpush.bf16.msrb.mxu3 %v6493_v34 }
 0xc99   : > { %2624 = vmatpush.bf16.msrb.mxu3 %v6485_v40  ;;  %v9117_v40 = vperm.slane %v6288_v38, 0 }
 0xca7   : > { %2199 = vmax.xlane.f32.xlu2 %v2198_v47  ;;  %v7408_v47 = vld [vmem:[%s10596_s3 + $0x284] sm:$0xf] }
 0xca8   : > { %v6477_v12 = vor.u32 %v7408_v47, %v6474_v49 }
 0xcaa   : > { %2625 = vmatpush.bf16.msrb.mxu3 %v6477_v12 }
 0xcd8   : > { %v7657_v50 = vpop.permute.xlu2 %7656 }
 0xcd9   : > { %v7659_v51 = vunpack.i.h.bf16 %v7657_v50  ;;  %v7658_v36 = vunpack.i.l.bf16 %v7657_v50  ;;  %v7405_v50 = vld [vmem:[%s10596_s3 + $0x264] sm:$0xf0] }
 0xcdb   : > { %v2380_v26 = vsel %vm1104_vm11, %v2245_v31, %v7658_v36  ;;  %v2381_v35 = vsel %vm1104_vm11, %v2247_v55, %v7659_v51  ;;  %v6464_v31 = vld [vmem:[%s10596_s3 + $0x250] sm:$0xf]  ;;  %v7402_v51 = vld [vmem:[%s10596_s3 + $0x254] sm:$0xf]  ;;  %v6466_v55 = vld [vmem:[%s10596_s3 + $0x268] sm:$0xf0] }
 0xcdc   : > { %v2383_v25 = vpack.c.bf16 %v2381_v35, %v2380_v26  ;;  %v6465_v36 = vor.u32 %v7405_v50, %v6464_v31  ;;  %v6469_v26 = vor.u32 %v7402_v51, %v6466_v55  ;;  %v6456_v35 = vld [vmem:[%s10596_s3 + $0x220] sm:$0xf] }
 0xcde   : > { %2425 = vmatmul.bf16.vlgmr.msrb.gmra.mxu0 %v2383_v25  ;;  %2626 = vmatpush.bf16.msrb.mxu3 %v6469_v26  ;;  %v7399_v25 = vld [vmem:[%s10596_s3 + $0x234] sm:$0xf0] }
 0xd00   : > { %v2307_v58 = vpop.xlane.xlu1 %2306 }
 0xd01   : > { %v2310_v60 = vsub.f32 %v2298_v23, %v2307_v58  ;;  %v7396_v58 = vld [vmem:[%s10596_s3 + $0x224] sm:$0xf] }
 0xd03   : > { %v2315_v61 = vmul.f32 1.442695, %v2310_v60  ;;  %v6457_v60 = vor.u32 %v7399_v25, %v6456_v35 }
 0xd05   : > { %7749 = vpow2.f32 %v2315_v61  ;;  %v6458_v61 = vld [vmem:[%s10596_s3 + $0x238] sm:$0xf0] }
 0xd0b   : > { %v7750_v62 = vpop.eup %7749 }
 0xd0c   : > { %v2323_v63 = vsel %vm1145_vm13, %v7750_v62, 0.0 }
 0xd0d   : > { %2324 = vadd.xlane.f32.xlu2 %v2323_v63  ;;  %v6448_v63 = vld [vmem:[%s10596_s3 + $0x1f0] sm:$0xf] }
 0xd1a   : > { %v2200_v0 = vpop.xlane.xlu2 %2199 }
 0xd1b   : > { %v2203_v1 = vsub.f32 %v2191_v44, %v2200_v0  ;;  %v7411_v44 = vld [vmem:[%s10596_s3 + $0x294] sm:$0xf0]  ;;  %v7393_v0 = vld [vmem:[%s10596_s3 + $0x204] sm:$0xf0] }
 0xd1c   : > { %v6473_v48 = vor.u32 %v7411_v44, %v6472_v42  ;;  %v6449_v52 = vor.u32 %v7393_v0, %v6448_v63  ;;  %v6289_v44 = vld [vmem:[%s10597_s5 + $0x1b] ss:$8 sm:$0x7] }
 0xd1d   : > { %v2208_v57 = vmul.f32 1.442695, %v2203_v1  ;;  %v7390_v1 = vld [vmem:[%s10596_s3 + $0x1f4] sm:$0xf]  ;;  %v9124_v31 = vperm.slane %v6289_v44, 0  ;;  %v7437_v63 = vld [vmem:[%s10598_s4 + $0xe8] sm:$0xff] }
 0xd1e   : > { %2607 = vmatpush.bf16.msrb.mxu2 %v6473_v48  ;;  %v7428_v0 = vld [vmem:[%s10598_s4 + $0xa0] sm:$0xff] }
 0xd1f   : > { %7751 = vpow2.f32 %v2208_v57  ;;  %v6450_v57 = vld [vmem:[%s10596_s3 + $0x208] sm:$0xf0] }
 0xd22   : > { %2608 = vmatpush.bf16.msrb.mxu2 %v6465_v36 }
 0xd25   : > { %v7752_v6 = vpop.eup %7751 }
 0xd26   : > { %v2216_v9 = vsel %vm1145_vm13, %v7752_v6, 0.0  ;;  %2609 = vmatpush.bf16.msrb.mxu2 %v6457_v60  ;;  %v7430_v60 = vld [vmem:[%s10598_s4 + $0xb0] sm:$0xff] }
 0xd2a   : > { %2610 = vmatpush.bf16.msrb.mxu2 %v6449_v52  ;;  %v7427_v52 = vld [vmem:[%s10598_s4 + $0x98] sm:$0xff] }
 0xd5b   : > { %v2426_v53 = vpop.f32.mrf.mxu0 }
 0xd5c   : > { %v2435_v3 = vadd.f32 %v2426_v53, %v8707_v14  ;;  %v6453_v53 = vor.u32 %v7390_v1, %v6450_v57  ;;  %v7436_v1 = vld [vmem:[%s10598_s4 + $0xe0] sm:$0xff]  ;;  %v7435_v57 = vld [vmem:[%s10598_s4 + $0xd8] sm:$0xff] }
 0xd5e   : > { %v8991_v4 = vadd.f32 %v8987_v2, %v2435_v3  ;;  %v6440_v3 = vld [vmem:[%s10596_s3 + $0x1c0] sm:$0xf] }
 0xd60   : > { %2444 = vadd.xlane.f32.xlu0 %v8991_v4 }
 0xd63   : > { %v2428_v5 = vpop.f32.mrf.mxu0 }
 0xd64   : > { %v2436_v7 = vadd.f32 %v2428_v5, %v8711_v19  ;;  %v7387_v5 = vld [vmem:[%s10596_s3 + $0x1d4] sm:$0xf0] }
 0xd66   : > { %v8996_v8 = vadd.f32 %v8987_v2, %v2436_v7  ;;  %v6441_v7 = vor.u32 %v7387_v5, %v6440_v3  ;;  %v7434_v3 = vld [vmem:[%s10598_s4 + $0xd0] sm:$0xff]  ;;  %v7425_v5 = vld [vmem:[%s10598_s4 + $0x88] sm:$0xff] }
 0xd68   : > { %2217 = vadd.xlane.f32.xlu0 %v2216_v9  ;;  %2446 = vadd.xlane.f32.xlu1 %v8996_v8  ;;  %v6442_v9 = vld [vmem:[%s10596_s3 + $0x1d8] sm:$0xf0] }
 0xd69   : > { %2611 = vmatpush.bf16.msrb.mxu2 %v6441_v7  ;;  %v6293_v7 = vld [vmem:[%s10597_s5 + $0x1f] ss:$8 sm:$0x7] }
 0xd80   : > { %v2325_v10 = vpop.xlane.xlu2 %2324 }
 0xd81   : > { %7753 = vrcp.f32 %v2325_v10  ;;  %v6432_v10 = vld [vmem:[%s10596_s3 + $0x190] sm:$0xf] }
 0xd87   : > { %v7754_v14 = vpop.eup %7753 }
 0xd88   : > { %v2331_v11 = vmul.f32 %v7754_v14, %v7750_v62  ;;  %v6461_v62 = vor.u32 %v7396_v58, %v6458_v61  ;;  %v7381_v14 = vld [vmem:[%s10596_s3 + $0x1a4] sm:$0xf0]  ;;  %v7439_v58 = vld [vmem:[%s10598_s4 + $0xf8] sm:$0xff]  ;;  %v7438_v61 = vld [vmem:[%s10598_s4 + $0xf0] sm:$0xff] }
 0xd89   : > { %2813 = vmatpush.bf16.msra.mxu0 %v7439_v58 }
 0xd8a   : > { %v2333_v13 = vpack.c.bf16 %v2331_v11, %v2331_v11  ;;  %2627 = vmatpush.bf16.msrb.mxu3 %v6461_v62  ;;  %v7429_v62 = vld [vmem:[%s10598_s4 + $0xa8] sm:$0xff] }
 0xd8c   : > { %6397 = vmatmul.msk.bf16.gmra.mxu1 %vm1138_vm12, %v2333_v13 }
 0xd8d   : > { %2814 = vmatpush.bf16.msra.mxu0 %v7438_v61 }
 0xd8e   : > { %2628 = vmatpush.bf16.msrb.mxu3 %v6453_v53  ;;  %v7426_v53 = vld [vmem:[%s10598_s4 + $0x90] sm:$0xff] }
 0xd91   : > { %2815 = vmatpush.bf16.msra.mxu0 %v7437_v63 }
 0xd95   : > { %2816 = vmatpush.bf16.msra.mxu0 %v7436_v1 }
 0xd99   : > { %2817 = vmatpush.bf16.msra.mxu0 %v7435_v57 }
 0xd9d   : > { %2818 = vmatpush.bf16.msra.mxu0 %v7434_v3  ;;  %v6291_v3 = vld [vmem:[%s10597_s5 + $0x1d] ss:$8 sm:$0x7] }
 0xdd3   : > { %v2445_v15 = vpop.xlane.xlu0 %2444 }
 0xdd4   : > { %v2451_v16 = vmul.f32 %v2445_v15, %v8237_v43  ;;  %v7378_v15 = vld [vmem:[%s10596_s3 + $0x194] sm:$0xf] }
 0xdd6   : > { %v9003_v19 = vsub.f32 %v8991_v4, %v2451_v16  ;;  %v6434_v16 = vld [vmem:[%s10596_s3 + $0x1a8] sm:$0xf0] }
 0xdd8   : > { %v2457_v17 = vmul.f32 %v9003_v19, %v9003_v19 }
 0xdda   : > { %2460 = vadd.xlane.f32.xlu1 %v2457_v17 }
 0xddb   : > { %v2218_v18 = vpop.xlane.xlu0 %2217  ;;  %v2447_v20 = vpop.xlane.xlu1 %2446 }
 0xddc   : > { %7755 = vrcp.f32 %v2218_v18  ;;  %v2452_v54 = vmul.f32 %v2447_v20, %v8237_v43  ;;  %v6433_v18 = vor.u32 %v7381_v14, %v6432_v10  ;;  %v6437_v20 = vor.u32 %v7378_v15, %v6434_v16  ;;  %v7432_v10 = vld [vmem:[%s10598_s4 + $0xc0] sm:$0xff] }
 0xddd   : > { %v9181_v14 = vperm.slane %v6293_v7, 0 }
 0xdde   : > { %v9009_v21 = vsub.f32 %v8996_v8, %v2452_v54  ;;  %2612 = vmatpush.bf16.msrb.mxu2 %v6433_v18 }
 0xde0   : > { %v2458_v23 = vmul.f32 %v9009_v21, %v9009_v21 }
 0xde2   : > { %v7756_v41 = vpop.eup %7755  ;;  %2462 = vadd.xlane.f32.xlu2 %v2458_v23 }
 0xde3   : > { %v2224_v24 = vmul.f32 %v7756_v41, %v7752_v6  ;;  %v7384_v6 = vld [vmem:[%s10596_s3 + $0x1c4] sm:$0xf]  ;;  %s7909_s3 = sshra.s32 %s5684_s20, 4  ;;  %s7910_s3 = int_to_ptr.hbm [resolvable:$true] %s7909_s3 }
 0xde4   : > { %v6445_v13 = vor.u32 %v7384_v6, %v6442_v9  ;;  %v7433_v6 = vld [vmem:[%s10598_s4 + $0xc8] sm:$0xff]  ;;  %v7424_v9 = vld [vmem:[%s10598_s4 + $0x80] sm:$0xff]  ;;  %p7916_p0 = scmp.lt.s32.totalorder %s7910_s3, %s10564_s15 }
 0xde5   : > { %v2226_v27 = vpack.c.bf16 %v2224_v24, %v2224_v24  ;;  %2819 = vmatpush.bf16.msra.mxu0 %v7433_v6 }
 0xde6   : > { %2629 = vmatpush.bf16.msrb.mxu3 %v6445_v13 }
 0xde7   : > { %6393 = vmatmul.msk.bf16.gmra.mxu2 %vm1138_vm12, %v2226_v27 }
 0xde9   : > { %2820 = vmatpush.bf16.msra.mxu0 %v7432_v10  ;;  %v9198_v10 = vperm.slane %v6291_v3, 0 }
 0xdea   : > { %2630 = vmatpush.bf16.msrb.mxu3 %v6437_v20 }
 0xe09   : > { %v2364_v28 = vpop.f32.mrf.mxu1 }
 0xe0a   : > { %2375 = vrot.lane.b32.xlu1 %v2364_v28, %s8022_s29 }
 0xe11   : > { %v2366_v45 = vpop.f32.mrf.mxu1 }
 0xe4d   : > { %v2461_v11 = vpop.xlane.xlu1 %2460 }
 0xe4e   : > { %v2467_v17 = vmul.f32 %v2461_v11, %v8237_v43  ;;  %v9183_v11 = vperm.slane %v6293_v7, 1 }
 0xe50   : > { %v2470_v54 = vadd.f32 1e-05, %v2467_v17 }
 0xe52   : > { %7757 = vrsqrt.f32 %v2470_v54  ;;  %vm2479_vm13 = vweird.f32 %v2470_v54 }
 0xe55   : > { %v2463_v23 = vpop.xlane.xlu2 %2462 }
 0xe56   : > { %v2468_v41 = vmul.f32 %v2463_v23, %v8237_v43 }
 0xe58   : > { %v7758_v24 = vpop.eup %7757  ;;  %v2471_v27 = vadd.f32 1e-05, %v2468_v41 }
 0xe59   : > { %v2474_v28 = vmul.f32 %v7758_v24, %v2470_v54  ;;  %vm2480_vm12 = vweird.f32 %v7758_v24 }
 0xe5a   : > { %7759 = vrsqrt.f32 %v2471_v27  ;;  %vm2481_vm5 = vmor %vm2479_vm13, %vm2480_vm12  ;;  %vm2489_vm7 = vweird.f32 %v2471_v27  ;;  %vm3122_vm13 = vcmask 1043456  }
 0xe5b   : > { %v2475_v45 = vmul.f32 %v7758_v24, %v2474_v28 }
 0xe5d   : > { %v2476_v56 = vmul.f32 0.5, %v2475_v45 }
 0xe5f   : > { %v2477_v29 = vsub.f32 1.5, %v2476_v56 }
 0xe60   : > { %v7760_v46 = vpop.eup %7759 }
 0xe61   : > { %v2478_v32 = vmul.f32 %v7758_v24, %v2477_v29  ;;  %v2484_v33 = vmul.f32 %v7760_v46, %v2471_v27  ;;  %vm2490_vm6 = vweird.f32 %v7760_v46 }
 0xe62   : > { %vm2491_vm8 = vmor %vm2489_vm7, %vm2490_vm6 }
 0xe63   : > { %v2485_v34 = vmul.f32 %v7760_v46, %v2484_v33  ;;  %v2482_v37 = vsel %vm2481_vm5, %v7758_v24, %v2478_v32 }
 0xe64   : > { %v2503_v39 = vmul.f32 %v2482_v37, %v9003_v19 }
 0xe65   : > { %v2486_v30 = vmul.f32 0.5, %v2485_v34 }
 0xe66   : > { %v2509_v12 = vmul.f32 %v9117_v40, %v2503_v39 }
 0xe67   : > { %v2487_v59 = vsub.f32 1.5, %v2486_v30 }
 0xe68   : > { %v2515_v19 = vadd.f32 %v9124_v31, %v2509_v12 }
 0xe69   : > { %v2488_v42 = vmul.f32 %v7760_v46, %v2487_v59 }
 0xe6a   : > { %v2250_v47 = vpop.f32.mrf.mxu2 }
 0xe6b   : > { %v2492_v48 = vsel %vm2491_vm8, %v7760_v46, %v2488_v42 }
 0xe6c   : > { %v2504_v49 = vmul.f32 %v2492_v48, %v9009_v21  ;;  %v7431_v21 = vld [vmem:[%s10598_s4 + $0xb8] sm:$0xff]  ;;  %s7911_s4 = scalar_lea.hbm %s7910_s3, 4 }
 0xe6d   : > { %2795 = vmatpush.bf16.msra.mxu1 %v7431_v21  ;;  %p7912_p11 = scmp.ne.s32.totalorder %s7910_s3, %s7911_s4 }
 0xe6e   : > { %v2510_v50 = vmul.f32 %v9117_v40, %v2504_v49 }
 0xe6f   : > { %p7913_p12 = pnand %p7912_p11, %p8152_p5 }
 0xe70   : > { %v2516_v51 = vadd.f32 %v9124_v31, %v2510_v50 }
 0xe71   : > { %2796 = vmatpush.bf16.msra.mxu1 %v7430_v60  ;;  %p7914_p13 = pneg %p7913_p12 }
 0xe72   : > { %v2252_v36 = vpop.f32.mrf.mxu2  ;;  %v2518_v55 = vpack.c.bf16 %v2516_v51, %v2515_v19 }
 0xe74   : > { %2613 = vmatmul.bf16.vlgmr.msrb.gmra.mxu2 %v2518_v55  ;;  %2631 = vmatmul.bf16.vlgmr.msrb.gmra.mxu3 %v2518_v55 }
 0xe75   : > { %2797 = vmatpush.bf16.msra.mxu1 %v7429_v62 }
 0xe79   : > { %2798 = vmatpush.bf16.msra.mxu1 %v7428_v0 }
 0xe7c   : > { %v2376_v26 = vpop.permute.xlu1 %2375 }
 0xe7d   : > { %v2382_v35 = vsel %vm1104_vm11, %v2250_v47, %v2376_v26  ;;  %2799 = vmatpush.bf16.msra.mxu1 %v7427_v52 }
 0xe7e   : > { %v2384_v25 = vpack.c.bf16 %v2382_v35, %v2382_v35 }
 0xe80   : > { %2430 = vmatmul.bf16.gmra.mxu0 %v2384_v25 }
 0xe81   : > { %2800 = vmatpush.bf16.msra.mxu1 %v7426_v53 }
 0xe85   : > { %2801 = vmatpush.bf16.msra.mxu1 %v7425_v5 }
 0xe89   : > { %2802 = vmatpush.bf16.msra.mxu1 %v7424_v9 }
 0xef7   : > { %v2614_v13 = vpop.f32.mrf.mxu2  ;;  %v2632_v15 = vpop.f32.mrf.mxu3 }
 0xef8   : > { %v2615_v16 = vadd.f32 %v2614_v13, %v9181_v14  ;;  %v2633_v17 = vadd.f32 %v2632_v15, %v9183_v11 }
 0xefa   : > { %v2647_v18 = vmul.f32 0.044715, %v2615_v16  ;;  %v2648_v20 = vmul.f32 0.044715, %v2633_v17  ;;  %v2641_v25 = vmul.f32 0.5, %v2615_v16  ;;  %v2642_v60 = vmul.f32 0.5, %v2633_v17 }
 0xefc   : > { %v2653_v54 = vmul.f32 %v2647_v18, %v2615_v16  ;;  %v2654_v23 = vmul.f32 %v2648_v20, %v2633_v17 }
 0xefd   : > { %v2431_v41 = vpop.f32.mrf.mxu0 }
 0xefe   : > { %v2659_v24 = vmul.f32 %v2653_v54, %v2615_v16  ;;  %v2660_v27 = vmul.f32 %v2654_v23, %v2633_v17  ;;  %v2437_v28 = vadd.f32 %v2431_v41, %v8715_v22 }
 0xeff   : > { %v2616_v45 = vpop.f32.mrf.mxu2  ;;  %v2634_v56 = vpop.f32.mrf.mxu3 }
 0xf00   : > { %v2665_v29 = vadd.f32 %v2659_v24, %v2615_v16  ;;  %v9189_v46 = vadd.f32 %v8987_v2, %v2437_v28  ;;  %v2617_v32 = vadd.f32 %v2616_v45, %v9181_v14  ;;  %v2666_v33 = vadd.f32 %v2660_v27, %v2633_v17 }
 0xf01   : > { %v2635_v34 = vadd.f32 %v2634_v56, %v9183_v11 }
 0xf02   : > { %v2649_v37 = vmul.f32 0.044715, %v2617_v32  ;;  %v2448_v38 = vsel %vm829_vm0, %v9189_v46, 0.0  ;;  %v2671_v59 = vmul.f32 0.7978846, %v2665_v29  ;;  %v2643_v21 = vmul.f32 0.5, %v2617_v32 }
 0xf03   : > { %v2650_v30 = vmul.f32 0.044715, %v2635_v34  ;;  %2449 = vadd.xlane.f32.xlu2 %v2448_v38  ;;  %v2672_v22 = vmul.f32 0.7978846, %v2666_v33  ;;  %v2644_v61 = vmul.f32 0.5, %v2635_v34 }
 0xf04   : > { %v2655_v39 = vmul.f32 %v2649_v37, %v2617_v32  ;;  %7761 = vtanh.f32 %v2671_v59 }
 0xf05   : > { %v2656_v42 = vmul.f32 %v2650_v30, %v2635_v34  ;;  %v2433_v44 = vpop.f32.mrf.mxu0  ;;  %7763 = vtanh.f32 %v2672_v22 }
 0xf06   : > { %v2661_v47 = vmul.f32 %v2655_v39, %v2617_v32 }
 0xf07   : > { %v2662_v48 = vmul.f32 %v2656_v42, %v2635_v34 }
 0xf08   : > { %v2667_v2 = vadd.f32 %v2661_v47, %v2617_v32 }
 0xf09   : > { %v2668_v49 = vadd.f32 %v2662_v48, %v2635_v34 }
 0xf0a   : > { %v2673_v12 = vmul.f32 0.7978846, %v2667_v2  ;;  %v7762_v19 = vpop.eup %7761 }
 0xf0b   : > { %v2674_v50 = vmul.f32 0.7978846, %v2668_v49  ;;  %v7764_v51 = vpop.eup %7763  ;;  %v2683_v36 = vadd.f32 1.0, %v7762_v19  ;;  %v7462_v19 = vld [vmem:[%s10599_s6 + $0xb0] sm:$0xf0] }
 0xf0c   : > { %7765 = vtanh.f32 %v2673_v12  ;;  %v2684_v26 = vadd.f32 1.0, %v7764_v51 }
 0xf0d   : > { %7767 = vtanh.f32 %v2674_v50  ;;  %v2689_v63 = vmul.f32 %v2683_v36, %v2641_v25  ;;  %v6588_v50 = vld [vmem:[%s10599_s6 + $0xa8] sm:$0xf]  ;;  %v6584_v36 = vld [vmem:[%s10599_s6 + $0x90] sm:$0xf]  ;;  %v6576_v25 = vld [vmem:[%s10599_s6 + $0x60] sm:$0xf] }
 0xf0e   : > { %v2690_v1 = vmul.f32 %v2684_v26, %v2642_v60  ;;  %v6589_v51 = vor.u32 %v7462_v19, %v6588_v50  ;;  %v7456_v26 = vld [vmem:[%s10599_s6 + $0x80] sm:$0xf0]  ;;  %v6572_v60 = vld [vmem:[%s10599_s6 + $0x48] sm:$0xf] }
 0xf10   : > { %3002 = vmatpush.bf16.msra.mxu2 %v6589_v51 }
 0xf12   : > { %v7766_v55 = vpop.eup %7765 }
 0xf13   : > { %v7768_v35 = vpop.eup %7767  ;;  %v2685_v58 = vadd.f32 1.0, %v7766_v55  ;;  %v6580_v55 = vld [vmem:[%s10599_s6 + $0x78] sm:$0xf] }
 0xf14   : > { %v2686_v62 = vadd.f32 1.0, %v7768_v35  ;;  %v6581_v35 = vor.u32 %v7456_v26, %v6580_v55 }
 0xf15   : > { %v2691_v0 = vmul.f32 %v2685_v58, %v2643_v21  ;;  %v7453_v21 = vld [vmem:[%s10599_s6 + $0x68] sm:$0xf0] }
 0xf16   : > { %v2692_v52 = vmul.f32 %v2686_v62, %v2644_v61  ;;  %v6577_v58 = vor.u32 %v7453_v21, %v6576_v25  ;;  %v7450_v61 = vld [vmem:[%s10599_s6 + $0x50] sm:$0xf0] }
 0xf17   : > { %v2695_v57 = vpack.c.bf16 %v2691_v0, %v2689_v63  ;;  %v6573_v62 = vor.u32 %v7450_v61, %v6572_v60  ;;  %v6568_v63 = vld [vmem:[%s10599_s6 + $0x30] sm:$0xf]  ;;  %v7447_v0 = vld [vmem:[%s10599_s6 + $0x38] sm:$0xf0] }
 0xf18   : > { %v2696_v53 = vpack.c.bf16 %v2692_v52, %v2690_v1  ;;  %v6569_v1 = vor.u32 %v7447_v0, %v6568_v63  ;;  %v6564_v52 = vld [vmem:[%s10599_s6 + $0x18] sm:$0xf] }
 0xf19   : > { %2803 = vmatmul.bf16.vlgmr.msra.gmra.mxu1 %v2695_v57  ;;  %v7444_v57 = vld [vmem:[%s10599_s6 + $0x20] sm:$0xf0] }
 0xf1a   : > { %2821 = vmatmul.bf16.vlgmr.msra.gmra.mxu0 %v2696_v53  ;;  %v6565_v53 = vor.u32 %v7444_v57, %v6564_v52  ;;  %v3018_v52 = vld [vmem:[%s10556_s7 + $0x8] sm:$0xf] }
 0xf1b   : > { %3019 = vst [vmem:[#allocation3 + $0x10] sm:$0xf] %v3018_v52 }
 0xf22   : > { %v9283_v57 = vld [vmem:[#allocation3 + $0x10] sm:$0xf] }
 0xf76   : > { %v2450_v5 = vpop.xlane.xlu2 %2449 }
 0xf77   : > { %v2453_v13 = vmul.f32 %v2450_v5, %v8237_v43 }
 0xf79   : > { %v2456_v17 = vsub.f32 %v9189_v46, %v2453_v13 }
 0xf7b   : > { %v2459_v23 = vmul.f32 %v2456_v17, %v2456_v17 }
 0xf7d   : > { %v2464_v27 = vsel %vm829_vm0, %v2459_v23, 0.0 }
 0xf96   : > { %v2804_v6 = vpop.f32.mrf.mxu1 }
 0xf97   : > { %v2822_v7 = vpop.f32.mrf.mxu0 }
 0xf98   : > { %v2823_v9 = vadd.f32 %v2822_v7, %v2804_v6  ;;  %v6560_v6 = vld [vmem:[%s10599_s6] sm:$0xf]  ;;  %v7441_v7 = vld [vmem:[%s10599_s6 + $0x8] sm:$0xf0] }
 0xf9a   : > { %v2831_v15 = vadd.f32 %v2823_v9, %v8991_v4  ;;  %v6561_v9 = vor.u32 %v7441_v7, %v6560_v6 }
 0xf9c   : > { %v2837_v16 = vadd.f32 %v9198_v10, %v2831_v15 }
 0xf9e   : > { %2843 = vadd.xlane.f32.xlu0 %v2837_v16  ;;  %v2806_v18 = vpop.f32.mrf.mxu1 }
 0xf9f   : > { %v2824_v20 = vpop.f32.mrf.mxu0 }
 0xfa0   : > { %v2825_v54 = vadd.f32 %v2824_v20, %v2806_v18 }
 0xfa2   : > { %v2832_v41 = vadd.f32 %v2825_v54, %v8996_v8 }
 0xfa4   : > { %v2838_v24 = vadd.f32 %v9198_v10, %v2832_v41 }
 0xfa6   : > { %2845 = vadd.xlane.f32.xlu2 %v2838_v24  ;;  %2465 = vadd.xlane.f32.xlu0 %v2464_v27 }
0x1011   : > { %v2844_v28 = vpop.xlane.xlu0 %2843 }
0x1012   : > { %v2850_v4 = vmul.f32 %v2844_v28, %v8237_v43 }
0x1014   : > { %v9208_v45 = vsub.f32 %v2837_v16, %v2850_v4  ;;  %v7672_v4 = vld [vmem:[%s10556_s7] ss:$0 sm:$0xff] }
0x1016   : > { %v2856_v56 = vmul.f32 %v9208_v45, %v9208_v45 }
0x1018   : > { %2859 = vadd.xlane.f32.xlu2 %v2856_v56 }
0x1019   : > { %v2846_v29 = vpop.xlane.xlu2 %2845  ;;  %v2466_v32 = vpop.xlane.xlu0 %2465 }
0x101a   : > { %v2851_v33 = vmul.f32 %v2846_v29, %v8237_v43  ;;  %v2469_v8 = vmul.f32 %v2466_v32, %v8237_v43  ;;  %v7673_v32 = vld [vmem:[%s10556_s7 + $0x1] ss:$0 sm:$0xff] }
0x101c   : > { %v9214_v34 = vsub.f32 %v2838_v24, %v2851_v33  ;;  %v2472_v37 = vadd.f32 1e-05, %v2469_v8 }
0x101e   : > { %7769 = vrsqrt.f32 %v2472_v37  ;;  %v2857_v30 = vmul.f32 %v9214_v34, %v9214_v34  ;;  %vm2499_vm10 = vweird.f32 %v2472_v37 }
0x1020   : > { %2861 = vadd.xlane.f32.xlu0 %v2857_v30 }
0x1024   : > { %v7770_v38 = vpop.eup %7769 }
0x1025   : > { %v2494_v59 = vmul.f32 %v7770_v38, %v2472_v37  ;;  %vm2500_vm9 = vweird.f32 %v7770_v38 }
0x1026   : > { %vm2501_vm14 = vmor %vm2499_vm10, %vm2500_vm9 }
0x1027   : > { %v2495_v39 = vmul.f32 %v7770_v38, %v2494_v59 }
0x1029   : > { %v2496_v22 = vmul.f32 0.5, %v2495_v39 }
0x102b   : > { %v2497_v42 = vsub.f32 1.5, %v2496_v22 }
0x102d   : > { %v2498_v44 = vmul.f32 %v7770_v38, %v2497_v42 }
0x102f   : > { %v2502_v47 = vsel %vm2501_vm14, %v7770_v38, %v2498_v44 }
0x1030   : > { %v2505_v48 = vmul.f32 %v2502_v47, %v2456_v17 }
0x1032   : > { %v2511_v2 = vmul.f32 %v9117_v40, %v2505_v48  ;;  %v7459_v40 = vld [vmem:[%s10599_s6 + $0x98] sm:$0xf0] }
0x1034   : > { %v2517_v49 = vadd.f32 %v9124_v31, %v2511_v2  ;;  %v6585_v31 = vor.u32 %v7459_v40, %v6584_v36 }
0x1036   : > { %v2519_v12 = vpack.c.bf16 %v2517_v49, %v2517_v49  ;;  %3003 = vmatpush.bf16.msra.mxu2 %v6585_v31 }
0x1038   : > { %2618 = vmatmul.bf16.gmra.mxu2 %v2519_v12  ;;  %2636 = vmatmul.bf16.gmra.mxu3 %v2519_v12 }
0x103a   : > { %3004 = vmatpush.bf16.msra.mxu2 %v6581_v35 }
0x103e   : > { %3005 = vmatpush.bf16.msra.mxu2 %v6577_v58 }
0x1042   : > { %3006 = vmatpush.bf16.msra.mxu2 %v6573_v62 }
0x1046   : > { %3007 = vmatpush.bf16.msra.mxu2 %v6569_v1 }
0x104a   : > { %3008 = vmatpush.bf16.msra.mxu2 %v6565_v53  ;;  %v3123_v53 = vsel %vm3122_vm13, %v9283_v57, 0.0 }
0x104b   : > { %3124 = vadd.xlane.f32.xlu0 %v3123_v53  ;;  %v6635_v53 = vld [vmem:[%s10557_s8 + $0x90] sm:$0xf] }
0x104e   : > { %3009 = vmatpush.bf16.msra.mxu2 %v6561_v9 }
0x108b   : > { %v2860_v3 = vpop.xlane.xlu2 %2859 }
0x108c   : > { %v2866_v5 = vmul.f32 %v2860_v3, %v8237_v43  ;;  %v7674_v3 = vld [vmem:[%s10556_s7 + $0x2] ss:$0 sm:$0xff] }
0x108e   : > { %v2869_v13 = vadd.f32 1e-05, %v2866_v5 }
0x1090   : > { %7771 = vrsqrt.f32 %v2869_v13  ;;  %vm2878_vm1 = vweird.f32 %v2869_v13 }
0x1093   : > { %v2862_v15 = vpop.xlane.xlu0 %2861 }
0x1094   : > { %v2867_v16 = vmul.f32 %v2862_v15, %v8237_v43 }
0x1096   : > { %v7772_v17 = vpop.eup %7771  ;;  %v2870_v18 = vadd.f32 1e-05, %v2867_v16 }
0x1097   : > { %v2873_v20 = vmul.f32 %v7772_v17, %v2869_v13  ;;  %vm2879_vm15 = vweird.f32 %v7772_v17 }
0x1098   : > { %7773 = vrsqrt.f32 %v2870_v18  ;;  %vm2880_vm2 = vmor %vm2878_vm1, %vm2879_vm15  ;;  %vm2888_vm4 = vweird.f32 %v2870_v18 }
0x1099   : > { %v2874_v54 = vmul.f32 %v7772_v17, %v2873_v20 }
0x109b   : > { %v2875_v23 = vmul.f32 0.5, %v2874_v54 }
0x109d   : > { %v2876_v41 = vsub.f32 1.5, %v2875_v23 }
0x109e   : > { %v7774_v24 = vpop.eup %7773 }
0x109f   : > { %v2877_v27 = vmul.f32 %v7772_v17, %v2876_v41  ;;  %v2883_v28 = vmul.f32 %v7774_v24, %v2870_v18  ;;  %vm2889_vm3 = vweird.f32 %v7774_v24 }
0x10a0   : > { %vm2890_vm12 = vmor %vm2888_vm4, %vm2889_vm3  ;;  %vm3423_vm3 = vcmask 162816   ;;  %vm3430_vm4 = vcmask 158720  }
0x10a1   : > { %v2881_v56 = vsel %vm2880_vm2, %v7772_v17, %v2877_v27  ;;  %v2884_v29 = vmul.f32 %v7774_v24, %v2883_v28  ;;  %vm3466_vm2 = vcmask 1041408  }
0x10a2   : > { %v2902_v33 = vmul.f32 %v2881_v56, %v9208_v45 }
0x10a3   : > { %v2885_v8 = vmul.f32 0.5, %v2884_v29 }
0x10a4   : > { %v2906_v37 = vmul.f32 %v7672_v4, %v2902_v33 }
0x10a5   : > { %v2886_v30 = vsub.f32 1.5, %v2885_v8 }
0x10a6   : > { %v2910_v38 = vadd.f32 %v7673_v32, %v2906_v37  ;;  %v6683_v37 = vld [vmem:[%s10557_s8 + $0x150] sm:$0xf] }
0x10a7   : > { %v2887_v59 = vmul.f32 %v7774_v24, %v2886_v30  ;;  %v7509_v30 = vld [vmem:[%s10557_s8 + $0x164] sm:$0xf0] }
0x10a9   : > { %v2891_v39 = vsel %vm2890_vm12, %v7774_v24, %v2887_v59  ;;  %v6684_v59 = vor.u32 %v7509_v30, %v6683_v37  ;;  %v6611_v37 = vld [vmem:[%s10557_s8 + $0x30] sm:$0xf]  ;;  %v7473_v30 = vld [vmem:[%s10557_s8 + $0x44] sm:$0xf0] }
0x10aa   : > { %v2903_v22 = vmul.f32 %v2891_v39, %v9214_v34  ;;  %v6685_v39 = vld [vmem:[%s10557_s8 + $0x168] sm:$0xf0] }
0x10ab   : > { %3330 = vmatpush.bf16.msra.mxu3 %v6684_v59  ;;  %v6612_v59 = vor.u32 %v7473_v30, %v6611_v37 }
0x10ac   : > { %v2907_v42 = vmul.f32 %v7672_v4, %v2903_v22  ;;  %v6691_v22 = vld [vmem:[%s10557_s8 + $0x158] sm:$0xf] }
0x10ae   : > { %v2911_v44 = vadd.f32 %v7673_v32, %v2907_v42  ;;  %v7510_v42 = vld [vmem:[%s10557_s8 + $0x16c] sm:$0xf0] }
0x10b0   : > { %v2920_v47 = vpack.c.bf16 %v2911_v44, %v2910_v38  ;;  %v7506_v38 = vld [vmem:[%s10557_s8 + $0x154] sm:$0xf] }
0x10b1   : > { %v6688_v44 = vor.u32 %v7506_v38, %v6685_v39  ;;  %v7470_v38 = vld [vmem:[%s10557_s8 + $0x34] sm:$0xf]  ;;  %v6613_v39 = vld [vmem:[%s10557_s8 + $0x48] sm:$0xf0] }
0x10b2   : > { %3010 = vmatmul.bf16.vlgmr.msra.gmra.mxu2 %v2920_v47  ;;  %v6692_v47 = vor.u32 %v7510_v42, %v6691_v22  ;;  %v6619_v22 = vld [vmem:[%s10557_s8 + $0x38] sm:$0xf]  ;;  %v7474_v42 = vld [vmem:[%s10557_s8 + $0x4c] sm:$0xf0] }
0x10b3   : > { %3348 = vmatpush.bf16.msrb.mxu1 %v6688_v44 }
0x10b4   : > { %3366 = vmatpush.bf16.msrb.mxu0 %v6692_v47  ;;  %v6616_v47 = vor.u32 %v7470_v38, %v6613_v39 }
0x10bb   : > { %v2619_v48 = vpop.f32.mrf.mxu2  ;;  %v2637_v2 = vpop.f32.mrf.mxu3 }
0x10bc   : > { %v2620_v49 = vadd.f32 %v2619_v48, %v9181_v14  ;;  %v2638_v45 = vadd.f32 %v2637_v2, %v9183_v11  ;;  %v6671_v48 = vld [vmem:[%s10557_s8 + $0x120] sm:$0xf]  ;;  %v7503_v2 = vld [vmem:[%s10557_s8 + $0x134] sm:$0xf0] }
0x10be   : > { %v2651_v12 = vmul.f32 0.044715, %v2620_v49  ;;  %v2652_v50 = vmul.f32 0.044715, %v2638_v45  ;;  %v2645_v60 = vmul.f32 0.5, %v2620_v49  ;;  %v2646_v61 = vmul.f32 0.5, %v2638_v45  ;;  %v3125_v20 = vpop.xlane.xlu0 %3124 }
0x10bf   : > { %v3128_v23 = vmul.f32 %v3125_v20, %v8237_v43 }
0x10c0   : > { %v2657_v19 = vmul.f32 %v2651_v12, %v2620_v49  ;;  %v2658_v51 = vmul.f32 %v2652_v50, %v2638_v45  ;;  %v6673_v12 = vld [vmem:[%s10557_s8 + $0x138] sm:$0xf0]  ;;  %v6679_v50 = vld [vmem:[%s10557_s8 + $0x128] sm:$0xf] }
0x10c1   : > { %v9304_v27 = vsub.f32 %v9283_v57, %v3128_v23  ;;  %v7479_v23 = vld [vmem:[%s10557_s8 + $0x74] sm:$0xf0] }
0x10c2   : > { %v2663_v36 = vmul.f32 %v2657_v19, %v2620_v49  ;;  %v2664_v40 = vmul.f32 %v2658_v51, %v2638_v45  ;;  %v7504_v19 = vld [vmem:[%s10557_s8 + $0x13c] sm:$0xf0] }
0x10c3   : > { %v2621_v31 = vpop.f32.mrf.mxu2  ;;  %v2639_v55 = vpop.f32.mrf.mxu3  ;;  %v3134_v56 = vmul.f32 %v9304_v27, %v9304_v27 }
0x10c4   : > { %v2669_v26 = vadd.f32 %v2663_v36, %v2620_v49  ;;  %v2670_v34 = vadd.f32 %v2664_v40, %v2638_v45  ;;  %v7500_v49 = vld [vmem:[%s10557_s8 + $0x124] sm:$0xf]  ;;  %v6672_v45 = vor.u32 %v7503_v2, %v6671_v48  ;;  %v6680_v36 = vor.u32 %v7504_v19, %v6679_v50  ;;  %v6659_v40 = vld [vmem:[%s10557_s8 + $0xf0] sm:$0xf]  ;;  %v7497_v31 = vld [vmem:[%s10557_s8 + $0x104] sm:$0xf0] }
0x10c5   : > { %v3139_v33 = vsel %vm3122_vm13, %v3134_v56, 0.0  ;;  %v6676_v51 = vor.u32 %v7500_v49, %v6673_v12  ;;  %v7494_v55 = vld [vmem:[%s10557_s8 + $0xf4] sm:$0xf]  ;;  %v6631_v56 = vld [vmem:[%s10557_s8 + $0x68] sm:$0xf]  ;;  %v6620_v48 = vor.u32 %v7474_v42, %v6619_v22 }
0x10c6   : > { %v2675_v35 = vmul.f32 0.7978846, %v2669_v26  ;;  %v2676_v25 = vmul.f32 0.7978846, %v2670_v34  ;;  %3331 = vmatpush.bf16.msra.mxu3 %v6672_v45  ;;  %3367 = vmatpush.bf16.msrb.mxu0 %v6680_v36  ;;  %v6660_v26 = vor.u32 %v7497_v31, %v6659_v40  ;;  %v6661_v34 = vld [vmem:[%s10557_s8 + $0x108] sm:$0xf0] }
0x10c7   : > { %3349 = vmatpush.bf16.msrb.mxu1 %v6676_v51  ;;  %v6599_v49 = vld [vmem:[%s10557_s8] sm:$0xf]  ;;  %v7467_v45 = vld [vmem:[%s10557_s8 + $0x14] sm:$0xf0]  ;;  %v7464_v12 = vld [vmem:[%s10557_s8 + $0x4] sm:$0xf] }
0x10c8   : > { %7775 = vtanh.f32 %v2675_v35  ;;  %v6667_v35 = vld [vmem:[%s10557_s8 + $0xf8] sm:$0xf]  ;;  %v6600_v19 = vor.u32 %v7467_v45, %v6599_v49  ;;  %v6601_v51 = vld [vmem:[%s10557_s8 + $0x18] sm:$0xf0]  ;;  %v6607_v36 = vld [vmem:[%s10557_s8 + $0x8] sm:$0xf] }
0x10c9   : > { %7777 = vtanh.f32 %v2676_v25  ;;  %v7498_v25 = vld [vmem:[%s10557_s8 + $0x10c] sm:$0xf0]  ;;  %v6604_v40 = vor.u32 %v7464_v12, %v6601_v51  ;;  %v7468_v31 = vld [vmem:[%s10557_s8 + $0x1c] sm:$0xf0] }
0x10ca   : > { %3332 = vmatpush.bf16.msra.mxu3 %v6660_v26 }
0x10ce   : > { %v7776_v21 = vpop.eup %7775 }
0x10cf   : > { %v7778_v58 = vpop.eup %7777  ;;  %v2687_v14 = vadd.f32 1.0, %v7776_v21  ;;  %v6664_v21 = vor.u32 %v7494_v55, %v6661_v34  ;;  %v6608_v55 = vor.u32 %v7468_v31, %v6607_v36 }
0x10d0   : > { %v2688_v11 = vadd.f32 1.0, %v7778_v58  ;;  %v6668_v58 = vor.u32 %v7498_v25, %v6667_v35 }
0x10d1   : > { %v2693_v62 = vmul.f32 %v2687_v14, %v2645_v60  ;;  %3350 = vmatpush.bf16.msrb.mxu1 %v6664_v21  ;;  %v6647_v60 = vld [vmem:[%s10557_s8 + $0xc0] sm:$0xf]  ;;  %v7491_v14 = vld [vmem:[%s10557_s8 + $0xd4] sm:$0xf0] }
0x10d2   : > { %v2694_v63 = vmul.f32 %v2688_v11, %v2646_v61  ;;  %3368 = vmatpush.bf16.msrb.mxu0 %v6668_v58  ;;  %v7488_v61 = vld [vmem:[%s10557_s8 + $0xc4] sm:$0xf]  ;;  %v6648_v11 = vor.u32 %v7491_v14, %v6647_v60 }
0x10d3   : > { %v2697_v0 = vpack.c.bf16 %v2693_v62, %v2693_v62  ;;  %v6649_v62 = vld [vmem:[%s10557_s8 + $0xd8] sm:$0xf0] }
0x10d4   : > { %v2698_v1 = vpack.c.bf16 %v2694_v63, %v2694_v63  ;;  %v6655_v63 = vld [vmem:[%s10557_s8 + $0xc8] sm:$0xf]  ;;  %3333 = vmatpush.bf16.msra.mxu3 %v6648_v11 }
0x10d5   : > { %2808 = vmatmul.bf16.gmra.mxu1 %v2697_v0  ;;  %v7492_v0 = vld [vmem:[%s10557_s8 + $0xdc] sm:$0xf0] }
0x10d6   : > { %2826 = vmatmul.bf16.gmra.mxu0 %v2698_v1  ;;  %v6652_v1 = vor.u32 %v7488_v61, %v6649_v62  ;;  %v6656_v52 = vor.u32 %v7492_v0, %v6655_v63 }
0x10d8   : > { %3351 = vmatpush.bf16.msrb.mxu1 %v6652_v1  ;;  %3369 = vmatpush.bf16.msrb.mxu0 %v6656_v52 }
0x1135   : > { %v3011_v5 = vpop.f32.mrf.mxu2 }
0x1136   : > { %v9290_v6 = vadd.f32 %v7674_v3, %v3011_v5  ;;  %v7482_v5 = vld [vmem:[%s10557_s8 + $0x94] sm:$0xf] }
0x1138   : > { %3118 = vadd.xlane.f32.xlu2 %v9290_v6 }
0x113d   : > { %v3013_v7 = vpop.f32.mrf.mxu2 }
0x113e   : > { %v9293_v9 = vadd.f32 %v7674_v3, %v3013_v7  ;;  %v7485_v3 = vld [vmem:[%s10557_s8 + $0xa4] sm:$0xf0] }
0x113f   : > { %v6636_v7 = vor.u32 %v7485_v3, %v6635_v53 }
0x1140   : > { %3120 = vadd.xlane.f32.xlu1 %v9293_v9 }
0x1141   : > { %3334 = vmatpush.bf16.msra.mxu3 %v6636_v7  ;;  %v3103_v7 = vld [vmem:[%s10559_s10] ss:$8 sm:$0x7] }
0x1152   : > { %v2809_v13 = vpop.f32.mrf.mxu1 }
0x1153   : > { %v2827_v15 = vpop.f32.mrf.mxu0 }
0x1154   : > { %v9296_v16 = vadd.f32 %v2827_v15, %v2809_v13  ;;  %v6637_v13 = vld [vmem:[%s10557_s8 + $0xa8] sm:$0xf0]  ;;  %v6643_v15 = vld [vmem:[%s10557_s8 + $0x98] sm:$0xf] }
0x115a   : > { %v2811_v17 = vpop.f32.mrf.mxu1 }
0x115b   : > { %v2829_v18 = vpop.f32.mrf.mxu0  ;;  %v7486_v17 = vld [vmem:[%s10557_s8 + $0xac] sm:$0xf0] }
0x115c   : > { %v6640_v18 = vor.u32 %v7482_v5, %v6637_v13  ;;  %v6644_v20 = vor.u32 %v7486_v17, %v6643_v15 }
0x115e   : > { %3352 = vmatpush.bf16.msrb.mxu1 %v6640_v18  ;;  %3370 = vmatpush.bf16.msrb.mxu0 %v6644_v20  ;;  %v3182_v20 = vperm.slane %v3103_v7, 0 }
0x11ab   : > { %v3119_v54 = vpop.xlane.xlu2 %3118 }
0x11ac   : > { %v3126_v41 = vmul.f32 %v3119_v54, %v8237_v43  ;;  %v6623_v54 = vld [vmem:[%s10557_s8 + $0x60] sm:$0xf] }
0x11ae   : > { %v9301_v24 = vsub.f32 %v9290_v6, %v3126_v41  ;;  %v7476_v41 = vld [vmem:[%s10557_s8 + $0x64] sm:$0xf] }
0x11b0   : > { %v3132_v28 = vmul.f32 %v9301_v24, %v9301_v24 }
0x11b2   : > { %3135 = vadd.xlane.f32.xlu2 %v3132_v28  ;;  %v6624_v28 = vor.u32 %v7479_v23, %v6623_v54  ;;  %v6590_v23 = vld [vmem:[%s10559_s10 + $0x1] ss:$8 sm:$0x7] }
0x11b3   : > { %v3121_v4 = vpop.xlane.xlu1 %3120 }
0x11b4   : > { %v3127_v29 = vmul.f32 %v3121_v4, %v8237_v43  ;;  %v6625_v4 = vld [vmem:[%s10557_s8 + $0x78] sm:$0xf0]  ;;  %3335 = vmatpush.bf16.msra.mxu3 %v6624_v28 }
0x11b6   : > { %v9312_v32 = vsub.f32 %v9293_v9, %v3127_v29  ;;  %v7480_v29 = vld [vmem:[%s10557_s8 + $0x7c] sm:$0xf0] }
0x11b8   : > { %v3133_v8 = vmul.f32 %v9312_v32, %v9312_v32  ;;  %3336 = vmatpush.bf16.msra.mxu3 %v6612_v59 }
0x11ba   : > { %3137 = vadd.xlane.f32.xlu0 %v3133_v8  ;;  %3140 = vadd.xlane.f32.xlu2 %v3139_v33  ;;  %v6628_v33 = vor.u32 %v7476_v41, %v6625_v4  ;;  %v6632_v8 = vor.u32 %v7480_v29, %v6631_v56  ;;  %v3188_v56 = vperm.slane %v6590_v23, 0 }
0x11bc   : > { %3353 = vmatpush.bf16.msrb.mxu1 %v6628_v33  ;;  %3371 = vmatpush.bf16.msrb.mxu0 %v6632_v8 }
0x11bd   : > { %3337 = vmatpush.bf16.msra.mxu3 %v6600_v19 }
0x11c0   : > { %3354 = vmatpush.bf16.msrb.mxu1 %v6616_v47  ;;  %3372 = vmatpush.bf16.msrb.mxu0 %v6620_v48  ;;  %v6595_v48 = vld [vmem:[%s10559_s10 + $0x6] ss:$8 sm:$0x7] }
0x11c1   : > { %v3198_v36 = vperm.slane %v6595_v48, 2 }
0x11c4   : > { %3355 = vmatpush.bf16.msrb.mxu1 %v6604_v40  ;;  %3373 = vmatpush.bf16.msrb.mxu0 %v6608_v55 }
0x1225   : > { %v3136_v44 = vpop.xlane.xlu2 %3135 }
0x1226   : > { %v3142_v2 = vmul.f32 %v3136_v44, %v8237_v43 }
0x1228   : > { %v3145_v50 = vadd.f32 1e-05, %v3142_v2  ;;  %v3197_v2 = vperm.slane %v6595_v48, 1 }
0x122a   : > { %7779 = vrsqrt.f32 %v3145_v50  ;;  %vm3154_vm6 = vweird.f32 %v3145_v50 }
0x122d   : > { %v3141_v26 = vpop.xlane.xlu2 %3140  ;;  %v3138_v34 = vpop.xlane.xlu0 %3137 }
0x122e   : > { %v3144_v35 = vmul.f32 %v3141_v26, %v8237_v43  ;;  %v3143_v25 = vmul.f32 %v3138_v34, %v8237_v43 }
0x1230   : > { %v7780_v21 = vpop.eup %7779  ;;  %v3147_v58 = vadd.f32 1e-05, %v3144_v35  ;;  %v3146_v60 = vadd.f32 1e-05, %v3143_v25  ;;  %v3196_v25 = vperm.slane %v6595_v48, 0 }
0x1231   : > { %v3149_v14 = vmul.f32 %v7780_v21, %v3145_v50  ;;  %vm3155_vm5 = vweird.f32 %v7780_v21 }
0x1232   : > { %7781 = vrsqrt.f32 %v3147_v58  ;;  %vm3156_vm7 = vmor %vm3154_vm6, %vm3155_vm5  ;;  %vm3164_vm9 = vweird.f32 %v3146_v60  ;;  %vm3174_vm14 = vweird.f32 %v3147_v58 }
0x1233   : > { %v3150_v61 = vmul.f32 %v7780_v21, %v3149_v14  ;;  %7783 = vrsqrt.f32 %v3146_v60 }
0x1235   : > { %v3151_v11 = vmul.f32 0.5, %v3150_v61 }
0x1237   : > { %v3152_v62 = vsub.f32 1.5, %v3151_v11 }
0x1238   : > { %v7782_v63 = vpop.eup %7781 }
0x1239   : > { %v7784_v0 = vpop.eup %7783  ;;  %v3169_v1 = vmul.f32 %v7782_v63, %v3147_v58  ;;  %v3153_v52 = vmul.f32 %v7780_v21, %v3152_v62  ;;  %vm3175_vm15 = vweird.f32 %v7782_v63 }
0x123a   : > { %v3159_v53 = vmul.f32 %v7784_v0, %v3146_v60  ;;  %vm3165_vm8 = vweird.f32 %v7784_v0  ;;  %vm3176_vm1 = vmor %vm3174_vm14, %vm3175_vm15 }
0x123b   : > { %v3170_v3 = vmul.f32 %v7782_v63, %v3169_v1  ;;  %v3157_v13 = vsel %vm3156_vm7, %v7780_v21, %v3153_v52  ;;  %vm3166_vm10 = vmor %vm3164_vm9, %vm3165_vm8 }
0x123c   : > { %v3160_v5 = vmul.f32 %v7784_v0, %v3159_v53  ;;  %v3178_v54 = vmul.f32 %v3157_v13, %v9301_v24 }
0x123d   : > { %v3171_v17 = vmul.f32 0.5, %v3170_v3 }
0x123e   : > { %v3161_v15 = vmul.f32 0.5, %v3160_v5  ;;  %v3184_v29 = vmul.f32 %v3182_v20, %v3178_v54 }
0x123f   : > { %v3172_v28 = vsub.f32 1.5, %v3171_v17 }
0x1240   : > { %v3162_v18 = vsub.f32 1.5, %v3161_v15  ;;  %v3190_v30 = vadd.f32 %v3188_v56, %v3184_v29 }
0x1241   : > { %v3173_v37 = vmul.f32 %v7782_v63, %v3172_v28 }
0x1242   : > { %v3163_v41 = vmul.f32 %v7784_v0, %v3162_v18 }
0x1243   : > { %v3177_v59 = vsel %vm3176_vm1, %v7782_v63, %v3173_v37 }
0x1244   : > { %v3167_v4 = vsel %vm3166_vm10, %v7784_v0, %v3163_v41  ;;  %v3180_v39 = vmul.f32 %v3177_v59, %v9304_v27 }
0x1245   : > { %v3179_v33 = vmul.f32 %v3167_v4, %v9312_v32 }
0x1246   : > { %v3186_v22 = vmul.f32 %v3182_v20, %v3180_v39 }
0x1247   : > { %v3185_v8 = vmul.f32 %v3182_v20, %v3179_v33 }
0x1248   : > { %v3192_v42 = vadd.f32 %v3188_v56, %v3186_v22 }
0x1249   : > { %v3191_v24 = vadd.f32 %v3188_v56, %v3185_v8 }
0x124a   : > { %v3194_v44 = vpack.c.bf16 %v3192_v42, %v3192_v42 }
0x124b   : > { %v3193_v38 = vpack.c.bf16 %v3191_v24, %v3190_v30 }
0x124d   : > { %3338 = vmatmul.bf16.vlgmr.msra.gmra.mxu3 %v3193_v38  ;;  %3356 = vmatmul.bf16.vlgmr.msrb.gmra.mxu1 %v3193_v38 }
0x124e   : > { %3374 = vmatmul.bf16.vlgmr.msrb.gmra.mxu0 %v3193_v38 }
0x125d   : > { %3343 = vmatmul.bf16.gmra.mxu3 %v3194_v44  ;;  %3361 = vmatmul.bf16.gmra.mxu1 %v3194_v44 }
0x125e   : > { %3379 = vmatmul.bf16.gmra.mxu0 %v3194_v44 }
0x12ca   : > { %v3357_v32 = vpop.f32.mrf.mxu1 }
0x12cb   : > { %v3375_v47 = vpop.f32.mrf.mxu0  ;;  %v3358_v12 = vadd.f32 %v3357_v32, %v3197_v2 }
0x12cc   : > { %v3376_v61 = vadd.f32 %v3375_v47, %v3198_v36 }
0x12d0   : > { %v3339_v49 = vpop.f32.mrf.mxu3 }
0x12d1   : > { %v3340_v0 = vadd.f32 %v3339_v49, %v3196_v25 }
0x12d2   : > { %v3359_v45 = vpop.f32.mrf.mxu1 }
0x12d3   : > { %v3360_v50 = vadd.f32 %v3359_v45, %v3197_v2  ;;  %v3377_v19 = vpop.f32.mrf.mxu0 }
0x12d4   : > { %v3378_v21 = vadd.f32 %v3377_v19, %v3198_v36 }
0x12d5   : > { %v3386_v51 = vpack.c.bf16 %v3360_v50, %v3358_v12 }
0x12d6   : > { %v9483_v1 = vpack.c.bf16 %v3378_v21, %v3376_v61 }
0x12d7   : > { %3496 = vrot.lane.b32.xlu2 %v3386_v51, %s8022_s29  ;;  %v3397_v5 = vsel %vm1104_vm11, %v3386_v51, 0 }
0x12d8   : > { %v3341_v27 = vpop.f32.mrf.mxu3 }
0x12d9   : > { %v3342_v11 = vadd.f32 %v3341_v27, %v3196_v25 }
0x12da   : > { %v3362_v40 = vpop.f32.mrf.mxu1 }
0x12db   : > { %v3363_v31 = vadd.f32 %v3362_v40, %v3197_v2  ;;  %v3380_v55 = vpop.f32.mrf.mxu0  ;;  %v3384_v3 = vpack.c.bf16 %v3342_v11, %v3340_v0 }
0x12dc   : > { %v3381_v26 = vadd.f32 %v3380_v55, %v3198_v36 }
0x12dd   : > { %v3387_v34 = vpack.c.bf16 %v3363_v31, %v3363_v31 }
0x12de   : > { %v9477_v35 = vpack.c.bf16 %v3381_v26, %v3381_v26 }
0x12df   : > { %3498 = vrot.lane.b32.xlu0 %v3387_v34, %s8022_s29  ;;  %v3400_v58 = vsel %vm1104_vm11, %v3387_v34, 0 }
0x12e0   : > { %v3468_v60 = vsel %vm3466_vm2, %v9477_v35, 0  ;;  %v3344_v14 = vpop.f32.mrf.mxu3  ;;  %3408 = vmatpush.bf16.xpose.msrb.mxu2 %v3400_v58 }
0x12e1   : > { %v3345_v62 = vadd.f32 %v3344_v14, %v3196_v25  ;;  %3476 = vmatpush.bf16.msrb.mxu3 %v3468_v60 }
0x12e2   : > { %v3364_v63 = vpop.f32.mrf.mxu1 }
0x12e3   : > { %v3385_v52 = vpack.c.bf16 %v3345_v62, %v3345_v62  ;;  %v3382_v53 = vpop.f32.mrf.mxu0 }
0x12e5   : > { %3477 = vmatpush.bf16.msrb.mxu3 %v9483_v1  ;;  %3492 = vrot.lane.b32.xlu1 %v3385_v52, %s8022_s29 }
0x12e7   : > { %3490 = vrot.lane.b32.xlu0 %v3384_v3, %s8022_s29 }
0x12e8   : > { %v3346_v7 = vpop.f32.mrf.mxu3  ;;  %3409 = vmatpush.bf16.xpose.msrb.mxu2 %v3397_v5 }
0x12ef   : > { %6693 = vmatmul.msk.bf16.vlgmr.msrb.gmra.mxu2 %vm1104_vm11, %v3384_v3 }
0x12ff   : > { %6694 = vmatmul.msk.bf16.gmra.mxu2 %vm1104_vm11, %v3385_v52 }
0x1331   : > { %v3497_v17 = vpop.permute.xlu2 %3496 }
0x1332   : > { %v3507_v18 = vsel %vm1104_vm11, %v3497_v17, 0 }
0x1351   : > { %v3499_v13 = vpop.permute.xlu0 %3498 }
0x1352   : > { %v3510_v15 = vsel %vm1104_vm11, %v3499_v13, 0 }
0x1353   : > { %3518 = vmatpush.bf16.xpose.msra.mxu1 %v3510_v15 }
0x1357   : > { %v3493_v54 = vpop.permute.xlu1 %3492 }
0x1359   : > { %v3491_v20 = vpop.permute.xlu0 %3490 }
0x135b   : > { %3519 = vmatpush.bf16.xpose.msra.mxu1 %v3507_v18 }
0x1362   : > { %6697 = vmatmul.msk.bf16.vlgmr.msra.gmra.mxu1 %vm1104_vm11, %v3491_v20 }
0x1372   : > { %v3411_v23 = vpop.f32.mrf.mxu2  ;;  %6698 = vmatmul.msk.bf16.gmra.mxu1 %vm1104_vm11, %v3493_v54 }
0x1373   : > { %v3420_v41 = vmul.f32 0.125, %v3411_v23 }
0x1375   : > { %v3424_v28 = vsel %vm3423_vm3, %v3420_v41, -inf }
0x1376   : > { %3425 = vmax.xlane.f32.xlu1 %v3424_v28 }
0x137a   : > { %v3413_v4 = vpop.f32.mrf.mxu2 }
0x137b   : > { %v3421_v32 = vmul.f32 0.125, %v3413_v4 }
0x137d   : > { %v3427_v49 = vsel %vm3423_vm3, %v3421_v32, -inf }
0x1382   : > { %v3416_v56 = vpop.f32.mrf.mxu2 }
0x1383   : > { %v3422_v29 = vmul.f32 0.125, %v3416_v56 }
0x1385   : > { %v3431_v33 = vsel %vm3430_vm4, %v3422_v29, -inf }
0x1386   : > { %3432 = vmax.xlane.f32.xlu1 %v3431_v33 }
0x138a   : > { %v3418_v8 = vpop.f32.mrf.mxu2 }
0x13df   : > { %v3521_v37 = vpop.f32.mrf.mxu1 }
0x13e0   : > { %v3530_v30 = vmul.f32 0.125, %v3521_v37 }
0x13e2   : > { %v3533_v24 = vsel %vm3423_vm3, %v3530_v30, -inf }
0x13e3   : > { %3534 = vmax.xlane.f32.xlu0 %v3533_v24 }
0x13e7   : > { %v3523_v38 = vpop.f32.mrf.mxu1 }
0x13e8   : > { %v3531_v59 = vmul.f32 0.125, %v3523_v38 }
0x13e9   : > { %v3426_v39 = vpop.xlane.xlu1 %3425 }
0x13ea   : > { %v3434_v22 = vsub.f32 %v3420_v41, %v3426_v39  ;;  %v3536_v42 = vsel %vm3423_vm3, %v3531_v59, -inf }
0x13eb   : > { %3537 = vmax.xlane.f32.xlu2 %v3536_v42 }
0x13ec   : > { %v3437_v44 = vmul.f32 1.442695, %v3434_v22 }
0x13ee   : > { %7785 = vpow2.f32 %v3437_v44 }
0x13ef   : > { %v3526_v47 = vpop.f32.mrf.mxu1 }
0x13f0   : > { %v3532_v48 = vmul.f32 0.125, %v3526_v47 }
0x13f2   : > { %v3539_v2 = vsel %vm3430_vm4, %v3532_v48, -inf }
0x13f3   : > { %3540 = vmax.xlane.f32.xlu0 %v3539_v2  ;;  %3428 = vmax.xlane.f32.xlu2 %v3427_v49 }
0x13f4   : > { %v9501_v45 = vpop.eup %7785 }
0x13f5   : > { %v3443_v12 = vsel %vm3423_vm3, %v9501_v45, 0.0 }
0x13f6   : > { %3444 = vadd.xlane.f32.xlu1 %v3443_v12  ;;  %v7507_v12 = vld [vmem:[%s10557_s8 + $0x15c] sm:$0xf] }
0x13f7   : > { %v3528_v50 = vpop.f32.mrf.mxu1 }
0x13f8   : > { %v6729_v50 = vld [vmem:[%s10557_s8 + $0x170] sm:$0xf0] }
0x13f9   : > { %v3433_v11 = vpop.xlane.xlu1 %3432 }
0x13fa   : > { %v3436_v62 = vsub.f32 %v3422_v29, %v3433_v11  ;;  %v7477_v11 = vld [vmem:[%s10557_s8 + $0x6c] sm:$0xf] }
0x13fc   : > { %v3441_v0 = vmul.f32 1.442695, %v3436_v62  ;;  %v6709_v62 = vld [vmem:[%s10557_s8 + $0x80] sm:$0xf0] }
0x1456   : > { %v3535_v19 = vpop.xlane.xlu0 %3534 }
0x1457   : > { %v3542_v51 = vsub.f32 %v3530_v30, %v3535_v19  ;;  %v7501_v19 = vld [vmem:[%s10557_s8 + $0x12c] sm:$0xf] }
0x1459   : > { %v3545_v27 = vmul.f32 1.442695, %v3542_v51  ;;  %v6732_v51 = vor.u32 %v7507_v12, %v6729_v50 }
0x145b   : > { %7787 = vpow2.f32 %v3545_v27  ;;  %v6725_v27 = vld [vmem:[%s10557_s8 + $0x140] sm:$0xf0]  ;;  %3651 = vmatpush.bf16.msra.mxu0 %v6732_v51  ;;  %v6791_v51 = vld [vmem:[%s10557_s8 + $0x160] sm:$0xf] }
0x145e   : > { %v3538_v36 = vpop.xlane.xlu2 %3537 }
0x145f   : > { %v3543_v40 = vsub.f32 %v3531_v59, %v3538_v36  ;;  %v6728_v36 = vor.u32 %v7501_v19, %v6725_v27  ;;  %v7511_v27 = vld [vmem:[%s10557_s8 + $0x174] sm:$0xf0] }
0x1461   : > { %v7788_v31 = vpop.eup %7787  ;;  %v3547_v55 = vmul.f32 1.442695, %v3543_v40  ;;  %v7495_v40 = vld [vmem:[%s10557_s8 + $0xfc] sm:$0xf]  ;;  %3652 = vmatpush.bf16.msra.mxu0 %v6728_v36  ;;  %v7508_v36 = vld [vmem:[%s10557_s8 + $0x164] sm:$0xf] }
0x1462   : > { %v3551_v26 = vsel %vm3423_vm3, %v7788_v31, 0.0 }
0x1463   : > { %7789 = vpow2.f32 %v3547_v55  ;;  %3552 = vadd.xlane.f32.xlu2 %v3551_v26 }
0x1466   : > { %v3541_v34 = vpop.xlane.xlu0 %3540  ;;  %v3429_v63 = vpop.xlane.xlu2 %3428 }
0x1467   : > { %v3544_v25 = vsub.f32 %v3532_v48, %v3541_v34  ;;  %v3435_v52 = vsub.f32 %v3421_v32, %v3429_v63  ;;  %v7489_v34 = vld [vmem:[%s10557_s8 + $0xcc] sm:$0xf]  ;;  %v6712_v63 = vor.u32 %v7477_v11, %v6709_v62  ;;  %v7496_v11 = vld [vmem:[%s10557_s8 + $0x104] sm:$0xf] }
0x1469   : > { %v7790_v21 = vpop.eup %7789  ;;  %v3549_v58 = vmul.f32 1.442695, %v3544_v25  ;;  %v3439_v53 = vmul.f32 1.442695, %v3435_v52  ;;  %v3445_v18 = vpop.xlane.xlu1 %3444  ;;  %v6717_v25 = vld [vmem:[%s10557_s8 + $0xe0] sm:$0xf0] }
0x146a   : > { %v3554_v60 = vsel %vm3423_vm3, %v7790_v21, 0.0  ;;  %v6705_v52 = vld [vmem:[%s10557_s8 + $0x50] sm:$0xf0] }
0x146b   : > { %7791 = vpow2.f32 %v3549_v58  ;;  %3555 = vadd.xlane.f32.xlu0 %v3554_v60  ;;  %v7483_v58 = vld [vmem:[%s10557_s8 + $0x9c] sm:$0xf]  ;;  %v6713_v60 = vld [vmem:[%s10557_s8 + $0xb0] sm:$0xf0] }
0x146c   : > { %7793 = vpow2.f32 %v3441_v0  ;;  %v7471_v0 = vld [vmem:[%s10557_s8 + $0x3c] sm:$0xf] }
0x146d   : > { %7795 = vpow2.f32 %v3439_v53  ;;  %v6708_v53 = vor.u32 %v7471_v0, %v6705_v52  ;;  %v6767_v52 = vld [vmem:[%s10557_s8 + $0xd0] sm:$0xf] }
0x1471   : > { %v7792_v14 = vpop.eup %7791 }
0x1472   : > { %v3557_v61 = vsel %vm3430_vm4, %v7792_v14, 0.0  ;;  %v7794_v3 = vpop.eup %7793 }
0x1473   : > { %3558 = vadd.xlane.f32.xlu1 %v3557_v61  ;;  %v3449_v5 = vsel %vm3430_vm4, %v7794_v3, 0.0  ;;  %v7796_v7 = vpop.eup %7795 }
0x1474   : > { %v3446_v13 = vsel %vm3423_vm3, %v7796_v7, 0.0 }
0x147b   : > { %3572 = vrot.lane.b32.xlu2 %v9477_v35, %s8022_s29 }
0x147f   : > { %3570 = vrot.lane.b32.xlu0 %v9483_v1, %s8022_s29 }
0x14a4   : > { %3450 = vadd.xlane.f32.xlu2 %v3449_v5 }
0x14a9   : > { %3447 = vadd.xlane.f32.xlu0 %v3446_v13  ;;  %v6701_v13 = vld [vmem:[%s10557_s8 + $0x20] sm:$0xf0] }
0x14d6   : > { %v3553_v35 = vpop.xlane.xlu2 %3552 }
0x14de   : > { %v3573_v15 = vpop.permute.xlu2 %3572  ;;  %v3556_v17 = vpop.xlane.xlu0 %3555 }
0x14df   : > { %v3582_v1 = vsel %vm3466_vm2, %v3573_v15, 0  ;;  %7797 = vrcp.f32 %v3556_v17 }
0x14e0   : > { %3590 = vmatpush.bf16.msra.mxu2 %v3582_v1  ;;  %7799 = vrcp.f32 %v3553_v35 }
0x14e5   : > { %v7798_v20 = vpop.eup %7797 }
0x14e6   : > { %v7800_v54 = vpop.eup %7799  ;;  %v3564_v23 = vmul.f32 %v7798_v20, %v7790_v21  ;;  %v3559_v56 = vpop.xlane.xlu1 %3558  ;;  %v6720_v21 = vor.u32 %v7489_v34, %v6717_v25  ;;  %v7505_v34 = vld [vmem:[%s10557_s8 + $0x144] sm:$0xf0]  ;;  %v7502_v25 = vld [vmem:[%s10557_s8 + $0x134] sm:$0xf] }
0x14e7   : > { %v3563_v41 = vmul.f32 %v7800_v54, %v7788_v31  ;;  %7801 = vrcp.f32 %v3559_v56  ;;  %v6721_v31 = vld [vmem:[%s10557_s8 + $0x110] sm:$0xf0] }
0x14e8   : > { %7803 = vrcp.f32 %v3445_v18  ;;  %v6724_v55 = vor.u32 %v7495_v40, %v6721_v31  ;;  %v6792_v40 = vor.u32 %v7511_v27, %v6791_v51  ;;  %v6793_v31 = vld [vmem:[%s10557_s8 + $0x178] sm:$0xf0] }
0x14e9   : > { %v3566_v4 = vpack.c.bf16 %v3564_v23, %v3563_v41 }
0x14ea   : > { %3653 = vmatpush.bf16.msra.mxu0 %v6724_v55  ;;  %v6796_v55 = vor.u32 %v7508_v36, %v6793_v31  ;;  %3839 = vmatpush.bf16.msra.mxu3 %v6792_v40 }
0x14ec   : > { %3857 = vmatpush.bf16.msrb.mxu1 %v6796_v55 }
0x14ed   : > { %v7802_v29 = vpop.eup %7801 }
0x14ee   : > { %v3565_v33 = vmul.f32 %v7802_v29, %v7792_v14  ;;  %v7804_v30 = vpop.eup %7803  ;;  %3654 = vmatpush.bf16.msra.mxu0 %v6720_v21  ;;  %v6716_v14 = vor.u32 %v7483_v58, %v6713_v60  ;;  %v6785_v58 = vld [vmem:[%s10557_s8 + $0x148] sm:$0xf0] }
0x14ef   : > { %v3455_v38 = vmul.f32 %v7804_v30, %v9501_v45  ;;  %v6788_v60 = vor.u32 %v7502_v25, %v6785_v58 }
0x14f0   : > { %v3567_v8 = vpack.c.bf16 %v3565_v33, %v3565_v33 }
0x14f1   : > { %v3571_v28 = vpop.permute.xlu0 %3570  ;;  %3858 = vmatpush.bf16.msrb.mxu1 %v6788_v60 }
0x14f2   : > { %3591 = vmatpush.bf16.msra.mxu2 %v3571_v28  ;;  %3655 = vmatpush.bf16.msra.mxu0 %v6716_v14  ;;  %v6775_v14 = vld [vmem:[%s10557_s8 + $0x100] sm:$0xf] }
0x14f5   : > { %6699 = vmatmul.msk.bf16.vlgmr.msra.gmra.mxu2 %vm3423_vm3, %v3566_v4  ;;  %v6593_v4 = vld [vmem:[%s10559_s10 + $0x4] ss:$8 sm:$0x7] }
0x14f6   : > { %3656 = vmatpush.bf16.msra.mxu0 %v6712_v63  ;;  %v3673_v56 = vperm.slane %v6593_v4, 0  ;;  %v6777_v63 = vld [vmem:[%s10557_s8 + $0x118] sm:$0xf0]  ;;  %v6753_v4 = vld [vmem:[%s10557_s8 + $0x88] sm:$0xf0] }
0x14f7   : > { %v6780_v0 = vor.u32 %v7496_v11, %v6777_v63 }
0x14f9   : > { %3859 = vmatpush.bf16.msrb.mxu1 %v6780_v0 }
0x14fa   : > { %3657 = vmatpush.bf16.msra.mxu0 %v6708_v53  ;;  %v7493_v53 = vld [vmem:[%s10557_s8 + $0xe4] sm:$0xf0] }
0x1505   : > { %6700 = vmatmul.msk.bf16.gmra.mxu2 %vm3423_vm3, %v3567_v8 }
0x1517   : > { %v3451_v39 = vpop.xlane.xlu2 %3450 }
0x151c   : > { %v3448_v37 = vpop.xlane.xlu0 %3447 }
0x151d   : > { %7805 = vrcp.f32 %v3448_v37 }
0x151e   : > { %7807 = vrcp.f32 %v3451_v39 }
0x1523   : > { %v7806_v24 = vpop.eup %7805 }
0x1524   : > { %v3456_v59 = vmul.f32 %v7806_v24, %v7796_v7  ;;  %v7808_v42 = vpop.eup %7807  ;;  %v7465_v7 = vld [vmem:[%s10557_s8 + $0xc] sm:$0xf] }
0x1525   : > { %v3457_v44 = vmul.f32 %v7808_v42, %v7794_v3  ;;  %v6704_v35 = vor.u32 %v7465_v7, %v6701_v13  ;;  %v6769_v7 = vld [vmem:[%s10557_s8 + $0xe8] sm:$0xf0] }
0x1526   : > { %v3458_v22 = vpack.c.bf16 %v3456_v59, %v3455_v38 }
0x1527   : > { %v3459_v32 = vpack.c.bf16 %v3457_v44, %v3457_v44  ;;  %3658 = vmatpush.bf16.msra.mxu0 %v6704_v35  ;;  %v6759_v35 = vld [vmem:[%s10557_s8 + $0xa0] sm:$0xf] }
0x1528   : > { %6695 = vmatmul.msk.bf16.vlgmr.msrb.gmra.mxu3 %vm3423_vm3, %v3458_v22 }
0x1538   : > { %6696 = vmatmul.msk.bf16.gmra.mxu3 %vm3423_vm3, %v3459_v32 }
0x1578   : > { %v3593_v47 = vpop.f32.mrf.mxu2 }
0x1580   : > { %v3595_v48 = vpop.f32.mrf.mxu2 }
0x1581   : > { %v7660_v2 = vpack.i.bf16 %v3595_v48, %v3593_v47 }
0x1583   : > { %7661 = vrot.lane.b32.xlu1 %v7660_v2, %s8022_s29 }
0x1588   : > { %v3598_v49 = vpop.f32.mrf.mxu2 }
0x158b   : > { %3609 = vrot.lane.b32.xlu1 %v3598_v49, %s8022_s29 }
0x1590   : > { %v3600_v45 = vpop.f32.mrf.mxu2 }
0x15ab   : > { %v3479_v26 = vpop.f32.mrf.mxu3 }
0x15b3   : > { %v3481_v61 = vpop.f32.mrf.mxu3 }
0x15bb   : > { %v3484_v3 = vpop.f32.mrf.mxu3 }
0x15c3   : > { %v3486_v5 = vpop.f32.mrf.mxu3 }
0x15c4   : > { %v6768_v5 = vor.u32 %v7493_v53, %v6767_v52  ;;  %v6592_v52 = vld [vmem:[%s10559_s10 + $0x3] ss:$8 sm:$0x7] }
0x15f5   : > { %v7662_v15 = vpop.permute.xlu1 %7661 }
0x15f6   : > { %v7664_v1 = vunpack.i.h.bf16 %v7662_v15  ;;  %v7663_v17 = vunpack.i.l.bf16 %v7662_v15  ;;  %v7487_v15 = vld [vmem:[%s10557_s8 + $0xb4] sm:$0xf0] }
0x15f8   : > { %v3615_v18 = vsel %vm1104_vm11, %v3481_v61, %v7664_v1  ;;  %v3614_v20 = vsel %vm1104_vm11, %v3479_v26, %v7663_v17  ;;  %v6783_v26 = vld [vmem:[%s10557_s8 + $0x130] sm:$0xf]  ;;  %v7499_v61 = vld [vmem:[%s10557_s8 + $0x114] sm:$0xf0]  ;;  %v7484_v1 = vld [vmem:[%s10557_s8 + $0xa4] sm:$0xf]  ;;  %v6760_v17 = vor.u32 %v7487_v15, %v6759_v35 }
0x15f9   : > { %v3617_v54 = vpack.c.bf16 %v3615_v18, %v3614_v20  ;;  %v6784_v21 = vor.u32 %v7505_v34, %v6783_v26  ;;  %v6776_v62 = vor.u32 %v7499_v61, %v6775_v14  ;;  %v6761_v18 = vld [vmem:[%s10557_s8 + $0xb8] sm:$0xf0]  ;;  %v6591_v14 = vld [vmem:[%s10559_s10 + $0x2] ss:$8 sm:$0x7] }
0x15fa   : > { %v6764_v20 = vor.u32 %v7484_v1, %v6761_v18  ;;  %v3741_v63 = vperm.slane %v6591_v14, 0 }
0x15fb   : > { %3659 = vmatmul.bf16.vlgmr.msra.gmra.mxu0 %v3617_v54  ;;  %3840 = vmatpush.bf16.msra.mxu3 %v6784_v21  ;;  %v6751_v54 = vld [vmem:[%s10557_s8 + $0x70] sm:$0xf] }
0x15fd   : > { %v3610_v23 = vpop.permute.xlu1 %3609 }
0x15fe   : > { %v3616_v41 = vsel %vm1104_vm11, %v3484_v3, %v3610_v23  ;;  %v7490_v3 = vld [vmem:[%s10557_s8 + $0xd4] sm:$0xf]  ;;  %v7481_v23 = vld [vmem:[%s10557_s8 + $0x84] sm:$0xf0] }
0x15ff   : > { %v3618_v28 = vpack.c.bf16 %v3616_v41, %v3616_v41  ;;  %3841 = vmatpush.bf16.msra.mxu3 %v6776_v62  ;;  %v6772_v13 = vor.u32 %v7490_v3, %v6769_v7  ;;  %v7478_v41 = vld [vmem:[%s10557_s8 + $0x74] sm:$0xf] }
0x1601   : > { %3860 = vmatpush.bf16.msrb.mxu1 %v6772_v13  ;;  %v3747_v13 = vperm.slane %v6592_v52, 0 }
0x1603   : > { %3842 = vmatpush.bf16.msra.mxu3 %v6768_v5 }
0x1605   : > { %3861 = vmatpush.bf16.msrb.mxu1 %v6764_v20 }
0x1607   : > { %3843 = vmatpush.bf16.msra.mxu3 %v6760_v17 }
0x160b   : > { %3664 = vmatmul.bf16.gmra.mxu0 %v3618_v28  ;;  %v6752_v28 = vor.u32 %v7481_v23, %v6751_v54 }
0x160d   : > { %3844 = vmatpush.bf16.msra.mxu3 %v6752_v28 }
0x1678   : > { %v3660_v29 = vpop.f32.mrf.mxu0 }
0x1679   : > { %v3669_v33 = vadd.f32 %v3660_v29, %v9290_v6  ;;  %v6743_v29 = vld [vmem:[%s10557_s8 + $0x40] sm:$0xf] }
0x167b   : > { %v9577_v8 = vadd.f32 %v3673_v56, %v3669_v33  ;;  %v7475_v33 = vld [vmem:[%s10557_s8 + $0x54] sm:$0xf0] }
0x167d   : > { %3678 = vadd.xlane.f32.xlu1 %v9577_v8 }
0x1680   : > { %v3662_v37 = vpop.f32.mrf.mxu0 }
0x1681   : > { %v3670_v30 = vadd.f32 %v3662_v37, %v9293_v9  ;;  %v7472_v37 = vld [vmem:[%s10557_s8 + $0x44] sm:$0xf] }
0x1683   : > { %v9581_v24 = vadd.f32 %v3673_v56, %v3670_v30  ;;  %v6744_v30 = vor.u32 %v7475_v33, %v6743_v29 }
0x1685   : > { %3680 = vadd.xlane.f32.xlu0 %v9581_v24  ;;  %3845 = vmatpush.bf16.msra.mxu3 %v6744_v30  ;;  %v7519_v30 = vld [vmem:[%s10558_s9 + $0x38] sm:$0xff] }
0x1686   : > { %4029 = vmatpush.bf16.msrb.mxu2 %v7519_v30 }
0x1688   : > { %v3665_v38 = vpop.f32.mrf.mxu0 }
0x1689   : > { %v3671_v59 = vadd.f32 %v3665_v38, %v9283_v57  ;;  %v6745_v38 = vld [vmem:[%s10557_s8 + $0x58] sm:$0xf0] }
0x168b   : > { %v9585_v39 = vadd.f32 %v3673_v56, %v3671_v59  ;;  %v6756_v56 = vor.u32 %v7478_v41, %v6753_v4 }
0x168d   : > { %v3682_v22 = vsel %vm3122_vm13, %v9585_v39, 0.0  ;;  %3862 = vmatpush.bf16.msrb.mxu1 %v6756_v56 }
0x168e   : > { %3683 = vadd.xlane.f32.xlu2 %v3682_v22  ;;  %v6748_v22 = vor.u32 %v7472_v37, %v6745_v38  ;;  %v7526_v37 = vld [vmem:[%s10558_s9 + $0x70] sm:$0xff] }
0x168f   : > { %v7518_v38 = vld [vmem:[%s10558_s9 + $0x30] sm:$0xff] }
0x1690   : > { %v3667_v6 = vpop.f32.mrf.mxu0  ;;  %4030 = vmatpush.bf16.msrb.mxu2 %v7518_v38 }
0x1691   : > { %3863 = vmatpush.bf16.msrb.mxu1 %v6748_v22  ;;  %v7517_v22 = vld [vmem:[%s10558_s9 + $0x28] sm:$0xff] }
0x1694   : > { %4031 = vmatpush.bf16.msrb.mxu2 %v7517_v22 }
0x16f0   : > { %v3679_v42 = vpop.xlane.xlu1 %3678 }
0x16f1   : > { %v3685_v44 = vmul.f32 %v3679_v42, %v8237_v43  ;;  %v6735_v42 = vld [vmem:[%s10557_s8 + $0x10] sm:$0xf] }
0x16f3   : > { %v9591_v32 = vsub.f32 %v9577_v8, %v3685_v44  ;;  %v7469_v44 = vld [vmem:[%s10557_s8 + $0x24] sm:$0xf0] }
0x16f5   : > { %v3691_v9 = vmul.f32 %v9591_v32, %v9591_v32 }
0x16f7   : > { %3694 = vadd.xlane.f32.xlu0 %v3691_v9  ;;  %v7466_v9 = vld [vmem:[%s10557_s8 + $0x14] sm:$0xf] }
0x16f8   : > { %v3681_v47 = vpop.xlane.xlu0 %3680 }
0x16f9   : > { %v3686_v57 = vmul.f32 %v3681_v47, %v8237_v43 }
0x16fb   : > { %v9597_v48 = vsub.f32 %v9581_v24, %v3686_v57  ;;  %v6736_v57 = vor.u32 %v7469_v44, %v6735_v42  ;;  %v7516_v42 = vld [vmem:[%s10558_s9 + $0x20] sm:$0xff]  ;;  %v7522_v44 = vld [vmem:[%s10558_s9 + $0x50] sm:$0xff] }
0x16fc   : > { %4032 = vmatpush.bf16.msrb.mxu2 %v7516_v42 }
0x16fd   : > { %v3692_v2 = vmul.f32 %v9597_v48, %v9597_v48  ;;  %3846 = vmatpush.bf16.msra.mxu3 %v6736_v57  ;;  %v7521_v57 = vld [vmem:[%s10558_s9 + $0x48] sm:$0xff] }
0x16ff   : > { %3696 = vadd.xlane.f32.xlu2 %v3692_v2  ;;  %v6737_v2 = vld [vmem:[%s10557_s8 + $0x28] sm:$0xf0] }
0x1701   : > { %v3684_v49 = vpop.xlane.xlu2 %3683 }
0x1702   : > { %v3687_v45 = vmul.f32 %v3684_v49, %v8237_v43  ;;  %v6740_v49 = vor.u32 %v7466_v9, %v6737_v2  ;;  %v7515_v9 = vld [vmem:[%s10558_s9 + $0x18] sm:$0xff]  ;;  %v7514_v2 = vld [vmem:[%s10558_s9 + $0x10] sm:$0xff] }
0x1703   : > { %4033 = vmatpush.bf16.msrb.mxu2 %v7515_v9 }
0x1704   : > { %v9603_v12 = vsub.f32 %v9585_v39, %v3687_v45  ;;  %3864 = vmatpush.bf16.msrb.mxu1 %v6740_v49 }
0x1706   : > { %v3693_v50 = vmul.f32 %v9603_v12, %v9603_v12 }
0x1707   : > { %4034 = vmatpush.bf16.msrb.mxu2 %v7514_v2 }
0x1708   : > { %v3698_v19 = vsel %vm3122_vm13, %v3693_v50, 0.0 }
0x1709   : > { %3699 = vadd.xlane.f32.xlu0 %v3698_v19 }
0x176a   : > { %v3695_v59 = vpop.xlane.xlu0 %3694 }
0x176b   : > { %v3701_v6 = vmul.f32 %v3695_v59, %v8237_v43  ;;  %v7524_v59 = vld [vmem:[%s10558_s9 + $0x60] sm:$0xff] }
0x176d   : > { %v3704_v47 = vadd.f32 1e-05, %v3701_v6  ;;  %v7523_v6 = vld [vmem:[%s10558_s9 + $0x58] sm:$0xff] }
0x176f   : > { %7809 = vrsqrt.f32 %v3704_v47  ;;  %vm3713_vm5 = vweird.f32 %v3704_v47 }
0x1772   : > { %v3697_v45 = vpop.xlane.xlu2 %3696 }
0x1773   : > { %v3702_v50 = vmul.f32 %v3697_v45, %v8237_v43  ;;  %v7520_v45 = vld [vmem:[%s10558_s9 + $0x40] sm:$0xff] }
0x1775   : > { %v7810_v19 = vpop.eup %7809  ;;  %v3705_v51 = vadd.f32 1e-05, %v3702_v50 }
0x1776   : > { %v3708_v27 = vmul.f32 %v7810_v19, %v3704_v47  ;;  %vm3714_vm12 = vweird.f32 %v7810_v19  ;;  %v6596_v47 = vld [vmem:[%s10559_s10 + $0x7] ss:$8 sm:$0x7] }
0x1777   : > { %7811 = vrsqrt.f32 %v3705_v51  ;;  %vm3715_vm6 = vmor %vm3713_vm5, %vm3714_vm12  ;;  %vm3723_vm8 = vweird.f32 %v3705_v51  ;;  %v3756_v49 = vperm.slane %v6596_v47, 1 }
0x1778   : > { %v3709_v36 = vmul.f32 %v7810_v19, %v3708_v27  ;;  %v7512_v27 = vld [vmem:[%s10558_s9] sm:$0xff] }
0x177a   : > { %v3710_v40 = vmul.f32 0.5, %v3709_v36 }
0x177c   : > { %v3711_v31 = vsub.f32 1.5, %v3710_v40  ;;  %v3700_v55 = vpop.xlane.xlu0 %3699  ;;  %v3755_v40 = vperm.slane %v6596_v47, 0 }
0x177d   : > { %v7812_v26 = vpop.eup %7811  ;;  %v3703_v34 = vmul.f32 %v3700_v55, %v8237_v43 }
0x177e   : > { %v3712_v25 = vmul.f32 %v7810_v19, %v3711_v31  ;;  %v3718_v21 = vmul.f32 %v7812_v26, %v3705_v51  ;;  %vm3724_vm7 = vweird.f32 %v7812_v26 }
0x177f   : > { %v3706_v58 = vadd.f32 1e-05, %v3703_v34  ;;  %vm3725_vm9 = vmor %vm3723_vm8, %vm3724_vm7 }
0x1780   : > { %v3719_v60 = vmul.f32 %v7812_v26, %v3718_v21  ;;  %v3716_v61 = vsel %vm3715_vm6, %v7810_v19, %v3712_v25  ;;  %v7513_v19 = vld [vmem:[%s10558_s9 + $0x8] sm:$0xff] }
0x1781   : > { %7813 = vrsqrt.f32 %v3706_v58  ;;  %v3737_v0 = vmul.f32 %v3716_v61, %v9591_v32  ;;  %vm3733_vm14 = vweird.f32 %v3706_v58  ;;  %4035 = vmatpush.bf16.msrb.mxu2 %v7513_v19 }
0x1782   : > { %v3720_v11 = vmul.f32 0.5, %v3719_v60 }
0x1783   : > { %v3743_v35 = vmul.f32 %v3741_v63, %v3737_v0 }
0x1784   : > { %v3721_v62 = vsub.f32 1.5, %v3720_v11 }
0x1785   : > { %v3749_v20 = vadd.f32 %v3747_v13, %v3743_v35  ;;  %4036 = vmatpush.bf16.msrb.mxu2 %v7512_v27 }
0x1786   : > { %v3722_v53 = vmul.f32 %v7812_v26, %v3721_v62 }
0x1787   : > { %v7814_v3 = vpop.eup %7813 }
0x1788   : > { %v3726_v5 = vsel %vm3725_vm9, %v7812_v26, %v3722_v53  ;;  %v3728_v7 = vmul.f32 %v7814_v3, %v3706_v58  ;;  %vm3734_vm10 = vweird.f32 %v7814_v3 }
0x1789   : > { %v3738_v15 = vmul.f32 %v3726_v5, %v9597_v48  ;;  %vm3735_vm15 = vmor %vm3733_vm14, %vm3734_vm10  ;;  %v7527_v48 = vld [vmem:[%s10558_s9 + $0x78] sm:$0xff] }
0x178a   : > { %v3729_v1 = vmul.f32 %v7814_v3, %v3728_v7  ;;  %4047 = vmatpush.bf16.msrb.mxu0 %v7527_v48 }
0x178b   : > { %v3744_v17 = vmul.f32 %v3741_v63, %v3738_v15 }
0x178c   : > { %v3730_v18 = vmul.f32 0.5, %v3729_v1 }
0x178d   : > { %v3750_v54 = vadd.f32 %v3747_v13, %v3744_v17 }
0x178e   : > { %v3731_v32 = vsub.f32 1.5, %v3730_v18  ;;  %4048 = vmatpush.bf16.msrb.mxu0 %v7526_v37 }
0x178f   : > { %v3752_v23 = vpack.c.bf16 %v3750_v54, %v3749_v20 }
0x1790   : > { %v3732_v41 = vmul.f32 %v7814_v3, %v3731_v32 }
0x1791   : > { %3847 = vmatmul.bf16.vlgmr.msra.gmra.mxu3 %v3752_v23  ;;  %3865 = vmatmul.bf16.vlgmr.msrb.gmra.mxu1 %v3752_v23 }
0x1792   : > { %v3736_v28 = vsel %vm3735_vm15, %v7814_v3, %v3732_v41 }
0x1793   : > { %v3739_v4 = vmul.f32 %v3736_v28, %v9603_v12  ;;  %v7525_v12 = vld [vmem:[%s10558_s9 + $0x68] sm:$0xff] }
0x1794   : > { %4049 = vmatpush.bf16.msrb.mxu0 %v7525_v12 }
0x1795   : > { %v3745_v56 = vmul.f32 %v3741_v63, %v3739_v4 }
0x1797   : > { %v3751_v29 = vadd.f32 %v3747_v13, %v3745_v56 }
0x1798   : > { %4050 = vmatpush.bf16.msrb.mxu0 %v7524_v59 }
0x1799   : > { %v3753_v33 = vpack.c.bf16 %v3751_v29, %v3751_v29 }
0x179c   : > { %4051 = vmatpush.bf16.msrb.mxu0 %v7523_v6 }
0x17a0   : > { %4052 = vmatpush.bf16.msrb.mxu0 %v7522_v44 }
0x17a1   : > { %3852 = vmatmul.bf16.gmra.mxu3 %v3753_v33  ;;  %3870 = vmatmul.bf16.gmra.mxu1 %v3753_v33 }
0x17a4   : > { %4053 = vmatpush.bf16.msrb.mxu0 %v7521_v57 }
0x17a8   : > { %4054 = vmatpush.bf16.msrb.mxu0 %v7520_v45 }
0x180e   : > { %v3866_v50 = vpop.f32.mrf.mxu1 }
0x180f   : > { %v3867_v51 = vadd.f32 %v3866_v50, %v3756_v49 }
0x1811   : > { %v3882_v36 = vmul.f32 0.044715, %v3867_v51  ;;  %v3876_v38 = vmul.f32 0.5, %v3867_v51 }
0x1813   : > { %v3888_v31 = vmul.f32 %v3882_v36, %v3867_v51 }
0x1814   : > { %v3848_v55 = vpop.f32.mrf.mxu3 }
0x1815   : > { %v3894_v26 = vmul.f32 %v3888_v31, %v3867_v51  ;;  %v3849_v34 = vadd.f32 %v3848_v55, %v3755_v40 }
0x1816   : > { %v3868_v25 = vpop.f32.mrf.mxu1 }
0x1817   : > { %v3900_v21 = vadd.f32 %v3894_v26, %v3867_v51  ;;  %v3881_v58 = vmul.f32 0.044715, %v3849_v34  ;;  %v3869_v60 = vadd.f32 %v3868_v25, %v3756_v49  ;;  %v3875_v27 = vmul.f32 0.5, %v3849_v34 }
0x1819   : > { %v3887_v14 = vmul.f32 %v3881_v58, %v3849_v34  ;;  %v3884_v61 = vmul.f32 0.044715, %v3869_v60  ;;  %v3906_v11 = vmul.f32 0.7978846, %v3900_v21  ;;  %v3878_v59 = vmul.f32 0.5, %v3869_v60 }
0x181b   : > { %v3893_v62 = vmul.f32 %v3887_v14, %v3849_v34  ;;  %v3890_v63 = vmul.f32 %v3884_v61, %v3869_v60  ;;  %7815 = vtanh.f32 %v3906_v11 }
0x181c   : > { %v3850_v0 = vpop.f32.mrf.mxu3 }
0x181d   : > { %v3899_v52 = vadd.f32 %v3893_v62, %v3849_v34  ;;  %v3896_v53 = vmul.f32 %v3890_v63, %v3869_v60  ;;  %v3851_v3 = vadd.f32 %v3850_v0, %v3755_v40 }
0x181e   : > { %v3871_v5 = vpop.f32.mrf.mxu1 }
0x181f   : > { %v3902_v7 = vadd.f32 %v3896_v53, %v3869_v60  ;;  %v3883_v13 = vmul.f32 0.044715, %v3851_v3  ;;  %v3872_v35 = vadd.f32 %v3871_v5, %v3756_v49  ;;  %v3905_v15 = vmul.f32 0.7978846, %v3899_v52 }
0x1820   : > { %v3877_v36 = vmul.f32 0.5, %v3851_v3  ;;  %v6594_v52 = vld [vmem:[%s10559_s10 + $0x5] ss:$8 sm:$0x7] }
0x1821   : > { %v3908_v1 = vmul.f32 0.7978846, %v3902_v7  ;;  %v3889_v17 = vmul.f32 %v3883_v13, %v3851_v3  ;;  %v3886_v18 = vmul.f32 0.044715, %v3872_v35  ;;  %v7816_v23 = vpop.eup %7815  ;;  %v3880_v21 = vmul.f32 0.5, %v3872_v35 }
0x1822   : > { %v3918_v48 = vadd.f32 1.0, %v7816_v23  ;;  %v4069_v5 = vperm.slane %v6594_v52, 0  ;;  %v7552_v52 = vld [vmem:[%s10557_s8 + $0x244] sm:$0xf] }
0x1823   : > { %7817 = vtanh.f32 %v3908_v1  ;;  %v3895_v20 = vmul.f32 %v3889_v17, %v3851_v3  ;;  %v3892_v54 = vmul.f32 %v3886_v18, %v3872_v35 }
0x1824   : > { %v3853_v32 = vpop.f32.mrf.mxu3  ;;  %7819 = vtanh.f32 %v3905_v15  ;;  %v3924_v47 = vmul.f32 %v3918_v48, %v3876_v38 }
0x1825   : > { %v3901_v41 = vadd.f32 %v3895_v20, %v3851_v3  ;;  %v3854_v28 = vadd.f32 %v3853_v32, %v3755_v40  ;;  %v3898_v56 = vmul.f32 %v3892_v54, %v3872_v35 }
0x1826   : > { %v3873_v4 = vpop.f32.mrf.mxu1 }
0x1827   : > { %v3907_v29 = vmul.f32 0.7978846, %v3901_v41  ;;  %v3885_v33 = vmul.f32 0.044715, %v3854_v28  ;;  %v3904_v37 = vadd.f32 %v3898_v56, %v3872_v35  ;;  %v3879_v11 = vmul.f32 0.5, %v3854_v28 }
0x1829   : > { %v7818_v30 = vpop.eup %7817  ;;  %7821 = vtanh.f32 %v3907_v29  ;;  %v3891_v12 = vmul.f32 %v3885_v33, %v3854_v28  ;;  %v3910_v6 = vmul.f32 0.7978846, %v3904_v37 }
0x182a   : > { %v3920_v22 = vadd.f32 1.0, %v7818_v30  ;;  %v7820_v42 = vpop.eup %7819 }
0x182b   : > { %v3897_v44 = vmul.f32 %v3891_v12, %v3854_v28  ;;  %7823 = vtanh.f32 %v3910_v6  ;;  %v3917_v49 = vadd.f32 1.0, %v7820_v42  ;;  %v7035_v6 = vld [vmem:[%s10557_s8 + $0x2d0] sm:$0xf]  ;;  %v7573_v42 = vld [vmem:[%s10557_s8 + $0x2e4] sm:$0xf0] }
0x182c   : > { %v3855_v9 = vpop.f32.mrf.mxu3  ;;  %v3926_v57 = vmul.f32 %v3920_v22, %v3878_v59 }
0x182d   : > { %v3903_v2 = vadd.f32 %v3897_v44, %v3854_v28  ;;  %v3923_v31 = vmul.f32 %v3917_v49, %v3875_v27  ;;  %v7570_v44 = vld [vmem:[%s10557_s8 + $0x2d4] sm:$0xf]  ;;  %v7036_v9 = vor.u32 %v7573_v42, %v7035_v6  ;;  %v7564_v27 = vld [vmem:[%s10557_s8 + $0x2a4] sm:$0xf]  ;;  %v6963_v6 = vld [vmem:[%s10557_s8 + $0x1b0] sm:$0xf] }
0x182e   : > { %v3930_v45 = vpack.c.bf16 %v3926_v57, %v3924_v47  ;;  %v7037_v47 = vld [vmem:[%s10557_s8 + $0x2e8] sm:$0xf0]  ;;  %v7043_v57 = vld [vmem:[%s10557_s8 + $0x2d8] sm:$0xf]  ;;  %v7537_v42 = vld [vmem:[%s10557_s8 + $0x1c4] sm:$0xf0] }
0x182f   : > { %v7822_v50 = vpop.eup %7821  ;;  %v3909_v19 = vmul.f32 0.7978846, %v3903_v2  ;;  %v7574_v2 = vld [vmem:[%s10557_s8 + $0x2ec] sm:$0xf0]  ;;  %v7040_v49 = vor.u32 %v7570_v44, %v7037_v47  ;;  %4383 = vmatpush.bf16.msrb.mxu3 %v7036_v9  ;;  %v7534_v44 = vld [vmem:[%s10557_s8 + $0x1b4] sm:$0xf]  ;;  %v6964_v9 = vor.u32 %v7537_v42, %v6963_v6 }
0x1830   : > { %v3919_v40 = vadd.f32 1.0, %v7822_v50  ;;  %4055 = vmatmul.bf16.vlgmr.msrb.gmra.mxu0 %v3930_v45  ;;  %v7044_v45 = vor.u32 %v7574_v2, %v7043_v57  ;;  %v7023_v50 = vld [vmem:[%s10557_s8 + $0x2a0] sm:$0xf]  ;;  %v6965_v47 = vld [vmem:[%s10557_s8 + $0x1c8] sm:$0xf0] }
0x1831   : > { %v7824_v55 = vpop.eup %7823  ;;  %7825 = vtanh.f32 %v3909_v19  ;;  %4401 = vmatpush.bf16.msra.mxu1 %v7040_v49  ;;  %v7567_v19 = vld [vmem:[%s10557_s8 + $0x2b4] sm:$0xf0]  ;;  %v7538_v2 = vld [vmem:[%s10557_s8 + $0x1cc] sm:$0xf0] }
0x1832   : > { %v3925_v51 = vmul.f32 %v3919_v40, %v3877_v36  ;;  %v3922_v25 = vadd.f32 1.0, %v7824_v55  ;;  %4419 = vmatpush.bf16.msra.mxu2 %v7044_v45  ;;  %v7024_v36 = vor.u32 %v7567_v19, %v7023_v50  ;;  %v7025_v40 = vld [vmem:[%s10557_s8 + $0x2b8] sm:$0xf0]  ;;  %v6971_v57 = vld [vmem:[%s10557_s8 + $0x1b8] sm:$0xf]  ;;  %v6968_v45 = vor.u32 %v7534_v44, %v6965_v47 }
0x1833   : > { %v7028_v55 = vor.u32 %v7564_v27, %v7025_v40  ;;  %v6972_v50 = vor.u32 %v7538_v2, %v6971_v57  ;;  %v6951_v27 = vld [vmem:[%s10557_s8 + $0x180] sm:$0xf]  ;;  %v7528_v40 = vld [vmem:[%s10557_s8 + $0x184] sm:$0xf] }
0x1834   : > { %v3929_v26 = vpack.c.bf16 %v3925_v51, %v3923_v31  ;;  %v3928_v60 = vmul.f32 %v3922_v25, %v3880_v21  ;;  %v7031_v31 = vld [vmem:[%s10557_s8 + $0x2a8] sm:$0xf]  ;;  %v7568_v51 = vld [vmem:[%s10557_s8 + $0x2bc] sm:$0xf0]  ;;  %4384 = vmatpush.bf16.msrb.mxu3 %v7024_v36  ;;  %v7011_v25 = vld [vmem:[%s10557_s8 + $0x270] sm:$0xf] }
0x1835   : > { %4402 = vmatpush.bf16.msra.mxu1 %v7028_v55  ;;  %v7561_v21 = vld [vmem:[%s10557_s8 + $0x284] sm:$0xf0]  ;;  %v7531_v36 = vld [vmem:[%s10557_s8 + $0x194] sm:$0xf0]  ;;  %v6953_v55 = vld [vmem:[%s10557_s8 + $0x198] sm:$0xf0] }
0x1836   : > { %4037 = vmatmul.bf16.vlgmr.msrb.gmra.mxu2 %v3929_v26  ;;  %v3932_v61 = vpack.c.bf16 %v3928_v60, %v3928_v60  ;;  %v7032_v26 = vor.u32 %v7568_v51, %v7031_v31  ;;  %v7012_v60 = vor.u32 %v7561_v21, %v7011_v25  ;;  %v6952_v51 = vor.u32 %v7531_v36, %v6951_v27  ;;  %v7532_v21 = vld [vmem:[%s10557_s8 + $0x19c] sm:$0xf0] }
0x1837   : > { %v7826_v58 = vpop.eup %7825  ;;  %v6956_v25 = vor.u32 %v7528_v40, %v6953_v55 }
0x1838   : > { %v3921_v14 = vadd.f32 1.0, %v7826_v58  ;;  %4420 = vmatpush.bf16.msra.mxu2 %v7032_v26  ;;  %v7558_v58 = vld [vmem:[%s10557_s8 + $0x274] sm:$0xf]  ;;  %4385 = vmatpush.bf16.msrb.mxu3 %v7012_v60  ;;  %v6959_v26 = vld [vmem:[%s10557_s8 + $0x188] sm:$0xf] }
0x183a   : > { %v3927_v62 = vmul.f32 %v3921_v14, %v3879_v11  ;;  %v7013_v14 = vld [vmem:[%s10557_s8 + $0x288] sm:$0xf0]  ;;  %v7562_v11 = vld [vmem:[%s10557_s8 + $0x28c] sm:$0xf0] }
0x183c   : > { %v3931_v63 = vpack.c.bf16 %v3927_v62, %v3927_v62  ;;  %v7016_v62 = vor.u32 %v7558_v58, %v7013_v14  ;;  %v6960_v58 = vor.u32 %v7532_v21, %v6959_v26 }
0x183e   : > { %4403 = vmatpush.bf16.msra.mxu1 %v7016_v62 }
0x1840   : > { %4060 = vmatmul.bf16.gmra.mxu0 %v3932_v61  ;;  %v7019_v61 = vld [vmem:[%s10557_s8 + $0x278] sm:$0xf] }
0x1846   : > { %4042 = vmatmul.bf16.gmra.mxu2 %v3931_v63  ;;  %v7020_v63 = vor.u32 %v7562_v11, %v7019_v61 }
0x1848   : > { %4421 = vmatpush.bf16.msra.mxu2 %v7020_v63 }
0x18ad   : > { %v4056_v34 = vpop.f32.mrf.mxu0 }
0x18b5   : > { %v4058_v0 = vpop.f32.mrf.mxu0 }
0x18b9   : > { %v4038_v53 = vpop.f32.mrf.mxu2 }
0x18ba   : > { %v4057_v3 = vadd.f32 %v4056_v34, %v4038_v53  ;;  %v6999_v34 = vld [vmem:[%s10557_s8 + $0x240] sm:$0xf] }
0x18bc   : > { %v4065_v7 = vadd.f32 %v4057_v3, %v9577_v8  ;;  %v7001_v3 = vld [vmem:[%s10557_s8 + $0x258] sm:$0xf0] }
0x18bd   : > { %v4061_v13 = vpop.f32.mrf.mxu0 }
0x18be   : > { %v9771_v35 = vadd.f32 %v4069_v5, %v4065_v7  ;;  %v7556_v7 = vld [vmem:[%s10557_s8 + $0x25c] sm:$0xf0] }
0x18c0   : > { %4172 = vadd.xlane.f32.xlu2 %v9771_v35 }
0x18c1   : > { %v4040_v15 = vpop.f32.mrf.mxu2 }
0x18c2   : > { %v4059_v1 = vadd.f32 %v4058_v0, %v4040_v15  ;;  %v7555_v0 = vld [vmem:[%s10557_s8 + $0x254] sm:$0xf0] }
0x18c3   : > { %v7000_v53 = vor.u32 %v7555_v0, %v6999_v34 }
0x18c4   : > { %v4066_v17 = vadd.f32 %v4059_v1, %v9581_v24  ;;  %v6987_v1 = vld [vmem:[%s10557_s8 + $0x210] sm:$0xf] }
0x18c5   : > { %v4063_v18 = vpop.f32.mrf.mxu0  ;;  %4386 = vmatpush.bf16.msrb.mxu3 %v7000_v53 }
0x18c6   : > { %v9775_v20 = vadd.f32 %v4069_v5, %v4066_v17  ;;  %v7549_v17 = vld [vmem:[%s10557_s8 + $0x224] sm:$0xf0]  ;;  %v7546_v18 = vld [vmem:[%s10557_s8 + $0x214] sm:$0xf] }
0x18c8   : > { %4174 = vadd.xlane.f32.xlu0 %v9775_v20 }
0x18c9   : > { %v4043_v54 = vpop.f32.mrf.mxu2 }
0x18ca   : > { %v4062_v32 = vadd.f32 %v4061_v13, %v4043_v54  ;;  %v7004_v13 = vor.u32 %v7552_v52, %v7001_v3  ;;  %v6988_v54 = vor.u32 %v7549_v17, %v6987_v1  ;;  %v6941_v1 = vld [vmem:[%s10559_s10 + $0x18] ss:$8 sm:$0x7] }
0x18cc   : > { %v4067_v23 = vadd.f32 %v4062_v32, %v9585_v39  ;;  %4404 = vmatpush.bf16.msra.mxu1 %v7004_v13  ;;  %v6989_v32 = vld [vmem:[%s10557_s8 + $0x228] sm:$0xf0]  ;;  %4387 = vmatpush.bf16.msrb.mxu3 %v6988_v54 }
0x18ce   : > { %v9779_v41 = vadd.f32 %v4069_v5, %v4067_v23  ;;  %v7007_v5 = vld [vmem:[%s10557_s8 + $0x248] sm:$0xf]  ;;  %v6995_v23 = vld [vmem:[%s10557_s8 + $0x218] sm:$0xf] }
0x18cf   : > { %v7008_v15 = vor.u32 %v7556_v7, %v7007_v5 }
0x18d0   : > { %v4176_v8 = vsel %vm3122_vm13, %v9779_v41, 0.0 }
0x18d1   : > { %4177 = vadd.xlane.f32.xlu2 %v4176_v8  ;;  %v4045_v28 = vpop.f32.mrf.mxu2  ;;  %4422 = vmatpush.bf16.msra.mxu2 %v7008_v15  ;;  %v7550_v8 = vld [vmem:[%s10557_s8 + $0x22c] sm:$0xf0] }
0x18d2   : > { %v6992_v28 = vor.u32 %v7546_v18, %v6989_v32  ;;  %v4235_v32 = vperm.slane %v6941_v1, 0 }
0x18d4   : > { %4405 = vmatpush.bf16.msra.mxu1 %v6992_v28 }
0x1933   : > { %v4173_v4 = vpop.xlane.xlu2 %4172 }
0x1934   : > { %v4179_v56 = vmul.f32 %v4173_v4, %v8237_v43  ;;  %v6996_v4 = vor.u32 %v7550_v8, %v6995_v23  ;;  %v6942_v8 = vld [vmem:[%s10559_s10 + $0x19] ss:$8 sm:$0x7] }
0x1936   : > { %v9785_v24 = vsub.f32 %v9771_v35, %v4179_v56  ;;  %4423 = vmatpush.bf16.msra.mxu2 %v6996_v4  ;;  %v6975_v56 = vld [vmem:[%s10557_s8 + $0x1e0] sm:$0xf] }
0x1938   : > { %v4185_v29 = vmul.f32 %v9785_v24, %v9785_v24 }
0x193a   : > { %4188 = vadd.xlane.f32.xlu0 %v4185_v29  ;;  %v7543_v29 = vld [vmem:[%s10557_s8 + $0x1f4] sm:$0xf0] }
0x193b   : > { %v4175_v33 = vpop.xlane.xlu0 %4174 }
0x193c   : > { %v4180_v39 = vmul.f32 %v4175_v33, %v8237_v43  ;;  %v7540_v33 = vld [vmem:[%s10557_s8 + $0x1e4] sm:$0xf] }
0x193e   : > { %v9791_v48 = vsub.f32 %v9775_v20, %v4180_v39  ;;  %v6976_v39 = vor.u32 %v7543_v29, %v6975_v56 }
0x1940   : > { %v4186_v37 = vmul.f32 %v9791_v48, %v9791_v48  ;;  %4388 = vmatpush.bf16.msrb.mxu3 %v6976_v39 }
0x1942   : > { %4190 = vadd.xlane.f32.xlu2 %v4186_v37  ;;  %v6977_v37 = vld [vmem:[%s10557_s8 + $0x1f8] sm:$0xf0] }
0x1944   : > { %v4178_v30 = vpop.xlane.xlu2 %4177  ;;  %4389 = vmatpush.bf16.msrb.mxu3 %v6964_v9 }
0x1945   : > { %v4181_v12 = vmul.f32 %v4178_v30, %v8237_v43  ;;  %v6983_v30 = vld [vmem:[%s10557_s8 + $0x1e8] sm:$0xf] }
0x1947   : > { %v9797_v38 = vsub.f32 %v9779_v41, %v4181_v12  ;;  %v7544_v12 = vld [vmem:[%s10557_s8 + $0x1fc] sm:$0xf0] }
0x1948   : > { %4390 = vmatpush.bf16.msrb.mxu3 %v6952_v51 }
0x1949   : > { %v4187_v59 = vmul.f32 %v9797_v38, %v9797_v38 }
0x194b   : > { %v4192_v22 = vsel %vm3122_vm13, %v4187_v59, 0.0  ;;  %v6980_v59 = vor.u32 %v7540_v33, %v6977_v37  ;;  %v4241_v33 = vperm.slane %v6942_v8, 0 }
0x194c   : > { %4193 = vadd.xlane.f32.xlu0 %v4192_v22  ;;  %v6984_v22 = vor.u32 %v7544_v12, %v6983_v30 }
0x194d   : > { %4406 = vmatpush.bf16.msra.mxu1 %v6980_v59 }
0x194e   : > { %4424 = vmatpush.bf16.msra.mxu2 %v6984_v22 }
0x1951   : > { %4407 = vmatpush.bf16.msra.mxu1 %v6968_v45  ;;  %v6947_v45 = vld [vmem:[%s10559_s10 + $0x1e] ss:$8 sm:$0x7] }
0x1952   : > { %4425 = vmatpush.bf16.msra.mxu2 %v6972_v50  ;;  %v4250_v50 = vperm.slane %v6947_v45, 1  ;;  %v4249_v51 = vperm.slane %v6947_v45, 0 }
0x1955   : > { %4408 = vmatpush.bf16.msra.mxu1 %v6956_v25 }
0x1956   : > { %4426 = vmatpush.bf16.msra.mxu2 %v6960_v58 }
0x19ad   : > { %v4189_v49 = vpop.xlane.xlu0 %4188 }
0x19ae   : > { %v4195_v19 = vmul.f32 %v4189_v49, %v8237_v43 }
0x19b0   : > { %v4198_v31 = vadd.f32 1e-05, %v4195_v19 }
0x19b2   : > { %7827 = vrsqrt.f32 %v4198_v31  ;;  %vm4207_vm12 = vweird.f32 %v4198_v31 }
0x19b5   : > { %v4191_v60 = vpop.xlane.xlu2 %4190 }
0x19b6   : > { %v4196_v14 = vmul.f32 %v4191_v60, %v8237_v43 }
0x19b8   : > { %v7828_v61 = vpop.eup %7827  ;;  %v4199_v11 = vadd.f32 1e-05, %v4196_v14 }
0x19b9   : > { %v4202_v62 = vmul.f32 %v7828_v61, %v4198_v31  ;;  %vm4208_vm1 = vweird.f32 %v7828_v61 }
0x19ba   : > { %7829 = vrsqrt.f32 %v4199_v11  ;;  %vm4209_vm5 = vmor %vm4207_vm12, %vm4208_vm1  ;;  %vm4217_vm7 = vweird.f32 %v4199_v11 }
0x19bb   : > { %v4203_v63 = vmul.f32 %v7828_v61, %v4202_v62  ;;  %v4251_v62 = vperm.slane %v6947_v45, 2 }
0x19bd   : > { %v4204_v34 = vmul.f32 0.5, %v4203_v63 }
0x19bf   : > { %v4205_v0 = vsub.f32 1.5, %v4204_v34  ;;  %v4194_v52 = vpop.xlane.xlu0 %4193 }
0x19c0   : > { %v7830_v53 = vpop.eup %7829  ;;  %v4197_v3 = vmul.f32 %v4194_v52, %v8237_v43 }
0x19c1   : > { %v4206_v5 = vmul.f32 %v7828_v61, %v4205_v0  ;;  %v4212_v7 = vmul.f32 %v7830_v53, %v4199_v11  ;;  %vm4218_vm6 = vweird.f32 %v7830_v53 }
0x19c2   : > { %v4200_v13 = vadd.f32 1e-05, %v4197_v3  ;;  %vm4219_vm8 = vmor %vm4217_vm7, %vm4218_vm6 }
0x19c3   : > { %v4213_v15 = vmul.f32 %v7830_v53, %v4212_v7  ;;  %v4210_v17 = vsel %vm4209_vm5, %v7828_v61, %v4206_v5 }
0x19c4   : > { %7831 = vrsqrt.f32 %v4200_v13  ;;  %v4231_v23 = vmul.f32 %v4210_v17, %v9785_v24  ;;  %vm4227_vm10 = vweird.f32 %v4200_v13 }
0x19c5   : > { %v4214_v18 = vmul.f32 0.5, %v4213_v15 }
0x19c6   : > { %v4237_v39 = vmul.f32 %v4235_v32, %v4231_v23 }
0x19c7   : > { %v4215_v54 = vsub.f32 1.5, %v4214_v18 }
0x19c8   : > { %v4243_v22 = vadd.f32 %v4241_v33, %v4237_v39 }
0x19c9   : > { %v4216_v28 = vmul.f32 %v7830_v53, %v4215_v54 }
0x19ca   : > { %v7832_v4 = vpop.eup %7831 }
0x19cb   : > { %v4220_v56 = vsel %vm4219_vm8, %v7830_v53, %v4216_v28  ;;  %v4222_v29 = vmul.f32 %v7832_v4, %v4200_v13  ;;  %vm4228_vm9 = vweird.f32 %v7832_v4 }
0x19cc   : > { %v4232_v37 = vmul.f32 %v4220_v56, %v9791_v48  ;;  %vm4229_vm14 = vmor %vm4227_vm10, %vm4228_vm9 }
0x19cd   : > { %v4223_v30 = vmul.f32 %v7832_v4, %v4222_v29 }
0x19ce   : > { %v4238_v12 = vmul.f32 %v4235_v32, %v4232_v37 }
0x19cf   : > { %v4224_v59 = vmul.f32 0.5, %v4223_v30 }
0x19d0   : > { %v4244_v6 = vadd.f32 %v4241_v33, %v4238_v12 }
0x19d1   : > { %v4225_v24 = vsub.f32 1.5, %v4224_v59 }
0x19d2   : > { %v4246_v42 = vpack.c.bf16 %v4244_v6, %v4243_v22 }
0x19d3   : > { %v4226_v44 = vmul.f32 %v7832_v4, %v4225_v24 }
0x19d4   : > { %4391 = vmatmul.bf16.vlgmr.msrb.gmra.mxu3 %v4246_v42  ;;  %4409 = vmatmul.bf16.vlgmr.msra.gmra.mxu1 %v4246_v42 }
0x19d5   : > { %v4230_v9 = vsel %vm4229_vm14, %v7832_v4, %v4226_v44  ;;  %4427 = vmatmul.bf16.vlgmr.msra.gmra.mxu2 %v4246_v42 }
0x19d6   : > { %v4233_v47 = vmul.f32 %v4230_v9, %v9797_v38 }
0x19d8   : > { %v4239_v57 = vmul.f32 %v4235_v32, %v4233_v47 }
0x19da   : > { %v4245_v2 = vadd.f32 %v4241_v33, %v4239_v57 }
0x19dc   : > { %v4247_v48 = vpack.c.bf16 %v4245_v2, %v4245_v2 }
0x19e4   : > { %4396 = vmatmul.bf16.gmra.mxu3 %v4247_v48  ;;  %4414 = vmatmul.bf16.gmra.mxu1 %v4247_v48 }
0x19e5   : > { %4432 = vmatmul.bf16.gmra.mxu2 %v4247_v48 }
0x1a51   : > { %v4410_v49 = vpop.f32.mrf.mxu1 }
0x1a52   : > { %v4411_v40 = vadd.f32 %v4410_v49, %v4250_v50 }
0x1a57   : > { %v4392_v19 = vpop.f32.mrf.mxu3 }
0x1a58   : > { %v4428_v27 = vpop.f32.mrf.mxu2  ;;  %v4393_v26 = vadd.f32 %v4392_v19, %v4249_v51 }
0x1a59   : > { %v4412_v36 = vpop.f32.mrf.mxu1  ;;  %v4429_v15 = vadd.f32 %v4428_v27, %v4251_v62 }
0x1a5a   : > { %v4413_v31 = vadd.f32 %v4412_v36, %v4250_v50 }
0x1a5c   : > { %v4439_v55 = vpack.c.bf16 %v4413_v31, %v4411_v40 }
0x1a5e   : > { %4546 = vrot.lane.b32.xlu2 %v4439_v55, %s8022_s29  ;;  %v4450_v1 = vsel %vm1104_vm11, %v4439_v55, 0 }
0x1a5f   : > { %v4394_v38 = vpop.f32.mrf.mxu3 }
0x1a60   : > { %v4395_v25 = vadd.f32 %v4394_v38, %v4249_v51  ;;  %v4430_v21 = vpop.f32.mrf.mxu2 }
0x1a61   : > { %v4415_v58 = vpop.f32.mrf.mxu1  ;;  %v4431_v5 = vadd.f32 %v4430_v21, %v4251_v62 }
0x1a62   : > { %v4437_v60 = vpack.c.bf16 %v4395_v25, %v4393_v26  ;;  %v4416_v14 = vadd.f32 %v4415_v58, %v4250_v50 }
0x1a63   : > { %v9968_v18 = vpack.c.bf16 %v4431_v5, %v4429_v15 }
0x1a64   : > { %v4440_v61 = vpack.c.bf16 %v4416_v14, %v4416_v14  ;;  %4540 = vrot.lane.b32.xlu0 %v4437_v60, %s8022_s29 }
0x1a66   : > { %v4453_v11 = vsel %vm1104_vm11, %v4440_v61, 0  ;;  %4548 = vrot.lane.b32.xlu1 %v4440_v61, %s8022_s29 }
0x1a67   : > { %v4397_v63 = vpop.f32.mrf.mxu3  ;;  %4461 = vmatpush.bf16.xpose.msra.mxu0 %v4453_v11 }
0x1a68   : > { %v4398_v34 = vadd.f32 %v4397_v63, %v4249_v51  ;;  %v4433_v0 = vpop.f32.mrf.mxu2 }
0x1a69   : > { %v4434_v52 = vadd.f32 %v4433_v0, %v4251_v62  ;;  %v4417_v53 = vpop.f32.mrf.mxu1 }
0x1a6a   : > { %v4438_v7 = vpack.c.bf16 %v4398_v34, %v4398_v34 }
0x1a6b   : > { %v4442_v3 = vpack.c.bf16 %v4434_v52, %v4434_v52 }
0x1a6d   : > { %v4518_v13 = vsel %vm3466_vm2, %v4442_v3, 0 }
0x1a6e   : > { %4526 = vmatpush.bf16.msra.mxu3 %v4518_v13  ;;  %4542 = vrot.lane.b32.xlu1 %v4438_v7, %s8022_s29 }
0x1a6f   : > { %v4399_v17 = vpop.f32.mrf.mxu3  ;;  %4462 = vmatpush.bf16.xpose.msra.mxu0 %v4450_v1 }
0x1a70   : > { %v4435_v54 = vpop.f32.mrf.mxu2 }
0x1a72   : > { %4527 = vmatpush.bf16.msra.mxu3 %v9968_v18 }
0x1a76   : > { %7045 = vmatmul.msk.bf16.vlgmr.msra.gmra.mxu0 %vm1104_vm11, %v4437_v60 }
0x1a86   : > { %7046 = vmatmul.msk.bf16.gmra.mxu0 %vm1104_vm11, %v4438_v7 }
0x1ab8   : > { %v4547_v8 = vpop.permute.xlu2 %4546 }
0x1ab9   : > { %v4557_v28 = vsel %vm1104_vm11, %v4547_v8, 0 }
0x1ad6   : > { %v4541_v4 = vpop.permute.xlu0 %4540 }
0x1ad8   : > { %v4549_v32 = vpop.permute.xlu1 %4548 }
0x1ad9   : > { %v4560_v23 = vsel %vm1104_vm11, %v4549_v32, 0 }
0x1ada   : > { %4568 = vmatpush.bf16.xpose.msrb.mxu1 %v4560_v23 }
0x1ae0   : > { %v4543_v39 = vpop.permute.xlu1 %4542 }
0x1ae2   : > { %4569 = vmatpush.bf16.xpose.msrb.mxu1 %v4557_v28 }
0x1ae9   : > { %7049 = vmatmul.msk.bf16.vlgmr.msrb.gmra.mxu1 %vm1104_vm11, %v4541_v4 }
0x1af3   : > { %v4464_v56 = vpop.f32.mrf.mxu0 }
0x1af4   : > { %v4473_v29 = vmul.f32 0.125, %v4464_v56 }
0x1af6   : > { %v4476_v33 = vsel %vm3423_vm3, %v4473_v29, -inf }
0x1af7   : > { %4477 = vmax.xlane.f32.xlu1 %v4476_v33 }
0x1af9   : > { %7050 = vmatmul.msk.bf16.gmra.mxu1 %vm1104_vm11, %v4543_v39 }
0x1afb   : > { %v4466_v37 = vpop.f32.mrf.mxu0 }
0x1afc   : > { %v4474_v24 = vmul.f32 0.125, %v4466_v37 }
0x1afe   : > { %v4479_v47 = vsel %vm3423_vm3, %v4474_v24, -inf }
0x1b03   : > { %v4469_v30 = vpop.f32.mrf.mxu0 }
0x1b04   : > { %v4475_v62 = vmul.f32 0.125, %v4469_v30 }
0x1b06   : > { %v4482_v0 = vsel %vm3430_vm4, %v4475_v62, -inf }
0x1b0b   : > { %v4471_v12 = vpop.f32.mrf.mxu0 }
0x1b66   : > { %v4571_v59 = vpop.f32.mrf.mxu1 }
0x1b67   : > { %v4580_v22 = vmul.f32 0.125, %v4571_v59 }
0x1b69   : > { %v4583_v6 = vsel %vm3423_vm3, %v4580_v22, -inf }
0x1b6a   : > { %4584 = vmax.xlane.f32.xlu2 %v4583_v6  ;;  %v4478_v25 = vpop.xlane.xlu1 %4477 }
0x1b6b   : > { %v4485_v58 = vsub.f32 %v4473_v29, %v4478_v25  ;;  %v7553_v25 = vld [vmem:[%s10557_s8 + $0x24c] sm:$0xf] }
0x1b6d   : > { %v4488_v11 = vmul.f32 1.442695, %v4485_v58 }
0x1b6e   : > { %v4573_v42 = vpop.f32.mrf.mxu1 }
0x1b6f   : > { %v4581_v44 = vmul.f32 0.125, %v4573_v42 }
0x1b71   : > { %v4586_v9 = vsel %vm3423_vm3, %v4581_v44, -inf }
0x1b72   : > { %4587 = vmax.xlane.f32.xlu0 %v4586_v9  ;;  %4480 = vmax.xlane.f32.xlu2 %v4479_v47 }
0x1b76   : > { %v4576_v57 = vpop.f32.mrf.mxu1 }
0x1b77   : > { %v4582_v2 = vmul.f32 0.125, %v4576_v57 }
0x1b79   : > { %v4589_v48 = vsel %vm3430_vm4, %v4582_v2, -inf }
0x1b7a   : > { %4590 = vmax.xlane.f32.xlu0 %v4589_v48 }
0x1b7e   : > { %v4578_v49 = vpop.f32.mrf.mxu1 }
0x1b7f   : > { %v7571_v49 = vld [vmem:[%s10557_s8 + $0x2dc] sm:$0xf] }
0x1b8e   : > { %4622 = vrot.lane.b32.xlu0 %v4442_v3, %s8022_s29 }
0x1bdd   : > { %v4585_v45 = vpop.xlane.xlu2 %4584 }
0x1bde   : > { %v4592_v50 = vsub.f32 %v4580_v22, %v4585_v45  ;;  %v7081_v45 = vld [vmem:[%s10557_s8 + $0x2f0] sm:$0xf0] }
0x1be0   : > { %v4595_v19 = vmul.f32 1.442695, %v4592_v50  ;;  %v7565_v50 = vld [vmem:[%s10557_s8 + $0x2ac] sm:$0xf] }
0x1be2   : > { %7833 = vpow2.f32 %v4595_v19 }
0x1be5   : > { %v4588_v27 = vpop.xlane.xlu0 %4587  ;;  %v4481_v36 = vpop.xlane.xlu2 %4480 }
0x1be6   : > { %v4593_v40 = vsub.f32 %v4581_v44, %v4588_v27  ;;  %v4486_v31 = vsub.f32 %v4474_v24, %v4481_v36  ;;  %v7084_v27 = vor.u32 %v7571_v49, %v7081_v45  ;;  %v7077_v36 = vld [vmem:[%s10557_s8 + $0x2c0] sm:$0xf0] }
0x1be8   : > { %v7834_v51 = vpop.eup %7833  ;;  %v4597_v55 = vmul.f32 1.442695, %v4593_v40  ;;  %v4490_v38 = vmul.f32 1.442695, %v4486_v31  ;;  %4701 = vmatpush.bf16.msrb.mxu0 %v7084_v27  ;;  %v7080_v31 = vor.u32 %v7565_v50, %v7077_v36 }
0x1be9   : > { %v4601_v26 = vsel %vm3423_vm3, %v7834_v51, 0.0 }
0x1bea   : > { %7835 = vpow2.f32 %v4597_v55  ;;  %4602 = vadd.xlane.f32.xlu2 %v4601_v26  ;;  %v7073_v55 = vld [vmem:[%s10557_s8 + $0x290] sm:$0xf0] }
0x1beb   : > { %7837 = vpow2.f32 %v4490_v38 }
0x1bec   : > { %7839 = vpow2.f32 %v4488_v11  ;;  %4702 = vmatpush.bf16.msrb.mxu0 %v7080_v31 }
0x1bed   : > { %v4591_v63 = vpop.xlane.xlu0 %4590 }
0x1bee   : > { %v4594_v34 = vsub.f32 %v4582_v2, %v4591_v63  ;;  %v7061_v63 = vld [vmem:[%s10557_s8 + $0x200] sm:$0xf0] }
0x1bf0   : > { %v7836_v21 = vpop.eup %7835  ;;  %v4599_v52 = vmul.f32 1.442695, %v4594_v34 }
0x1bf1   : > { %v7838_v60 = vpop.eup %7837  ;;  %v4604_v14 = vsel %vm3423_vm3, %v7836_v21, 0.0 }
0x1bf2   : > { %4605 = vadd.xlane.f32.xlu1 %v4604_v14  ;;  %v4497_v61 = vsel %vm3423_vm3, %v7838_v60, 0.0  ;;  %v7840_v53 = vpop.eup %7839  ;;  %7841 = vpow2.f32 %v4599_v52  ;;  %v7547_v14 = vld [vmem:[%s10557_s8 + $0x21c] sm:$0xf]  ;;  %v7057_v52 = vld [vmem:[%s10557_s8 + $0x1d0] sm:$0xf0] }
0x1bf3   : > { %4498 = vadd.xlane.f32.xlu0 %v4497_v61  ;;  %v4494_v7 = vsel %vm3423_vm3, %v7840_v53, 0.0  ;;  %v7065_v61 = vld [vmem:[%s10557_s8 + $0x230] sm:$0xf0] }
0x1bf4   : > { %v7068_v11 = vor.u32 %v7547_v14, %v7065_v61  ;;  %v7569_v14 = vld [vmem:[%s10557_s8 + $0x2c4] sm:$0xf0]  ;;  %v7566_v61 = vld [vmem:[%s10557_s8 + $0x2b4] sm:$0xf] }
0x1bf8   : > { %v7842_v13 = vpop.eup %7841 }
0x1bf9   : > { %v4607_v15 = vsel %vm3430_vm4, %v7842_v13, 0.0 }
0x1bfa   : > { %4483 = vmax.xlane.f32.xlu1 %v4482_v0  ;;  %v7535_v0 = vld [vmem:[%s10557_s8 + $0x1bc] sm:$0xf] }
0x1c00   : > { %v4623_v3 = vpop.permute.xlu0 %4622 }
0x1c01   : > { %v4632_v5 = vsel %vm3466_vm2, %v4623_v3, 0 }
0x1c02   : > { %4495 = vadd.xlane.f32.xlu1 %v4494_v7  ;;  %4640 = vmatpush.bf16.msrb.mxu2 %v4632_v5  ;;  %v7529_v7 = vld [vmem:[%s10557_s8 + $0x18c] sm:$0xf] }
0x1c03   : > { %4620 = vrot.lane.b32.xlu2 %v9968_v18, %s8022_s29 }
0x1c0a   : > { %4608 = vadd.xlane.f32.xlu1 %v4607_v15 }
0x1c5d   : > { %v4603_v1 = vpop.xlane.xlu2 %4602 }
0x1c5e   : > { %7843 = vrcp.f32 %v4603_v1 }
0x1c64   : > { %v7844_v32 = vpop.eup %7843 }
0x1c65   : > { %v4606_v17 = vpop.xlane.xlu1 %4605  ;;  %v4621_v54 = vpop.permute.xlu2 %4620  ;;  %v4613_v8 = vmul.f32 %v7844_v32, %v7834_v51  ;;  %v7559_v51 = vld [vmem:[%s10557_s8 + $0x27c] sm:$0xf] }
0x1c66   : > { %7845 = vrcp.f32 %v4606_v17  ;;  %4641 = vmatpush.bf16.msrb.mxu2 %v4621_v54  ;;  %v4499_v39 = vpop.xlane.xlu0 %4498  ;;  %v7076_v38 = vor.u32 %v7559_v51, %v7073_v55  ;;  %v7143_v55 = vld [vmem:[%s10557_s8 + $0x2e0] sm:$0xf] }
0x1c68   : > { %4703 = vmatpush.bf16.msrb.mxu0 %v7076_v38  ;;  %v7575_v38 = vld [vmem:[%s10557_s8 + $0x2f4] sm:$0xf0] }
0x1c6c   : > { %v7846_v23 = vpop.eup %7845 }
0x1c6d   : > { %v4614_v28 = vmul.f32 %v7846_v23, %v7836_v21  ;;  %v4484_v4 = vpop.xlane.xlu1 %4483  ;;  %v7069_v21 = vld [vmem:[%s10557_s8 + $0x260] sm:$0xf0] }
0x1c6e   : > { %v4487_v56 = vsub.f32 %v4475_v62, %v4484_v4  ;;  %v7541_v62 = vld [vmem:[%s10557_s8 + $0x1ec] sm:$0xf] }
0x1c6f   : > { %v4616_v29 = vpack.c.bf16 %v4614_v28, %v4613_v8  ;;  %v7064_v34 = vor.u32 %v7541_v62, %v7061_v63  ;;  %v7137_v62 = vld [vmem:[%s10557_s8 + $0x2c8] sm:$0xf0] }
0x1c70   : > { %v4492_v33 = vmul.f32 1.442695, %v4487_v56  ;;  %v7140_v63 = vor.u32 %v7566_v61, %v7137_v62 }
0x1c71   : > { %7051 = vmatmul.msk.bf16.vlgmr.msrb.gmra.mxu2 %vm3423_vm3, %v4616_v29 }
0x1c72   : > { %7847 = vpow2.f32 %v4492_v33 }
0x1c73   : > { %7849 = vrcp.f32 %v4499_v39 }
0x1c75   : > { %v4496_v18 = vpop.xlane.xlu1 %4495 }
0x1c76   : > { %7851 = vrcp.f32 %v4496_v18 }
0x1c78   : > { %v7848_v37 = vpop.eup %7847 }
0x1c79   : > { %v4500_v30 = vsel %vm3430_vm4, %v7848_v37, 0.0  ;;  %v7850_v12 = vpop.eup %7849 }
0x1c7a   : > { %4501 = vadd.xlane.f32.xlu2 %v4500_v30  ;;  %v4507_v22 = vmul.f32 %v7850_v12, %v7838_v60  ;;  %v7072_v60 = vor.u32 %v7553_v25, %v7069_v21  ;;  %v7144_v25 = vor.u32 %v7575_v38, %v7143_v55  ;;  %v7145_v21 = vld [vmem:[%s10557_s8 + $0x2f8] sm:$0xf0] }
0x1c7c   : > { %v7852_v59 = vpop.eup %7851  ;;  %4704 = vmatpush.bf16.msrb.mxu0 %v7072_v60  ;;  %4889 = vmatpush.bf16.msrb.mxu3 %v7144_v25  ;;  %v7135_v60 = vld [vmem:[%s10557_s8 + $0x2b0] sm:$0xf] }
0x1c7d   : > { %v4506_v6 = vmul.f32 %v7852_v59, %v7840_v53  ;;  %v4609_v24 = vpop.xlane.xlu1 %4608  ;;  %v7060_v53 = vor.u32 %v7535_v0, %v7057_v52  ;;  %v7563_v0 = vld [vmem:[%s10557_s8 + $0x294] sm:$0xf0]  ;;  %v7560_v52 = vld [vmem:[%s10557_s8 + $0x284] sm:$0xf] }
0x1c7e   : > { %7853 = vrcp.f32 %v4609_v24 }
0x1c7f   : > { %v4509_v42 = vpack.c.bf16 %v4507_v22, %v4506_v6 }
0x1c80   : > { %4705 = vmatpush.bf16.msrb.mxu0 %v7068_v11  ;;  %v7136_v11 = vor.u32 %v7569_v14, %v7135_v60 }
0x1c81   : > { %7047 = vmatmul.msk.bf16.vlgmr.msra.gmra.mxu3 %vm3423_vm3, %v4509_v42 }
0x1c82   : > { %4890 = vmatpush.bf16.msrb.mxu3 %v7136_v11 }
0x1c84   : > { %v7854_v44 = vpop.eup %7853  ;;  %4706 = vmatpush.bf16.msrb.mxu0 %v7064_v34  ;;  %v7127_v34 = vld [vmem:[%s10557_s8 + $0x280] sm:$0xf] }
0x1c85   : > { %v4615_v9 = vmul.f32 %v7854_v44, %v7842_v13  ;;  %v7053_v13 = vld [vmem:[%s10557_s8 + $0x1a0] sm:$0xf0] }
0x1c86   : > { %v7056_v15 = vor.u32 %v7529_v7, %v7053_v13  ;;  %v7119_v7 = vld [vmem:[%s10557_s8 + $0x250] sm:$0xf]  ;;  %v7557_v13 = vld [vmem:[%s10557_s8 + $0x264] sm:$0xf0] }
0x1c87   : > { %v4617_v47 = vpack.c.bf16 %v4615_v9, %v4615_v9 }
0x1c88   : > { %4707 = vmatpush.bf16.msrb.mxu0 %v7060_v53  ;;  %v7128_v53 = vor.u32 %v7563_v0, %v7127_v34  ;;  %v6943_v34 = vld [vmem:[%s10559_s10 + $0x1a] ss:$8 sm:$0x7] }
0x1c89   : > { %7052 = vmatmul.msk.bf16.gmra.mxu2 %vm3423_vm3, %v4617_v47 }
0x1c8a   : > { %4891 = vmatpush.bf16.msrb.mxu3 %v7128_v53 }
0x1c8c   : > { %4708 = vmatpush.bf16.msrb.mxu0 %v7056_v15  ;;  %v7554_v15 = vld [vmem:[%s10557_s8 + $0x254] sm:$0xf] }
0x1ced   : > { %v4502_v57 = vpop.xlane.xlu2 %4501 }
0x1cee   : > { %7855 = vrcp.f32 %v4502_v57 }
0x1cf4   : > { %v7856_v2 = vpop.eup %7855  ;;  %v4643_v48 = vpop.f32.mrf.mxu2 }
0x1cf5   : > { %v4508_v19 = vmul.f32 %v7856_v2, %v7848_v37  ;;  %v6945_v37 = vld [vmem:[%s10559_s10 + $0x1c] ss:$8 sm:$0x7] }
0x1cf6   : > { %v4723_v30 = vperm.slane %v6945_v37, 0  ;;  %v7105_v37 = vld [vmem:[%s10557_s8 + $0x208] sm:$0xf0] }
0x1cf7   : > { %v4510_v40 = vpack.c.bf16 %v4508_v19, %v4508_v19 }
0x1cf9   : > { %7048 = vmatmul.msk.bf16.gmra.mxu3 %vm3423_vm3, %v4510_v40 }
0x1cfc   : > { %v4645_v26 = vpop.f32.mrf.mxu2 }
0x1cfd   : > { %v7665_v58 = vpack.i.bf16 %v4645_v26, %v4643_v48  ;;  %v7572_v26 = vld [vmem:[%s10557_s8 + $0x2e4] sm:$0xf] }
0x1cff   : > { %7666 = vrot.lane.b32.xlu1 %v7665_v58, %s8022_s29  ;;  %v7148_v58 = vor.u32 %v7572_v26, %v7145_v21 }
0x1d01   : > { %4907 = vmatpush.bf16.msra.mxu1 %v7148_v58 }
0x1d04   : > { %v4529_v1 = vpop.f32.mrf.mxu3 }
0x1d05   : > { %4908 = vmatpush.bf16.msra.mxu1 %v7140_v63 }
0x1d0c   : > { %v4648_v3 = vpop.f32.mrf.mxu2  ;;  %v4531_v23 = vpop.f32.mrf.mxu3 }
0x1d0d   : > { %4659 = vrot.lane.b32.xlu1 %v4648_v3, %s8022_s29  ;;  %v7129_v3 = vld [vmem:[%s10557_s8 + $0x298] sm:$0xf0] }
0x1d14   : > { %v4650_v5 = vpop.f32.mrf.mxu2 }
0x1d15   : > { %v7132_v5 = vor.u32 %v7560_v52, %v7129_v3  ;;  %v4791_v3 = vperm.slane %v6943_v34, 0 }
0x1d17   : > { %4909 = vmatpush.bf16.msra.mxu1 %v7132_v5 }
0x1d71   : > { %v7667_v17 = vpop.permute.xlu1 %7666 }
0x1d72   : > { %v7669_v54 = vunpack.i.h.bf16 %v7667_v17  ;;  %v7668_v32 = vunpack.i.l.bf16 %v7667_v17  ;;  %v7121_v17 = vld [vmem:[%s10557_s8 + $0x268] sm:$0xf0] }
0x1d74   : > { %v4664_v8 = vsel %vm1104_vm11, %v4529_v1, %v7668_v32  ;;  %v4665_v28 = vsel %vm1104_vm11, %v4531_v23, %v7669_v54  ;;  %v7120_v1 = vor.u32 %v7557_v13, %v7119_v7  ;;  %v7124_v54 = vor.u32 %v7554_v15, %v7121_v17  ;;  %v7111_v32 = vld [vmem:[%s10557_s8 + $0x220] sm:$0xf]  ;;  %v7551_v23 = vld [vmem:[%s10557_s8 + $0x234] sm:$0xf0] }
0x1d75   : > { %v4667_v4 = vpack.c.bf16 %v4665_v28, %v4664_v8  ;;  %v7548_v8 = vld [vmem:[%s10557_s8 + $0x224] sm:$0xf]  ;;  %v7112_v28 = vor.u32 %v7551_v23, %v7111_v32  ;;  %v6944_v7 = vld [vmem:[%s10559_s10 + $0x1b] ss:$8 sm:$0x7] }
0x1d76   : > { %4892 = vmatpush.bf16.msrb.mxu3 %v7120_v1  ;;  %4910 = vmatpush.bf16.msra.mxu1 %v7124_v54  ;;  %v4797_v54 = vperm.slane %v6944_v7, 0 }
0x1d77   : > { %4709 = vmatmul.bf16.vlgmr.msrb.gmra.mxu0 %v4667_v4  ;;  %v7113_v4 = vld [vmem:[%s10557_s8 + $0x238] sm:$0xf0] }
0x1d7a   : > { %4893 = vmatpush.bf16.msrb.mxu3 %v7112_v28 }
0x1d7c   : > { %v4534_v56 = vpop.f32.mrf.mxu3 }
0x1d7f   : > { %v4660_v29 = vpop.permute.xlu1 %4659 }
0x1d80   : > { %v4666_v33 = vsel %vm1104_vm11, %v4534_v56, %v4660_v29  ;;  %v7116_v56 = vor.u32 %v7548_v8, %v7113_v4  ;;  %v7103_v29 = vld [vmem:[%s10557_s8 + $0x1f0] sm:$0xf] }
0x1d81   : > { %v4668_v18 = vpack.c.bf16 %v4666_v33, %v4666_v33  ;;  %v7545_v33 = vld [vmem:[%s10557_s8 + $0x204] sm:$0xf0] }
0x1d82   : > { %4911 = vmatpush.bf16.msra.mxu1 %v7116_v56 }
0x1d84   : > { %v4536_v39 = vpop.f32.mrf.mxu3 }
0x1d85   : > { %v7542_v39 = vld [vmem:[%s10557_s8 + $0x1f4] sm:$0xf] }
0x1d87   : > { %4714 = vmatmul.bf16.gmra.mxu0 %v4668_v18  ;;  %v7104_v18 = vor.u32 %v7545_v33, %v7103_v29 }
0x1d89   : > { %4894 = vmatpush.bf16.msrb.mxu3 %v7104_v18 }
0x1df4   : > { %v4710_v12 = vpop.f32.mrf.mxu0 }
0x1df5   : > { %v4719_v59 = vadd.f32 %v4710_v12, %v9771_v35  ;;  %v7095_v12 = vld [vmem:[%s10557_s8 + $0x1c0] sm:$0xf] }
0x1df7   : > { %v10054_v22 = vadd.f32 %v4723_v30, %v4719_v59  ;;  %v7539_v59 = vld [vmem:[%s10557_s8 + $0x1d4] sm:$0xf0] }
0x1df9   : > { %4728 = vadd.xlane.f32.xlu0 %v10054_v22 }
0x1dfc   : > { %v4712_v6 = vpop.f32.mrf.mxu0 }
0x1dfd   : > { %v4720_v24 = vadd.f32 %v4712_v6, %v9775_v20  ;;  %v7536_v6 = vld [vmem:[%s10557_s8 + $0x1c4] sm:$0xf] }
0x1dff   : > { %v10058_v42 = vadd.f32 %v4723_v30, %v4720_v24  ;;  %v7096_v24 = vor.u32 %v7539_v59, %v7095_v12 }
0x1e01   : > { %4730 = vadd.xlane.f32.xlu1 %v10058_v42  ;;  %4895 = vmatpush.bf16.msrb.mxu3 %v7096_v24  ;;  %v7583_v24 = vld [vmem:[%s10558_s9 + $0xb8] sm:$0xff] }
0x1e02   : > { %5079 = vmatpush.bf16.msra.mxu2 %v7583_v24 }
0x1e04   : > { %v4715_v44 = vpop.f32.mrf.mxu0 }
0x1e05   : > { %v4721_v9 = vadd.f32 %v4715_v44, %v9779_v41  ;;  %v7097_v44 = vld [vmem:[%s10557_s8 + $0x1d8] sm:$0xf0] }
0x1e07   : > { %v10062_v47 = vadd.f32 %v4723_v30, %v4721_v9  ;;  %v7108_v30 = vor.u32 %v7542_v39, %v7105_v37 }
0x1e09   : > { %v4732_v57 = vsel %vm3122_vm13, %v10062_v47, 0.0  ;;  %4912 = vmatpush.bf16.msra.mxu1 %v7108_v30 }
0x1e0a   : > { %4733 = vadd.xlane.f32.xlu0 %v4732_v57  ;;  %v7100_v57 = vor.u32 %v7536_v6, %v7097_v44  ;;  %v7590_v6 = vld [vmem:[%s10558_s9 + $0xf0] sm:$0xff] }
0x1e0b   : > { %v7582_v44 = vld [vmem:[%s10558_s9 + $0xb0] sm:$0xff] }
0x1e0c   : > { %v4717_v35 = vpop.f32.mrf.mxu0  ;;  %5080 = vmatpush.bf16.msra.mxu2 %v7582_v44 }
0x1e0d   : > { %4913 = vmatpush.bf16.msra.mxu1 %v7100_v57  ;;  %v7581_v57 = vld [vmem:[%s10558_s9 + $0xa8] sm:$0xff] }
0x1e10   : > { %5081 = vmatpush.bf16.msra.mxu2 %v7581_v57 }
0x1e6c   : > { %v4729_v2 = vpop.xlane.xlu0 %4728 }
0x1e6d   : > { %v4735_v48 = vmul.f32 %v4729_v2, %v8237_v43  ;;  %v7087_v2 = vld [vmem:[%s10557_s8 + $0x190] sm:$0xf] }
0x1e6f   : > { %v10068_v49 = vsub.f32 %v10054_v22, %v4735_v48  ;;  %v7533_v48 = vld [vmem:[%s10557_s8 + $0x1a4] sm:$0xf0] }
0x1e71   : > { %v4741_v20 = vmul.f32 %v10068_v49, %v10068_v49 }
0x1e73   : > { %4744 = vadd.xlane.f32.xlu2 %v4741_v20  ;;  %v7530_v20 = vld [vmem:[%s10557_s8 + $0x194] sm:$0xf] }
0x1e74   : > { %v4731_v45 = vpop.xlane.xlu1 %4730 }
0x1e75   : > { %v4736_v41 = vmul.f32 %v4731_v45, %v8237_v43 }
0x1e77   : > { %v10074_v50 = vsub.f32 %v10058_v42, %v4736_v41  ;;  %v7088_v41 = vor.u32 %v7533_v48, %v7087_v2  ;;  %v7580_v2 = vld [vmem:[%s10558_s9 + $0xa0] sm:$0xff]  ;;  %v7586_v48 = vld [vmem:[%s10558_s9 + $0xd0] sm:$0xff] }
0x1e78   : > { %5082 = vmatpush.bf16.msra.mxu2 %v7580_v2 }
0x1e79   : > { %v4742_v19 = vmul.f32 %v10074_v50, %v10074_v50  ;;  %4896 = vmatpush.bf16.msrb.mxu3 %v7088_v41  ;;  %v7585_v41 = vld [vmem:[%s10558_s9 + $0xc8] sm:$0xff] }
0x1e7b   : > { %4746 = vadd.xlane.f32.xlu0 %v4742_v19  ;;  %v7089_v19 = vld [vmem:[%s10557_s8 + $0x1a8] sm:$0xf0] }
0x1e7d   : > { %v4734_v27 = vpop.xlane.xlu0 %4733 }
0x1e7e   : > { %v4737_v36 = vmul.f32 %v4734_v27, %v8237_v43  ;;  %v7092_v27 = vor.u32 %v7530_v20, %v7089_v19  ;;  %v7579_v20 = vld [vmem:[%s10558_s9 + $0x98] sm:$0xff]  ;;  %v7578_v19 = vld [vmem:[%s10558_s9 + $0x90] sm:$0xff] }
0x1e7f   : > { %5083 = vmatpush.bf16.msra.mxu2 %v7579_v20 }
0x1e80   : > { %v10080_v40 = vsub.f32 %v10062_v47, %v4737_v36  ;;  %4914 = vmatpush.bf16.msra.mxu1 %v7092_v27 }
0x1e82   : > { %v4743_v31 = vmul.f32 %v10080_v40, %v10080_v40 }
0x1e83   : > { %5084 = vmatpush.bf16.msra.mxu2 %v7578_v19 }
0x1e84   : > { %v4748_v51 = vsel %vm3122_vm13, %v4743_v31, 0.0 }
0x1e85   : > { %4749 = vadd.xlane.f32.xlu2 %v4748_v51 }
0x1ee6   : > { %v4745_v9 = vpop.xlane.xlu2 %4744 }
0x1ee7   : > { %v4751_v35 = vmul.f32 %v4745_v9, %v8237_v43  ;;  %v7588_v9 = vld [vmem:[%s10558_s9 + $0xe0] sm:$0xff] }
0x1ee9   : > { %v4754_v45 = vadd.f32 1e-05, %v4751_v35  ;;  %v7587_v35 = vld [vmem:[%s10558_s9 + $0xd8] sm:$0xff] }
0x1eeb   : > { %7857 = vrsqrt.f32 %v4754_v45  ;;  %vm4763_vm2 = vweird.f32 %v4754_v45 }
0x1eee   : > { %v4747_v36 = vpop.xlane.xlu0 %4746 }
0x1eef   : > { %v4752_v31 = vmul.f32 %v4747_v36, %v8237_v43  ;;  %v7584_v36 = vld [vmem:[%s10558_s9 + $0xc0] sm:$0xff] }
0x1ef1   : > { %v7858_v51 = vpop.eup %7857  ;;  %v4755_v55 = vadd.f32 1e-05, %v4752_v31 }
0x1ef2   : > { %v4758_v38 = vmul.f32 %v7858_v51, %v4754_v45  ;;  %vm4764_vm11 = vweird.f32 %v7858_v51  ;;  %v6948_v45 = vld [vmem:[%s10559_s10 + $0x1f] ss:$8 sm:$0x7] }
0x1ef3   : > { %7859 = vrsqrt.f32 %v4755_v55  ;;  %vm4765_vm3 = vmor %vm4763_vm2, %vm4764_vm11  ;;  %vm4773_vm15 = vweird.f32 %v4755_v55  ;;  %v4806_v27 = vperm.slane %v6948_v45, 1 }
0x1ef4   : > { %v4759_v26 = vmul.f32 %v7858_v51, %v4758_v38  ;;  %v7576_v38 = vld [vmem:[%s10558_s9 + $0x80] sm:$0xff] }
0x1ef6   : > { %v4760_v25 = vmul.f32 0.5, %v4759_v26 }
0x1ef8   : > { %v4761_v21 = vsub.f32 1.5, %v4760_v25  ;;  %v4750_v58 = vpop.xlane.xlu2 %4749  ;;  %v4805_v25 = vperm.slane %v6948_v45, 0 }
0x1ef9   : > { %v7860_v60 = vpop.eup %7859  ;;  %v4753_v14 = vmul.f32 %v4750_v58, %v8237_v43 }
0x1efa   : > { %v4762_v61 = vmul.f32 %v7858_v51, %v4761_v21  ;;  %v4768_v11 = vmul.f32 %v7860_v60, %v4755_v55  ;;  %vm4774_vm4 = vweird.f32 %v7860_v60 }
0x1efb   : > { %v4756_v62 = vadd.f32 1e-05, %v4753_v14  ;;  %vm4775_vm1 = vmor %vm4773_vm15, %vm4774_vm4 }
0x1efc   : > { %v4769_v63 = vmul.f32 %v7860_v60, %v4768_v11  ;;  %v4766_v0 = vsel %vm4765_vm3, %v7858_v51, %v4762_v61  ;;  %v7577_v51 = vld [vmem:[%s10558_s9 + $0x88] sm:$0xff] }
0x1efd   : > { %7861 = vrsqrt.f32 %v4756_v62  ;;  %v4787_v5 = vmul.f32 %v4766_v0, %v10068_v49  ;;  %vm4783_vm5 = vweird.f32 %v4756_v62  ;;  %5085 = vmatpush.bf16.msra.mxu2 %v7577_v51 }
0x1efe   : > { %v4770_v52 = vmul.f32 0.5, %v4769_v63 }
0x1eff   : > { %v4793_v32 = vmul.f32 %v4791_v3, %v4787_v5 }
0x1f00   : > { %v4771_v53 = vsub.f32 1.5, %v4770_v52 }
0x1f01   : > { %v4799_v56 = vadd.f32 %v4797_v54, %v4793_v32  ;;  %5086 = vmatpush.bf16.msra.mxu2 %v7576_v38 }
0x1f02   : > { %v4772_v13 = vmul.f32 %v7860_v60, %v4771_v53 }
0x1f03   : > { %v7862_v15 = vpop.eup %7861 }
0x1f04   : > { %v4776_v1 = vsel %vm4775_vm1, %v7860_v60, %v4772_v13  ;;  %v4778_v17 = vmul.f32 %v7862_v15, %v4756_v62  ;;  %vm4784_vm12 = vweird.f32 %v7862_v15 }
0x1f05   : > { %v4788_v23 = vmul.f32 %v4776_v1, %v10074_v50  ;;  %vm4785_vm6 = vmor %vm4783_vm5, %vm4784_vm12  ;;  %v7591_v50 = vld [vmem:[%s10558_s9 + $0xf8] sm:$0xff] }
0x1f06   : > { %v4779_v8 = vmul.f32 %v7862_v15, %v4778_v17  ;;  %5097 = vmatpush.bf16.msra.mxu0 %v7591_v50 }
0x1f07   : > { %v4794_v28 = vmul.f32 %v4791_v3, %v4788_v23 }
0x1f08   : > { %v4780_v4 = vmul.f32 0.5, %v4779_v8 }
0x1f09   : > { %v4800_v29 = vadd.f32 %v4797_v54, %v4794_v28 }
0x1f0a   : > { %v4781_v49 = vsub.f32 1.5, %v4780_v4  ;;  %5098 = vmatpush.bf16.msra.mxu0 %v7590_v6 }
0x1f0b   : > { %v4802_v33 = vpack.c.bf16 %v4800_v29, %v4799_v56 }
0x1f0c   : > { %v4782_v39 = vmul.f32 %v7862_v15, %v4781_v49 }
0x1f0d   : > { %4897 = vmatmul.bf16.vlgmr.msrb.gmra.mxu3 %v4802_v33  ;;  %4915 = vmatmul.bf16.vlgmr.msra.gmra.mxu1 %v4802_v33 }
0x1f0e   : > { %v4786_v18 = vsel %vm4785_vm6, %v7862_v15, %v4782_v39 }
0x1f0f   : > { %v4789_v37 = vmul.f32 %v4786_v18, %v10080_v40  ;;  %v7589_v40 = vld [vmem:[%s10558_s9 + $0xe8] sm:$0xff] }
0x1f10   : > { %5099 = vmatpush.bf16.msra.mxu0 %v7589_v40 }
0x1f11   : > { %v4795_v30 = vmul.f32 %v4791_v3, %v4789_v37 }
0x1f13   : > { %v4801_v12 = vadd.f32 %v4797_v54, %v4795_v30 }
0x1f14   : > { %5100 = vmatpush.bf16.msra.mxu0 %v7588_v9 }
0x1f15   : > { %v4803_v59 = vpack.c.bf16 %v4801_v12, %v4801_v12 }
0x1f18   : > { %5101 = vmatpush.bf16.msra.mxu0 %v7587_v35 }
0x1f1c   : > { %5102 = vmatpush.bf16.msra.mxu0 %v7586_v48 }
0x1f1d   : > { %4902 = vmatmul.bf16.gmra.mxu3 %v4803_v59  ;;  %4920 = vmatmul.bf16.gmra.mxu1 %v4803_v59 }
0x1f20   : > { %5103 = vmatpush.bf16.msra.mxu0 %v7585_v41 }
0x1f24   : > { %5104 = vmatpush.bf16.msra.mxu0 %v7584_v36 }
0x1f8a   : > { %v4916_v31 = vpop.f32.mrf.mxu1 }
0x1f8b   : > { %v4917_v55 = vadd.f32 %v4916_v31, %v4806_v27 }
0x1f8d   : > { %v4932_v26 = vmul.f32 0.044715, %v4917_v55  ;;  %v4926_v44 = vmul.f32 0.5, %v4917_v55 }
0x1f8f   : > { %v4938_v21 = vmul.f32 %v4932_v26, %v4917_v55 }
0x1f90   : > { %v4898_v58 = vpop.f32.mrf.mxu3 }
0x1f91   : > { %v4944_v60 = vmul.f32 %v4938_v21, %v4917_v55  ;;  %v4899_v14 = vadd.f32 %v4898_v58, %v4805_v25 }
0x1f92   : > { %v4918_v61 = vpop.f32.mrf.mxu1 }
0x1f93   : > { %v4950_v11 = vadd.f32 %v4944_v60, %v4917_v55  ;;  %v4931_v62 = vmul.f32 0.044715, %v4899_v14  ;;  %v4919_v63 = vadd.f32 %v4918_v61, %v4806_v27  ;;  %v4925_v38 = vmul.f32 0.5, %v4899_v14 }
0x1f95   : > { %v4937_v34 = vmul.f32 %v4931_v62, %v4899_v14  ;;  %v4934_v0 = vmul.f32 0.044715, %v4919_v63  ;;  %v4956_v52 = vmul.f32 0.7978846, %v4950_v11  ;;  %v4928_v9 = vmul.f32 0.5, %v4919_v63 }
0x1f97   : > { %v4943_v53 = vmul.f32 %v4937_v34, %v4899_v14  ;;  %v4940_v3 = vmul.f32 %v4934_v0, %v4919_v63  ;;  %7863 = vtanh.f32 %v4956_v52 }
0x1f98   : > { %v4900_v5 = vpop.f32.mrf.mxu3 }
0x1f99   : > { %v4949_v7 = vadd.f32 %v4943_v53, %v4899_v14  ;;  %v4946_v13 = vmul.f32 %v4940_v3, %v4919_v63  ;;  %v4901_v15 = vadd.f32 %v4900_v5, %v4805_v25 }
0x1f9a   : > { %v4921_v1 = vpop.f32.mrf.mxu1 }
0x1f9b   : > { %v4952_v17 = vadd.f32 %v4946_v13, %v4919_v63  ;;  %v4933_v54 = vmul.f32 0.044715, %v4901_v15  ;;  %v4922_v32 = vadd.f32 %v4921_v1, %v4806_v27  ;;  %v4955_v23 = vmul.f32 0.7978846, %v4949_v7 }
0x1f9c   : > { %v4927_v26 = vmul.f32 0.5, %v4901_v15  ;;  %v6946_v7 = vld [vmem:[%s10559_s10 + $0x1d] ss:$8 sm:$0x7] }
0x1f9d   : > { %v4958_v8 = vmul.f32 0.7978846, %v4952_v17  ;;  %v4939_v28 = vmul.f32 %v4933_v54, %v4901_v15  ;;  %v4936_v4 = vmul.f32 0.044715, %v4922_v32  ;;  %v7864_v33 = vpop.eup %7863  ;;  %v4930_v11 = vmul.f32 0.5, %v4922_v32 }
0x1f9e   : > { %v4968_v50 = vadd.f32 1.0, %v7864_v33  ;;  %v5119_v1 = vperm.slane %v6946_v7, 0  ;;  %v7457_v7 = vld [vmem:[%s10599_s6 + $0x88] sm:$0xf0] }
0x1f9f   : > { %7865 = vtanh.f32 %v4958_v8  ;;  %v4945_v56 = vmul.f32 %v4939_v28, %v4901_v15  ;;  %v4942_v29 = vmul.f32 %v4936_v4, %v4922_v32 }
0x1fa0   : > { %v4903_v49 = vpop.f32.mrf.mxu3  ;;  %7867 = vtanh.f32 %v4955_v23  ;;  %v4974_v45 = vmul.f32 %v4968_v50, %v4926_v44 }
0x1fa1   : > { %v4951_v39 = vadd.f32 %v4945_v56, %v4901_v15  ;;  %v4904_v18 = vadd.f32 %v4903_v49, %v4805_v25  ;;  %v4948_v30 = vmul.f32 %v4942_v29, %v4922_v32 }
0x1fa2   : > { %v4923_v37 = vpop.f32.mrf.mxu1 }
0x1fa3   : > { %v4957_v12 = vmul.f32 0.7978846, %v4951_v39  ;;  %v4935_v59 = vmul.f32 0.044715, %v4904_v18  ;;  %v4954_v6 = vadd.f32 %v4948_v30, %v4922_v32  ;;  %v4929_v52 = vmul.f32 0.5, %v4904_v18 }
0x1fa5   : > { %v7866_v24 = vpop.eup %7865  ;;  %7869 = vtanh.f32 %v4957_v12  ;;  %v4941_v40 = vmul.f32 %v4935_v59, %v4904_v18  ;;  %v4960_v35 = vmul.f32 0.7978846, %v4954_v6 }
0x1fa6   : > { %v4970_v57 = vadd.f32 1.0, %v7866_v24  ;;  %v7868_v2 = vpop.eup %7867 }
0x1fa7   : > { %v4947_v48 = vmul.f32 %v4941_v40, %v4904_v18  ;;  %7871 = vtanh.f32 %v4960_v35  ;;  %v4967_v27 = vadd.f32 1.0, %v7868_v2  ;;  %v7461_v35 = vld [vmem:[%s10599_s6 + $0xac] sm:$0xf]  ;;  %v7241_v2 = vld [vmem:[%s10599_s6 + $0xb4] sm:$0xf0] }
0x1fa8   : > { %v4905_v20 = vpop.f32.mrf.mxu3  ;;  %v4976_v41 = vmul.f32 %v4970_v57, %v4928_v9 }
0x1fa9   : > { %v4953_v19 = vadd.f32 %v4947_v48, %v4904_v18  ;;  %v4973_v21 = vmul.f32 %v4967_v27, %v4925_v38  ;;  %v7244_v48 = vor.u32 %v7461_v35, %v7241_v2  ;;  %v7458_v20 = vld [vmem:[%s10599_s6 + $0x94] sm:$0xf]  ;;  %v7233_v27 = vld [vmem:[%s10599_s6 + $0x84] sm:$0xf0] }
0x1faa   : > { %v4980_v36 = vpack.c.bf16 %v4976_v41, %v4974_v45  ;;  %v7237_v45 = vld [vmem:[%s10599_s6 + $0x9c] sm:$0xf0] }
0x1fab   : > { %v7870_v31 = vpop.eup %7869  ;;  %v4959_v51 = vmul.f32 0.7978846, %v4953_v19  ;;  %5236 = vmatpush.bf16.msra.mxu3 %v7244_v48  ;;  %v7240_v41 = vor.u32 %v7458_v20, %v7237_v45  ;;  %v7455_v19 = vld [vmem:[%s10599_s6 + $0x7c] sm:$0xf] }
0x1fac   : > { %v4969_v25 = vadd.f32 1.0, %v7870_v31  ;;  %5105 = vmatmul.bf16.vlgmr.msra.gmra.mxu0 %v4980_v36  ;;  %v7236_v36 = vor.u32 %v7455_v19, %v7233_v27  ;;  %v7452_v31 = vld [vmem:[%s10599_s6 + $0x64] sm:$0xf]  ;;  %v7675_v27 = vld [vmem:[%s10556_s7 + $0x3] ss:$0 sm:$0xff] }
0x1fad   : > { %v7872_v58 = vpop.eup %7871  ;;  %7873 = vtanh.f32 %v4959_v51  ;;  %v7229_v51 = vld [vmem:[%s10599_s6 + $0x6c] sm:$0xf0] }
0x1fae   : > { %v4975_v55 = vmul.f32 %v4969_v25, %v4927_v26  ;;  %v4972_v61 = vadd.f32 1.0, %v7872_v58  ;;  %v7232_v38 = vor.u32 %v7452_v31, %v7229_v51  ;;  %v7449_v26 = vld [vmem:[%s10599_s6 + $0x4c] sm:$0xf]  ;;  %v7225_v25 = vld [vmem:[%s10599_s6 + $0x54] sm:$0xf0] }
0x1faf   : > { %5237 = vmatpush.bf16.msra.mxu3 %v7240_v41  ;;  %v7463_v58 = vld [vmem:[%s10599_s6 + $0xb8] sm:$0xf0] }
0x1fb0   : > { %v4979_v60 = vpack.c.bf16 %v4975_v55, %v4973_v21  ;;  %v4978_v63 = vmul.f32 %v4972_v61, %v4930_v11  ;;  %v7228_v21 = vor.u32 %v7449_v26, %v7225_v25  ;;  %v7275_v55 = vld [vmem:[%s10599_s6 + $0xb0] sm:$0xf]  ;;  %v7446_v61 = vld [vmem:[%s10599_s6 + $0x34] sm:$0xf]  ;;  %v7221_v11 = vld [vmem:[%s10599_s6 + $0x3c] sm:$0xf0] }
0x1fb2   : > { %5087 = vmatmul.bf16.vlgmr.msra.gmra.mxu2 %v4979_v60  ;;  %v4982_v0 = vpack.c.bf16 %v4978_v63, %v4978_v63  ;;  %v7276_v60 = vor.u32 %v7463_v58, %v7275_v55  ;;  %v7271_v63 = vld [vmem:[%s10599_s6 + $0x98] sm:$0xf] }
0x1fb3   : > { %v7874_v62 = vpop.eup %7873  ;;  %5238 = vmatpush.bf16.msra.mxu3 %v7236_v36 }
0x1fb4   : > { %v4971_v34 = vadd.f32 1.0, %v7874_v62  ;;  %5298 = vmatpush.bf16.msrb.mxu1 %v7276_v60  ;;  %v7224_v62 = vor.u32 %v7446_v61, %v7221_v11 }
0x1fb6   : > { %v4977_v53 = vmul.f32 %v4971_v34, %v4929_v52  ;;  %v7460_v34 = vld [vmem:[%s10599_s6 + $0xa0] sm:$0xf0]  ;;  %v7443_v52 = vld [vmem:[%s10599_s6 + $0x1c] sm:$0xf] }
0x1fb7   : > { %5239 = vmatpush.bf16.msra.mxu3 %v7232_v38  ;;  %v7676_v38 = vld [vmem:[%s10556_s7 + $0x4] ss:$0 sm:$0xff] }
0x1fb8   : > { %v4981_v3 = vpack.c.bf16 %v4977_v53, %v4977_v53  ;;  %v7217_v53 = vld [vmem:[%s10599_s6 + $0x24] sm:$0xf0] }
0x1fbb   : > { %5240 = vmatpush.bf16.msra.mxu3 %v7228_v21 }
0x1fbc   : > { %5110 = vmatmul.bf16.gmra.mxu0 %v4982_v0  ;;  %v7272_v0 = vor.u32 %v7460_v34, %v7271_v63 }
0x1fbe   : > { %5299 = vmatpush.bf16.msrb.mxu1 %v7272_v0 }
0x1fbf   : > { %5241 = vmatpush.bf16.msra.mxu3 %v7224_v62 }
0x1fc2   : > { %5092 = vmatmul.bf16.gmra.mxu2 %v4981_v3  ;;  %v7220_v3 = vor.u32 %v7443_v52, %v7217_v53 }
0x1fc4   : > { %5242 = vmatpush.bf16.msra.mxu3 %v7220_v3 }
0x2029   : > { %v5106_v14 = vpop.f32.mrf.mxu0 }
0x2031   : > { %v5108_v5 = vpop.f32.mrf.mxu0 }
0x2035   : > { %v5088_v13 = vpop.f32.mrf.mxu2 }
0x2036   : > { %v5107_v15 = vadd.f32 %v5106_v14, %v5088_v13 }
0x2038   : > { %v5115_v17 = vadd.f32 %v5107_v15, %v10054_v22 }
0x2039   : > { %v5111_v54 = vpop.f32.mrf.mxu0 }
0x203a   : > { %v5121_v32 = vadd.f32 %v5119_v1, %v5115_v17  ;;  %v7213_v17 = vld [vmem:[%s10599_s6 + $0xc] sm:$0xf0] }
0x203c   : > { %5126 = vadd.xlane.f32.xlu0 %v5121_v32 }
0x203d   : > { %v5090_v23 = vpop.f32.mrf.mxu2 }
0x203e   : > { %v5109_v8 = vadd.f32 %v5108_v5, %v5090_v23  ;;  %v7267_v5 = vld [vmem:[%s10599_s6 + $0x80] sm:$0xf]  ;;  %v7263_v23 = vld [vmem:[%s10599_s6 + $0x68] sm:$0xf] }
0x203f   : > { %v7268_v15 = vor.u32 %v7457_v7, %v7267_v5 }
0x2040   : > { %v5116_v28 = vadd.f32 %v5109_v8, %v10058_v42  ;;  %v7454_v8 = vld [vmem:[%s10599_s6 + $0x70] sm:$0xf0] }
0x2041   : > { %v5113_v4 = vpop.f32.mrf.mxu0  ;;  %5300 = vmatpush.bf16.msrb.mxu1 %v7268_v15 }
0x2042   : > { %v5122_v56 = vadd.f32 %v5119_v1, %v5116_v28  ;;  %v7264_v28 = vor.u32 %v7454_v8, %v7263_v23 }
0x2044   : > { %5128 = vadd.xlane.f32.xlu2 %v5122_v56 }
0x2045   : > { %v5093_v29 = vpop.f32.mrf.mxu2  ;;  %5301 = vmatpush.bf16.msrb.mxu1 %v7264_v28  ;;  %v2833_v28 = vadd.f32 %v9296_v16, %v9189_v46 }
0x2046   : > { %v5112_v49 = vadd.f32 %v5111_v54, %v5093_v29  ;;  %v7451_v29 = vld [vmem:[%s10599_s6 + $0x58] sm:$0xf0] }
0x2048   : > { %v5117_v33 = vadd.f32 %v5112_v49, %v10062_v47 }
0x204a   : > { %v5123_v39 = vadd.f32 %v5119_v1, %v5117_v33  ;;  %v7440_v1 = vld [vmem:[%s10599_s6 + $0x4] sm:$0xf] }
0x204c   : > { %v5130_v18 = vsel %vm3122_vm13, %v5123_v39, 0.0 }
0x204d   : > { %5131 = vadd.xlane.f32.xlu0 %v5130_v18  ;;  %v5095_v37 = vpop.f32.mrf.mxu2 }
0x20af   : > { %v5127_v22 = vpop.xlane.xlu0 %5126 }
0x20b0   : > { %v5133_v30 = vmul.f32 %v5127_v22, %v8237_v43  ;;  %v7255_v22 = vld [vmem:[%s10599_s6 + $0x38] sm:$0xf] }
0x20b2   : > { %v10252_v12 = vsub.f32 %v5121_v32, %v5133_v30  ;;  %v7216_v32 = vor.u32 %v7440_v1, %v7213_v17  ;;  %v7448_v30 = vld [vmem:[%s10599_s6 + $0x40] sm:$0xf0] }
0x20b4   : > { %v5139_v42 = vmul.f32 %v10252_v12, %v10252_v12  ;;  %5243 = vmatpush.bf16.msra.mxu3 %v7216_v32 }
0x20b6   : > { %5142 = vadd.xlane.f32.xlu2 %v5139_v42  ;;  %v7256_v42 = vor.u32 %v7448_v30, %v7255_v22 }
0x20b7   : > { %v5129_v59 = vpop.xlane.xlu2 %5128 }
0x20b8   : > { %v5134_v50 = vmul.f32 %v5129_v59, %v8237_v43 }
0x20ba   : > { %v10257_v6 = vsub.f32 %v5122_v56, %v5134_v50  ;;  %v7259_v56 = vld [vmem:[%s10599_s6 + $0x50] sm:$0xf]  ;;  %v7251_v50 = vld [vmem:[%s10599_s6 + $0x20] sm:$0xf] }
0x20bb   : > { %v7260_v33 = vor.u32 %v7451_v29, %v7259_v56  ;;  %v2839_v56 = vadd.f32 %v9198_v10, %v2833_v28 }
0x20bc   : > { %v5140_v47 = vmul.f32 %v10257_v6, %v10257_v6 }
0x20bd   : > { %5302 = vmatpush.bf16.msrb.mxu1 %v7260_v33 }
0x20be   : > { %5144 = vadd.xlane.f32.xlu0 %v5140_v47  ;;  %v7445_v47 = vld [vmem:[%s10599_s6 + $0x28] sm:$0xf0] }
0x20c0   : > { %v5132_v24 = vpop.xlane.xlu0 %5131 }
0x20c1   : > { %v5135_v40 = vmul.f32 %v5132_v24, %v8237_v43  ;;  %5303 = vmatpush.bf16.msrb.mxu1 %v7256_v42 }
0x20c3   : > { %v10262_v44 = vsub.f32 %v5123_v39, %v5135_v40  ;;  %v7252_v40 = vor.u32 %v7445_v47, %v7251_v50 }
0x20c5   : > { %v5141_v9 = vmul.f32 %v10262_v44, %v10262_v44  ;;  %5304 = vmatpush.bf16.msrb.mxu1 %v7252_v40 }
0x20c7   : > { %v5146_v57 = vsel %vm3122_vm13, %v5141_v9, 0.0  ;;  %v7247_v9 = vld [vmem:[%s10599_s6 + $0x8] sm:$0xf] }
0x20c8   : > { %5147 = vadd.xlane.f32.xlu2 %v5146_v57  ;;  %v7442_v57 = vld [vmem:[%s10599_s6 + $0x10] sm:$0xf0] }
0x20c9   : > { %v7248_v45 = vor.u32 %v7442_v57, %v7247_v9 }
0x20cb   : > { %5305 = vmatpush.bf16.msrb.mxu1 %v7248_v45 }
0x2129   : > { %v5143_v14 = vpop.xlane.xlu2 %5142 }
0x212a   : > { %v5149_v13 = vmul.f32 %v5143_v14, %v8237_v43 }
0x212c   : > { %v5152_v54 = vadd.f32 1e-05, %v5149_v13 }
0x212e   : > { %7875 = vrsqrt.f32 %v5152_v54  ;;  %vm5161_vm8 = vweird.f32 %v5152_v54 }
0x2131   : > { %v5145_v4 = vpop.xlane.xlu0 %5144 }
0x2132   : > { %v5150_v49 = vmul.f32 %v5145_v4, %v8237_v43 }
0x2134   : > { %v7876_v39 = vpop.eup %7875  ;;  %v5153_v18 = vadd.f32 1e-05, %v5150_v49  ;;  %v2847_v49 = vsel %vm829_vm0, %v2839_v56, 0.0 }
0x2135   : > { %v5156_v37 = vmul.f32 %v7876_v39, %v5152_v54  ;;  %vm5162_vm7 = vweird.f32 %v7876_v39 }
0x2136   : > { %7877 = vrsqrt.f32 %v5153_v18  ;;  %vm5163_vm9 = vmor %vm5161_vm8, %vm5162_vm7  ;;  %vm5171_vm14 = vweird.f32 %v5153_v18 }
0x2137   : > { %v5157_v59 = vmul.f32 %v7876_v39, %v5156_v37  ;;  %v8023_v37 = vmov 1  }
0x2138   : > { %7671 = vset.pattern.permute.xlu0 %v8023_v37 }
0x2139   : > { %v5158_v24 = vmul.f32 0.5, %v5157_v59 }
0x213b   : > { %v5159_v35 = vsub.f32 1.5, %v5158_v24  ;;  %v5148_v2 = vpop.xlane.xlu2 %5147 }
0x213c   : > { %v7878_v48 = vpop.eup %7877  ;;  %v5151_v20 = vmul.f32 %v5148_v2, %v8237_v43 }
0x213d   : > { %v5160_v41 = vmul.f32 %v7876_v39, %v5159_v35  ;;  %v5166_v19 = vmul.f32 %v7878_v48, %v5153_v18  ;;  %vm5172_vm10 = vweird.f32 %v7878_v48  ;;  %v5406_v18 = vld [vmem:[%s10560_s11] sm:$0xf] }
0x213e   : > { %v5154_v36 = vadd.f32 1e-05, %v5151_v20  ;;  %vm5173_vm11 = vmor %vm5171_vm14, %vm5172_vm10 }
0x213f   : > { %v5164_v31 = vsel %vm5163_vm9, %v7876_v39, %v5160_v41  ;;  %v5167_v51 = vmul.f32 %v7878_v48, %v5166_v19 }
0x2140   : > { %v5185_v26 = vmul.f32 %v5164_v31, %v10252_v12  ;;  %7879 = vrsqrt.f32 %v5154_v36  ;;  %vm5181_vm3 = vweird.f32 %v5154_v36 }
0x2141   : > { %v5168_v25 = vmul.f32 0.5, %v5167_v51 }
0x2142   : > { %v5189_v21 = vmul.f32 %v7675_v27, %v5185_v26 }
0x2143   : > { %v5169_v55 = vsub.f32 1.5, %v5168_v25 }
0x2144   : > { %v5193_v58 = vadd.f32 %v7676_v38, %v5189_v21 }
0x2145   : > { %v5170_v60 = vmul.f32 %v7878_v48, %v5169_v55 }
0x2146   : > { %v7880_v61 = vpop.eup %7879 }
0x2147   : > { %v5174_v11 = vsel %vm5173_vm11, %v7878_v48, %v5170_v60  ;;  %v5176_v62 = vmul.f32 %v7880_v61, %v5154_v36  ;;  %vm5182_vm2 = vweird.f32 %v7880_v61 }
0x2148   : > { %v5186_v63 = vmul.f32 %v5174_v11, %v10257_v6  ;;  %vm5183_vm4 = vmor %vm5181_vm3, %vm5182_vm2  ;;  %vm5380_vm2 = vcmask 125952  }
0x2149   : > { %v5177_v34 = vmul.f32 %v7880_v61, %v5176_v62 }
0x214a   : > { %v5190_v0 = vmul.f32 %v7675_v27, %v5186_v63 }
0x214b   : > { %v5178_v52 = vmul.f32 0.5, %v5177_v34 }
0x214c   : > { %v5194_v53 = vadd.f32 %v7676_v38, %v5190_v0 }
0x214d   : > { %v5179_v12 = vsub.f32 1.5, %v5178_v52  ;;  %v8024_v52 = vmov 4.0  }
0x214e   : > { %v5201_v3 = vpack.c.bf16 %v5194_v53, %v5193_v58 }
0x214f   : > { %v5180_v14 = vmul.f32 %v7880_v61, %v5179_v12 }
0x2150   : > { %5244 = vmatmul.bf16.vlgmr.msra.gmra.mxu3 %v5201_v3 }
0x2151   : > { %v5184_v5 = vsel %vm5183_vm4, %v7880_v61, %v5180_v14 }
0x2152   : > { %v5187_v7 = vmul.f32 %v5184_v5, %v10262_v44 }
0x2154   : > { %v5191_v13 = vmul.f32 %v7675_v27, %v5187_v7 }
0x2156   : > { %v5195_v15 = vadd.f32 %v7676_v38, %v5191_v13 }
0x2158   : > { %5198 = vst [vmem:[#allocation3 + $0x10] sm:$0xf] %v5195_v15 }
0x215f   : > { %v5202_v1 = vld [vmem:[#allocation3 + $0x10] sm:$0xf] }
0x2160   : > { %v5203_v17 = vpack.c.bf16 %v5202_v1, %v5202_v1 }
0x2162   : > { %5306 = vmatmul.bf16.vlgmr.msrb.gmra.mxu1 %v5203_v17 }
0x21d3   : > { %v5245_v6 = vpop.f32.mrf.mxu3 }
0x21d4   : > { %v5311_v54 = vmul.f32 %v5245_v6, %v5245_v6 }
0x21d6   : > { %5313 = vadd.xlane.f32.xlu0 %v5311_v54 }
0x21db   : > { %v10375_v32 = vpop.f32.mrf.mxu3 }
0x21dc   : > { %v5312_v23 = vmul.f32 %v10375_v32, %v10375_v32 }
0x21de   : > { %5315 = vadd.xlane.f32.xlu1 %v5312_v23  ;;  %v7894_v23 = vld [vmem:[%s10556_s7 + $0x1] ss:$0 sm:$0xff] }
0x21df   : > { %v10379_v8 = vpop.f32.mrf.mxu1 }
0x21e0   : > { %v5341_v44 = vmul.f32 %v10379_v8, %v10379_v8 }
0x21e2   : > { %v5342_v4 = vsel %vm3122_vm13, %v5341_v44, 0.0 }
0x21e3   : > { %5343 = vadd.xlane.f32.xlu2 %v5342_v4 }
0x21e7   : > { %v5309_v29 = vpop.f32.mrf.mxu1 }
0x21ea   : > { %5426 = vperm.xlu0 %7671, %v5406_v18  }
0x21eb   : > { %2848 = vadd.xlane.f32.xlu2 %v2847_v49 }
0x21f7   : > { %5421 = vperm.xlu1 %7670, %v5406_v18  }
0x2249   : > { %v5314_v33 = vpop.xlane.xlu0 %5313 }
0x224a   : > { %v5317_v39 = vadd.f32 1e-12, %v5314_v33 }
0x224c   : > { %7881 = vrsqrt.f32 %v5317_v39  ;;  %vm5325_vm1 = vweird.f32 %v5317_v39 }
0x2251   : > { %v5316_v46 = vpop.xlane.xlu1 %5315 }
0x2252   : > { %v7882_v16 = vpop.eup %7881  ;;  %v5318_v22 = vadd.f32 1e-12, %v5316_v46 }
0x2253   : > { %v5320_v10 = vmul.f32 %v7882_v16, %v5317_v39  ;;  %vm5326_vm15 = vweird.f32 %v7882_v16 }
0x2254   : > { %7883 = vrsqrt.f32 %v5318_v22  ;;  %vm5327_vm12 = vmor %vm5325_vm1, %vm5326_vm15  ;;  %vm5335_vm6 = vweird.f32 %v5318_v22 }
0x2255   : > { %v5321_v30 = vmul.f32 %v7882_v16, %v5320_v10 }
0x2256   : > { %v5344_v42 = vpop.xlane.xlu2 %5343 }
0x2257   : > { %v5322_v59 = vmul.f32 0.5, %v5321_v30  ;;  %v5345_v50 = vadd.f32 1e-12, %v5344_v42 }
0x2259   : > { %v5323_v47 = vsub.f32 1.5, %v5322_v59  ;;  %7885 = vrsqrt.f32 %v5345_v50  ;;  %vm5352_vm9 = vweird.f32 %v5345_v50 }
0x225a   : > { %v7884_v24 = vpop.eup %7883 }
0x225b   : > { %v5330_v40 = vmul.f32 %v7884_v24, %v5318_v22  ;;  %v5324_v9 = vmul.f32 %v7882_v16, %v5323_v47  ;;  %vm5336_vm5 = vweird.f32 %v7884_v24  ;;  %v5441_v47 = vld [vmem:[%s10561_s12 + $0x58] sm:$0xff] }
0x225c   : > { %vm5337_vm7 = vmor %vm5335_vm6, %vm5336_vm5  ;;  %5524 = vmatpush.msrb.mxu0 %v5441_v47 }
0x225d   : > { %v5331_v57 = vmul.f32 %v7884_v24, %v5330_v40  ;;  %v5328_v35 = vsel %vm5327_vm12, %v7882_v16, %v5324_v9  ;;  %v5439_v40 = vld [vmem:[%s10561_s12 + $0x48] sm:$0xff]  ;;  %vm5446_vm12 = vcmask 130048  }
0x225e   : > { %v2849_v2 = vpop.xlane.xlu2 %2848  ;;  %v5339_v48 = vmul.f32 %v5328_v35, %v5245_v6  ;;  %v5431_v35 = vld [vmem:[%s10561_s12 + $0x8] sm:$0xff] }
0x225f   : > { %v7886_v20 = vpop.eup %7885  ;;  %v5332_v45 = vmul.f32 0.5, %v5331_v57  ;;  %v2852_v41 = vmul.f32 %v2849_v2, %v8237_v43  ;;  %v5430_v57 = vld [vmem:[%s10561_s12] sm:$0xff]  ;;  %v5433_v2 = vld [vmem:[%s10561_s12 + $0x18] sm:$0xff] }
0x2260   : > { %v5347_v19 = vmul.f32 %v7886_v20, %v5345_v50  ;;  %5357 = vst [vmem:[%s10396_s13] sm:$0xff] %v5339_v48  ;;  %vm5353_vm8 = vweird.f32 %v7886_v20  ;;  %v5438_v50 = vld [vmem:[%s10561_s12 + $0x40] sm:$0xff]  ;;  %5525 = vmatpush.msrb.mxu0 %v5433_v2 }
0x2261   : > { %v5333_v27 = vsub.f32 1.5, %v5332_v45  ;;  %v2855_v36 = vsub.f32 %v2839_v56, %v2852_v41  ;;  %vm5354_vm10 = vmor %vm5352_vm9, %vm5353_vm8  ;;  %5464 = vmatpush.msrb.mxu3 %v5438_v50  ;;  %v5440_v45 = vld [vmem:[%s10561_s12 + $0x50] sm:$0xff]  ;;  %v5443_v41 = vld [vmem:[%s10561_s12 + $0x68] sm:$0xff] }
0x2262   : > { %v5348_v31 = vmul.f32 %v7886_v20, %v5347_v19  ;;  %v5445_v19 = vld [vmem:[%s10561_s12 + $0x78] sm:$0xff] }
0x2263   : > { %v5334_v51 = vmul.f32 %v7884_v24, %v5333_v27  ;;  %v2858_v38 = vmul.f32 %v2855_v36, %v2855_v36  ;;  %5465 = vmatpush.msrb.mxu3 %v5430_v57  ;;  %5604 = vmatpush.msra.mxu0 %v5445_v19 }
0x2264   : > { %v5349_v26 = vmul.f32 0.5, %v5348_v31  ;;  %v5435_v31 = vld [vmem:[%s10561_s12 + $0x28] sm:$0xff] }
0x2265   : > { %v5338_v25 = vsel %vm5337_vm7, %v7884_v24, %v5334_v51  ;;  %v2863_v21 = vsel %vm829_vm0, %v2858_v38, 0.0  ;;  %v5442_v24 = vld [vmem:[%s10561_s12 + $0x60] sm:$0xff]  ;;  %5504 = vmatpush.msra.mxu3 %v5440_v45  ;;  %v5437_v51 = vld [vmem:[%s10561_s12 + $0x38] sm:$0xff] }
0x2266   : > { %v5350_v55 = vsub.f32 1.5, %v5349_v26  ;;  %2864 = vadd.xlane.f32.xlu2 %v2863_v21  ;;  %v5340_v58 = vmul.f32 %v5338_v25, %v10375_v32  ;;  %5544 = vmatpush.msra.mxu1 %v5442_v24 }
0x2267   : > { %5605 = vmatpush.msra.mxu0 %v5437_v51 }
0x2268   : > { %v5351_v60 = vmul.f32 %v7886_v20, %v5350_v55  ;;  %5374 = vmatpush.xpose.msrb.mxu2 %v5340_v58  ;;  %5358 = vst [vmem:[%s10396_s13 + $0x8] sm:$0xff] %v5340_v58 }
0x226a   : > { %v5355_v61 = vsel %vm5354_vm10, %v7886_v20, %v5351_v60 }
0x226b   : > { %v5356_v11 = vmul.f32 %v5355_v61, %v10379_v8 }
0x226c   : > { %5375 = vmatpush.xpose.msrb.mxu2 %v5339_v48  ;;  %v5434_v48 = vld [vmem:[%s10561_s12 + $0x20] sm:$0xff] }
0x226d   : > { %5359 = vst [vmem:[%s10404_s21] sm:$0xf] %v5356_v11  ;;  %5545 = vmatpush.msra.mxu1 %v5434_v48  ;;  %s7915_s21 = scalar_lea.hbm %s10564_s15, 8 }
0x226e   : > { %p7917_p1 = scmp.lt.s32.totalorder %s7915_s21, %s7911_s4 }
0x226f   : > { %5376 = vmatmul.f32.vlgmr.msrb.gmra.mxu2 %v5356_v11  ;;  %v5422_v11 = vpop.permute.xlu1 %5421 }
0x2270   : > { %5484 = vmatpush.msra.mxu2 %v5439_v40  ;;  %p7918_p2 = por %p7917_p1, %p7916_p0 }
0x2272   : > { %5485 = vmatpush.msra.mxu2 %v5431_v35  ;;  %p7919_p3 = pnand %p7918_p2, %p7914_p13 }
0x2274   : > { %5564 = vmatpush.msrb.mxu2 %v5443_v41 }
0x2276   : > { %5565 = vmatpush.msrb.mxu2 %v5435_v31 }
0x22d9   : > { %v2865_v62 = vpop.xlane.xlu2 %2864 }
0x22da   : > { %v2868_v63 = vmul.f32 %v2865_v62, %v8237_v43  ;;  %v7893_v43 = vld [vmem:[%s10556_s7] ss:$0 sm:$0xff] }
0x22dc   : > { %v2871_v34 = vadd.f32 1e-05, %v2868_v63 }
0x22de   : > { %7887 = vrsqrt.f32 %v2871_v34  ;;  %vm2898_vm14 = vweird.f32 %v2871_v34 }
0x22df   : > { %7889 = vrcp.f32 %v8024_v52 }
0x22e4   : > { %v7888_v0 = vpop.eup %7887 }
0x22e5   : > { %v2893_v53 = vmul.f32 %v7888_v0, %v2871_v34  ;;  %v7890_v14 = vpop.eup %7889  ;;  %vm2899_vm0 = vweird.f32 %v7888_v0  ;;  %v5427_v34 = vpop.permute.xlu0 %5426 }
0x22e6   : > { %v5389_v13 = vmul.f32 4.0, %v7890_v14  ;;  %vm2900_vm11 = vmor %vm2898_vm14, %vm2899_vm0  ;;  %vm5393_vm3 = vweird.f32 %v7890_v14 }
0x22e7   : > { %v2894_v12 = vmul.f32 %v7888_v0, %v2893_v53  ;;  %v5444_v53 = vld [vmem:[%s10561_s12 + $0x70] sm:$0xff] }
0x22e8   : > { %v5390_v17 = vsub.f32 1.0, %v5389_v13 }
0x22e9   : > { %v2895_v3 = vmul.f32 0.5, %v2894_v12  ;;  %v5436_v12 = vld [vmem:[%s10561_s12 + $0x30] sm:$0xff] }
0x22ea   : > { %v5391_v28 = vmul.f32 %v7890_v14, %v5390_v17 }
0x22eb   : > { %v2896_v5 = vsub.f32 1.5, %v2895_v3 }
0x22ec   : > { %v5392_v29 = vadd.f32 %v7890_v14, %v5391_v28 }
0x22ed   : > { %v2897_v7 = vmul.f32 %v7888_v0, %v2896_v5 }
0x22ee   : > { %v5394_v39 = vsel %vm5393_vm3, %v7890_v14, %v5392_v29 }
0x22ef   : > { %v2901_v15 = vsel %vm2900_vm11, %v7888_v0, %v2897_v7 }
0x22f0   : > { %v2904_v1 = vmul.f32 %v2901_v15, %v2855_v36  ;;  %v5432_v36 = vld [vmem:[%s10561_s12 + $0x10] sm:$0xff] }
0x22f1   : > { %5505 = vmatpush.msra.mxu3 %v5432_v36 }
0x22f2   : > { %v2908_v6 = vmul.f32 %v7893_v43, %v2904_v1  ;;  %v5377_v54 = vpop.f32.mrf.mxu2 }
0x22f3   : > { %v5381_v32 = vsel %vm5380_vm2, %v5377_v54, 0.0 }
0x22f4   : > { %v2912_v8 = vadd.f32 %v7894_v23, %v2908_v6  ;;  %v5382_v44 = vrot.slane %v5381_v32, 4 }
0x22f6   : > { %2915 = vst [vmem:[#allocation2 + $0x8] sm:$0x1] %v2912_v8  ;;  %v5383_v4 = vadd.f32 %v5382_v44, %v5381_v32 }
0x22f8   : > { %v5384_v56 = vrot.slane %v5383_v4, 2 }
0x22fa   : > { %v5385_v49 = vadd.f32 %v5384_v56, %v5383_v4 }
0x22fc   : > { %v5386_v33 = vrot.slane %v5385_v49, 1 }
0x22fd   : > { %v2916_v18 = vld [vmem:[#allocation2 + $0x8] sm:$0x1] }
0x22fe   : > { %v5387_v37 = vadd.f32 %v5386_v33, %v5385_v49  ;;  %2917 = vst [vmem:[%s10575_s18] sm:$0x1] %v2916_v18  ;;  %s5644_s18 = sand.u32 1, %s8133_s25  }
0x22ff   : > { %s10480_s13 = scalar_lea.sflag [#allocation7], %s5644_s18 }
0x2300   : > { %v5395_v46 = vmul.f32 %v5394_v39, %v5387_v37 }
0x2302   : > { %v5396_v16 = vsub.f32 %v5377_v54, %v5395_v46 }
0x2304   : > { %v5397_v22 = vmul.f32 %v5396_v16, %v5396_v16 }
0x2306   : > { %v5398_v10 = vsel %vm5380_vm2, %v5397_v22, 0.0 }
0x2307   : > { %v5399_v30 = vrot.slane %v5398_v10, 4 }
0x2309   : > { %v5400_v42 = vadd.f32 %v5399_v30, %v5398_v10 }
0x230b   : > { %v5401_v59 = vrot.slane %v5400_v42, 2 }
0x230d   : > { %v5402_v9 = vadd.f32 %v5401_v59, %v5400_v42 }
0x230f   : > { %v5403_v20 = vrot.slane %v5402_v9, 1 }
0x2311   : > { %v5404_v27 = vadd.f32 %v5403_v20, %v5402_v9 }
0x2313   : > { %v5405_v38 = vmul.f32 %v5404_v27, %v5394_v39 }
0x2315   : > { %v5407_v26 = vadd.f32 1e-05, %v5405_v38 }
0x2317   : > { %7891 = vrsqrt.f32 %v5407_v26  ;;  %vm5414_vm15 = vweird.f32 %v5407_v26 }
0x231d   : > { %v7892_v25 = vpop.eup %7891 }
0x231e   : > { %v5409_v21 = vmul.f32 %v7892_v25, %v5407_v26  ;;  %vm5415_vm4 = vweird.f32 %v7892_v25 }
0x231f   : > { %vm5416_vm1 = vmor %vm5414_vm15, %vm5415_vm4 }
0x2320   : > { %v5410_v55 = vmul.f32 %v7892_v25, %v5409_v21 }
0x2322   : > { %v5411_v58 = vmul.f32 0.5, %v5410_v55 }
0x2324   : > { %v5412_v60 = vsub.f32 1.5, %v5411_v58 }
0x2326   : > { %v5413_v61 = vmul.f32 %v7892_v25, %v5412_v60 }
0x2328   : > { %v5417_v62 = vsel %vm5416_vm1, %v7892_v25, %v5413_v61 }
0x2329   : > { %v5418_v63 = vmul.f32 %v5417_v62, %v5396_v16 }
0x232b   : > { %v5424_v0 = vmul.f32 %v5422_v11, %v5418_v63 }
0x232d   : > { %v5429_v52 = vadd.f32 %v5427_v34, %v5424_v0 }
0x232f   : > { %7277 = vmatmul.msk.f32.vlgmr.msrb.gmra.mxu3 %vm5446_vm12, %v5429_v52  ;;  %7278 = vmatmul.msk.f32.vlgmr.msra.gmra.mxu2 %vm5446_vm12, %v5429_v52 }
0x2330   : > { %7280 = vmatmul.msk.f32.vlgmr.msrb.gmra.mxu0 %vm5446_vm12, %v5429_v52  ;;  %7281 = vmatmul.msk.f32.vlgmr.msra.gmra.mxu1 %vm5446_vm12, %v5429_v52 }
0x2331   : > { %5584 = vmatpush.msrb.mxu3 %v5444_v53 }
0x2333   : > { %5585 = vmatpush.msrb.mxu3 %v5436_v12 }
0x2337   : > { %7279 = vmatmul.msk.f32.vlgmr.msra.gmra.mxu3 %vm5446_vm12, %v5429_v52  ;;  %7282 = vmatmul.msk.f32.vlgmr.msrb.gmra.mxu2 %vm5446_vm12, %v5429_v52 }
0x2338   : > { %7284 = vmatmul.msk.f32.vlgmr.msra.gmra.mxu0 %vm5446_vm12, %v5429_v52 }
0x233f   : > { %7283 = vmatmul.msk.f32.vlgmr.msrb.gmra.mxu3 %vm5446_vm12, %v5429_v52 }
0x2340   : > { %7922 = shalt.err (!%p7919_p3)
}
0x2341   : > { %7594 = dma.vmem_to_hbm [thread:$0]  (%p8152_p5), %s5682_s27, 64, %s5684_s20, %s10480_s13  }
0x2342   : > { %s5666_s1 = sshll.u32 %s5663_s2, 4  ;;  %s5640_s30 = scalar_lea.sflag [#allocation5], %s10392_s17  ;;  %s5667_s1 = int_to_ptr.hbm [resolvable:$true] %s5666_s1 }
0x2343   : > { %s7937_s18 = sshra.s32 %s5667_s1, 4  ;;  %s7943_s16 = scalar_lea.hbm %s10563_s14, 32  ;;  %s7938_s18 = int_to_ptr.hbm [resolvable:$true] %s7937_s18 }
0x2344   : > { %s7939_s28 = scalar_lea.hbm %s7938_s18, 16  ;;  %p7944_p9 = scmp.lt.s32.totalorder %s7938_s18, %s10563_s14 }
0x2345   : > { %p7940_p4 = scmp.ne.s32.totalorder %s7938_s18, %s7939_s28  ;;  %p7945_p10 = scmp.lt.s32.totalorder %s7943_s16, %s7939_s28 }
0x2347   : > { %p7941_p7 = pnand %p7940_p4, %p8152_p5  ;;  %p7946_p11 = por %p7945_p10, %p7944_p9 }
0x2349   : > { %p7942_p8 = pneg %p7941_p7 }
0x234b   : > { %p7947_p12 = pnand %p7946_p11, %p7942_p8 }
0x234d   : > { %7950 = shalt.err (!%p7947_p12)
}
0x234e   : > { %s8025_s2 = smov 128   ;;  %s8026_s27 = smov 8  }
0x234f   : > { %7593 = dma.vmem_to_hbm [thread:$0]  (%p8152_p5), %s10468_s26, 256, %s5667_s1, %s5640_s30, %s8025_s2, %s8025_s2, %s8026_s27  }
0x2350   : > { %s10600_s23 = sld [smem:[#allocation25_spill]]  ;;  %s10602_s5 = scalar_lea.vmem [#allocation8], %s10392_s17 }
0x2351   : > { %s5694_s24 = sshll.u32 %s10602_s5, 4  ;;  %s5695_s24 = int_to_ptr.vmem [resolvable:$true] %s5694_s24 }
0x2356   : > { %s10601_s3 = smov %s10600_s23  ;;  %s5692_s4 = scalar_lea.hbm %s10600_s23, %s8133_s25 }
0x2357   : > { %s5696_s18 = sshll.u32 %s5692_s4, 4  ;;  %s7971_s26 = scalar_lea.hbm %s10601_s3, 2  ;;  %s5697_s18 = int_to_ptr.hbm [resolvable:$true] %s5696_s18 }
0x2358   : > { %s7965_s28 = sshra.s32 %s5697_s18, 4  ;;  %s7966_s28 = int_to_ptr.hbm [resolvable:$true] %s7965_s28 }
0x2359   : > { %s7967_s16 = scalar_lea.hbm %s7966_s28, 1  ;;  %p7972_p2 = scmp.lt.s32.totalorder %s7966_s28, %s10601_s3 }
0x235a   : > { %p7968_p13 = scmp.ne.s32.totalorder %s7966_s28, %s7967_s16  ;;  %p7973_p3 = scmp.lt.s32.totalorder %s7971_s26, %s7967_s16 }
0x235c   : > { %p7969_p0 = pnand %p7968_p13, %p8152_p5  ;;  %p7974_p4 = por %p7973_p3, %p7972_p2 }
0x235e   : > { %p7970_p1 = pneg %p7969_p0 }
0x2360   : > { %p7975_p7 = pnand %p7974_p4, %p7970_p1 }
0x2362   : > { %7978 = shalt.err (!%p7975_p7)
}
0x2363   : > { %7595 = dma.vmem_to_hbm [thread:$0]  (%p8152_p5), %s5695_s24, 16, %s5697_s18, %s10480_s13  }
0x2364   : > { %s7293_s5 = sshll.u32 %s8194_s19, 5  ;;  %s10603_s6 = sld [smem:[#allocation24_spill]] }
0x236a   : > { %s548_s2 = scalar_lea.vmem %s10603_s6, %s7293_s5 }
0x23ad   : > { %v5527_v7 = vpop.f32.mrf.mxu0  ;;  %v5547_v54 = vpop.f32.mrf.mxu1 }
0x23ae   : > { %v5619_v15 = vrot.slane %v5527_v7, 4 }
0x23b2   : > { %v5467_v3 = vpop.f32.mrf.mxu3  ;;  %v5487_v14 = vpop.f32.mrf.mxu2 }
0x23b3   : > { %v5618_v5 = vrot.slane %v5487_v14, 4 }
0x23b5   : > { %v5622_v13 = vsel %vm3122_vm13, %v5467_v3, %v5618_v5  ;;  %v5607_v23 = vpop.f32.mrf.mxu0 }
0x23b6   : > { %5630 = vst [vmem:[%s548_s2] sm:$0xff] %v5622_v13  ;;  %v5621_v8 = vrot.slane %v5607_v23, 4 }
0x23ba   : > { %v5507_v1 = vpop.f32.mrf.mxu3  ;;  %v5567_v17 = vpop.f32.mrf.mxu2 }
0x23bb   : > { %v5623_v43 = vsel %vm3122_vm13, %v5507_v1, %v5619_v15  ;;  %v5620_v6 = vrot.slane %v5567_v17, 4 }
0x23bc   : > { %5631 = vst [vmem:[%s548_s2 + $0x8] sm:$0xff] %v5623_v43 }
0x23bd   : > { %v5624_v32 = vsel %vm3122_vm13, %v5547_v54, %v5620_v6 }
0x23be   : > { %5632 = vst [vmem:[%s548_s2 + $0x10] sm:$0xff] %v5624_v32 }
0x23c2   : > { %v5587_v44 = vpop.f32.mrf.mxu3 }
0x23c3   : > { %v5625_v28 = vsel %vm3122_vm13, %v5587_v44, %v5621_v8 }
0x23c4   : > { %5633 = vst [vmem:[%s548_s2 + $0x18] sm:$0xff] %v5625_v28 }
0x23c5 PF: > { %s10604_s0 = sld [smem:[#allocation13_spill]] }
0x23c6   : > { %s10605_s19 = sld [smem:[#allocation11_spill]] }
0x23cb   : > { %p7609_p5 = scmp.ge.s32.totalorder %s10604_s0, 2 }
0x23cc   : > { %s5716_s27 = sand.u32 1, %s10605_s19  }
0x23cd   : > { %p7600_p8 = pnand %p7609_p5, %p8156_p6  ;;  %s5717_s20 = scalar_lea.sflag [#allocation5], %s5716_s27 }
0x23cf   : > { %p7601_p9 = pneg %p7600_p8 }
0x23d1   : > { %7996 = dma.done.wait (%p7601_p9), %s5717_s20, 256  }
0x23d2   : > { %7998 = vsyncadd (%p7601_p9), %s5717_s20, 4294967040  ;;  %s10607_s29 = sadd.s32 4294967294, %s10604_s0  }
0x23d3   : > { %s5726_s23 = sand.u32 1, %s10607_s29  }
0x23d4   : > { %s5727_s4 = scalar_lea.sflag [#allocation7], %s5726_s23 }
0x23d5   : > { %8000 = dma.done.wait (%p7601_p9), %s5727_s4, 80  }
0x23d6   : > { %8002 = vsyncadd (%p7601_p9), %s5727_s4, 4294967216  ;;  %s10608_s24 = sld [smem:[#allocation14_spill]]  ;;  %s10611_s21 = smov %s8009_s22 }
0x23d7   : > { %s10609_s18 = sld [smem:[#allocation12_spill]] }
0x23d8   : > { %s10610_s23 = sld [smem:[#allocation15_spill]] }
0x23dc   : > { %p30_p10 = scmp.ge.s32.totalorder %s10608_s24, 4  }
0x23dd   : > { %s10612_s22 = smov %s10609_s18 }
0x23de   :  { %32 = sbr.rel (!%p30_p10) target bundleno = 15 (0xf), region = 185 }
0x23e3   :  { %5742 = vsyncpa [#allocation5], 1 }
0x23e4   :  { %5744 = vsyncpa [#allocation5 + $0x1], 1 }
0x23e5   :  { %5745 = vsyncpa [#allocation7], 1 }
0x23e6   :  { %5747 = vsyncpa [#allocation7 + $0x1], 1 }

</bundles_post_ra>
